<compile_context>
chip_gen: v7x
topology: tpu7x:2x2x1
jax: 0.10.0
libtpu: 0.0.40
codegen_flags: <defaults>
</compile_context>

<pallas_src>
import jax
import jax.numpy as jnp
from jax.experimental import pallas as pl
from jax.experimental.pallas import tpu as pltpu


def _convt3d_kernel(x_ref, w_ref, o_ref):
    # x_ref: (1, Dp, Ho*Wo, Kdim)   im2col'd zero-padded input (one batch)
    # w_ref: (Kdim, KD*Cout)        flipped weight; depth taps folded into columns
    # o_ref: (1, Do, Ho*Wo, Cout)
    Dp, HoWo, Kdim = x_ref.shape[1], x_ref.shape[2], x_ref.shape[3]
    Do = o_ref.shape[1]
    Cout = o_ref.shape[3]
    KD = Dp - Do + 1

    # One MXU pass for all depth taps: layout-preserving merge of (Dp, HoWo).
    lhs = x_ref[0].reshape(Dp * HoWo, Kdim)
    y = jnp.dot(lhs, w_ref[...], preferred_element_type=jnp.float32)
    y = y.reshape(Dp, HoWo, KD * Cout)

    # Shifted add over depth taps: out[d] = sum_a y[d + a, :, a*Cout:(a+1)*Cout]
    acc = y[0:Do, :, 0:Cout]
    for a in range(1, KD):
        acc = acc + y[a:a + Do, :, a * Cout:(a + 1) * Cout]
    o_ref[0] = acc.astype(o_ref.dtype)


def conv_transpose3d(x_ncdhw, weight_ioDHW):
    """Transposed 3D conv, stride=1, padding=0, no bias.

    x_ncdhw:      (N, Cin, D, H, W)       float32
    weight_ioDHW: (Cin, Cout, KD, KH, KW) float32  (PyTorch ConvTranspose3d layout)
    returns:      (N, Cout, D+KD-1, H+KH-1, W+KW-1) float32
    """
    N, Cin, D, H, W = x_ncdhw.shape
    Cin2, Cout, KD, KH, KW = weight_ioDHW.shape
    assert Cin2 == Cin
    Do, Ho, Wo = D + KD - 1, H + KH - 1, W + KW - 1
    Dp = D + 2 * (KD - 1)
    Kdim = KH * KW * Cin

    # ---- wrapper glue (plain XLA): layout + H/W im2col ----
    x = jnp.transpose(x_ncdhw, (0, 2, 3, 4, 1))                   # (N, D, H, W, Cin)
    x = jnp.pad(x, ((0, 0), (KD - 1, KD - 1), (KH - 1, KH - 1),
                    (KW - 1, KW - 1), (0, 0)))                    # (N, Dp, Hp, Wp, Cin)

    cols = []
    for b in range(KH):
        for c in range(KW):
            cols.append(x[:, :, b:b + Ho, c:c + Wo, :])           # (N, Dp, Ho, Wo, Cin)
    xcol = jnp.stack(cols, axis=-2)                               # (N, Dp, Ho, Wo, KH*KW, Cin)
    xcol = xcol.reshape(N, Dp, Ho * Wo, Kdim)

    # Flipped weight; H/W taps folded into K (order matches xcol: (b, c, i)),
    # depth taps folded into output columns: wcat[(b*KW+c)*Cin+i, a*Cout+o].
    w = weight_ioDHW[:, :, ::-1, ::-1, ::-1]
    w = jnp.transpose(w, (2, 3, 4, 0, 1)).reshape(KD, Kdim, Cout)
    wcat = jnp.transpose(w, (1, 0, 2)).reshape(Kdim, KD * Cout)

    out = pl.pallas_call(
        _convt3d_kernel,
        out_shape=jax.ShapeDtypeStruct((N, Do, Ho * Wo, Cout), jnp.float32),
        grid_spec=pltpu.PrefetchScalarGridSpec(
            num_scalar_prefetch=0,
            grid=(N,),
            in_specs=[
                pl.BlockSpec((1, Dp, Ho * Wo, Kdim), lambda n: (n, 0, 0, 0)),
                pl.BlockSpec((Kdim, KD * Cout), lambda n: (0, 0)),
            ],
            out_specs=pl.BlockSpec((1, Do, Ho * Wo, Cout),
                                   lambda n: (n, 0, 0, 0)),
        ),
        compiler_params=pltpu.CompilerParams(
            dimension_semantics=("parallel",),
            vmem_limit_bytes=48 * 1024 * 1024),
    )(xcol, wcat)

    out = out.reshape(N, Do, Ho, Wo, Cout)
    return jnp.transpose(out, (0, 4, 1, 2, 3))                    # NCDHW


def _reference(x_ncdhw, weight_ioDHW):
    """Direct transposed-conv definition (scatter form) for verification."""
    N, Cin, D, H, W = x_ncdhw.shape
    _, Cout, KD, KH, KW = weight_ioDHW.shape
    Do, Ho, Wo = D + KD - 1, H + KH - 1, W + KW - 1
    out = jnp.zeros((N, Cout, Do, Ho, Wo), dtype=jnp.float32)
    for kd in range(KD):
        for kh in range(KH):
            for kw in range(KW):
                contrib = jnp.einsum('ncdhw,co->nodhw', x_ncdhw,
                                     weight_ioDHW[:, :, kd, kh, kw],
                                     precision=jax.lax.Precision.HIGHEST)
                out = out.at[:, :, kd:kd + D, kh:kh + H, kw:kw + W].add(contrib)
    return out


if __name__ == "__main__":
    # Square spatial input, asymmetric kernel (depth differs from width==height).
    N = 2
    in_channels = 32
    out_channels = 64
    D = H = W = 8
    kernel_size = (3, 5, 5)  # (KD, KH, KW), KH == KW

    key = jax.random.PRNGKey(0)
    kx, kw_ = jax.random.split(key)
    x = jax.random.normal(kx, (N, in_channels, D, H, W), dtype=jnp.float32)
    # PyTorch ConvTranspose3d weight layout: (in_channels, out_channels, KD, KH, KW)
    weight = 0.05 * jax.random.normal(
        kw_, (in_channels, out_channels) + kernel_size, dtype=jnp.float32)

    f = jax.jit(conv_transpose3d)
    out = jax.block_until_ready(f(x, weight))

    ref = _reference(x, weight)
    assert out.shape == (N, out_channels, D + kernel_size[0] - 1,
                         H + kernel_size[1] - 1, W + kernel_size[2] - 1)
    max_err = float(jnp.max(jnp.abs(out - ref)))
    assert jnp.allclose(out, ref, atol=1e-3, rtol=1e-3), max_err

    print("KERNEL_OK")
</pallas_src>

<mosaic_0001>
module attributes {stable_mosaic.version = 11 : i64} {
  func.func @_convt3d_kernel(%arg0: i32, %arg1: memref<1x12x144x800xf32, #tpu.memory_space<vmem>>, %arg2: memref<800x192xf32, #tpu.memory_space<vmem>>, %arg3: memref<1x10x144x64xf32, #tpu.memory_space<vmem>>) attributes {dimension_semantics = [#tpu.dimension_semantics<parallel>], iteration_bounds = array<i64: 2>, scalar_prefetch = 0 : i64, scratch_operands = 0 : i64, tpu.core_type = #tpu.core_type<tc>, window_params = [{transform_indices = @transform_0, window_bounds = array<i64: 1, 12, 144, 800>}, {pipeline_mode = #tpu.pipeline_mode<synchronous>, transform_indices = @transform_1, window_bounds = array<i64: 800, 192>}, {transform_indices = @transform_2, window_bounds = array<i64: 1, 10, 144, 64>}]} {
    %c0 = arith.constant 0 : index
    %c0_0 = arith.constant 0 : index
    %c0_1 = arith.constant 0 : index
    %c0_2 = arith.constant 0 : index
    %0 = vector.load %arg1[%c0, %c0_0, %c0_1, %c0_2] : memref<1x12x144x800xf32, #tpu.memory_space<vmem>>, vector<1x12x144x800xf32>
    %1 = vector.shape_cast %0 : vector<1x12x144x800xf32> to vector<12x144x800xf32>
    %2 = vector.shape_cast %1 : vector<12x144x800xf32> to vector<1728x800xf32>
    %c0_3 = arith.constant 0 : index
    %c0_4 = arith.constant 0 : index
    %3 = vector.load %arg2[%c0_3, %c0_4] : memref<800x192xf32, #tpu.memory_space<vmem>>, vector<800x192xf32>
    %cst = arith.constant dense<0.000000e+00> : vector<1728x192xf32>
    %4 = tpu.matmul %2, %3, %cst {dimension_numbers = #tpu.dot_dimension_numbers<[1], [0], [0], [1], [0, 0, 1, 1], [], []>} : vector<1728x800xf32>, vector<800x192xf32>, vector<1728x192xf32> -> vector<1728x192xf32>
    %5 = vector.shape_cast %4 : vector<1728x192xf32> to vector<12x144x192xf32>
    %6 = vector.extract_strided_slice %5 {offsets = [0, 0, 0], sizes = [10, 144, 64], strides = [1, 1, 1]} : vector<12x144x192xf32> to vector<10x144x64xf32>
    %7 = vector.extract_strided_slice %5 {offsets = [1, 0, 64], sizes = [10, 144, 64], strides = [1, 1, 1]} : vector<12x144x192xf32> to vector<10x144x64xf32>
    %8 = arith.addf %6, %7 : vector<10x144x64xf32>
    %9 = vector.extract_strided_slice %5 {offsets = [2, 0, 128], sizes = [10, 144, 64], strides = [1, 1, 1]} : vector<12x144x192xf32> to vector<10x144x64xf32>
    %10 = arith.addf %8, %9 : vector<10x144x64xf32>
    %c0_5 = arith.constant 0 : index
    %c0_6 = arith.constant 0 : index
    %c0_7 = arith.constant 0 : index
    %c0_8 = arith.constant 0 : index
    %11 = vector.load %arg3[%c0_5, %c0_6, %c0_7, %c0_8] : memref<1x10x144x64xf32, #tpu.memory_space<vmem>>, vector<1x10x144x64xf32>
    %12 = vector.shape_cast %11 : vector<1x10x144x64xf32> to vector<10x144x64xf32>
    %13 = vector.shape_cast %10 : vector<10x144x64xf32> to vector<1x10x144x64xf32>
    tpu.vector_store %arg3[%c0_5, %c0_6, %c0_7, %c0_8], %13 {strides = array<i32>} : memref<1x10x144x64xf32, #tpu.memory_space<vmem>>, vector<1x10x144x64xf32>,
    return
  }
  func.func @transform_0(%arg0: i32) -> (i32, i32, i32, i32) {
    %c0_i32 = arith.constant 0 : i32
    %c0_i32_0 = arith.constant 0 : i32
    %c0_i32_1 = arith.constant 0 : i32
    %c0_i32_2 = arith.constant 0 : i32
    return %arg0, %c0_i32, %c0_i32_0, %c0_i32_1 : i32, i32, i32, i32
  }
  func.func @transform_1(%arg0: i32) -> (i32, i32) {
    %c0_i32 = arith.constant 0 : i32
    %c0_i32_0 = arith.constant 0 : i32
    %c0_i32_1 = arith.constant 0 : i32
    return %c0_i32, %c0_i32_0 : i32, i32
  }
  func.func @transform_2(%arg0: i32) -> (i32, i32, i32, i32) {
    %c0_i32 = arith.constant 0 : i32
    %c0_i32_0 = arith.constant 0 : i32
    %c0_i32_1 = arith.constant 0 : i32
    %c0_i32_2 = arith.constant 0 : i32
    return %arg0, %c0_i32, %c0_i32_0, %c0_i32_1 : i32, i32, i32, i32
  }
}

</mosaic_0001>

<bundles_post_ra>
// kernel: conv_transpose3d.1
= control target key start
LH: loop header
LB: loop body
LE: loop exit
PB: predicated region body
PF: predicated region fallthrough
CT: control target
= control target key end

     0   :  { %s10573_s9 = smov 0   ;;  %s16194_s0 = inlined_call_operand.vmem [shape: f32[2,12,144,800], index: 0, kind: input, shape index: {}]   ;;  %s16195_s1 = inlined_call_operand.vmem [shape: f32[800,192], index: 1, kind: input, shape index: {}]   ;;  %s16196_s2 = inlined_call_operand.vmem [shape: f32[2,10,144,64], index: 2, kind: output, shape index: {}]  }
   0x1 LB: > { %s9049_s10 = sadd.s32 4294967295, %s10554_s9   ;;  %p9053_p0 = scmp.ge.s32.totalorder %s10554_s9, 1  ;;  %s10554_s9 = sphi %s10573_s9, %s12_s9  }
   0x2   : > { %p112_p1 = scmp.lt.s32.totalorder %s10554_s9, 3 }
   0x4   : > { %p113_p2 = pnand %p9053_p0, %p112_p1 }
   0x6   : > { %116 = sbr.rel (%p113_p2) target bundleno = 2067 (0x813), region = 28 }
   0xd   : > { %v1657_v0 = vld [vmem:[%s16195_s1 + $0x8] sm:$0xff]  ;;  %v1659_v1 = vld [vmem:[%s16195_s1 + $0x18] sm:$0xff]  ;;  %v1656_v5 = vld [vmem:[%s16195_s1] sm:$0xff]  ;;  %p10787_p3 = scmp.lt.s32.totalorder %s9049_s10, 1  ;;  %vm1856_vm0 = vcmask 261120   ;;  %s10557_s6 = smov 64  }
   0xe   : > { %v1785_v2 = vld [vmem:[%s16195_s1 + $0x408] sm:$0xff]  ;;  %v9274_v3 = vpack.c.bf16 %v1659_v1, %v1657_v0  ;;  %v1787_v4 = vld [vmem:[%s16195_s1 + $0x418] sm:$0xff]  ;;  %v1658_v6 = vld [vmem:[%s16195_s1 + $0x10] sm:$0xff]  ;;  %vm8813_vm1 = vcmask 523264  }
   0xf   : > { %v9402_v7 = vpack.c.bf16 %v1787_v4, %v1785_v2  ;;  %v9276_v8 = vpack.c.bf16 %v1658_v6, %v1656_v5  ;;  %v1784_v9 = vld [vmem:[%s16195_s1 + $0x400] sm:$0xff]  ;;  %v1786_v10 = vld [vmem:[%s16195_s1 + $0x410] sm:$0xff]  ;;  %v1661_v11 = vld [vmem:[%s16195_s1 + $0x28] sm:$0xff]  ;;  %s17125_s10 = smov (!%p10787_p3, %s9049_s10), 1 }
  0x10   : > { %9275 = vmatprep.subr.bf16.mxu1 %v9274_v3  ;;  %v9404_v12 = vpack.c.bf16 %v1786_v10, %v1784_v9  ;;  %v1663_v13 = vld [vmem:[%s16195_s1 + $0x38] sm:$0xff]  ;;  %v1789_v14 = vld [vmem:[%s16195_s1 + $0x428] sm:$0xff]  ;;  %v1660_v18 = vld [vmem:[%s16195_s1 + $0x20] sm:$0xff]  ;;  %s10536_s24 = smul.u32 12096, %s17125_s10 }
  0x11   : > { %v1791_v15 = vld [vmem:[%s16195_s1 + $0x438] sm:$0xff]  ;;  %9403 = vmatprep.subr.bf16.mxu0 %v9402_v7  ;;  %9277 = vmatpush1.bf16.msra.mxu1 %v9276_v8  ;;  %v9278_v16 = vpack.c.bf16 %v1663_v13, %v1661_v11  ;;  %v1662_v19 = vld [vmem:[%s16195_s1 + $0x30] sm:$0xff]  ;;  %v1788_v20 = vld [vmem:[%s16195_s1 + $0x420] sm:$0xff]  ;;  %s10537_s7 = smul.u32 1440, %s17125_s10 }
  0x12   : > { %v9406_v17 = vpack.c.bf16 %v1791_v15, %v1789_v14  ;;  %9405 = vmatpush1.bf16.msra.mxu0 %v9404_v12  ;;  %v9280_v21 = vpack.c.bf16 %v1662_v19, %v1660_v18  ;;  %v1790_v22 = vld [vmem:[%s16195_s1 + $0x430] sm:$0xff]  ;;  %v1665_v23 = vld [vmem:[%s16195_s1 + $0x48] sm:$0xff]  ;;  %v1667_v24 = vld [vmem:[%s16195_s1 + $0x58] sm:$0xff]  ;;  %s10873_s17 = scalar_lea.vmem %s16194_s0, %s10536_s24 }
  0x13   : > { %9279 = vmatprep.subr.bf16.mxu1 %v9278_v16  ;;  %v9408_v25 = vpack.c.bf16 %v1790_v22, %v1788_v20  ;;  %v9282_v26 = vpack.c.bf16 %v1667_v24, %v1665_v23  ;;  %v1793_v27 = vld [vmem:[%s16195_s1 + $0x448] sm:$0xff]  ;;  %v1795_v28 = vld [vmem:[%s16195_s1 + $0x458] sm:$0xff]  ;;  %v1664_v29 = vld [vmem:[%s16195_s1 + $0x40] sm:$0xff]  ;;  %s13640_s11 = scalar_lea.vmem %s16196_s2, %s10537_s7 }
  0x14   : > { %9407 = vmatprep.subr.bf16.mxu0 %v9406_v17  ;;  %v9410_v30 = vpack.c.bf16 %v1795_v28, %v1793_v27  ;;  %v1666_v31 = vld [vmem:[%s16195_s1 + $0x50] sm:$0xff]  ;;  %v1792_v32 = vld [vmem:[%s16195_s1 + $0x440] sm:$0xff]  ;;  %v1669_v35 = vld [vmem:[%s16195_s1 + $0x68] sm:$0xff] }
  0x15   : > { %v1794_v33 = vld [vmem:[%s16195_s1 + $0x450] sm:$0xff]  ;;  %9281 = vmatpush1.bf16.msra.mxu1 %v9280_v21  ;;  %v9284_v34 = vpack.c.bf16 %v1666_v31, %v1664_v29  ;;  %v1671_v36 = vld [vmem:[%s16195_s1 + $0x78] sm:$0xff]  ;;  %v1797_v37 = vld [vmem:[%s16195_s1 + $0x468] sm:$0xff] }
  0x16   : > { %9409 = vmatpush1.bf16.msra.mxu0 %v9408_v25  ;;  %9283 = vmatprep.subr.bf16.mxu1 %v9282_v26  ;;  %v9412_v38 = vpack.c.bf16 %v1794_v33, %v1792_v32  ;;  %v9286_v39 = vpack.c.bf16 %v1671_v36, %v1669_v35  ;;  %v1799_v40 = vld [vmem:[%s16195_s1 + $0x478] sm:$0xff]  ;;  %v1668_v41 = vld [vmem:[%s16195_s1 + $0x60] sm:$0xff]  ;;  %v1670_v42 = vld [vmem:[%s16195_s1 + $0x70] sm:$0xff] }
  0x17   : > { %9411 = vmatprep.subr.bf16.mxu0 %v9410_v30  ;;  %v9414_v43 = vpack.c.bf16 %v1799_v40, %v1797_v37  ;;  %v1796_v44 = vld [vmem:[%s16195_s1 + $0x460] sm:$0xff]  ;;  %v1798_v45 = vld [vmem:[%s16195_s1 + $0x470] sm:$0xff]  ;;  %v1673_v46 = vld [vmem:[%s16195_s1 + $0x88] sm:$0xff]  ;;  %v9288_v50 = vpack.c.bf16 %v1670_v42, %v1668_v41 }
  0x18   : > { %v1675_v47 = vld [vmem:[%s16195_s1 + $0x98] sm:$0xff]  ;;  %v1801_v48 = vld [vmem:[%s16195_s1 + $0x488] sm:$0xff]  ;;  %v9416_v51 = vpack.c.bf16 %v1798_v45, %v1796_v44  ;;  %v1672_v53 = vld [vmem:[%s16195_s1 + $0x80] sm:$0xff] }
  0x19   : > { %v1803_v49 = vld [vmem:[%s16195_s1 + $0x498] sm:$0xff]  ;;  %9285 = vmatpush1.bf16.msra.mxu1 %v9284_v34  ;;  %v9290_v52 = vpack.c.bf16 %v1675_v47, %v1673_v46  ;;  %v1674_v54 = vld [vmem:[%s16195_s1 + $0x90] sm:$0xff]  ;;  %v1800_v55 = vld [vmem:[%s16195_s1 + $0x480] sm:$0xff] }
  0x1a   : > { %9413 = vmatpush1.bf16.msra.mxu0 %v9412_v38  ;;  %9287 = vmatprep.subr.bf16.mxu1 %v9286_v39  ;;  %v9418_v56 = vpack.c.bf16 %v1803_v49, %v1801_v48  ;;  %v1802_v57 = vld [vmem:[%s16195_s1 + $0x490] sm:$0xff]  ;;  %v1677_v58 = vld [vmem:[%s16195_s1 + $0xa8] sm:$0xff]  ;;  %v1679_v59 = vld [vmem:[%s16195_s1 + $0xb8] sm:$0xff]  ;;  %v9292_v62 = vpack.c.bf16 %v1674_v54, %v1672_v53 }
  0x1b   : > { %9415 = vmatprep.subr.bf16.mxu0 %v9414_v43  ;;  %v1805_v60 = vld [vmem:[%s16195_s1 + $0x4a8] sm:$0xff]  ;;  %v1807_v61 = vld [vmem:[%s16195_s1 + $0x4b8] sm:$0xff]  ;;  %v9420_v63 = vpack.c.bf16 %v1802_v57, %v1800_v55  ;;  %v9294_v0 = vpack.c.bf16 %v1679_v59, %v1677_v58  ;;  %v1676_v1 = vld [vmem:[%s16195_s1 + $0xa0] sm:$0xff] }
  0x1c   : > { %v1678_v2 = vld [vmem:[%s16195_s1 + $0xb0] sm:$0xff]  ;;  %v1804_v3 = vld [vmem:[%s16195_s1 + $0x4a0] sm:$0xff]  ;;  %v9422_v4 = vpack.c.bf16 %v1807_v61, %v1805_v60  ;;  %v1681_v6 = vld [vmem:[%s16195_s1 + $0xc8] sm:$0xff] }
  0x1d   : > { %9289 = vmatpush1.bf16.msra.mxu1 %v9288_v50  ;;  %v1806_v5 = vld [vmem:[%s16195_s1 + $0x4b0] sm:$0xff]  ;;  %v1683_v7 = vld [vmem:[%s16195_s1 + $0xd8] sm:$0xff]  ;;  %v1809_v8 = vld [vmem:[%s16195_s1 + $0x4c8] sm:$0xff]  ;;  %v9296_v10 = vpack.c.bf16 %v1678_v2, %v1676_v1 }
  0x1e   : > { %9417 = vmatpush1.bf16.msra.mxu0 %v9416_v51  ;;  %9291 = vmatprep.subr.bf16.mxu1 %v9290_v52  ;;  %v1811_v9 = vld [vmem:[%s16195_s1 + $0x4d8] sm:$0xff]  ;;  %v9424_v11 = vpack.c.bf16 %v1806_v5, %v1804_v3  ;;  %v9298_v12 = vpack.c.bf16 %v1683_v7, %v1681_v6  ;;  %v1680_v13 = vld [vmem:[%s16195_s1 + $0xc0] sm:$0xff]  ;;  %v1682_v14 = vld [vmem:[%s16195_s1 + $0xd0] sm:$0xff] }
  0x1f   : > { %9419 = vmatprep.subr.bf16.mxu0 %v9418_v56  ;;  %v1808_v15 = vld [vmem:[%s16195_s1 + $0x4c0] sm:$0xff]  ;;  %v9426_v16 = vpack.c.bf16 %v1811_v9, %v1809_v8  ;;  %v1810_v17 = vld [vmem:[%s16195_s1 + $0x4d0] sm:$0xff]  ;;  %v1685_v18 = vld [vmem:[%s16195_s1 + $0xe8] sm:$0xff]  ;;  %v9300_v22 = vpack.c.bf16 %v1682_v14, %v1680_v13 }
  0x20   : > { %v1687_v19 = vld [vmem:[%s16195_s1 + $0xf8] sm:$0xff]  ;;  %v1813_v20 = vld [vmem:[%s16195_s1 + $0x4e8] sm:$0xff]  ;;  %v9428_v23 = vpack.c.bf16 %v1810_v17, %v1808_v15  ;;  %v1684_v25 = vld [vmem:[%s16195_s1 + $0xe0] sm:$0xff] }
  0x21   : > { %9293 = vmatpush1.bf16.msra.mxu1 %v9292_v62  ;;  %v1815_v21 = vld [vmem:[%s16195_s1 + $0x4f8] sm:$0xff]  ;;  %v9302_v24 = vpack.c.bf16 %v1687_v19, %v1685_v18  ;;  %v1686_v26 = vld [vmem:[%s16195_s1 + $0xf0] sm:$0xff]  ;;  %v1812_v27 = vld [vmem:[%s16195_s1 + $0x4e0] sm:$0xff] }
  0x22   : > { %9421 = vmatpush1.bf16.msra.mxu0 %v9420_v63  ;;  %9295 = vmatprep.subr.bf16.mxu1 %v9294_v0  ;;  %v9430_v28 = vpack.c.bf16 %v1815_v21, %v1813_v20  ;;  %v1814_v29 = vld [vmem:[%s16195_s1 + $0x4f0] sm:$0xff]  ;;  %v1689_v30 = vld [vmem:[%s16195_s1 + $0x108] sm:$0xff]  ;;  %v1691_v31 = vld [vmem:[%s16195_s1 + $0x118] sm:$0xff]  ;;  %v9304_v34 = vpack.c.bf16 %v1686_v26, %v1684_v25 }
  0x23   : > { %9423 = vmatprep.subr.bf16.mxu0 %v9422_v4  ;;  %v1817_v32 = vld [vmem:[%s16195_s1 + $0x508] sm:$0xff]  ;;  %v1819_v33 = vld [vmem:[%s16195_s1 + $0x518] sm:$0xff]  ;;  %v9432_v35 = vpack.c.bf16 %v1814_v29, %v1812_v27  ;;  %v9306_v36 = vpack.c.bf16 %v1691_v31, %v1689_v30  ;;  %v1688_v37 = vld [vmem:[%s16195_s1 + $0x100] sm:$0xff] }
  0x24   : > { %v1690_v38 = vld [vmem:[%s16195_s1 + $0x110] sm:$0xff]  ;;  %v1816_v39 = vld [vmem:[%s16195_s1 + $0x500] sm:$0xff]  ;;  %v9434_v40 = vpack.c.bf16 %v1819_v33, %v1817_v32  ;;  %v1693_v42 = vld [vmem:[%s16195_s1 + $0x128] sm:$0xff] }
  0x25   : > { %9297 = vmatpush1.bf16.msra.mxu1 %v9296_v10  ;;  %v1818_v41 = vld [vmem:[%s16195_s1 + $0x510] sm:$0xff]  ;;  %v1695_v43 = vld [vmem:[%s16195_s1 + $0x138] sm:$0xff]  ;;  %v1821_v44 = vld [vmem:[%s16195_s1 + $0x528] sm:$0xff]  ;;  %v9308_v46 = vpack.c.bf16 %v1690_v38, %v1688_v37 }
  0x26   : > { %9425 = vmatpush1.bf16.msra.mxu0 %v9424_v11  ;;  %9299 = vmatprep.subr.bf16.mxu1 %v9298_v12  ;;  %v1823_v45 = vld [vmem:[%s16195_s1 + $0x538] sm:$0xff]  ;;  %v9436_v47 = vpack.c.bf16 %v1818_v41, %v1816_v39  ;;  %v9310_v48 = vpack.c.bf16 %v1695_v43, %v1693_v42  ;;  %v1692_v49 = vld [vmem:[%s16195_s1 + $0x120] sm:$0xff]  ;;  %v1694_v50 = vld [vmem:[%s16195_s1 + $0x130] sm:$0xff] }
  0x27   : > { %9427 = vmatprep.subr.bf16.mxu0 %v9426_v16  ;;  %v1820_v51 = vld [vmem:[%s16195_s1 + $0x520] sm:$0xff]  ;;  %v9438_v52 = vpack.c.bf16 %v1823_v45, %v1821_v44  ;;  %v1822_v53 = vld [vmem:[%s16195_s1 + $0x530] sm:$0xff]  ;;  %v1697_v54 = vld [vmem:[%s16195_s1 + $0x148] sm:$0xff]  ;;  %v9312_v58 = vpack.c.bf16 %v1694_v50, %v1692_v49 }
  0x28   : > { %v1699_v55 = vld [vmem:[%s16195_s1 + $0x158] sm:$0xff]  ;;  %v1825_v56 = vld [vmem:[%s16195_s1 + $0x548] sm:$0xff]  ;;  %v9440_v59 = vpack.c.bf16 %v1822_v53, %v1820_v51  ;;  %v1696_v61 = vld [vmem:[%s16195_s1 + $0x140] sm:$0xff] }
  0x29   : > { %9301 = vmatpush1.bf16.msra.mxu1 %v9300_v22  ;;  %v1827_v57 = vld [vmem:[%s16195_s1 + $0x558] sm:$0xff]  ;;  %v9314_v60 = vpack.c.bf16 %v1699_v55, %v1697_v54  ;;  %v1698_v62 = vld [vmem:[%s16195_s1 + $0x150] sm:$0xff]  ;;  %v1824_v63 = vld [vmem:[%s16195_s1 + $0x540] sm:$0xff] }
  0x2a   : > { %9429 = vmatpush1.bf16.msra.mxu0 %v9428_v23  ;;  %9303 = vmatprep.subr.bf16.mxu1 %v9302_v24  ;;  %v9442_v0 = vpack.c.bf16 %v1827_v57, %v1825_v56  ;;  %v1826_v1 = vld [vmem:[%s16195_s1 + $0x550] sm:$0xff]  ;;  %v1701_v2 = vld [vmem:[%s16195_s1 + $0x168] sm:$0xff]  ;;  %v1703_v3 = vld [vmem:[%s16195_s1 + $0x178] sm:$0xff]  ;;  %v9316_v6 = vpack.c.bf16 %v1698_v62, %v1696_v61 }
  0x2b   : > { %9431 = vmatprep.subr.bf16.mxu0 %v9430_v28  ;;  %v1829_v4 = vld [vmem:[%s16195_s1 + $0x568] sm:$0xff]  ;;  %v1831_v5 = vld [vmem:[%s16195_s1 + $0x578] sm:$0xff]  ;;  %v1700_v7 = vld [vmem:[%s16195_s1 + $0x160] sm:$0xff]  ;;  %v9444_v8 = vpack.c.bf16 %v1826_v1, %v1824_v63  ;;  %v9318_v9 = vpack.c.bf16 %v1703_v3, %v1701_v2 }
  0x2c   : > { %v1702_v10 = vld [vmem:[%s16195_s1 + $0x170] sm:$0xff]  ;;  %v1828_v11 = vld [vmem:[%s16195_s1 + $0x560] sm:$0xff]  ;;  %v9446_v13 = vpack.c.bf16 %v1831_v5, %v1829_v4  ;;  %v1705_v14 = vld [vmem:[%s16195_s1 + $0x188] sm:$0xff] }
  0x2d   : > { %9305 = vmatpush1.bf16.msra.mxu1 %v9304_v34  ;;  %v1830_v12 = vld [vmem:[%s16195_s1 + $0x570] sm:$0xff]  ;;  %v1707_v15 = vld [vmem:[%s16195_s1 + $0x198] sm:$0xff]  ;;  %v145_v16 = vld [vmem:[%s10873_s17 + $0x8] sm:$0xff]  ;;  %v9320_v20 = vpack.c.bf16 %v1702_v10, %v1700_v7 }
  0x2e   : > { %9433 = vmatpush1.bf16.msra.mxu0 %v9432_v35  ;;  %9307 = vmatprep.subr.bf16.mxu1 %v9306_v36  ;;  %v1833_v17 = vld [vmem:[%s16195_s1 + $0x588] sm:$0xff]  ;;  %v1835_v18 = vld [vmem:[%s16195_s1 + $0x598] sm:$0xff]  ;;  %v9448_v21 = vpack.c.bf16 %v1830_v12, %v1828_v11  ;;  %v9322_v22 = vpack.c.bf16 %v1707_v15, %v1705_v14  ;;  %v1704_v23 = vld [vmem:[%s16195_s1 + $0x180] sm:$0xff] }
  0x2f   : > { %9435 = vmatprep.subr.bf16.mxu0 %v9434_v40  ;;  %2569 = vmatprep.mubr.f32.mxu1 %v145_v16  ;;  %v149_v19 = vld [vmem:[%s10873_s17 + $0x28] sm:$0xff]  ;;  %v1706_v24 = vld [vmem:[%s16195_s1 + $0x190] sm:$0xff]  ;;  %v1832_v25 = vld [vmem:[%s16195_s1 + $0x580] sm:$0xff]  ;;  %v9450_v26 = vpack.c.bf16 %v1835_v18, %v1833_v17 }
  0x30   : > { %5183 = vmatprep.mubr.f32.mxu0 %v149_v19  ;;  %v1834_v27 = vld [vmem:[%s16195_s1 + $0x590] sm:$0xff]  ;;  %v1709_v28 = vld [vmem:[%s16195_s1 + $0x1a8] sm:$0xff]  ;;  %v1711_v29 = vld [vmem:[%s16195_s1 + $0x1b8] sm:$0xff]  ;;  %v9324_v32 = vpack.c.bf16 %v1706_v24, %v1704_v23 }
  0x31   : > { %9309 = vmatpush1.bf16.msra.mxu1 %v9308_v46  ;;  %v1837_v30 = vld [vmem:[%s16195_s1 + $0x5a8] sm:$0xff]  ;;  %v1839_v31 = vld [vmem:[%s16195_s1 + $0x5b8] sm:$0xff]  ;;  %v9452_v33 = vpack.c.bf16 %v1834_v27, %v1832_v25  ;;  %v9326_v34 = vpack.c.bf16 %v1711_v29, %v1709_v28  ;;  %v1708_v35 = vld [vmem:[%s16195_s1 + $0x1a0] sm:$0xff] }
  0x32   : > { %9437 = vmatpush1.bf16.msra.mxu0 %v9436_v47  ;;  %9311 = vmatprep.subr.bf16.mxu1 %v9310_v48  ;;  %v1710_v36 = vld [vmem:[%s16195_s1 + $0x1b0] sm:$0xff]  ;;  %v1836_v37 = vld [vmem:[%s16195_s1 + $0x5a0] sm:$0xff]  ;;  %v9454_v38 = vpack.c.bf16 %v1839_v31, %v1837_v30  ;;  %v1713_v40 = vld [vmem:[%s16195_s1 + $0x1c8] sm:$0xff] }
  0x33   : > { %9439 = vmatprep.subr.bf16.mxu0 %v9438_v52  ;;  %v1838_v39 = vld [vmem:[%s16195_s1 + $0x5b0] sm:$0xff]  ;;  %v1715_v41 = vld [vmem:[%s16195_s1 + $0x1d8] sm:$0xff]  ;;  %v1841_v42 = vld [vmem:[%s16195_s1 + $0x5c8] sm:$0xff]  ;;  %v9328_v44 = vpack.c.bf16 %v1710_v36, %v1708_v35 }
  0x34   : > { %v1843_v43 = vld [vmem:[%s16195_s1 + $0x5d8] sm:$0xff]  ;;  %v9456_v45 = vpack.c.bf16 %v1838_v39, %v1836_v37  ;;  %v9330_v46 = vpack.c.bf16 %v1715_v41, %v1713_v40  ;;  %v1712_v47 = vld [vmem:[%s16195_s1 + $0x1c0] sm:$0xff]  ;;  %v1714_v48 = vld [vmem:[%s16195_s1 + $0x1d0] sm:$0xff] }
  0x35   : > { %9313 = vmatpush1.bf16.msra.mxu1 %v9312_v58  ;;  %v1840_v49 = vld [vmem:[%s16195_s1 + $0x5c0] sm:$0xff]  ;;  %v9458_v50 = vpack.c.bf16 %v1843_v43, %v1841_v42  ;;  %v1842_v51 = vld [vmem:[%s16195_s1 + $0x5d0] sm:$0xff]  ;;  %v1717_v52 = vld [vmem:[%s16195_s1 + $0x1e8] sm:$0xff]  ;;  %v9332_v56 = vpack.c.bf16 %v1714_v48, %v1712_v47 }
  0x36   : > { %9441 = vmatpush1.bf16.msra.mxu0 %v9440_v59  ;;  %9315 = vmatprep.subr.bf16.mxu1 %v9314_v60  ;;  %v1719_v53 = vld [vmem:[%s16195_s1 + $0x1f8] sm:$0xff]  ;;  %v1845_v54 = vld [vmem:[%s16195_s1 + $0x5e8] sm:$0xff]  ;;  %v9460_v57 = vpack.c.bf16 %v1842_v51, %v1840_v49  ;;  %v1716_v59 = vld [vmem:[%s16195_s1 + $0x1e0] sm:$0xff] }
  0x37   : > { %9443 = vmatprep.subr.bf16.mxu0 %v9442_v0  ;;  %v1847_v55 = vld [vmem:[%s16195_s1 + $0x5f8] sm:$0xff]  ;;  %v9334_v58 = vpack.c.bf16 %v1719_v53, %v1717_v52  ;;  %v1718_v60 = vld [vmem:[%s16195_s1 + $0x1f0] sm:$0xff]  ;;  %v1844_v61 = vld [vmem:[%s16195_s1 + $0x5e0] sm:$0xff] }
  0x38   : > { %v9462_v62 = vpack.c.bf16 %v1847_v55, %v1845_v54  ;;  %v1846_v63 = vld [vmem:[%s16195_s1 + $0x5f0] sm:$0xff]  ;;  %v1721_v0 = vld [vmem:[%s16195_s1 + $0x208] sm:$0xff]  ;;  %v1723_v1 = vld [vmem:[%s16195_s1 + $0x218] sm:$0xff]  ;;  %v9336_v4 = vpack.c.bf16 %v1718_v60, %v1716_v59 }
  0x39   : > { %9317 = vmatpush1.bf16.msra.mxu1 %v9316_v6  ;;  %v1849_v2 = vld [vmem:[%s16195_s1 + $0x608] sm:$0xff]  ;;  %v1851_v3 = vld [vmem:[%s16195_s1 + $0x618] sm:$0xff]  ;;  %v9464_v5 = vpack.c.bf16 %v1846_v63, %v1844_v61  ;;  %v9338_v6 = vpack.c.bf16 %v1723_v1, %v1721_v0  ;;  %v1720_v7 = vld [vmem:[%s16195_s1 + $0x200] sm:$0xff] }
  0x3a   : > { %9445 = vmatpush1.bf16.msra.mxu0 %v9444_v8  ;;  %9319 = vmatprep.subr.bf16.mxu1 %v9318_v9  ;;  %v1722_v8 = vld [vmem:[%s16195_s1 + $0x210] sm:$0xff]  ;;  %v9466_v9 = vpack.c.bf16 %v1851_v3, %v1849_v2  ;;  %v1848_v10 = vld [vmem:[%s16195_s1 + $0x600] sm:$0xff]  ;;  %v1725_v14 = vld [vmem:[%s16195_s1 + $0x228] sm:$0xff] }
  0x3b   : > { %9447 = vmatprep.subr.bf16.mxu0 %v9446_v13  ;;  %v1850_v11 = vld [vmem:[%s16195_s1 + $0x610] sm:$0xff]  ;;  %v144_v12 = vld [vmem:[%s10873_s17] sm:$0xff]  ;;  %v9340_v13 = vpack.c.bf16 %v1722_v8, %v1720_v7  ;;  %v1727_v15 = vld [vmem:[%s16195_s1 + $0x238] sm:$0xff] }
  0x3c   : > { %v148_v16 = vld [vmem:[%s10873_s17 + $0x20] sm:$0xff]  ;;  %v9468_v17 = vpack.c.bf16 %v1850_v11, %v1848_v10  ;;  %v9342_v19 = vpack.c.bf16 %v1727_v15, %v1725_v14  ;;  %v151_v23 = vld [vmem:[%s10873_s17 + $0x38] sm:$0xff]  ;;  %v158_v28 = vld [vmem:[%s10873_s17 + $0x70] sm:$0xff] }
  0x3d   : > { %9321 = vmatpush1.bf16.msra.mxu1 %v9320_v20  ;;  %v152_v18 = vld [vmem:[%s10873_s17 + $0x40] sm:$0xff]  ;;  %v155_v24 = vld [vmem:[%s10873_s17 + $0x58] sm:$0xff]  ;;  %v162_v29 = vld [vmem:[%s10873_s17 + $0x90] sm:$0xff] }
  0x3e   : > { %9449 = vmatpush1.bf16.msra.mxu0 %v9448_v21  ;;  %9323 = vmatprep.subr.bf16.mxu1 %v9322_v22  ;;  %v1724_v20 = vld [vmem:[%s16195_s1 + $0x220] sm:$0xff]  ;;  %v1726_v21 = vld [vmem:[%s16195_s1 + $0x230] sm:$0xff]  ;;  %v159_v25 = vld [vmem:[%s10873_s17 + $0x78] sm:$0xff] }
  0x3f   : > { %9451 = vmatprep.subr.bf16.mxu0 %v9450_v26  ;;  %v156_v22 = vld [vmem:[%s10873_s17 + $0x60] sm:$0xff]  ;;  %v9344_v26 = vpack.c.bf16 %v1726_v21, %v1724_v20  ;;  %v163_v27 = vld [vmem:[%s10873_s17 + $0x98] sm:$0xff]  ;;  %v166_v30 = vld [vmem:[%s10873_s17 + $0xb0] sm:$0xff] }
  0x40   : > { %v170_v31 = vld [vmem:[%s10873_s17 + $0xd0] sm:$0xff]  ;;  %v177_v35 = vld [vmem:[%s10873_s17 + $0x108] sm:$0xff]  ;;  %v172_v36 = vld [vmem:[%s10873_s17 + $0xe0] sm:$0xff] }
  0x41   : > { %9325 = vmatpush1.bf16.msra.mxu1 %v9324_v32  ;;  %v165_v32 = vld [vmem:[%s10873_s17 + $0xa8] sm:$0xff]  ;;  %v176_v37 = vld [vmem:[%s10873_s17 + $0x100] sm:$0xff]  ;;  %v179_v41 = vld [vmem:[%s10873_s17 + $0x118] sm:$0xff] }
  0x42   : > { %9453 = vmatpush1.bf16.msra.mxu0 %v9452_v33  ;;  %9327 = vmatprep.subr.bf16.mxu1 %v9326_v34  ;;  %v169_v33 = vld [vmem:[%s10873_s17 + $0xc8] sm:$0xff]  ;;  %v184_v39 = vld [vmem:[%s10873_s17 + $0x140] sm:$0xff]  ;;  %v1731_v42 = vld [vmem:[%s16195_s1 + $0x258] sm:$0xff] }
  0x43   : > { %9455 = vmatprep.subr.bf16.mxu0 %v9454_v38  ;;  %v173_v34 = vld [vmem:[%s10873_s17 + $0xe8] sm:$0xff]  ;;  %v180_v38 = vld [vmem:[%s10873_s17 + $0x120] sm:$0xff]  ;;  %v1730_v47 = vld [vmem:[%s16195_s1 + $0x250] sm:$0xff] }
  0x44   : > { %v1729_v40 = vld [vmem:[%s16195_s1 + $0x248] sm:$0xff]  ;;  %v1728_v43 = vld [vmem:[%s16195_s1 + $0x240] sm:$0xff]  ;;  %v191_v48 = vld [vmem:[%s10873_s17 + $0x178] sm:$0xff] }
  0x45   : > { %9329 = vmatpush1.bf16.msra.mxu1 %v9328_v44  ;;  %v183_v44 = vld [vmem:[%s10873_s17 + $0x138] sm:$0xff]  ;;  %v9348_v49 = vpack.c.bf16 %v1730_v47, %v1728_v43  ;;  %v190_v51 = vld [vmem:[%s10873_s17 + $0x170] sm:$0xff]  ;;  %v193_v54 = vld [vmem:[%s10873_s17 + $0x188] sm:$0xff] }
  0x46   : > { %9457 = vmatpush1.bf16.msra.mxu0 %v9456_v45  ;;  %9331 = vmatprep.subr.bf16.mxu1 %v9330_v46  ;;  %v187_v45 = vld [vmem:[%s10873_s17 + $0x158] sm:$0xff]  ;;  %v9346_v46 = vpack.c.bf16 %v1731_v42, %v1729_v40  ;;  %v194_v52 = vld [vmem:[%s10873_s17 + $0x190] sm:$0xff]  ;;  %v197_v55 = vld [vmem:[%s10873_s17 + $0x1a8] sm:$0xff] }
  0x47   : > { %9459 = vmatprep.subr.bf16.mxu0 %v9458_v50  ;;  %v186_v50 = vld [vmem:[%s10873_s17 + $0x150] sm:$0xff]  ;;  %v204_v59 = vld [vmem:[%s10873_s17 + $0x1e0] sm:$0xff]  ;;  %v211_v63 = vld [vmem:[%s10873_s17 + $0x218] sm:$0xff] }
  0x48   : > { %v198_v53 = vld [vmem:[%s10873_s17 + $0x1b0] sm:$0xff]  ;;  %v208_v60 = vld [vmem:[%s10873_s17 + $0x200] sm:$0xff]  ;;  %v215_v0 = vld [vmem:[%s10873_s17 + $0x238] sm:$0xff] }
  0x49   : > { %9333 = vmatpush1.bf16.msra.mxu1 %v9332_v56  ;;  %v201_v56 = vld [vmem:[%s10873_s17 + $0x1c8] sm:$0xff]  ;;  %v212_v61 = vld [vmem:[%s10873_s17 + $0x220] sm:$0xff]  ;;  %v219_v1 = vld [vmem:[%s10873_s17 + $0x258] sm:$0xff] }
  0x4a   : > { %9461 = vmatpush1.bf16.msra.mxu0 %v9460_v57  ;;  %9335 = vmatprep.subr.bf16.mxu1 %v9334_v58  ;;  %v205_v57 = vld [vmem:[%s10873_s17 + $0x1e8] sm:$0xff]  ;;  %v200_v58 = vld [vmem:[%s10873_s17 + $0x1c0] sm:$0xff]  ;;  %v1735_v3 = vld [vmem:[%s16195_s1 + $0x278] sm:$0xff] }
  0x4b   : > { %9463 = vmatprep.subr.bf16.mxu0 %v9462_v62  ;;  %v207_v62 = vld [vmem:[%s10873_s17 + $0x1f8] sm:$0xff]  ;;  %v1733_v2 = vld [vmem:[%s16195_s1 + $0x268] sm:$0xff]  ;;  %v1734_v7 = vld [vmem:[%s16195_s1 + $0x270] sm:$0xff] }
  0x4c   : > { %v218_v8 = vld [vmem:[%s10873_s17 + $0x250] sm:$0xff]  ;;  %v229_v14 = vld [vmem:[%s10873_s17 + $0x2a8] sm:$0xff]  ;;  %v235_v20 = vld [vmem:[%s10873_s17 + $0x2d8] sm:$0xff] }
  0x4d   : > { %9337 = vmatpush1.bf16.msra.mxu1 %v9336_v4  ;;  %v1732_v4 = vld [vmem:[%s16195_s1 + $0x260] sm:$0xff]  ;;  %v226_v11 = vld [vmem:[%s10873_s17 + $0x290] sm:$0xff]  ;;  %v233_v15 = vld [vmem:[%s10873_s17 + $0x2c8] sm:$0xff] }
  0x4e   : > { %9465 = vmatpush1.bf16.msra.mxu0 %v9464_v5  ;;  %9339 = vmatprep.subr.bf16.mxu1 %v9338_v6  ;;  %v214_v5 = vld [vmem:[%s10873_s17 + $0x230] sm:$0xff]  ;;  %v9350_v6 = vpack.c.bf16 %v1735_v3, %v1733_v2  ;;  %v9352_v10 = vpack.c.bf16 %v1734_v7, %v1732_v4  ;;  %v239_v21 = vld [vmem:[%s10873_s17 + $0x2f8] sm:$0xff]  ;;  %v289_v47 = vld [vmem:[%s10873_s17 + $0x488] sm:$0xff] }
  0x4f   : > { %9467 = vmatprep.subr.bf16.mxu0 %v9466_v9  ;;  %v222_v9 = vld [vmem:[%s10873_s17 + $0x270] sm:$0xff]  ;;  %v309_v2 = vld [vmem:[%s10873_s17 + $0x528] sm:$0xff]  ;;  %v316_v7 = vld [vmem:[%s10873_s17 + $0x560] sm:$0xff] }
  0x50   : > { %2570 = vmatmul.mubr.f32.vlgmr.msra.gmra.mrb[0].mxu1 %v144_v12  ;;  %v221_v12 = vld [vmem:[%s10873_s17 + $0x268] sm:$0xff]  ;;  %v270_v40 = vld [vmem:[%s10873_s17 + $0x3f0] sm:$0xff] }
  0x51   : > { %5184 = vmatmul.mubr.f32.vlgmr.msra.gmra.mrb[0].mxu0 %v148_v16  ;;  %9341 = vmatpush1.bf16.msra.mxu1 %v9340_v13  ;;  %v225_v13 = vld [vmem:[%s10873_s17 + $0x288] sm:$0xff]  ;;  %v228_v16 = vld [vmem:[%s10873_s17 + $0x2a0] sm:$0xff]  ;;  %v278_v42 = vld [vmem:[%s10873_s17 + $0x430] sm:$0xff] }
  0x52   : > { %9469 = vmatpush1.bf16.msra.mxu0 %v9468_v17  ;;  %2574 = vmatprep.mubr.f32.mxu1 %v152_v18  ;;  %v232_v17 = vld [vmem:[%s10873_s17 + $0x2c0] sm:$0xff]  ;;  %v282_v43 = vld [vmem:[%s10873_s17 + $0x450] sm:$0xff]  ;;  %v313_v3 = vld [vmem:[%s10873_s17 + $0x548] sm:$0xff] }
  0x53   : > { %5188 = vmatprep.mubr.f32.mxu0 %v156_v22  ;;  %9343 = vmatprep.subr.bf16.mxu1 %v9342_v19  ;;  %v236_v18 = vld [vmem:[%s10873_s17 + $0x2e0] sm:$0xff]  ;;  %v243_v22 = vld [vmem:[%s10873_s17 + $0x318] sm:$0xff] }
  0x54   : > { %2575 = vmatmul.mubr.f32.gmra.mrb[2].mxu1 %v151_v23  ;;  %v240_v19 = vld [vmem:[%s10873_s17 + $0x300] sm:$0xff]  ;;  %v247_v23 = vld [vmem:[%s10873_s17 + $0x338] sm:$0xff] }
  0x55   : > { %5189 = vmatmul.mubr.f32.gmra.mrb[2].mxu0 %v155_v24  ;;  %2579 = vmatprep.mubr.f32.mxu1 %v159_v25  ;;  %v242_v24 = vld [vmem:[%s10873_s17 + $0x310] sm:$0xff] }
  0x56   : > { %5193 = vmatprep.mubr.f32.mxu0 %v163_v27  ;;  %9345 = vmatpush1.bf16.msra.mxu1 %v9344_v26  ;;  %v246_v25 = vld [vmem:[%s10873_s17 + $0x330] sm:$0xff] }
  0x57   : > { %9347 = vmatprep.subr.bf16.mxu1 %v9346_v46  ;;  %v250_v26 = vld [vmem:[%s10873_s17 + $0x350] sm:$0xff]  ;;  %v285_v46 = vld [vmem:[%s10873_s17 + $0x468] sm:$0xff] }
  0x58   : > { %2580 = vmatmul.mubr.f32.gmra.mrb[4].mxu1 %v158_v28  ;;  %v254_v27 = vld [vmem:[%s10873_s17 + $0x370] sm:$0xff]  ;;  %v249_v28 = vld [vmem:[%s10873_s17 + $0x348] sm:$0xff] }
  0x59   : > { %5194 = vmatmul.mubr.f32.gmra.mrb[4].mxu0 %v162_v29  ;;  %2584 = vmatprep.mubr.f32.mxu1 %v166_v30  ;;  %v253_v29 = vld [vmem:[%s10873_s17 + $0x368] sm:$0xff] }
  0x5a   : > { %5198 = vmatprep.mubr.f32.mxu0 %v170_v31  ;;  %9349 = vmatpush1.bf16.msra.mxu1 %v9348_v49  ;;  %v257_v30 = vld [vmem:[%s10873_s17 + $0x388] sm:$0xff]  ;;  %v288_v49 = vld [vmem:[%s10873_s17 + $0x480] sm:$0xff] }
  0x5b   : > { %9351 = vmatprep.subr.bf16.mxu1 %v9350_v6  ;;  %v261_v31 = vld [vmem:[%s10873_s17 + $0x3a8] sm:$0xff]  ;;  %v312_v6 = vld [vmem:[%s10873_s17 + $0x540] sm:$0xff] }
  0x5c   : > { %2585 = vmatmul.mubr.f32.gmra.mrb[6].mxu1 %v165_v32  ;;  %v256_v32 = vld [vmem:[%s10873_s17 + $0x380] sm:$0xff] }
  0x5d   : > { %5199 = vmatmul.mubr.f32.gmra.mrb[6].mxu0 %v169_v33  ;;  %2589 = vmatprep.mubr.f32.mxu1 %v173_v34  ;;  %v260_v33 = vld [vmem:[%s10873_s17 + $0x3a0] sm:$0xff] }
  0x5e   : > { %5203 = vmatprep.mubr.f32.mxu0 %v177_v35  ;;  %9353 = vmatpush1.bf16.msra.mxu1 %v9352_v10  ;;  %v264_v34 = vld [vmem:[%s10873_s17 + $0x3c0] sm:$0xff]  ;;  %v319_v10 = vld [vmem:[%s10873_s17 + $0x578] sm:$0xff] }
  0x5f   : > { %v268_v35 = vld [vmem:[%s10873_s17 + $0x3e0] sm:$0xff] }
  0x60   : > { %2590 = vmatmul.mubr.f32.gmra.mrb[8].mxu1 %v172_v36  ;;  %v263_v36 = vld [vmem:[%s10873_s17 + $0x3b8] sm:$0xff] }
  0x61   : > { %5204 = vmatmul.mubr.f32.gmra.mrb[8].mxu0 %v176_v37  ;;  %2594 = vmatprep.mubr.f32.mxu1 %v180_v38  ;;  %v267_v37 = vld [vmem:[%s10873_s17 + $0x3d8] sm:$0xff] }
  0x62   : > { %5208 = vmatprep.mubr.f32.mxu0 %v184_v39  ;;  %v271_v38 = vld [vmem:[%s10873_s17 + $0x3f8] sm:$0xff] }
  0x63   : > { %v275_v39 = vld [vmem:[%s10873_s17 + $0x418] sm:$0xff] }
  0x64   : > { %2595 = vmatmul.mubr.f32.gmra.mrb[10].mxu1 %v179_v41  ;;  %v274_v41 = vld [vmem:[%s10873_s17 + $0x410] sm:$0xff] }
  0x65   : > { %5209 = vmatmul.mubr.f32.gmra.mrb[10].mxu0 %v183_v44  ;;  %2599 = vmatprep.mubr.f32.mxu1 %v187_v45  ;;  %v277_v44 = vld [vmem:[%s10873_s17 + $0x428] sm:$0xff] }
  0x66   : > { %5213 = vmatprep.mubr.f32.mxu0 %v191_v48  ;;  %v281_v45 = vld [vmem:[%s10873_s17 + $0x448] sm:$0xff]  ;;  %v284_v48 = vld [vmem:[%s10873_s17 + $0x460] sm:$0xff] }
  0x68   : > { %2600 = vmatmul.mubr.f32.gmra.mrb[12].mxu1 %v186_v50  ;;  %v292_v50 = vld [vmem:[%s10873_s17 + $0x4a0] sm:$0xff] }
  0x69   : > { %5214 = vmatmul.mubr.f32.gmra.mrb[12].mxu0 %v190_v51  ;;  %2604 = vmatprep.mubr.f32.mxu1 %v194_v52  ;;  %v296_v51 = vld [vmem:[%s10873_s17 + $0x4c0] sm:$0xff]  ;;  %v291_v52 = vld [vmem:[%s10873_s17 + $0x498] sm:$0xff] }
  0x6a   : > { %5218 = vmatprep.mubr.f32.mxu0 %v198_v53  ;;  %v295_v53 = vld [vmem:[%s10873_s17 + $0x4b8] sm:$0xff] }
  0x6c   : > { %2605 = vmatmul.mubr.f32.gmra.mrb[14].mxu1 %v193_v54  ;;  %v299_v54 = vld [vmem:[%s10873_s17 + $0x4d8] sm:$0xff] }
  0x6d   : > { %5219 = vmatmul.mubr.f32.gmra.mrb[14].mxu0 %v197_v55  ;;  %2609 = vmatprep.mubr.f32.mxu1 %v201_v56  ;;  %v303_v55 = vld [vmem:[%s10873_s17 + $0x4f8] sm:$0xff]  ;;  %v298_v56 = vld [vmem:[%s10873_s17 + $0x4d0] sm:$0xff] }
  0x6e   : > { %5223 = vmatprep.mubr.f32.mxu0 %v205_v57  ;;  %v302_v57 = vld [vmem:[%s10873_s17 + $0x4f0] sm:$0xff] }
  0x70   : > { %2610 = vmatmul.mubr.f32.gmra.mrb[16].mxu1 %v200_v58  ;;  %v306_v58 = vld [vmem:[%s10873_s17 + $0x510] sm:$0xff] }
  0x71   : > { %5224 = vmatmul.mubr.f32.gmra.mrb[16].mxu0 %v204_v59  ;;  %2614 = vmatprep.mubr.f32.mxu1 %v208_v60  ;;  %v310_v59 = vld [vmem:[%s10873_s17 + $0x530] sm:$0xff]  ;;  %v1737_v60 = vld [vmem:[%s16195_s1 + $0x288] sm:$0xff] }
  0x72   : > { %5228 = vmatprep.mubr.f32.mxu0 %v212_v61  ;;  %v1739_v61 = vld [vmem:[%s16195_s1 + $0x298] sm:$0xff] }
  0x74   : > { %2615 = vmatmul.mubr.f32.gmra.mrb[18].mxu1 %v207_v62  ;;  %v305_v62 = vld [vmem:[%s10873_s17 + $0x508] sm:$0xff] }
  0x75   : > { %5229 = vmatmul.mubr.f32.gmra.mrb[18].mxu0 %v211_v63  ;;  %2619 = vmatprep.mubr.f32.mxu1 %v215_v0  ;;  %v9354_v63 = vpack.c.bf16 %v1739_v61, %v1737_v60  ;;  %v1736_v0 = vld [vmem:[%s16195_s1 + $0x280] sm:$0xff] }
  0x76   : > { %5233 = vmatprep.mubr.f32.mxu0 %v219_v1  ;;  %v1738_v1 = vld [vmem:[%s16195_s1 + $0x290] sm:$0xff]  ;;  %v408_v60 = vld [vmem:[%s10873_s17 + $0x840] sm:$0xff] }
  0x77   : > { %v9356_v4 = vpack.c.bf16 %v1738_v1, %v1736_v0  ;;  %9355 = vmatprep.subr.bf16.mxu1 %v9354_v63  ;;  %v1740_v61 = vld [vmem:[%s16195_s1 + $0x2a0] sm:$0xff]  ;;  %v403_v0 = vld [vmem:[%s10873_s17 + $0x818] sm:$0xff] }
  0x78   : > { %2620 = vmatmul.mubr.f32.gmra.mrb[20].mxu1 %v214_v5  ;;  %v317_v5 = vld [vmem:[%s10873_s17 + $0x568] sm:$0xff]  ;;  %v407_v1 = vld [vmem:[%s10873_s17 + $0x838] sm:$0xff] }
  0x79   : > { %5234 = vmatmul.mubr.f32.gmra.mrb[20].mxu0 %v218_v8  ;;  %2624 = vmatprep.mubr.f32.mxu1 %v222_v9  ;;  %v320_v8 = vld [vmem:[%s10873_s17 + $0x580] sm:$0xff] }
  0x7a   : > { %5238 = vmatprep.mubr.f32.mxu0 %v226_v11  ;;  %9357 = vmatpush1.bf16.msra.mxu1 %v9356_v4  ;;  %v324_v9 = vld [vmem:[%s10873_s17 + $0x5a0] sm:$0xff]  ;;  %v323_v11 = vld [vmem:[%s10873_s17 + $0x598] sm:$0xff]  ;;  %v410_v4 = vld [vmem:[%s10873_s17 + $0x850] sm:$0xff] }
  0x7c   : > { %2625 = vmatmul.mubr.f32.gmra.mrb[22].mxu1 %v221_v12  ;;  %v327_v12 = vld [vmem:[%s10873_s17 + $0x5b8] sm:$0xff] }
  0x7d   : > { %5239 = vmatmul.mubr.f32.gmra.mrb[22].mxu0 %v225_v13  ;;  %2629 = vmatprep.mubr.f32.mxu1 %v229_v14  ;;  %v331_v13 = vld [vmem:[%s10873_s17 + $0x5d8] sm:$0xff]  ;;  %v326_v14 = vld [vmem:[%s10873_s17 + $0x5b0] sm:$0xff] }
  0x7e   : > { %5243 = vmatprep.mubr.f32.mxu0 %v233_v15  ;;  %v330_v15 = vld [vmem:[%s10873_s17 + $0x5d0] sm:$0xff] }
  0x80   : > { %2630 = vmatmul.mubr.f32.gmra.mrb[24].mxu1 %v228_v16  ;;  %v334_v16 = vld [vmem:[%s10873_s17 + $0x5f0] sm:$0xff] }
  0x81   : > { %5244 = vmatmul.mubr.f32.gmra.mrb[24].mxu0 %v232_v17  ;;  %2634 = vmatprep.mubr.f32.mxu1 %v236_v18  ;;  %v338_v17 = vld [vmem:[%s10873_s17 + $0x610] sm:$0xff]  ;;  %v333_v18 = vld [vmem:[%s10873_s17 + $0x5e8] sm:$0xff] }
  0x82   : > { %5248 = vmatprep.mubr.f32.mxu0 %v240_v19  ;;  %v337_v19 = vld [vmem:[%s10873_s17 + $0x608] sm:$0xff] }
  0x84   : > { %2635 = vmatmul.mubr.f32.gmra.mrb[26].mxu1 %v235_v20  ;;  %v341_v20 = vld [vmem:[%s10873_s17 + $0x628] sm:$0xff] }
  0x85   : > { %5249 = vmatmul.mubr.f32.gmra.mrb[26].mxu0 %v239_v21  ;;  %2639 = vmatprep.mubr.f32.mxu1 %v243_v22  ;;  %v345_v21 = vld [vmem:[%s10873_s17 + $0x648] sm:$0xff]  ;;  %v340_v22 = vld [vmem:[%s10873_s17 + $0x620] sm:$0xff] }
  0x86   : > { %5253 = vmatprep.mubr.f32.mxu0 %v247_v23  ;;  %v344_v23 = vld [vmem:[%s10873_s17 + $0x640] sm:$0xff] }
  0x88   : > { %2640 = vmatmul.mubr.f32.gmra.mrb[28].mxu1 %v242_v24  ;;  %v348_v24 = vld [vmem:[%s10873_s17 + $0x660] sm:$0xff] }
  0x89   : > { %5254 = vmatmul.mubr.f32.gmra.mrb[28].mxu0 %v246_v25  ;;  %2644 = vmatprep.mubr.f32.mxu1 %v250_v26  ;;  %v352_v25 = vld [vmem:[%s10873_s17 + $0x680] sm:$0xff]  ;;  %v347_v26 = vld [vmem:[%s10873_s17 + $0x658] sm:$0xff] }
  0x8a   : > { %5258 = vmatprep.mubr.f32.mxu0 %v254_v27  ;;  %v351_v27 = vld [vmem:[%s10873_s17 + $0x678] sm:$0xff] }
  0x8c   : > { %2645 = vmatmul.mubr.f32.gmra.mrb[30].mxu1 %v249_v28  ;;  %v355_v28 = vld [vmem:[%s10873_s17 + $0x698] sm:$0xff] }
  0x8d   : > { %5259 = vmatmul.mubr.f32.gmra.mrb[30].mxu0 %v253_v29  ;;  %2649 = vmatprep.mubr.f32.mxu1 %v257_v30  ;;  %v359_v29 = vld [vmem:[%s10873_s17 + $0x6b8] sm:$0xff]  ;;  %v354_v30 = vld [vmem:[%s10873_s17 + $0x690] sm:$0xff] }
  0x8e   : > { %5263 = vmatprep.mubr.f32.mxu0 %v261_v31  ;;  %v358_v31 = vld [vmem:[%s10873_s17 + $0x6b0] sm:$0xff] }
  0x90   : > { %2650 = vmatmul.mubr.f32.gmra.mrb[32].mxu1 %v256_v32  ;;  %v362_v32 = vld [vmem:[%s10873_s17 + $0x6d0] sm:$0xff] }
  0x91   : > { %5264 = vmatmul.mubr.f32.gmra.mrb[32].mxu0 %v260_v33  ;;  %2654 = vmatprep.mubr.f32.mxu1 %v264_v34  ;;  %v366_v33 = vld [vmem:[%s10873_s17 + $0x6f0] sm:$0xff]  ;;  %v361_v34 = vld [vmem:[%s10873_s17 + $0x6c8] sm:$0xff] }
  0x92   : > { %5268 = vmatprep.mubr.f32.mxu0 %v268_v35  ;;  %v365_v35 = vld [vmem:[%s10873_s17 + $0x6e8] sm:$0xff] }
  0x94   : > { %2655 = vmatmul.mubr.f32.gmra.mrb[34].mxu1 %v263_v36  ;;  %v369_v36 = vld [vmem:[%s10873_s17 + $0x708] sm:$0xff] }
  0x95   : > { %5269 = vmatmul.mubr.f32.gmra.mrb[34].mxu0 %v267_v37  ;;  %2659 = vmatprep.mubr.f32.mxu1 %v271_v38  ;;  %v373_v37 = vld [vmem:[%s10873_s17 + $0x728] sm:$0xff]  ;;  %v368_v38 = vld [vmem:[%s10873_s17 + $0x700] sm:$0xff] }
  0x96   : > { %5273 = vmatprep.mubr.f32.mxu0 %v275_v39  ;;  %v372_v39 = vld [vmem:[%s10873_s17 + $0x720] sm:$0xff] }
  0x98   : > { %2660 = vmatmul.mubr.f32.gmra.mrb[36].mxu1 %v270_v40  ;;  %v376_v40 = vld [vmem:[%s10873_s17 + $0x740] sm:$0xff] }
  0x99   : > { %5274 = vmatmul.mubr.f32.gmra.mrb[36].mxu0 %v274_v41  ;;  %2664 = vmatprep.mubr.f32.mxu1 %v278_v42  ;;  %v380_v41 = vld [vmem:[%s10873_s17 + $0x760] sm:$0xff]  ;;  %v375_v42 = vld [vmem:[%s10873_s17 + $0x738] sm:$0xff] }
  0x9a   : > { %5278 = vmatprep.mubr.f32.mxu0 %v282_v43  ;;  %v379_v43 = vld [vmem:[%s10873_s17 + $0x758] sm:$0xff] }
  0x9c   : > { %2665 = vmatmul.mubr.f32.gmra.mrb[38].mxu1 %v277_v44  ;;  %v383_v44 = vld [vmem:[%s10873_s17 + $0x778] sm:$0xff] }
  0x9d   : > { %5279 = vmatmul.mubr.f32.gmra.mrb[38].mxu0 %v281_v45  ;;  %2669 = vmatprep.mubr.f32.mxu1 %v285_v46  ;;  %v387_v45 = vld [vmem:[%s10873_s17 + $0x798] sm:$0xff]  ;;  %v382_v46 = vld [vmem:[%s10873_s17 + $0x770] sm:$0xff] }
  0x9e   : > { %5283 = vmatprep.mubr.f32.mxu0 %v289_v47  ;;  %v386_v47 = vld [vmem:[%s10873_s17 + $0x790] sm:$0xff] }
  0xa0   : > { %2670 = vmatmul.mubr.f32.gmra.mrb[40].mxu1 %v284_v48  ;;  %v390_v48 = vld [vmem:[%s10873_s17 + $0x7b0] sm:$0xff] }
  0xa1   : > { %5284 = vmatmul.mubr.f32.gmra.mrb[40].mxu0 %v288_v49  ;;  %2674 = vmatprep.mubr.f32.mxu1 %v292_v50  ;;  %v394_v49 = vld [vmem:[%s10873_s17 + $0x7d0] sm:$0xff]  ;;  %v389_v50 = vld [vmem:[%s10873_s17 + $0x7a8] sm:$0xff] }
  0xa2   : > { %5288 = vmatprep.mubr.f32.mxu0 %v296_v51  ;;  %v393_v51 = vld [vmem:[%s10873_s17 + $0x7c8] sm:$0xff] }
  0xa4   : > { %2675 = vmatmul.mubr.f32.gmra.mrb[42].mxu1 %v291_v52  ;;  %v397_v52 = vld [vmem:[%s10873_s17 + $0x7e8] sm:$0xff] }
  0xa5   : > { %5289 = vmatmul.mubr.f32.gmra.mrb[42].mxu0 %v295_v53  ;;  %2679 = vmatprep.mubr.f32.mxu1 %v299_v54  ;;  %v401_v53 = vld [vmem:[%s10873_s17 + $0x808] sm:$0xff]  ;;  %v396_v54 = vld [vmem:[%s10873_s17 + $0x7e0] sm:$0xff] }
  0xa6   : > { %5293 = vmatprep.mubr.f32.mxu0 %v303_v55  ;;  %v1741_v55 = vld [vmem:[%s16195_s1 + $0x2a8] sm:$0xff] }
  0xa8   : > { %2680 = vmatmul.mubr.f32.gmra.mrb[44].mxu1 %v298_v56  ;;  %v1743_v56 = vld [vmem:[%s16195_s1 + $0x2b8] sm:$0xff] }
  0xa9   : > { %5294 = vmatmul.mubr.f32.gmra.mrb[44].mxu0 %v302_v57  ;;  %2684 = vmatprep.mubr.f32.mxu1 %v306_v58  ;;  %v400_v57 = vld [vmem:[%s10873_s17 + $0x800] sm:$0xff] }
  0xaa   : > { %5298 = vmatprep.mubr.f32.mxu0 %v310_v59  ;;  %v404_v58 = vld [vmem:[%s10873_s17 + $0x820] sm:$0xff]  ;;  %v9358_v59 = vpack.c.bf16 %v1743_v56, %v1741_v55 }
  0xab   : > { %v1744_v56 = vld [vmem:[%s16195_s1 + $0x2c0] sm:$0xff] }
  0xac   : > { %2685 = vmatmul.mubr.f32.gmra.mrb[46].mxu1 %v305_v62  ;;  %v1742_v62 = vld [vmem:[%s16195_s1 + $0x2b0] sm:$0xff]  ;;  %9359 = vmatprep.subr.bf16.mxu1 %v9358_v59 }
  0xad   : > { %5299 = vmatmul.mubr.f32.gmra.mrb[46].mxu0 %v309_v2  ;;  %2689 = vmatprep.mubr.f32.mxu1 %v313_v3  ;;  %v9360_v63 = vpack.c.bf16 %v1742_v62, %v1740_v61  ;;  %v411_v2 = vld [vmem:[%s10873_s17 + $0x858] sm:$0xff]  ;;  %v502_v59 = vld [vmem:[%s10873_s17 + $0xb30] sm:$0xff]  ;;  %v501_v62 = vld [vmem:[%s10873_s17 + $0xb28] sm:$0xff] }
  0xae   : > { %5303 = vmatprep.mubr.f32.mxu0 %v317_v5  ;;  %v415_v3 = vld [vmem:[%s10873_s17 + $0x878] sm:$0xff]  ;;  %v414_v5 = vld [vmem:[%s10873_s17 + $0x870] sm:$0xff] }
  0xaf   : > { %9361 = vmatpush1.bf16.msra.mxu1 %v9360_v63  ;;  %v506_v61 = vld [vmem:[%s10873_s17 + $0xb50] sm:$0xff]  ;;  %v505_v63 = vld [vmem:[%s10873_s17 + $0xb48] sm:$0xff] }
  0xb0   : > { %2690 = vmatmul.mubr.f32.gmra.mrb[48].mxu1 %v312_v6  ;;  %v418_v6 = vld [vmem:[%s10873_s17 + $0x890] sm:$0xff] }
  0xb1   : > { %5304 = vmatmul.mubr.f32.gmra.mrb[48].mxu0 %v316_v7  ;;  %2694 = vmatprep.mubr.f32.mxu1 %v320_v8  ;;  %v422_v7 = vld [vmem:[%s10873_s17 + $0x8b0] sm:$0xff]  ;;  %v417_v8 = vld [vmem:[%s10873_s17 + $0x888] sm:$0xff] }
  0xb2   : > { %5308 = vmatprep.mubr.f32.mxu0 %v324_v9  ;;  %v421_v9 = vld [vmem:[%s10873_s17 + $0x8a8] sm:$0xff] }
  0xb4   : > { %2695 = vmatmul.mubr.f32.gmra.mrb[50].mxu1 %v319_v10  ;;  %v425_v10 = vld [vmem:[%s10873_s17 + $0x8c8] sm:$0xff] }
  0xb5   : > { %5309 = vmatmul.mubr.f32.gmra.mrb[50].mxu0 %v323_v11  ;;  %2699 = vmatprep.mubr.f32.mxu1 %v327_v12  ;;  %v429_v11 = vld [vmem:[%s10873_s17 + $0x8e8] sm:$0xff]  ;;  %v424_v12 = vld [vmem:[%s10873_s17 + $0x8c0] sm:$0xff] }
  0xb6   : > { %5313 = vmatprep.mubr.f32.mxu0 %v331_v13  ;;  %v428_v13 = vld [vmem:[%s10873_s17 + $0x8e0] sm:$0xff] }
  0xb8   : > { %2700 = vmatmul.mubr.f32.gmra.mrb[52].mxu1 %v326_v14  ;;  %v432_v14 = vld [vmem:[%s10873_s17 + $0x900] sm:$0xff] }
  0xb9   : > { %5314 = vmatmul.mubr.f32.gmra.mrb[52].mxu0 %v330_v15  ;;  %2704 = vmatprep.mubr.f32.mxu1 %v334_v16  ;;  %v436_v15 = vld [vmem:[%s10873_s17 + $0x920] sm:$0xff]  ;;  %v431_v16 = vld [vmem:[%s10873_s17 + $0x8f8] sm:$0xff] }
  0xba   : > { %5318 = vmatprep.mubr.f32.mxu0 %v338_v17  ;;  %v435_v17 = vld [vmem:[%s10873_s17 + $0x918] sm:$0xff] }
  0xbc   : > { %2705 = vmatmul.mubr.f32.gmra.mrb[54].mxu1 %v333_v18  ;;  %v439_v18 = vld [vmem:[%s10873_s17 + $0x938] sm:$0xff] }
  0xbd   : > { %5319 = vmatmul.mubr.f32.gmra.mrb[54].mxu0 %v337_v19  ;;  %2709 = vmatprep.mubr.f32.mxu1 %v341_v20  ;;  %v443_v19 = vld [vmem:[%s10873_s17 + $0x958] sm:$0xff]  ;;  %v438_v20 = vld [vmem:[%s10873_s17 + $0x930] sm:$0xff] }
  0xbe   : > { %5323 = vmatprep.mubr.f32.mxu0 %v345_v21  ;;  %v442_v21 = vld [vmem:[%s10873_s17 + $0x950] sm:$0xff] }
  0xc0   : > { %2710 = vmatmul.mubr.f32.gmra.mrb[56].mxu1 %v340_v22  ;;  %v446_v22 = vld [vmem:[%s10873_s17 + $0x970] sm:$0xff] }
  0xc1   : > { %5324 = vmatmul.mubr.f32.gmra.mrb[56].mxu0 %v344_v23  ;;  %2714 = vmatprep.mubr.f32.mxu1 %v348_v24  ;;  %v450_v23 = vld [vmem:[%s10873_s17 + $0x990] sm:$0xff]  ;;  %v445_v24 = vld [vmem:[%s10873_s17 + $0x968] sm:$0xff] }
  0xc2   : > { %5328 = vmatprep.mubr.f32.mxu0 %v352_v25  ;;  %v449_v25 = vld [vmem:[%s10873_s17 + $0x988] sm:$0xff] }
  0xc4   : > { %2715 = vmatmul.mubr.f32.gmra.mrb[58].mxu1 %v347_v26  ;;  %v453_v26 = vld [vmem:[%s10873_s17 + $0x9a8] sm:$0xff] }
  0xc5   : > { %5329 = vmatmul.mubr.f32.gmra.mrb[58].mxu0 %v351_v27  ;;  %2719 = vmatprep.mubr.f32.mxu1 %v355_v28  ;;  %v457_v27 = vld [vmem:[%s10873_s17 + $0x9c8] sm:$0xff]  ;;  %v452_v28 = vld [vmem:[%s10873_s17 + $0x9a0] sm:$0xff] }
  0xc6   : > { %5333 = vmatprep.mubr.f32.mxu0 %v359_v29  ;;  %v456_v29 = vld [vmem:[%s10873_s17 + $0x9c0] sm:$0xff] }
  0xc8   : > { %2720 = vmatmul.mubr.f32.gmra.mrb[60].mxu1 %v354_v30  ;;  %v460_v30 = vld [vmem:[%s10873_s17 + $0x9e0] sm:$0xff] }
  0xc9   : > { %5334 = vmatmul.mubr.f32.gmra.mrb[60].mxu0 %v358_v31  ;;  %2724 = vmatprep.mubr.f32.mxu1 %v362_v32  ;;  %v464_v31 = vld [vmem:[%s10873_s17 + $0xa00] sm:$0xff]  ;;  %v459_v32 = vld [vmem:[%s10873_s17 + $0x9d8] sm:$0xff] }
  0xca   : > { %5338 = vmatprep.mubr.f32.mxu0 %v366_v33  ;;  %v463_v33 = vld [vmem:[%s10873_s17 + $0x9f8] sm:$0xff] }
  0xcc   : > { %2725 = vmatmul.mubr.f32.gmra.mrb[62].mxu1 %v361_v34  ;;  %v467_v34 = vld [vmem:[%s10873_s17 + $0xa18] sm:$0xff] }
  0xcd   : > { %5339 = vmatmul.mubr.f32.gmra.mrb[62].mxu0 %v365_v35  ;;  %2729 = vmatprep.mubr.f32.mxu1 %v369_v36  ;;  %v471_v35 = vld [vmem:[%s10873_s17 + $0xa38] sm:$0xff]  ;;  %v466_v36 = vld [vmem:[%s10873_s17 + $0xa10] sm:$0xff] }
  0xce   : > { %5343 = vmatprep.mubr.f32.mxu0 %v373_v37  ;;  %v470_v37 = vld [vmem:[%s10873_s17 + $0xa30] sm:$0xff] }
  0xd0   : > { %2730 = vmatmul.mubr.f32.gmra.mrb[64].mxu1 %v368_v38  ;;  %v474_v38 = vld [vmem:[%s10873_s17 + $0xa50] sm:$0xff] }
  0xd1   : > { %5344 = vmatmul.mubr.f32.gmra.mrb[64].mxu0 %v372_v39  ;;  %2734 = vmatprep.mubr.f32.mxu1 %v376_v40  ;;  %v478_v39 = vld [vmem:[%s10873_s17 + $0xa70] sm:$0xff]  ;;  %v473_v40 = vld [vmem:[%s10873_s17 + $0xa48] sm:$0xff] }
  0xd2   : > { %5348 = vmatprep.mubr.f32.mxu0 %v380_v41  ;;  %v477_v41 = vld [vmem:[%s10873_s17 + $0xa68] sm:$0xff] }
  0xd4   : > { %2735 = vmatmul.mubr.f32.gmra.mrb[66].mxu1 %v375_v42  ;;  %v481_v42 = vld [vmem:[%s10873_s17 + $0xa88] sm:$0xff] }
  0xd5   : > { %5349 = vmatmul.mubr.f32.gmra.mrb[66].mxu0 %v379_v43  ;;  %2739 = vmatprep.mubr.f32.mxu1 %v383_v44  ;;  %v485_v43 = vld [vmem:[%s10873_s17 + $0xaa8] sm:$0xff]  ;;  %v480_v44 = vld [vmem:[%s10873_s17 + $0xa80] sm:$0xff] }
  0xd6   : > { %5353 = vmatprep.mubr.f32.mxu0 %v387_v45  ;;  %v484_v45 = vld [vmem:[%s10873_s17 + $0xaa0] sm:$0xff] }
  0xd8   : > { %2740 = vmatmul.mubr.f32.gmra.mrb[68].mxu1 %v382_v46  ;;  %v488_v46 = vld [vmem:[%s10873_s17 + $0xac0] sm:$0xff] }
  0xd9   : > { %5354 = vmatmul.mubr.f32.gmra.mrb[68].mxu0 %v386_v47  ;;  %2744 = vmatprep.mubr.f32.mxu1 %v390_v48  ;;  %v492_v47 = vld [vmem:[%s10873_s17 + $0xae0] sm:$0xff]  ;;  %v487_v48 = vld [vmem:[%s10873_s17 + $0xab8] sm:$0xff] }
  0xda   : > { %5358 = vmatprep.mubr.f32.mxu0 %v394_v49  ;;  %v491_v49 = vld [vmem:[%s10873_s17 + $0xad8] sm:$0xff] }
  0xdc   : > { %2745 = vmatmul.mubr.f32.gmra.mrb[70].mxu1 %v389_v50  ;;  %v495_v50 = vld [vmem:[%s10873_s17 + $0xaf8] sm:$0xff] }
  0xdd   : > { %5359 = vmatmul.mubr.f32.gmra.mrb[70].mxu0 %v393_v51  ;;  %2749 = vmatprep.mubr.f32.mxu1 %v397_v52  ;;  %v499_v51 = vld [vmem:[%s10873_s17 + $0xb18] sm:$0xff]  ;;  %v1745_v52 = vld [vmem:[%s16195_s1 + $0x2c8] sm:$0xff] }
  0xde   : > { %5363 = vmatprep.mubr.f32.mxu0 %v401_v53  ;;  %v1747_v53 = vld [vmem:[%s16195_s1 + $0x2d8] sm:$0xff] }
  0xdf   : > { %v9362_v55 = vpack.c.bf16 %v1747_v53, %v1745_v52 }
  0xe0   : > { %2750 = vmatmul.mubr.f32.gmra.mrb[72].mxu1 %v396_v54  ;;  %v494_v54 = vld [vmem:[%s10873_s17 + $0xaf0] sm:$0xff] }
  0xe1   : > { %5364 = vmatmul.mubr.f32.gmra.mrb[72].mxu0 %v400_v57  ;;  %2755 = vmatprep.mubr.f32.mxu1 %v404_v58  ;;  %v1746_v57 = vld [vmem:[%s16195_s1 + $0x2d0] sm:$0xff] }
  0xe2   : > { %5369 = vmatprep.mubr.f32.mxu0 %v408_v60  ;;  %v498_v58 = vld [vmem:[%s10873_s17 + $0xb10] sm:$0xff]  ;;  %v9364_v60 = vpack.c.bf16 %v1746_v57, %v1744_v56  ;;  %9363 = vmatprep.subr.bf16.mxu1 %v9362_v55  ;;  %v561_v55 = vld [vmem:[%s10873_s17 + $0xd08] sm:$0xff] }
  0xe3   : > { %v565_v56 = vld [vmem:[%s10873_s17 + $0xd28] sm:$0xff] }
  0xe4   : > { %2756 = vmatmul.mubr.f32.gmra.mrb[74].mxu1 %v403_v0  ;;  %v509_v0 = vld [vmem:[%s10873_s17 + $0xb68] sm:$0xff] }
  0xe5   : > { %5370 = vmatmul.mubr.f32.gmra.mrb[74].mxu0 %v407_v1  ;;  %2761 = vmatprep.mubr.f32.mxu1 %v411_v2  ;;  %v513_v1 = vld [vmem:[%s10873_s17 + $0xb88] sm:$0xff]  ;;  %v508_v2 = vld [vmem:[%s10873_s17 + $0xb60] sm:$0xff] }
  0xe6   : > { %5375 = vmatprep.mubr.f32.mxu0 %v415_v3  ;;  %9365 = vmatpush1.bf16.msra.mxu1 %v9364_v60  ;;  %v512_v3 = vld [vmem:[%s10873_s17 + $0xb80] sm:$0xff] }
  0xe8   : > { %2762 = vmatmul.mubr.f32.gmra.mrb[76].mxu1 %v410_v4  ;;  %v516_v4 = vld [vmem:[%s10873_s17 + $0xba0] sm:$0xff] }
  0xe9   : > { %5376 = vmatmul.mubr.f32.gmra.mrb[76].mxu0 %v414_v5  ;;  %2767 = vmatprep.mubr.f32.mxu1 %v418_v6  ;;  %v520_v5 = vld [vmem:[%s10873_s17 + $0xbc0] sm:$0xff]  ;;  %v515_v6 = vld [vmem:[%s10873_s17 + $0xb98] sm:$0xff] }
  0xea   : > { %5381 = vmatprep.mubr.f32.mxu0 %v422_v7  ;;  %v519_v7 = vld [vmem:[%s10873_s17 + $0xbb8] sm:$0xff] }
  0xec   : > { %2768 = vmatmul.mubr.f32.gmra.mrb[78].mxu1 %v417_v8  ;;  %v523_v8 = vld [vmem:[%s10873_s17 + $0xbd8] sm:$0xff] }
  0xed   : > { %5382 = vmatmul.mubr.f32.gmra.mrb[78].mxu0 %v421_v9  ;;  %2773 = vmatprep.mubr.f32.mxu1 %v425_v10  ;;  %v527_v10 = vld [vmem:[%s10873_s17 + $0xbf8] sm:$0xff] }
  0xee   : > { %5387 = vmatprep.mubr.f32.mxu0 %v429_v11 }
  0xf0   : > { %2774 = vmatmul.mubr.f32.gmra.mrb[80].mxu1 %v424_v12 }
  0xf1   : > { %5388 = vmatmul.mubr.f32.gmra.mrb[80].mxu0 %v428_v13  ;;  %2779 = vmatprep.mubr.f32.mxu1 %v432_v14  ;;  %v522_v14 = vld [vmem:[%s10873_s17 + $0xbd0] sm:$0xff] }
  0xf2   : > { %5393 = vmatprep.mubr.f32.mxu0 %v436_v15  ;;  %v526_v15 = vld [vmem:[%s10873_s17 + $0xbf0] sm:$0xff] }
  0xf4   : > { %2780 = vmatmul.mubr.f32.gmra.mrb[82].mxu1 %v431_v16  ;;  %v530_v16 = vld [vmem:[%s10873_s17 + $0xc10] sm:$0xff] }
  0xf5   : > { %5394 = vmatmul.mubr.f32.gmra.mrb[82].mxu0 %v435_v17  ;;  %2785 = vmatprep.mubr.f32.mxu1 %v439_v18  ;;  %v534_v18 = vld [vmem:[%s10873_s17 + $0xc30] sm:$0xff] }
  0xf6   : > { %5399 = vmatprep.mubr.f32.mxu0 %v443_v19 }
  0xf8   : > { %2786 = vmatmul.mubr.f32.gmra.mrb[84].mxu1 %v438_v20 }
  0xf9   : > { %5400 = vmatmul.mubr.f32.gmra.mrb[84].mxu0 %v442_v21  ;;  %2791 = vmatprep.mubr.f32.mxu1 %v446_v22  ;;  %v529_v22 = vld [vmem:[%s10873_s17 + $0xc08] sm:$0xff] }
  0xfa   : > { %5405 = vmatprep.mubr.f32.mxu0 %v450_v23  ;;  %v533_v23 = vld [vmem:[%s10873_s17 + $0xc28] sm:$0xff] }
  0xfc   : > { %2792 = vmatmul.mubr.f32.gmra.mrb[86].mxu1 %v445_v24  ;;  %v537_v24 = vld [vmem:[%s10873_s17 + $0xc48] sm:$0xff] }
  0xfd   : > { %5406 = vmatmul.mubr.f32.gmra.mrb[86].mxu0 %v449_v25  ;;  %2797 = vmatprep.mubr.f32.mxu1 %v453_v26  ;;  %v541_v26 = vld [vmem:[%s10873_s17 + $0xc68] sm:$0xff] }
  0xfe   : > { %5411 = vmatprep.mubr.f32.mxu0 %v457_v27 }
 0x100   : > { %2798 = vmatmul.mubr.f32.gmra.mrb[88].mxu1 %v452_v28 }
 0x101   : > { %5412 = vmatmul.mubr.f32.gmra.mrb[88].mxu0 %v456_v29  ;;  %2803 = vmatprep.mubr.f32.mxu1 %v460_v30  ;;  %v536_v30 = vld [vmem:[%s10873_s17 + $0xc40] sm:$0xff] }
 0x102   : > { %5417 = vmatprep.mubr.f32.mxu0 %v464_v31  ;;  %v540_v31 = vld [vmem:[%s10873_s17 + $0xc60] sm:$0xff] }
 0x104   : > { %2804 = vmatmul.mubr.f32.gmra.mrb[90].mxu1 %v459_v32  ;;  %v544_v32 = vld [vmem:[%s10873_s17 + $0xc80] sm:$0xff] }
 0x105   : > { %5418 = vmatmul.mubr.f32.gmra.mrb[90].mxu0 %v463_v33  ;;  %2809 = vmatprep.mubr.f32.mxu1 %v467_v34  ;;  %v548_v34 = vld [vmem:[%s10873_s17 + $0xca0] sm:$0xff] }
 0x106   : > { %5423 = vmatprep.mubr.f32.mxu0 %v471_v35 }
 0x108   : > { %2810 = vmatmul.mubr.f32.gmra.mrb[92].mxu1 %v466_v36 }
 0x109   : > { %5424 = vmatmul.mubr.f32.gmra.mrb[92].mxu0 %v470_v37  ;;  %2815 = vmatprep.mubr.f32.mxu1 %v474_v38  ;;  %v543_v38 = vld [vmem:[%s10873_s17 + $0xc78] sm:$0xff] }
 0x10a   : > { %5429 = vmatprep.mubr.f32.mxu0 %v478_v39  ;;  %v547_v39 = vld [vmem:[%s10873_s17 + $0xc98] sm:$0xff] }
 0x10c   : > { %2816 = vmatmul.mubr.f32.gmra.mrb[94].mxu1 %v473_v40  ;;  %v551_v40 = vld [vmem:[%s10873_s17 + $0xcb8] sm:$0xff] }
 0x10d   : > { %5430 = vmatmul.mubr.f32.gmra.mrb[94].mxu0 %v477_v41  ;;  %2821 = vmatprep.mubr.f32.mxu1 %v481_v42  ;;  %v555_v42 = vld [vmem:[%s10873_s17 + $0xcd8] sm:$0xff] }
 0x10e   : > { %5435 = vmatprep.mubr.f32.mxu0 %v485_v43 }
 0x110   : > { %2822 = vmatmul.mubr.f32.gmra.mrb[96].mxu1 %v480_v44 }
 0x111   : > { %5436 = vmatmul.mubr.f32.gmra.mrb[96].mxu0 %v484_v45  ;;  %2827 = vmatprep.mubr.f32.mxu1 %v488_v46  ;;  %v550_v46 = vld [vmem:[%s10873_s17 + $0xcb0] sm:$0xff] }
 0x112   : > { %5441 = vmatprep.mubr.f32.mxu0 %v492_v47  ;;  %v554_v47 = vld [vmem:[%s10873_s17 + $0xcd0] sm:$0xff] }
 0x114   : > { %2828 = vmatmul.mubr.f32.gmra.mrb[98].mxu1 %v487_v48  ;;  %v558_v48 = vld [vmem:[%s10873_s17 + $0xcf0] sm:$0xff] }
 0x115   : > { %5442 = vmatmul.mubr.f32.gmra.mrb[98].mxu0 %v491_v49  ;;  %2833 = vmatprep.mubr.f32.mxu1 %v495_v50  ;;  %v562_v50 = vld [vmem:[%s10873_s17 + $0xd10] sm:$0xff] }
 0x116   : > { %5447 = vmatprep.mubr.f32.mxu0 %v499_v51 }
 0x118   : > { %2834 = vmatmul.mubr.f32.gmra.mrb[100].mxu1 %v494_v54  ;;  %v557_v54 = vld [vmem:[%s10873_s17 + $0xce8] sm:$0xff] }
 0x119   : > { %5448 = vmatmul.mubr.f32.gmra.mrb[100].mxu0 %v498_v58  ;;  %2839 = vmatprep.mubr.f32.mxu1 %v502_v59  ;;  %v569_v58 = vld [vmem:[%s10873_s17 + $0xd48] sm:$0xff] }
 0x11a   : > { %5453 = vmatprep.mubr.f32.mxu0 %v506_v61 }
 0x11c   : > { %2840 = vmatmul.mubr.f32.gmra.mrb[102].mxu1 %v501_v62  ;;  %v564_v62 = vld [vmem:[%s10873_s17 + $0xd20] sm:$0xff] }
 0x11d   : > { %5454 = vmatmul.mubr.f32.gmra.mrb[102].mxu0 %v505_v63  ;;  %2845 = vmatprep.mubr.f32.mxu1 %v509_v0  ;;  %v568_v63 = vld [vmem:[%s10873_s17 + $0xd40] sm:$0xff] }
 0x11e   : > { %5459 = vmatprep.mubr.f32.mxu0 %v513_v1  ;;  %v572_v0 = vld [vmem:[%s10873_s17 + $0xd60] sm:$0xff] }
 0x120   : > { %2846 = vmatmul.mubr.f32.gmra.mrb[104].mxu1 %v508_v2  ;;  %v576_v2 = vld [vmem:[%s10873_s17 + $0xd80] sm:$0xff] }
 0x121   : > { %5460 = vmatmul.mubr.f32.gmra.mrb[104].mxu0 %v512_v3  ;;  %2851 = vmatprep.mubr.f32.mxu1 %v516_v4 }
 0x122   : > { %5465 = vmatprep.mubr.f32.mxu0 %v520_v5 }
 0x123   : > { %v11296_v9 = vpop.f32.mrb[0].mxu1 }
 0x124   : > { %v11299_v11 = vpop.f32.mrb[0].mxu0  ;;  %v2573_v12 = vpop.f32.mrb[1].mxu1  ;;  %2852 = vmatmul.mubr.f32.gmra.mrb[106].mxu1 %v515_v6  ;;  %v571_v6 = vld [vmem:[%s10873_s17 + $0xd58] sm:$0xff] }
 0x125   : > { %v5187_v13 = vpop.f32.mrb[1].mxu0  ;;  %5466 = vmatmul.mubr.f32.gmra.mrb[106].mxu0 %v519_v7  ;;  %2857 = vmatprep.mubr.f32.mxu1 %v523_v8  ;;  %v575_v7 = vld [vmem:[%s10873_s17 + $0xd78] sm:$0xff] }
 0x126   : > { %5471 = vmatprep.mubr.f32.mxu0 %v527_v10  ;;  %v579_v8 = vld [vmem:[%s10873_s17 + $0xd98] sm:$0xff] }
 0x127   : > { %v11304_v17 = vpop.f32.mrb[2].mxu1  ;;  %v583_v12 = vld [vmem:[%s10873_s17 + $0xdb8] sm:$0xff] }
 0x128   : > { %v11307_v19 = vpop.f32.mrb[2].mxu0  ;;  %v2578_v20 = vpop.f32.mrb[3].mxu1  ;;  %2858 = vmatmul.mubr.f32.gmra.mrb[108].mxu1 %v522_v14 }
 0x129   : > { %v5192_v21 = vpop.f32.mrb[3].mxu0  ;;  %5472 = vmatmul.mubr.f32.gmra.mrb[108].mxu0 %v526_v15  ;;  %2863 = vmatprep.mubr.f32.mxu1 %v530_v16  ;;  %v578_v16 = vld [vmem:[%s10873_s17 + $0xd90] sm:$0xff] }
 0x12a   : > { %5477 = vmatprep.mubr.f32.mxu0 %v534_v18  ;;  %v582_v18 = vld [vmem:[%s10873_s17 + $0xdb0] sm:$0xff] }
 0x12b   : > { %v11312_v25 = vpop.f32.mrb[4].mxu1  ;;  %v586_v20 = vld [vmem:[%s10873_s17 + $0xdd0] sm:$0xff] }
 0x12c   : > { %v11315_v27 = vpop.f32.mrb[4].mxu0  ;;  %v2583_v28 = vpop.f32.mrb[5].mxu1  ;;  %2864 = vmatmul.mubr.f32.gmra.mrb[110].mxu1 %v529_v22  ;;  %v590_v22 = vld [vmem:[%s10873_s17 + $0xdf0] sm:$0xff] }
 0x12d   : > { %v5197_v29 = vpop.f32.mrb[5].mxu0  ;;  %5478 = vmatmul.mubr.f32.gmra.mrb[110].mxu0 %v533_v23  ;;  %2869 = vmatprep.mubr.f32.mxu1 %v537_v24 }
 0x12e   : > { %5483 = vmatprep.mubr.f32.mxu0 %v541_v26  ;;  %v585_v26 = vld [vmem:[%s10873_s17 + $0xdc8] sm:$0xff] }
 0x12f   : > { %v11320_v33 = vpop.f32.mrb[6].mxu1  ;;  %v589_v29 = vld [vmem:[%s10873_s17 + $0xde8] sm:$0xff] }
 0x130   : > { %v11323_v35 = vpop.f32.mrb[6].mxu0  ;;  %v2588_v36 = vpop.f32.mrb[7].mxu1  ;;  %2870 = vmatmul.mubr.f32.gmra.mrb[112].mxu1 %v536_v30  ;;  %v1749_v30 = vld [vmem:[%s16195_s1 + $0x2e8] sm:$0xff] }
 0x131   : > { %v5202_v37 = vpop.f32.mrb[7].mxu0  ;;  %5484 = vmatmul.mubr.f32.gmra.mrb[112].mxu0 %v540_v31  ;;  %2875 = vmatprep.mubr.f32.mxu1 %v544_v32  ;;  %v1751_v31 = vld [vmem:[%s16195_s1 + $0x2f8] sm:$0xff]  ;;  %v593_v32 = vld [vmem:[%s10873_s17 + $0xe08] sm:$0xff]  ;;  %v1748_v36 = vld [vmem:[%s16195_s1 + $0x2e0] sm:$0xff] }
 0x132   : > { %5489 = vmatprep.mubr.f32.mxu0 %v548_v34  ;;  %v9366_v34 = vpack.c.bf16 %v1751_v31, %v1749_v30  ;;  %v1750_v37 = vld [vmem:[%s16195_s1 + $0x2f0] sm:$0xff]  ;;  %v620_v30 = vld [vmem:[%s10873_s17 + $0xee0] sm:$0xff] }
 0x133   : > { %v11328_v41 = vpop.f32.mrb[8].mxu1  ;;  %v624_v31 = vld [vmem:[%s10873_s17 + $0xf00] sm:$0xff] }
 0x134   : > { %v11331_v43 = vpop.f32.mrb[8].mxu0  ;;  %v2593_v44 = vpop.f32.mrb[9].mxu1  ;;  %2876 = vmatmul.mubr.f32.gmra.mrb[114].mxu1 %v543_v38  ;;  %9367 = vmatprep.subr.bf16.mxu1 %v9366_v34 }
 0x135   : > { %v5207_v45 = vpop.f32.mrb[9].mxu0  ;;  %5490 = vmatmul.mubr.f32.gmra.mrb[114].mxu0 %v547_v39  ;;  %2881 = vmatprep.mubr.f32.mxu1 %v551_v40  ;;  %v597_v39 = vld [vmem:[%s10873_s17 + $0xe28] sm:$0xff]  ;;  %v9368_v40 = vpack.c.bf16 %v1750_v37, %v1748_v36  ;;  %v632_v36 = vld [vmem:[%s10873_s17 + $0xf40] sm:$0xff] }
 0x136   : > { %5495 = vmatprep.mubr.f32.mxu0 %v555_v42 }
 0x137   : > { %v11336_v49 = vpop.f32.mrb[10].mxu1  ;;  %9369 = vmatpush1.bf16.msra.mxu1 %v9368_v40 }
 0x138   : > { %v11339_v51 = vpop.f32.mrb[10].mxu0  ;;  %v2598_v52 = vpop.f32.mrb[11].mxu1  ;;  %2882 = vmatmul.mubr.f32.gmra.mrb[116].mxu1 %v550_v46  ;;  %v592_v46 = vld [vmem:[%s10873_s17 + $0xe00] sm:$0xff] }
 0x139   : > { %v5212_v53 = vpop.f32.mrb[11].mxu0  ;;  %5496 = vmatmul.mubr.f32.gmra.mrb[116].mxu0 %v554_v47  ;;  %2887 = vmatprep.mubr.f32.mxu1 %v558_v48  ;;  %v596_v47 = vld [vmem:[%s10873_s17 + $0xe20] sm:$0xff] }
 0x13a   : > { %5501 = vmatprep.mubr.f32.mxu0 %v562_v50  ;;  %v600_v48 = vld [vmem:[%s10873_s17 + $0xe40] sm:$0xff] }
 0x13b   : > { %v11344_v57 = vpop.f32.mrb[12].mxu1  ;;  %v604_v52 = vld [vmem:[%s10873_s17 + $0xe60] sm:$0xff] }
 0x13c   : > { %v11347_v59 = vpop.f32.mrb[12].mxu0  ;;  %v2603_v60 = vpop.f32.mrb[13].mxu1  ;;  %2888 = vmatmul.mubr.f32.gmra.mrb[118].mxu1 %v557_v54 }
 0x13d   : > { %v5217_v61 = vpop.f32.mrb[13].mxu0  ;;  %5502 = vmatmul.mubr.f32.gmra.mrb[118].mxu0 %v561_v55  ;;  %2893 = vmatprep.mubr.f32.mxu1 %v565_v56  ;;  %v599_v56 = vld [vmem:[%s10873_s17 + $0xe38] sm:$0xff] }
 0x13e   : > { %5507 = vmatprep.mubr.f32.mxu0 %v569_v58  ;;  %v603_v58 = vld [vmem:[%s10873_s17 + $0xe58] sm:$0xff] }
 0x13f   : > { %v11352_v1 = vpop.f32.mrb[14].mxu1  ;;  %v607_v60 = vld [vmem:[%s10873_s17 + $0xe78] sm:$0xff] }
 0x140   : > { %v11355_v3 = vpop.f32.mrb[14].mxu0  ;;  %v2608_v4 = vpop.f32.mrb[15].mxu1  ;;  %2894 = vmatmul.mubr.f32.gmra.mrb[120].mxu1 %v564_v62  ;;  %v611_v62 = vld [vmem:[%s10873_s17 + $0xe98] sm:$0xff] }
 0x141   : > { %v5222_v5 = vpop.f32.mrb[15].mxu0  ;;  %5508 = vmatmul.mubr.f32.gmra.mrb[120].mxu0 %v568_v63  ;;  %2899 = vmatprep.mubr.f32.mxu1 %v572_v0  ;;  %v606_v4 = vld [vmem:[%s10873_s17 + $0xe70] sm:$0xff] }
 0x142   : > { %5513 = vmatprep.mubr.f32.mxu0 %v576_v2  ;;  %v610_v5 = vld [vmem:[%s10873_s17 + $0xe90] sm:$0xff] }
 0x143   : > { %v11360_v10 = vpop.f32.mrb[16].mxu1 }
 0x144   : > { %v11363_v13 = vpop.f32.mrb[16].mxu0  ;;  %v2613_v14 = vpop.f32.mrb[17].mxu1  ;;  %2900 = vmatmul.mubr.f32.gmra.mrb[122].mxu1 %v571_v6  ;;  %v614_v6 = vld [vmem:[%s10873_s17 + $0xeb0] sm:$0xff] }
 0x145   : > { %v5227_v15 = vpop.f32.mrb[17].mxu0  ;;  %5514 = vmatmul.mubr.f32.gmra.mrb[122].mxu0 %v575_v7  ;;  %2905 = vmatprep.mubr.f32.mxu1 %v579_v8  ;;  %v618_v8 = vld [vmem:[%s10873_s17 + $0xed0] sm:$0xff] }
 0x146   : > { %5519 = vmatprep.mubr.f32.mxu0 %v583_v12 }
 0x147   : > { %v11368_v21 = vpop.f32.mrb[18].mxu1 }
 0x148   : > { %v11371_v23 = vpop.f32.mrb[18].mxu0  ;;  %v2618_v24 = vpop.f32.mrb[19].mxu1  ;;  %2906 = vmatmul.mubr.f32.gmra.mrb[124].mxu1 %v578_v16  ;;  %v613_v16 = vld [vmem:[%s10873_s17 + $0xea8] sm:$0xff] }
 0x149   : > { %v5232_v28 = vpop.f32.mrb[19].mxu0  ;;  %5520 = vmatmul.mubr.f32.gmra.mrb[124].mxu0 %v582_v18  ;;  %2911 = vmatprep.mubr.f32.mxu1 %v586_v20  ;;  %v617_v18 = vld [vmem:[%s10873_s17 + $0xec8] sm:$0xff] }
 0x14a   : > { %5525 = vmatprep.mubr.f32.mxu0 %v590_v22  ;;  %v621_v20 = vld [vmem:[%s10873_s17 + $0xee8] sm:$0xff] }
 0x14b   : > { %v11388_v38 = vpop.f32.mrb[20].mxu1  ;;  %v625_v24 = vld [vmem:[%s10873_s17 + $0xf08] sm:$0xff] }
 0x14c   : > { %v11391_v42 = vpop.f32.mrb[20].mxu0  ;;  %v2623_v44 = vpop.f32.mrb[21].mxu1  ;;  %2912 = vmatmul.mubr.f32.gmra.mrb[126].mxu1 %v585_v26 }
 0x14d   : > { %v5237_v45 = vpop.f32.mrb[21].mxu0  ;;  %5526 = vmatmul.mubr.f32.gmra.mrb[126].mxu0 %v589_v29  ;;  %2917 = vmatprep.mubr.f32.mxu1 %v593_v32  ;;  %v628_v32 = vld [vmem:[%s10873_s17 + $0xf20] sm:$0xff]  ;;  %v627_v44 = vld [vmem:[%s10873_s17 + $0xf18] sm:$0xff] }
 0x14e   : > { %5531 = vmatprep.mubr.f32.mxu0 %v597_v39  ;;  %v631_v45 = vld [vmem:[%s10873_s17 + $0xf38] sm:$0xff] }
 0x14f   : > { %v11396_v50 = vpop.f32.mrb[22].mxu1 }
 0x150   : > { %v11399_v53 = vpop.f32.mrb[22].mxu0  ;;  %v2628_v54 = vpop.f32.mrb[23].mxu1  ;;  %2918 = vmatmul.mubr.f32.gmra.mrb[128].mxu1 %v592_v46  ;;  %v635_v46 = vld [vmem:[%s10873_s17 + $0xf58] sm:$0xff] }
 0x151   : > { %v5242_v55 = vpop.f32.mrb[23].mxu0  ;;  %5532 = vmatmul.mubr.f32.gmra.mrb[128].mxu0 %v596_v47  ;;  %2923 = vmatprep.mubr.f32.mxu1 %v600_v48  ;;  %v639_v48 = vld [vmem:[%s10873_s17 + $0xf78] sm:$0xff] }
 0x152   : > { %5537 = vmatprep.mubr.f32.mxu0 %v604_v52 }
 0x153   : > { %v11404_v61 = vpop.f32.mrb[24].mxu1 }
 0x154   : > { %v11407_v63 = vpop.f32.mrb[24].mxu0  ;;  %v2633_v0 = vpop.f32.mrb[25].mxu1  ;;  %2924 = vmatmul.mubr.f32.gmra.mrb[130].mxu1 %v599_v56  ;;  %v634_v56 = vld [vmem:[%s10873_s17 + $0xf50] sm:$0xff] }
 0x155   : > { %v5247_v2 = vpop.f32.mrb[25].mxu0  ;;  %5538 = vmatmul.mubr.f32.gmra.mrb[130].mxu0 %v603_v58  ;;  %2929 = vmatprep.mubr.f32.mxu1 %v607_v60  ;;  %v638_v58 = vld [vmem:[%s10873_s17 + $0xf70] sm:$0xff] }
 0x156   : > { %5543 = vmatprep.mubr.f32.mxu0 %v611_v62  ;;  %v642_v60 = vld [vmem:[%s10873_s17 + $0xf90] sm:$0xff] }
 0x157   : > { %v11412_v7 = vpop.f32.mrb[26].mxu1  ;;  %v646_v0 = vld [vmem:[%s10873_s17 + $0xfb0] sm:$0xff] }
 0x158   : > { %v11415_v12 = vpop.f32.mrb[26].mxu0  ;;  %v2638_v14 = vpop.f32.mrb[27].mxu1  ;;  %2930 = vmatmul.mubr.f32.gmra.mrb[132].mxu1 %v606_v4 }
 0x159   : > { %v5252_v15 = vpop.f32.mrb[27].mxu0  ;;  %5544 = vmatmul.mubr.f32.gmra.mrb[132].mxu0 %v610_v5  ;;  %2935 = vmatprep.mubr.f32.mxu1 %v614_v6  ;;  %v641_v6 = vld [vmem:[%s10873_s17 + $0xf88] sm:$0xff] }
 0x15a   : > { %5549 = vmatprep.mubr.f32.mxu0 %v618_v8  ;;  %v645_v8 = vld [vmem:[%s10873_s17 + $0xfa8] sm:$0xff] }
 0x15b   : > { %v11420_v22 = vpop.f32.mrb[28].mxu1  ;;  %v649_v14 = vld [vmem:[%s10873_s17 + $0xfc8] sm:$0xff] }
 0x15c   : > { %v11423_v26 = vpop.f32.mrb[28].mxu0  ;;  %v2643_v28 = vpop.f32.mrb[29].mxu1  ;;  %2936 = vmatmul.mubr.f32.gmra.mrb[134].mxu1 %v613_v16  ;;  %v653_v15 = vld [vmem:[%s10873_s17 + $0xfe8] sm:$0xff]  ;;  %v648_v16 = vld [vmem:[%s10873_s17 + $0xfc0] sm:$0xff] }
 0x15d   : > { %v5257_v29 = vpop.f32.mrb[29].mxu0  ;;  %5550 = vmatmul.mubr.f32.gmra.mrb[134].mxu0 %v617_v18  ;;  %2941 = vmatprep.mubr.f32.mxu1 %v621_v20  ;;  %v652_v18 = vld [vmem:[%s10873_s17 + $0xfe0] sm:$0xff]  ;;  %v655_v28 = vld [vmem:[%s10873_s17 + $0xff8] sm:$0xff] }
 0x15e   : > { %5555 = vmatprep.mubr.f32.mxu0 %v625_v24  ;;  %v656_v20 = vld [vmem:[%s10873_s17 + $0x1000] sm:$0xff]  ;;  %v659_v29 = vld [vmem:[%s10873_s17 + $0x1018] sm:$0xff] }
 0x15f   : > { %v11428_v34 = vpop.f32.mrb[30].mxu1  ;;  %v660_v24 = vld [vmem:[%s10873_s17 + $0x1020] sm:$0xff] }
 0x160   : > { %v11431_v37 = vpop.f32.mrb[30].mxu0  ;;  %v2648_v39 = vpop.f32.mrb[31].mxu1  ;;  %2942 = vmatmul.mubr.f32.gmra.mrb[136].mxu1 %v620_v30  ;;  %v663_v30 = vld [vmem:[%s10873_s17 + $0x1038] sm:$0xff] }
 0x161   : > { %v5262_v40 = vpop.f32.mrb[31].mxu0  ;;  %5556 = vmatmul.mubr.f32.gmra.mrb[136].mxu0 %v624_v31  ;;  %2947 = vmatprep.mubr.f32.mxu1 %v628_v32  ;;  %v667_v31 = vld [vmem:[%s10873_s17 + $0x1058] sm:$0xff]  ;;  %v662_v32 = vld [vmem:[%s10873_s17 + $0x1030] sm:$0xff] }
 0x162   : > { %5561 = vmatprep.mubr.f32.mxu0 %v632_v36  ;;  %v666_v36 = vld [vmem:[%s10873_s17 + $0x1050] sm:$0xff] }
 0x163   : > { %v11436_v47 = vpop.f32.mrb[32].mxu1  ;;  %v670_v39 = vld [vmem:[%s10873_s17 + $0x1070] sm:$0xff] }
 0x164   : > { %v11439_v52 = vpop.f32.mrb[32].mxu0  ;;  %v2653_v54 = vpop.f32.mrb[33].mxu1  ;;  %2948 = vmatmul.mubr.f32.gmra.mrb[138].mxu1 %v627_v44  ;;  %v674_v40 = vld [vmem:[%s10873_s17 + $0x1090] sm:$0xff]  ;;  %v669_v44 = vld [vmem:[%s10873_s17 + $0x1068] sm:$0xff] }
 0x165   : > { %v5267_v55 = vpop.f32.mrb[33].mxu0  ;;  %5562 = vmatmul.mubr.f32.gmra.mrb[138].mxu0 %v631_v45  ;;  %2953 = vmatprep.mubr.f32.mxu1 %v635_v46  ;;  %v673_v45 = vld [vmem:[%s10873_s17 + $0x1088] sm:$0xff]  ;;  %v676_v54 = vld [vmem:[%s10873_s17 + $0x10a0] sm:$0xff] }
 0x166   : > { %5567 = vmatprep.mubr.f32.mxu0 %v639_v48  ;;  %v677_v46 = vld [vmem:[%s10873_s17 + $0x10a8] sm:$0xff]  ;;  %v680_v55 = vld [vmem:[%s10873_s17 + $0x10c0] sm:$0xff] }
 0x167   : > { %v11444_v62 = vpop.f32.mrb[34].mxu1  ;;  %v681_v48 = vld [vmem:[%s10873_s17 + $0x10c8] sm:$0xff] }
 0x168   : > { %v11447_v2 = vpop.f32.mrb[34].mxu0  ;;  %v2658_v4 = vpop.f32.mrb[35].mxu1  ;;  %2954 = vmatmul.mubr.f32.gmra.mrb[140].mxu1 %v634_v56  ;;  %v684_v56 = vld [vmem:[%s10873_s17 + $0x10e0] sm:$0xff] }
 0x169   : > { %v5272_v5 = vpop.f32.mrb[35].mxu0  ;;  %5568 = vmatmul.mubr.f32.gmra.mrb[140].mxu0 %v638_v58  ;;  %2959 = vmatprep.mubr.f32.mxu1 %v642_v60  ;;  %v688_v58 = vld [vmem:[%s10873_s17 + $0x1100] sm:$0xff]  ;;  %v683_v60 = vld [vmem:[%s10873_s17 + $0x10d8] sm:$0xff] }
 0x16a   : > { %5573 = vmatprep.mubr.f32.mxu0 %v646_v0  ;;  %v687_v0 = vld [vmem:[%s10873_s17 + $0x10f8] sm:$0xff]  ;;  %v1753_v5 = vld [vmem:[%s16195_s1 + $0x308] sm:$0xff] }
 0x16b   : > { %v691_v4 = vld [vmem:[%s10873_s17 + $0x1118] sm:$0xff] }
 0x16c   : > { %2960 = vmatmul.mubr.f32.gmra.mrb[142].mxu1 %v641_v6  ;;  %v1755_v6 = vld [vmem:[%s16195_s1 + $0x318] sm:$0xff] }
 0x16d   : > { %5574 = vmatmul.mubr.f32.gmra.mrb[142].mxu0 %v645_v8  ;;  %2965 = vmatprep.mubr.f32.mxu1 %v649_v14  ;;  %v9370_v8 = vpack.c.bf16 %v1755_v6, %v1753_v5  ;;  %v1853_v14 = vld [vmem:[%s16195_s1 + $0x628] sm:$0xff]  ;;  %v723_v5 = vld [vmem:[%s10873_s17 + $0x1218] sm:$0xff]  ;;  %v718_v6 = vld [vmem:[%s10873_s17 + $0x11f0] sm:$0xff] }
 0x16e   : > { %5579 = vmatprep.mubr.f32.mxu0 %v653_v15  ;;  %v1855_v15 = vld [vmem:[%s16195_s1 + $0x638] sm:$0xff] }
 0x16f   : > { %9371 = vmatprep.subr.bf16.mxu1 %v9370_v8  ;;  %v722_v8 = vld [vmem:[%s10873_s17 + $0x1210] sm:$0xff] }
 0x170   : > { %2966 = vmatmul.mubr.f32.gmra.mrb[144].mxu1 %v648_v16  ;;  %v1752_v16 = vld [vmem:[%s16195_s1 + $0x300] sm:$0xff] }
 0x171   : > { %5580 = vmatmul.mubr.f32.gmra.mrb[144].mxu0 %v652_v18  ;;  %2971 = vmatprep.mubr.f32.mxu1 %v656_v20  ;;  %v9470_v18 = vpack.c.bf16 %v1855_v15, %v1853_v14  ;;  %v1754_v20 = vld [vmem:[%s16195_s1 + $0x310] sm:$0xff] }
 0x172   : > { %5585 = vmatprep.mubr.f32.mxu0 %v660_v24  ;;  %v1852_v24 = vld [vmem:[%s16195_s1 + $0x620] sm:$0xff]  ;;  %v726_v14 = vld [vmem:[%s10873_s17 + $0x1230] sm:$0xff] }
 0x173   : > { %9471 = vmatprep.subr.bf16.mxu0 %v9470_v18  ;;  %v730_v15 = vld [vmem:[%s10873_s17 + $0x1250] sm:$0xff]  ;;  %v729_v18 = vld [vmem:[%s10873_s17 + $0x1248] sm:$0xff] }
 0x174   : > { %2972 = vmatmul.mubr.f32.gmra.mrb[146].mxu1 %v655_v28  ;;  %v1854_v28 = vld [vmem:[%s16195_s1 + $0x630] sm:$0xff] }
 0x175   : > { %5586 = vmatmul.mubr.f32.gmra.mrb[146].mxu0 %v659_v29  ;;  %2977 = vmatprep.mubr.f32.mxu1 %v663_v30  ;;  %v695_v29 = vld [vmem:[%s10873_s17 + $0x1138] sm:$0xff]  ;;  %v9372_v30 = vpack.c.bf16 %v1754_v20, %v1752_v16  ;;  %v725_v16 = vld [vmem:[%s10873_s17 + $0x1228] sm:$0xff] }
 0x176   : > { %5591 = vmatprep.mubr.f32.mxu0 %v667_v31  ;;  %v9472_v31 = vpack.c.bf16 %v1854_v28, %v1852_v24  ;;  %v733_v20 = vld [vmem:[%s10873_s17 + $0x1268] sm:$0xff]  ;;  %v732_v28 = vld [vmem:[%s10873_s17 + $0x1260] sm:$0xff] }
 0x177   : > { %9373 = vmatpush1.bf16.msra.mxu1 %v9372_v30  ;;  %v737_v24 = vld [vmem:[%s10873_s17 + $0x1288] sm:$0xff]  ;;  %v740_v30 = vld [vmem:[%s10873_s17 + $0x12a0] sm:$0xff] }
 0x178   : > { %2978 = vmatmul.mubr.f32.gmra.mrb[148].mxu1 %v662_v32  ;;  %v690_v32 = vld [vmem:[%s10873_s17 + $0x1110] sm:$0xff]  ;;  %9473 = vmatpush1.bf16.msra.mxu0 %v9472_v31  ;;  %v744_v31 = vld [vmem:[%s10873_s17 + $0x12c0] sm:$0xff] }
 0x179   : > { %5592 = vmatmul.mubr.f32.gmra.mrb[148].mxu0 %v666_v36  ;;  %2983 = vmatprep.mubr.f32.mxu1 %v670_v39  ;;  %v694_v36 = vld [vmem:[%s10873_s17 + $0x1130] sm:$0xff] }
 0x17a   : > { %5597 = vmatprep.mubr.f32.mxu0 %v674_v40  ;;  %v698_v39 = vld [vmem:[%s10873_s17 + $0x1150] sm:$0xff] }
 0x17b   : > { %v702_v40 = vld [vmem:[%s10873_s17 + $0x1170] sm:$0xff] }
 0x17c   : > { %2984 = vmatmul.mubr.f32.gmra.mrb[150].mxu1 %v669_v44  ;;  %v697_v44 = vld [vmem:[%s10873_s17 + $0x1148] sm:$0xff] }
 0x17d   : > { %5598 = vmatmul.mubr.f32.gmra.mrb[150].mxu0 %v673_v45  ;;  %2989 = vmatprep.mubr.f32.mxu1 %v677_v46  ;;  %v701_v45 = vld [vmem:[%s10873_s17 + $0x1168] sm:$0xff] }
 0x17e   : > { %5603 = vmatprep.mubr.f32.mxu0 %v681_v48  ;;  %v705_v46 = vld [vmem:[%s10873_s17 + $0x1188] sm:$0xff] }
 0x17f   : > { %v709_v48 = vld [vmem:[%s10873_s17 + $0x11a8] sm:$0xff] }
 0x180   : > { %2990 = vmatmul.mubr.f32.gmra.mrb[152].mxu1 %v676_v54  ;;  %v704_v54 = vld [vmem:[%s10873_s17 + $0x1180] sm:$0xff] }
 0x181   : > { %5604 = vmatmul.mubr.f32.gmra.mrb[152].mxu0 %v680_v55  ;;  %2995 = vmatprep.mubr.f32.mxu1 %v684_v56  ;;  %v708_v55 = vld [vmem:[%s10873_s17 + $0x11a0] sm:$0xff] }
 0x182   : > { %5609 = vmatprep.mubr.f32.mxu0 %v688_v58  ;;  %v712_v56 = vld [vmem:[%s10873_s17 + $0x11c0] sm:$0xff] }
 0x183   : > { %v716_v58 = vld [vmem:[%s10873_s17 + $0x11e0] sm:$0xff] }
 0x184   : > { %2996 = vmatmul.mubr.f32.gmra.mrb[154].mxu1 %v683_v60  ;;  %v711_v60 = vld [vmem:[%s10873_s17 + $0x11b8] sm:$0xff] }
 0x185   : > { %5610 = vmatmul.mubr.f32.gmra.mrb[154].mxu0 %v687_v0  ;;  %3001 = vmatprep.mubr.f32.mxu1 %v691_v4  ;;  %v715_v0 = vld [vmem:[%s10873_s17 + $0x11d8] sm:$0xff] }
 0x186   : > { %5615 = vmatprep.mubr.f32.mxu0 %v695_v29  ;;  %v719_v4 = vld [vmem:[%s10873_s17 + $0x11f8] sm:$0xff]  ;;  %v736_v29 = vld [vmem:[%s10873_s17 + $0x1280] sm:$0xff] }
 0x188   : > { %3002 = vmatmul.mubr.f32.gmra.mrb[156].mxu1 %v690_v32  ;;  %v739_v32 = vld [vmem:[%s10873_s17 + $0x1298] sm:$0xff] }
 0x189   : > { %5616 = vmatmul.mubr.f32.gmra.mrb[156].mxu0 %v694_v36  ;;  %3007 = vmatprep.mubr.f32.mxu1 %v698_v39  ;;  %v743_v36 = vld [vmem:[%s10873_s17 + $0x12b8] sm:$0xff] }
 0x18a   : > { %5621 = vmatprep.mubr.f32.mxu0 %v702_v40  ;;  %v747_v39 = vld [vmem:[%s10873_s17 + $0x12d8] sm:$0xff] }
 0x18b   : > { %v751_v40 = vld [vmem:[%s10873_s17 + $0x12f8] sm:$0xff] }
 0x18c   : > { %3008 = vmatmul.mubr.f32.gmra.mrb[158].mxu1 %v697_v44  ;;  %v746_v44 = vld [vmem:[%s10873_s17 + $0x12d0] sm:$0xff] }
 0x18d   : > { %5622 = vmatmul.mubr.f32.gmra.mrb[158].mxu0 %v701_v45  ;;  %3013 = vmatprep.mubr.f32.mxu1 %v705_v46  ;;  %v750_v45 = vld [vmem:[%s10873_s17 + $0x12f0] sm:$0xff] }
 0x18e   : > { %5627 = vmatprep.mubr.f32.mxu0 %v709_v48  ;;  %v754_v46 = vld [vmem:[%s10873_s17 + $0x1310] sm:$0xff] }
 0x18f   : > { %v758_v48 = vld [vmem:[%s10873_s17 + $0x1330] sm:$0xff] }
 0x190   : > { %3014 = vmatmul.mubr.f32.gmra.mrb[160].mxu1 %v704_v54  ;;  %v753_v54 = vld [vmem:[%s10873_s17 + $0x1308] sm:$0xff] }
 0x191   : > { %5628 = vmatmul.mubr.f32.gmra.mrb[160].mxu0 %v708_v55  ;;  %3019 = vmatprep.mubr.f32.mxu1 %v712_v56  ;;  %v757_v55 = vld [vmem:[%s10873_s17 + $0x1328] sm:$0xff] }
 0x192   : > { %5633 = vmatprep.mubr.f32.mxu0 %v716_v58  ;;  %v761_v56 = vld [vmem:[%s10873_s17 + $0x1348] sm:$0xff] }
 0x193   : > { %v765_v58 = vld [vmem:[%s10873_s17 + $0x1368] sm:$0xff] }
 0x194   : > { %3020 = vmatmul.mubr.f32.gmra.mrb[162].mxu1 %v711_v60  ;;  %v760_v60 = vld [vmem:[%s10873_s17 + $0x1340] sm:$0xff] }
 0x195   : > { %5634 = vmatmul.mubr.f32.gmra.mrb[162].mxu0 %v715_v0  ;;  %3025 = vmatprep.mubr.f32.mxu1 %v719_v4  ;;  %v764_v0 = vld [vmem:[%s10873_s17 + $0x1360] sm:$0xff] }
 0x196   : > { %5639 = vmatprep.mubr.f32.mxu0 %v723_v5  ;;  %v768_v4 = vld [vmem:[%s10873_s17 + $0x1380] sm:$0xff] }
 0x197   : > { %v772_v5 = vld [vmem:[%s10873_s17 + $0x13a0] sm:$0xff] }
 0x198   : > { %3026 = vmatmul.mubr.f32.gmra.mrb[164].mxu1 %v718_v6  ;;  %v767_v6 = vld [vmem:[%s10873_s17 + $0x1378] sm:$0xff] }
 0x199   : > { %5640 = vmatmul.mubr.f32.gmra.mrb[164].mxu0 %v722_v8  ;;  %3031 = vmatprep.mubr.f32.mxu1 %v726_v14  ;;  %v771_v8 = vld [vmem:[%s10873_s17 + $0x1398] sm:$0xff] }
 0x19a   : > { %5645 = vmatprep.mubr.f32.mxu0 %v730_v15  ;;  %v775_v14 = vld [vmem:[%s10873_s17 + $0x13b8] sm:$0xff] }
 0x19b   : > { %v779_v15 = vld [vmem:[%s10873_s17 + $0x13d8] sm:$0xff] }
 0x19c   : > { %3032 = vmatmul.mubr.f32.gmra.mrb[166].mxu1 %v725_v16  ;;  %v774_v16 = vld [vmem:[%s10873_s17 + $0x13b0] sm:$0xff] }
 0x19d   : > { %5646 = vmatmul.mubr.f32.gmra.mrb[166].mxu0 %v729_v18  ;;  %3037 = vmatprep.mubr.f32.mxu1 %v733_v20  ;;  %v778_v18 = vld [vmem:[%s10873_s17 + $0x13d0] sm:$0xff]  ;;  %v1757_v20 = vld [vmem:[%s16195_s1 + $0x328] sm:$0xff] }
 0x19e   : > { %5651 = vmatprep.mubr.f32.mxu0 %v737_v24  ;;  %v1759_v24 = vld [vmem:[%s16195_s1 + $0x338] sm:$0xff] }
 0x1a0   : > { %3038 = vmatmul.mubr.f32.gmra.mrb[168].mxu1 %v732_v28  ;;  %v782_v28 = vld [vmem:[%s10873_s17 + $0x13f0] sm:$0xff] }
 0x1a1   : > { %5652 = vmatmul.mubr.f32.gmra.mrb[168].mxu0 %v736_v29  ;;  %3043 = vmatprep.mubr.f32.mxu1 %v740_v30  ;;  %v9374_v29 = vpack.c.bf16 %v1759_v24, %v1757_v20  ;;  %v1756_v30 = vld [vmem:[%s16195_s1 + $0x320] sm:$0xff] }
 0x1a2   : > { %5657 = vmatprep.mubr.f32.mxu0 %v744_v31  ;;  %v1758_v31 = vld [vmem:[%s16195_s1 + $0x330] sm:$0xff]  ;;  %v816_v20 = vld [vmem:[%s10873_s17 + $0x1500] sm:$0xff] }
 0x1a3   : > { %9375 = vmatprep.subr.bf16.mxu1 %v9374_v29  ;;  %v820_v24 = vld [vmem:[%s10873_s17 + $0x1520] sm:$0xff] }
 0x1a4   : > { %3044 = vmatmul.mubr.f32.gmra.mrb[170].mxu1 %v739_v32  ;;  %v786_v32 = vld [vmem:[%s10873_s17 + $0x1410] sm:$0xff]  ;;  %v828_v29 = vld [vmem:[%s10873_s17 + $0x1560] sm:$0xff] }
 0x1a5   : > { %5658 = vmatmul.mubr.f32.gmra.mrb[170].mxu0 %v743_v36  ;;  %3049 = vmatprep.mubr.f32.mxu1 %v747_v39  ;;  %v9376_v36 = vpack.c.bf16 %v1758_v31, %v1756_v30  ;;  %v781_v39 = vld [vmem:[%s10873_s17 + $0x13e8] sm:$0xff]  ;;  %v823_v30 = vld [vmem:[%s10873_s17 + $0x1538] sm:$0xff] }
 0x1a6   : > { %5663 = vmatprep.mubr.f32.mxu0 %v751_v40  ;;  %v785_v40 = vld [vmem:[%s10873_s17 + $0x1408] sm:$0xff]  ;;  %v827_v31 = vld [vmem:[%s10873_s17 + $0x1558] sm:$0xff] }
 0x1a7   : > { %9377 = vmatpush1.bf16.msra.mxu1 %v9376_v36  ;;  %v835_v36 = vld [vmem:[%s10873_s17 + $0x1598] sm:$0xff] }
 0x1a8   : > { %3050 = vmatmul.mubr.f32.gmra.mrb[172].mxu1 %v746_v44  ;;  %v789_v44 = vld [vmem:[%s10873_s17 + $0x1428] sm:$0xff] }
 0x1a9   : > { %5664 = vmatmul.mubr.f32.gmra.mrb[172].mxu0 %v750_v45  ;;  %3055 = vmatprep.mubr.f32.mxu1 %v754_v46  ;;  %v793_v45 = vld [vmem:[%s10873_s17 + $0x1448] sm:$0xff]  ;;  %v788_v46 = vld [vmem:[%s10873_s17 + $0x1420] sm:$0xff] }
 0x1aa   : > { %5669 = vmatprep.mubr.f32.mxu0 %v758_v48  ;;  %v792_v48 = vld [vmem:[%s10873_s17 + $0x1440] sm:$0xff] }
 0x1ac   : > { %3056 = vmatmul.mubr.f32.gmra.mrb[174].mxu1 %v753_v54  ;;  %v796_v54 = vld [vmem:[%s10873_s17 + $0x1460] sm:$0xff] }
 0x1ad   : > { %5670 = vmatmul.mubr.f32.gmra.mrb[174].mxu0 %v757_v55  ;;  %3061 = vmatprep.mubr.f32.mxu1 %v761_v56  ;;  %v800_v55 = vld [vmem:[%s10873_s17 + $0x1480] sm:$0xff]  ;;  %v795_v56 = vld [vmem:[%s10873_s17 + $0x1458] sm:$0xff] }
 0x1ae   : > { %5675 = vmatprep.mubr.f32.mxu0 %v765_v58  ;;  %v799_v58 = vld [vmem:[%s10873_s17 + $0x1478] sm:$0xff] }
 0x1b0   : > { %3062 = vmatmul.mubr.f32.gmra.mrb[176].mxu1 %v760_v60  ;;  %v803_v60 = vld [vmem:[%s10873_s17 + $0x1498] sm:$0xff] }
 0x1b1   : > { %5676 = vmatmul.mubr.f32.gmra.mrb[176].mxu0 %v764_v0  ;;  %3067 = vmatprep.mubr.f32.mxu1 %v768_v4  ;;  %v807_v0 = vld [vmem:[%s10873_s17 + $0x14b8] sm:$0xff]  ;;  %v802_v4 = vld [vmem:[%s10873_s17 + $0x1490] sm:$0xff] }
 0x1b2   : > { %5681 = vmatprep.mubr.f32.mxu0 %v772_v5  ;;  %v806_v5 = vld [vmem:[%s10873_s17 + $0x14b0] sm:$0xff] }
 0x1b4   : > { %3068 = vmatmul.mubr.f32.gmra.mrb[178].mxu1 %v767_v6  ;;  %v810_v6 = vld [vmem:[%s10873_s17 + $0x14d0] sm:$0xff] }
 0x1b5   : > { %5682 = vmatmul.mubr.f32.gmra.mrb[178].mxu0 %v771_v8  ;;  %3073 = vmatprep.mubr.f32.mxu1 %v775_v14  ;;  %v814_v8 = vld [vmem:[%s10873_s17 + $0x14f0] sm:$0xff]  ;;  %v809_v14 = vld [vmem:[%s10873_s17 + $0x14c8] sm:$0xff] }
 0x1b6   : > { %5687 = vmatprep.mubr.f32.mxu0 %v779_v15  ;;  %v813_v15 = vld [vmem:[%s10873_s17 + $0x14e8] sm:$0xff] }
 0x1b8   : > { %3074 = vmatmul.mubr.f32.gmra.mrb[180].mxu1 %v774_v16  ;;  %v817_v16 = vld [vmem:[%s10873_s17 + $0x1508] sm:$0xff] }
 0x1b9   : > { %5688 = vmatmul.mubr.f32.gmra.mrb[180].mxu0 %v778_v18  ;;  %3079 = vmatprep.mubr.f32.mxu1 %v782_v28  ;;  %v821_v18 = vld [vmem:[%s10873_s17 + $0x1528] sm:$0xff]  ;;  %v824_v28 = vld [vmem:[%s10873_s17 + $0x1540] sm:$0xff] }
 0x1ba   : > { %5693 = vmatprep.mubr.f32.mxu0 %v786_v32  ;;  %v831_v32 = vld [vmem:[%s10873_s17 + $0x1578] sm:$0xff] }
 0x1bc   : > { %3080 = vmatmul.mubr.f32.gmra.mrb[182].mxu1 %v781_v39  ;;  %v830_v39 = vld [vmem:[%s10873_s17 + $0x1570] sm:$0xff] }
 0x1bd   : > { %5694 = vmatmul.mubr.f32.gmra.mrb[182].mxu0 %v785_v40  ;;  %3085 = vmatprep.mubr.f32.mxu1 %v789_v44  ;;  %v834_v40 = vld [vmem:[%s10873_s17 + $0x1590] sm:$0xff] }
 0x1be   : > { %5699 = vmatprep.mubr.f32.mxu0 %v793_v45  ;;  %v838_v44 = vld [vmem:[%s10873_s17 + $0x15b0] sm:$0xff] }
 0x1bf   : > { %v842_v45 = vld [vmem:[%s10873_s17 + $0x15d0] sm:$0xff] }
 0x1c0   : > { %3086 = vmatmul.mubr.f32.gmra.mrb[184].mxu1 %v788_v46  ;;  %v837_v46 = vld [vmem:[%s10873_s17 + $0x15a8] sm:$0xff] }
 0x1c1   : > { %5700 = vmatmul.mubr.f32.gmra.mrb[184].mxu0 %v792_v48  ;;  %3091 = vmatprep.mubr.f32.mxu1 %v796_v54  ;;  %v841_v48 = vld [vmem:[%s10873_s17 + $0x15c8] sm:$0xff] }
 0x1c2   : > { %5705 = vmatprep.mubr.f32.mxu0 %v800_v55  ;;  %v845_v54 = vld [vmem:[%s10873_s17 + $0x15e8] sm:$0xff] }
 0x1c3   : > { %v849_v55 = vld [vmem:[%s10873_s17 + $0x1608] sm:$0xff] }
 0x1c4   : > { %3092 = vmatmul.mubr.f32.gmra.mrb[186].mxu1 %v795_v56  ;;  %v844_v56 = vld [vmem:[%s10873_s17 + $0x15e0] sm:$0xff] }
 0x1c5   : > { %5706 = vmatmul.mubr.f32.gmra.mrb[186].mxu0 %v799_v58  ;;  %3097 = vmatprep.mubr.f32.mxu1 %v803_v60  ;;  %v848_v58 = vld [vmem:[%s10873_s17 + $0x1600] sm:$0xff] }
 0x1c6   : > { %5711 = vmatprep.mubr.f32.mxu0 %v807_v0  ;;  %v852_v60 = vld [vmem:[%s10873_s17 + $0x1620] sm:$0xff] }
 0x1c7   : > { %v856_v0 = vld [vmem:[%s10873_s17 + $0x1640] sm:$0xff] }
 0x1c8   : > { %3098 = vmatmul.mubr.f32.gmra.mrb[188].mxu1 %v802_v4  ;;  %v851_v4 = vld [vmem:[%s10873_s17 + $0x1618] sm:$0xff] }
 0x1c9   : > { %5712 = vmatmul.mubr.f32.gmra.mrb[188].mxu0 %v806_v5  ;;  %3103 = vmatprep.mubr.f32.mxu1 %v810_v6  ;;  %v855_v5 = vld [vmem:[%s10873_s17 + $0x1638] sm:$0xff] }
 0x1ca   : > { %5717 = vmatprep.mubr.f32.mxu0 %v814_v8  ;;  %v859_v6 = vld [vmem:[%s10873_s17 + $0x1658] sm:$0xff] }
 0x1cb   : > { %v863_v8 = vld [vmem:[%s10873_s17 + $0x1678] sm:$0xff] }
 0x1cc   : > { %3104 = vmatmul.mubr.f32.gmra.mrb[190].mxu1 %v809_v14  ;;  %v858_v14 = vld [vmem:[%s10873_s17 + $0x1650] sm:$0xff] }
 0x1cd   : > { %5718 = vmatmul.mubr.f32.gmra.mrb[190].mxu0 %v813_v15  ;;  %3109 = vmatprep.mubr.f32.mxu1 %v817_v16  ;;  %v862_v15 = vld [vmem:[%s10873_s17 + $0x1670] sm:$0xff] }
 0x1ce   : > { %5723 = vmatprep.mubr.f32.mxu0 %v821_v18  ;;  %v866_v16 = vld [vmem:[%s10873_s17 + $0x1690] sm:$0xff] }
 0x1cf   : > { %v870_v18 = vld [vmem:[%s10873_s17 + $0x16b0] sm:$0xff] }
 0x1d0   : > { %3110 = vmatmul.mubr.f32.gmra.mrb[192].mxu1 %v816_v20  ;;  %v865_v20 = vld [vmem:[%s10873_s17 + $0x1688] sm:$0xff] }
 0x1d1   : > { %5724 = vmatmul.mubr.f32.gmra.mrb[192].mxu0 %v820_v24  ;;  %3115 = vmatprep.mubr.f32.mxu1 %v824_v28  ;;  %v869_v24 = vld [vmem:[%s10873_s17 + $0x16a8] sm:$0xff] }
 0x1d2   : > { %5729 = vmatprep.mubr.f32.mxu0 %v828_v29  ;;  %v873_v28 = vld [vmem:[%s10873_s17 + $0x16c8] sm:$0xff] }
 0x1d3   : > { %v877_v29 = vld [vmem:[%s10873_s17 + $0x16e8] sm:$0xff] }
 0x1d4   : > { %3116 = vmatmul.mubr.f32.gmra.mrb[194].mxu1 %v823_v30  ;;  %v1761_v30 = vld [vmem:[%s16195_s1 + $0x348] sm:$0xff] }
 0x1d5   : > { %5730 = vmatmul.mubr.f32.gmra.mrb[194].mxu0 %v827_v31  ;;  %3121 = vmatprep.mubr.f32.mxu1 %v831_v32  ;;  %v1763_v31 = vld [vmem:[%s16195_s1 + $0x358] sm:$0xff]  ;;  %v872_v32 = vld [vmem:[%s10873_s17 + $0x16c0] sm:$0xff] }
 0x1d6   : > { %5735 = vmatprep.mubr.f32.mxu0 %v835_v36  ;;  %v9378_v36 = vpack.c.bf16 %v1763_v31, %v1761_v30  ;;  %v915_v30 = vld [vmem:[%s10873_s17 + $0x1818] sm:$0xff] }
 0x1d7   : > { %v919_v31 = vld [vmem:[%s10873_s17 + $0x1838] sm:$0xff] }
 0x1d8   : > { %3122 = vmatmul.mubr.f32.gmra.mrb[196].mxu1 %v830_v39  ;;  %v1760_v39 = vld [vmem:[%s16195_s1 + $0x340] sm:$0xff]  ;;  %9379 = vmatprep.subr.bf16.mxu1 %v9378_v36  ;;  %v918_v36 = vld [vmem:[%s10873_s17 + $0x1830] sm:$0xff] }
 0x1d9   : > { %5736 = vmatmul.mubr.f32.gmra.mrb[196].mxu0 %v834_v40  ;;  %3127 = vmatprep.mubr.f32.mxu1 %v838_v44  ;;  %v1762_v40 = vld [vmem:[%s16195_s1 + $0x350] sm:$0xff]  ;;  %v876_v44 = vld [vmem:[%s10873_s17 + $0x16e0] sm:$0xff] }
 0x1da   : > { %5741 = vmatprep.mubr.f32.mxu0 %v842_v45  ;;  %v880_v45 = vld [vmem:[%s10873_s17 + $0x1700] sm:$0xff] }
 0x1dc   : > { %3128 = vmatmul.mubr.f32.gmra.mrb[198].mxu1 %v837_v46  ;;  %v9380_v46 = vpack.c.bf16 %v1762_v40, %v1760_v39  ;;  %v922_v39 = vld [vmem:[%s10873_s17 + $0x1850] sm:$0xff] }
 0x1dd   : > { %5742 = vmatmul.mubr.f32.gmra.mrb[198].mxu0 %v841_v48  ;;  %3133 = vmatprep.mubr.f32.mxu1 %v845_v54  ;;  %v884_v48 = vld [vmem:[%s10873_s17 + $0x1720] sm:$0xff]  ;;  %v879_v54 = vld [vmem:[%s10873_s17 + $0x16f8] sm:$0xff]  ;;  %v926_v40 = vld [vmem:[%s10873_s17 + $0x1870] sm:$0xff] }
 0x1de   : > { %5747 = vmatprep.mubr.f32.mxu0 %v849_v55  ;;  %v883_v55 = vld [vmem:[%s10873_s17 + $0x1718] sm:$0xff]  ;;  %9381 = vmatpush1.bf16.msra.mxu1 %v9380_v46  ;;  %v929_v46 = vld [vmem:[%s10873_s17 + $0x1888] sm:$0xff] }
 0x1e0   : > { %3134 = vmatmul.mubr.f32.gmra.mrb[200].mxu1 %v844_v56  ;;  %v887_v56 = vld [vmem:[%s10873_s17 + $0x1738] sm:$0xff] }
 0x1e1   : > { %5748 = vmatmul.mubr.f32.gmra.mrb[200].mxu0 %v848_v58  ;;  %3139 = vmatprep.mubr.f32.mxu1 %v852_v60  ;;  %v891_v58 = vld [vmem:[%s10873_s17 + $0x1758] sm:$0xff]  ;;  %v886_v60 = vld [vmem:[%s10873_s17 + $0x1730] sm:$0xff] }
 0x1e2   : > { %5753 = vmatprep.mubr.f32.mxu0 %v856_v0  ;;  %v890_v0 = vld [vmem:[%s10873_s17 + $0x1750] sm:$0xff] }
 0x1e4   : > { %3140 = vmatmul.mubr.f32.gmra.mrb[202].mxu1 %v851_v4  ;;  %v894_v4 = vld [vmem:[%s10873_s17 + $0x1770] sm:$0xff] }
 0x1e5   : > { %5754 = vmatmul.mubr.f32.gmra.mrb[202].mxu0 %v855_v5  ;;  %3145 = vmatprep.mubr.f32.mxu1 %v859_v6  ;;  %v898_v5 = vld [vmem:[%s10873_s17 + $0x1790] sm:$0xff]  ;;  %v893_v6 = vld [vmem:[%s10873_s17 + $0x1768] sm:$0xff] }
 0x1e6   : > { %5759 = vmatprep.mubr.f32.mxu0 %v863_v8  ;;  %v897_v8 = vld [vmem:[%s10873_s17 + $0x1788] sm:$0xff] }
 0x1e8   : > { %3146 = vmatmul.mubr.f32.gmra.mrb[204].mxu1 %v858_v14  ;;  %v901_v14 = vld [vmem:[%s10873_s17 + $0x17a8] sm:$0xff] }
 0x1e9   : > { %5760 = vmatmul.mubr.f32.gmra.mrb[204].mxu0 %v862_v15  ;;  %3151 = vmatprep.mubr.f32.mxu1 %v866_v16  ;;  %v905_v15 = vld [vmem:[%s10873_s17 + $0x17c8] sm:$0xff]  ;;  %v900_v16 = vld [vmem:[%s10873_s17 + $0x17a0] sm:$0xff] }
 0x1ea   : > { %5765 = vmatprep.mubr.f32.mxu0 %v870_v18  ;;  %v904_v18 = vld [vmem:[%s10873_s17 + $0x17c0] sm:$0xff] }
 0x1ec   : > { %3152 = vmatmul.mubr.f32.gmra.mrb[206].mxu1 %v865_v20  ;;  %v908_v20 = vld [vmem:[%s10873_s17 + $0x17e0] sm:$0xff] }
 0x1ed   : > { %5766 = vmatmul.mubr.f32.gmra.mrb[206].mxu0 %v869_v24  ;;  %3157 = vmatprep.mubr.f32.mxu1 %v873_v28  ;;  %v912_v24 = vld [vmem:[%s10873_s17 + $0x1800] sm:$0xff]  ;;  %v907_v28 = vld [vmem:[%s10873_s17 + $0x17d8] sm:$0xff] }
 0x1ee   : > { %5771 = vmatprep.mubr.f32.mxu0 %v877_v29  ;;  %v911_v29 = vld [vmem:[%s10873_s17 + $0x17f8] sm:$0xff] }
 0x1f0   : > { %3158 = vmatmul.mubr.f32.gmra.mrb[208].mxu1 %v872_v32  ;;  %v914_v32 = vld [vmem:[%s10873_s17 + $0x1810] sm:$0xff] }
 0x1f1   : > { %5772 = vmatmul.mubr.f32.gmra.mrb[208].mxu0 %v876_v44  ;;  %3163 = vmatprep.mubr.f32.mxu1 %v880_v45  ;;  %v921_v44 = vld [vmem:[%s10873_s17 + $0x1848] sm:$0xff] }
 0x1f2   : > { %5777 = vmatprep.mubr.f32.mxu0 %v884_v48  ;;  %v925_v45 = vld [vmem:[%s10873_s17 + $0x1868] sm:$0xff] }
 0x1f3   : > { %v933_v48 = vld [vmem:[%s10873_s17 + $0x18a8] sm:$0xff] }
 0x1f4   : > { %3164 = vmatmul.mubr.f32.gmra.mrb[210].mxu1 %v879_v54  ;;  %v928_v54 = vld [vmem:[%s10873_s17 + $0x1880] sm:$0xff] }
 0x1f5   : > { %5778 = vmatmul.mubr.f32.gmra.mrb[210].mxu0 %v883_v55  ;;  %3169 = vmatprep.mubr.f32.mxu1 %v887_v56  ;;  %v932_v55 = vld [vmem:[%s10873_s17 + $0x18a0] sm:$0xff] }
 0x1f6   : > { %5783 = vmatprep.mubr.f32.mxu0 %v891_v58  ;;  %v936_v56 = vld [vmem:[%s10873_s17 + $0x18c0] sm:$0xff] }
 0x1f7   : > { %v940_v58 = vld [vmem:[%s10873_s17 + $0x18e0] sm:$0xff] }
 0x1f8   : > { %3170 = vmatmul.mubr.f32.gmra.mrb[212].mxu1 %v886_v60  ;;  %v935_v60 = vld [vmem:[%s10873_s17 + $0x18b8] sm:$0xff] }
 0x1f9   : > { %5784 = vmatmul.mubr.f32.gmra.mrb[212].mxu0 %v890_v0  ;;  %3175 = vmatprep.mubr.f32.mxu1 %v894_v4  ;;  %v939_v0 = vld [vmem:[%s10873_s17 + $0x18d8] sm:$0xff] }
 0x1fa   : > { %5789 = vmatprep.mubr.f32.mxu0 %v898_v5  ;;  %v943_v4 = vld [vmem:[%s10873_s17 + $0x18f8] sm:$0xff] }
 0x1fb   : > { %v947_v5 = vld [vmem:[%s10873_s17 + $0x1918] sm:$0xff] }
 0x1fc   : > { %3176 = vmatmul.mubr.f32.gmra.mrb[214].mxu1 %v893_v6  ;;  %v942_v6 = vld [vmem:[%s10873_s17 + $0x18f0] sm:$0xff] }
 0x1fd   : > { %5790 = vmatmul.mubr.f32.gmra.mrb[214].mxu0 %v897_v8  ;;  %3181 = vmatprep.mubr.f32.mxu1 %v901_v14  ;;  %v946_v8 = vld [vmem:[%s10873_s17 + $0x1910] sm:$0xff] }
 0x1fe   : > { %5795 = vmatprep.mubr.f32.mxu0 %v905_v15  ;;  %v950_v14 = vld [vmem:[%s10873_s17 + $0x1930] sm:$0xff] }
 0x1ff   : > { %v954_v15 = vld [vmem:[%s10873_s17 + $0x1950] sm:$0xff] }
 0x200   : > { %3182 = vmatmul.mubr.f32.gmra.mrb[216].mxu1 %v900_v16  ;;  %v949_v16 = vld [vmem:[%s10873_s17 + $0x1928] sm:$0xff] }
 0x201   : > { %5796 = vmatmul.mubr.f32.gmra.mrb[216].mxu0 %v904_v18  ;;  %3187 = vmatprep.mubr.f32.mxu1 %v908_v20  ;;  %v953_v18 = vld [vmem:[%s10873_s17 + $0x1948] sm:$0xff] }
 0x202   : > { %5801 = vmatprep.mubr.f32.mxu0 %v912_v24  ;;  %v957_v20 = vld [vmem:[%s10873_s17 + $0x1968] sm:$0xff] }
 0x203   : > { %v961_v24 = vld [vmem:[%s10873_s17 + $0x1988] sm:$0xff] }
 0x204   : > { %3188 = vmatmul.mubr.f32.gmra.mrb[218].mxu1 %v907_v28  ;;  %v956_v28 = vld [vmem:[%s10873_s17 + $0x1960] sm:$0xff] }
 0x205   : > { %5802 = vmatmul.mubr.f32.gmra.mrb[218].mxu0 %v911_v29  ;;  %3193 = vmatprep.mubr.f32.mxu1 %v915_v30  ;;  %v960_v29 = vld [vmem:[%s10873_s17 + $0x1980] sm:$0xff] }
 0x206   : > { %5807 = vmatprep.mubr.f32.mxu0 %v919_v31  ;;  %v964_v30 = vld [vmem:[%s10873_s17 + $0x19a0] sm:$0xff] }
 0x207   : > { %v968_v31 = vld [vmem:[%s10873_s17 + $0x19c0] sm:$0xff] }
 0x208   : > { %3194 = vmatmul.mubr.f32.gmra.mrb[220].mxu1 %v914_v32  ;;  %v963_v32 = vld [vmem:[%s10873_s17 + $0x1998] sm:$0xff] }
 0x209   : > { %5808 = vmatmul.mubr.f32.gmra.mrb[220].mxu0 %v918_v36  ;;  %3199 = vmatprep.mubr.f32.mxu1 %v922_v39  ;;  %v1765_v36 = vld [vmem:[%s16195_s1 + $0x368] sm:$0xff]  ;;  %v1767_v39 = vld [vmem:[%s16195_s1 + $0x378] sm:$0xff] }
 0x20a   : > { %5813 = vmatprep.mubr.f32.mxu0 %v926_v40  ;;  %v967_v40 = vld [vmem:[%s10873_s17 + $0x19b8] sm:$0xff] }
 0x20c   : > { %3200 = vmatmul.mubr.f32.gmra.mrb[222].mxu1 %v921_v44  ;;  %v971_v44 = vld [vmem:[%s10873_s17 + $0x19d8] sm:$0xff] }
 0x20d   : > { %5814 = vmatmul.mubr.f32.gmra.mrb[222].mxu0 %v925_v45  ;;  %3205 = vmatprep.mubr.f32.mxu1 %v929_v46  ;;  %v9382_v45 = vpack.c.bf16 %v1767_v39, %v1765_v36  ;;  %v975_v46 = vld [vmem:[%s10873_s17 + $0x19f8] sm:$0xff]  ;;  %v1010_v36 = vld [vmem:[%s10873_s17 + $0x1b10] sm:$0xff]  ;;  %v1005_v39 = vld [vmem:[%s10873_s17 + $0x1ae8] sm:$0xff] }
 0x20e   : > { %5819 = vmatprep.mubr.f32.mxu0 %v933_v48  ;;  %v1764_v48 = vld [vmem:[%s16195_s1 + $0x360] sm:$0xff] }
 0x20f   : > { %9383 = vmatprep.subr.bf16.mxu1 %v9382_v45  ;;  %v1017_v45 = vld [vmem:[%s10873_s17 + $0x1b48] sm:$0xff] }
 0x210   : > { %3206 = vmatmul.mubr.f32.gmra.mrb[224].mxu1 %v928_v54  ;;  %v1766_v54 = vld [vmem:[%s16195_s1 + $0x370] sm:$0xff] }
 0x211   : > { %5820 = vmatmul.mubr.f32.gmra.mrb[224].mxu0 %v932_v55  ;;  %3211 = vmatprep.mubr.f32.mxu1 %v936_v56  ;;  %v9384_v55 = vpack.c.bf16 %v1766_v54, %v1764_v48  ;;  %v970_v56 = vld [vmem:[%s10873_s17 + $0x19d0] sm:$0xff]  ;;  %v1016_v48 = vld [vmem:[%s10873_s17 + $0x1b40] sm:$0xff] }
 0x212   : > { %5825 = vmatprep.mubr.f32.mxu0 %v940_v58  ;;  %v974_v58 = vld [vmem:[%s10873_s17 + $0x19f0] sm:$0xff]  ;;  %v1020_v54 = vld [vmem:[%s10873_s17 + $0x1b60] sm:$0xff] }
 0x213   : > { %9385 = vmatpush1.bf16.msra.mxu1 %v9384_v55  ;;  %v1024_v55 = vld [vmem:[%s10873_s17 + $0x1b80] sm:$0xff] }
 0x214   : > { %3212 = vmatmul.mubr.f32.gmra.mrb[226].mxu1 %v935_v60  ;;  %v978_v60 = vld [vmem:[%s10873_s17 + $0x1a10] sm:$0xff] }
 0x215   : > { %5826 = vmatmul.mubr.f32.gmra.mrb[226].mxu0 %v939_v0  ;;  %3217 = vmatprep.mubr.f32.mxu1 %v943_v4  ;;  %v982_v0 = vld [vmem:[%s10873_s17 + $0x1a30] sm:$0xff]  ;;  %v977_v4 = vld [vmem:[%s10873_s17 + $0x1a08] sm:$0xff] }
 0x216   : > { %5831 = vmatprep.mubr.f32.mxu0 %v947_v5  ;;  %v981_v5 = vld [vmem:[%s10873_s17 + $0x1a28] sm:$0xff] }
 0x218   : > { %3218 = vmatmul.mubr.f32.gmra.mrb[228].mxu1 %v942_v6  ;;  %v985_v6 = vld [vmem:[%s10873_s17 + $0x1a48] sm:$0xff] }
 0x219   : > { %5832 = vmatmul.mubr.f32.gmra.mrb[228].mxu0 %v946_v8  ;;  %3223 = vmatprep.mubr.f32.mxu1 %v950_v14  ;;  %v989_v8 = vld [vmem:[%s10873_s17 + $0x1a68] sm:$0xff]  ;;  %v984_v14 = vld [vmem:[%s10873_s17 + $0x1a40] sm:$0xff] }
 0x21a   : > { %5837 = vmatprep.mubr.f32.mxu0 %v954_v15  ;;  %v988_v15 = vld [vmem:[%s10873_s17 + $0x1a60] sm:$0xff] }
 0x21c   : > { %3224 = vmatmul.mubr.f32.gmra.mrb[230].mxu1 %v949_v16  ;;  %v992_v16 = vld [vmem:[%s10873_s17 + $0x1a80] sm:$0xff] }
 0x21d   : > { %5838 = vmatmul.mubr.f32.gmra.mrb[230].mxu0 %v953_v18  ;;  %3229 = vmatprep.mubr.f32.mxu1 %v957_v20  ;;  %v996_v18 = vld [vmem:[%s10873_s17 + $0x1aa0] sm:$0xff]  ;;  %v991_v20 = vld [vmem:[%s10873_s17 + $0x1a78] sm:$0xff] }
 0x21e   : > { %5843 = vmatprep.mubr.f32.mxu0 %v961_v24  ;;  %v995_v24 = vld [vmem:[%s10873_s17 + $0x1a98] sm:$0xff] }
 0x220   : > { %3230 = vmatmul.mubr.f32.gmra.mrb[232].mxu1 %v956_v28  ;;  %v999_v28 = vld [vmem:[%s10873_s17 + $0x1ab8] sm:$0xff] }
 0x221   : > { %5844 = vmatmul.mubr.f32.gmra.mrb[232].mxu0 %v960_v29  ;;  %3235 = vmatprep.mubr.f32.mxu1 %v964_v30  ;;  %v1003_v29 = vld [vmem:[%s10873_s17 + $0x1ad8] sm:$0xff]  ;;  %v998_v30 = vld [vmem:[%s10873_s17 + $0x1ab0] sm:$0xff] }
 0x222   : > { %5849 = vmatprep.mubr.f32.mxu0 %v968_v31  ;;  %v1002_v31 = vld [vmem:[%s10873_s17 + $0x1ad0] sm:$0xff] }
 0x224   : > { %3236 = vmatmul.mubr.f32.gmra.mrb[234].mxu1 %v963_v32  ;;  %v1006_v32 = vld [vmem:[%s10873_s17 + $0x1af0] sm:$0xff] }
 0x225   : > { %5850 = vmatmul.mubr.f32.gmra.mrb[234].mxu0 %v967_v40  ;;  %3241 = vmatprep.mubr.f32.mxu1 %v971_v44  ;;  %v1009_v40 = vld [vmem:[%s10873_s17 + $0x1b08] sm:$0xff] }
 0x226   : > { %5855 = vmatprep.mubr.f32.mxu0 %v975_v46  ;;  %v1013_v44 = vld [vmem:[%s10873_s17 + $0x1b28] sm:$0xff]  ;;  %v1012_v46 = vld [vmem:[%s10873_s17 + $0x1b20] sm:$0xff] }
 0x228   : > { %3242 = vmatmul.mubr.f32.gmra.mrb[236].mxu1 %v970_v56  ;;  %v1019_v56 = vld [vmem:[%s10873_s17 + $0x1b58] sm:$0xff] }
 0x229   : > { %5856 = vmatmul.mubr.f32.gmra.mrb[236].mxu0 %v974_v58  ;;  %3247 = vmatprep.mubr.f32.mxu1 %v978_v60  ;;  %v1023_v58 = vld [vmem:[%s10873_s17 + $0x1b78] sm:$0xff] }
 0x22a   : > { %5861 = vmatprep.mubr.f32.mxu0 %v982_v0  ;;  %v1027_v60 = vld [vmem:[%s10873_s17 + $0x1b98] sm:$0xff] }
 0x22b   : > { %v1031_v0 = vld [vmem:[%s10873_s17 + $0x1bb8] sm:$0xff] }
 0x22c   : > { %3248 = vmatmul.mubr.f32.gmra.mrb[238].mxu1 %v977_v4  ;;  %v1026_v4 = vld [vmem:[%s10873_s17 + $0x1b90] sm:$0xff] }
 0x22d   : > { %5862 = vmatmul.mubr.f32.gmra.mrb[238].mxu0 %v981_v5  ;;  %3253 = vmatprep.mubr.f32.mxu1 %v985_v6  ;;  %v1030_v5 = vld [vmem:[%s10873_s17 + $0x1bb0] sm:$0xff] }
 0x22e   : > { %5867 = vmatprep.mubr.f32.mxu0 %v989_v8  ;;  %v1034_v6 = vld [vmem:[%s10873_s17 + $0x1bd0] sm:$0xff] }
 0x22f   : > { %v1038_v8 = vld [vmem:[%s10873_s17 + $0x1bf0] sm:$0xff] }
 0x230   : > { %3254 = vmatmul.mubr.f32.gmra.mrb[240].mxu1 %v984_v14  ;;  %v1033_v14 = vld [vmem:[%s10873_s17 + $0x1bc8] sm:$0xff] }
 0x231   : > { %5868 = vmatmul.mubr.f32.gmra.mrb[240].mxu0 %v988_v15  ;;  %3259 = vmatprep.mubr.f32.mxu1 %v992_v16  ;;  %v1037_v15 = vld [vmem:[%s10873_s17 + $0x1be8] sm:$0xff] }
 0x232   : > { %5873 = vmatprep.mubr.f32.mxu0 %v996_v18  ;;  %v1041_v16 = vld [vmem:[%s10873_s17 + $0x1c08] sm:$0xff] }
 0x233   : > { %v1045_v18 = vld [vmem:[%s10873_s17 + $0x1c28] sm:$0xff] }
 0x234   : > { %3260 = vmatmul.mubr.f32.gmra.mrb[242].mxu1 %v991_v20  ;;  %v1040_v20 = vld [vmem:[%s10873_s17 + $0x1c00] sm:$0xff] }
 0x235   : > { %5874 = vmatmul.mubr.f32.gmra.mrb[242].mxu0 %v995_v24  ;;  %3265 = vmatprep.mubr.f32.mxu1 %v999_v28  ;;  %v1044_v24 = vld [vmem:[%s10873_s17 + $0x1c20] sm:$0xff] }
 0x236   : > { %5879 = vmatprep.mubr.f32.mxu0 %v1003_v29  ;;  %v1048_v28 = vld [vmem:[%s10873_s17 + $0x1c40] sm:$0xff] }
 0x237   : > { %v1052_v29 = vld [vmem:[%s10873_s17 + $0x1c60] sm:$0xff] }
 0x238   : > { %3266 = vmatmul.mubr.f32.gmra.mrb[244].mxu1 %v998_v30  ;;  %v1047_v30 = vld [vmem:[%s10873_s17 + $0x1c38] sm:$0xff] }
 0x239   : > { %5880 = vmatmul.mubr.f32.gmra.mrb[244].mxu0 %v1002_v31  ;;  %3271 = vmatprep.mubr.f32.mxu1 %v1006_v32  ;;  %v1051_v31 = vld [vmem:[%s10873_s17 + $0x1c58] sm:$0xff] }
 0x23a   : > { %5885 = vmatprep.mubr.f32.mxu0 %v1010_v36  ;;  %v1055_v32 = vld [vmem:[%s10873_s17 + $0x1c78] sm:$0xff] }
 0x23b   : > { %v1059_v36 = vld [vmem:[%s10873_s17 + $0x1c98] sm:$0xff] }
 0x23c   : > { %3272 = vmatmul.mubr.f32.gmra.mrb[246].mxu1 %v1005_v39  ;;  %v1054_v39 = vld [vmem:[%s10873_s17 + $0x1c70] sm:$0xff] }
 0x23d   : > { %5886 = vmatmul.mubr.f32.gmra.mrb[246].mxu0 %v1009_v40  ;;  %3277 = vmatprep.mubr.f32.mxu1 %v1013_v44  ;;  %v1058_v40 = vld [vmem:[%s10873_s17 + $0x1c90] sm:$0xff] }
 0x23e   : > { %5891 = vmatprep.mubr.f32.mxu0 %v1017_v45  ;;  %v1062_v44 = vld [vmem:[%s10873_s17 + $0x1cb0] sm:$0xff] }
 0x23f   : > { %v1066_v45 = vld [vmem:[%s10873_s17 + $0x1cd0] sm:$0xff] }
 0x240   : > { %3278 = vmatmul.mubr.f32.gmra.mrb[248].mxu1 %v1012_v46  ;;  %v1769_v46 = vld [vmem:[%s16195_s1 + $0x388] sm:$0xff] }
 0x241   : > { %5892 = vmatmul.mubr.f32.gmra.mrb[248].mxu0 %v1016_v48  ;;  %3283 = vmatprep.mubr.f32.mxu1 %v1020_v54  ;;  %v1771_v48 = vld [vmem:[%s16195_s1 + $0x398] sm:$0xff]  ;;  %v1061_v54 = vld [vmem:[%s10873_s17 + $0x1ca8] sm:$0xff] }
 0x242   : > { %5897 = vmatprep.mubr.f32.mxu0 %v1024_v55  ;;  %v9386_v55 = vpack.c.bf16 %v1771_v48, %v1769_v46  ;;  %v1104_v46 = vld [vmem:[%s10873_s17 + $0x1e00] sm:$0xff] }
 0x243   : > { %v1108_v48 = vld [vmem:[%s10873_s17 + $0x1e20] sm:$0xff] }
 0x244   : > { %3284 = vmatmul.mubr.f32.gmra.mrb[250].mxu1 %v1019_v56  ;;  %v1768_v56 = vld [vmem:[%s16195_s1 + $0x380] sm:$0xff]  ;;  %9387 = vmatprep.subr.bf16.mxu1 %v9386_v55  ;;  %v1107_v55 = vld [vmem:[%s10873_s17 + $0x1e18] sm:$0xff] }
 0x245   : > { %5898 = vmatmul.mubr.f32.gmra.mrb[250].mxu0 %v1023_v58  ;;  %3289 = vmatprep.mubr.f32.mxu1 %v1027_v60  ;;  %v1770_v58 = vld [vmem:[%s16195_s1 + $0x390] sm:$0xff]  ;;  %v1065_v60 = vld [vmem:[%s10873_s17 + $0x1cc8] sm:$0xff] }
 0x246   : > { %5903 = vmatprep.mubr.f32.mxu0 %v1031_v0  ;;  %v1069_v0 = vld [vmem:[%s10873_s17 + $0x1ce8] sm:$0xff] }
 0x248   : > { %3290 = vmatmul.mubr.f32.gmra.mrb[252].mxu1 %v1026_v4  ;;  %v9388_v4 = vpack.c.bf16 %v1770_v58, %v1768_v56  ;;  %v1111_v56 = vld [vmem:[%s10873_s17 + $0x1e38] sm:$0xff] }
 0x249   : > { %5904 = vmatmul.mubr.f32.gmra.mrb[252].mxu0 %v1030_v5  ;;  %3295 = vmatprep.mubr.f32.mxu1 %v1034_v6  ;;  %v1073_v5 = vld [vmem:[%s10873_s17 + $0x1d08] sm:$0xff]  ;;  %v1068_v6 = vld [vmem:[%s10873_s17 + $0x1ce0] sm:$0xff]  ;;  %v1115_v58 = vld [vmem:[%s10873_s17 + $0x1e58] sm:$0xff] }
 0x24a   : > { %5909 = vmatprep.mubr.f32.mxu0 %v1038_v8  ;;  %v1072_v8 = vld [vmem:[%s10873_s17 + $0x1d00] sm:$0xff]  ;;  %9389 = vmatpush1.bf16.msra.mxu1 %v9388_v4  ;;  %v1118_v4 = vld [vmem:[%s10873_s17 + $0x1e70] sm:$0xff] }
 0x24c   : > { %3296 = vmatmul.mubr.f32.gmra.mrb[254].mxu1 %v1033_v14  ;;  %v1076_v14 = vld [vmem:[%s10873_s17 + $0x1d20] sm:$0xff] }
 0x24d   : > { %5910 = vmatmul.mubr.f32.gmra.mrb[254].mxu0 %v1037_v15  ;;  %3301 = vmatprep.mubr.f32.mxu1 %v1041_v16  ;;  %v1080_v15 = vld [vmem:[%s10873_s17 + $0x1d40] sm:$0xff]  ;;  %v1075_v16 = vld [vmem:[%s10873_s17 + $0x1d18] sm:$0xff] }
 0x24e   : > { %5915 = vmatprep.mubr.f32.mxu0 %v1045_v18  ;;  %v1079_v18 = vld [vmem:[%s10873_s17 + $0x1d38] sm:$0xff] }
 0x250   : > { %3302 = vmatmul.mubr.f32.gmra.mrb[0].mxu1 %v1040_v20  ;;  %v1083_v20 = vld [vmem:[%s10873_s17 + $0x1d58] sm:$0xff] }
 0x251   : > { %5916 = vmatmul.mubr.f32.gmra.mrb[0].mxu0 %v1044_v24  ;;  %3307 = vmatprep.mubr.f32.mxu1 %v1048_v28  ;;  %v1087_v24 = vld [vmem:[%s10873_s17 + $0x1d78] sm:$0xff]  ;;  %v1082_v28 = vld [vmem:[%s10873_s17 + $0x1d50] sm:$0xff] }
 0x252   : > { %5921 = vmatprep.mubr.f32.mxu0 %v1052_v29  ;;  %v1086_v29 = vld [vmem:[%s10873_s17 + $0x1d70] sm:$0xff] }
 0x254   : > { %3308 = vmatmul.mubr.f32.gmra.mrb[2].mxu1 %v1047_v30  ;;  %v1090_v30 = vld [vmem:[%s10873_s17 + $0x1d90] sm:$0xff] }
 0x255   : > { %5922 = vmatmul.mubr.f32.gmra.mrb[2].mxu0 %v1051_v31  ;;  %3313 = vmatprep.mubr.f32.mxu1 %v1055_v32  ;;  %v1094_v31 = vld [vmem:[%s10873_s17 + $0x1db0] sm:$0xff]  ;;  %v1089_v32 = vld [vmem:[%s10873_s17 + $0x1d88] sm:$0xff] }
 0x256   : > { %5927 = vmatprep.mubr.f32.mxu0 %v1059_v36  ;;  %v1093_v36 = vld [vmem:[%s10873_s17 + $0x1da8] sm:$0xff] }
 0x258   : > { %3314 = vmatmul.mubr.f32.gmra.mrb[4].mxu1 %v1054_v39  ;;  %v1097_v39 = vld [vmem:[%s10873_s17 + $0x1dc8] sm:$0xff] }
 0x259   : > { %5928 = vmatmul.mubr.f32.gmra.mrb[4].mxu0 %v1058_v40  ;;  %3319 = vmatprep.mubr.f32.mxu1 %v1062_v44  ;;  %v1101_v40 = vld [vmem:[%s10873_s17 + $0x1de8] sm:$0xff]  ;;  %v1096_v44 = vld [vmem:[%s10873_s17 + $0x1dc0] sm:$0xff] }
 0x25a   : > { %5933 = vmatprep.mubr.f32.mxu0 %v1066_v45  ;;  %v1100_v45 = vld [vmem:[%s10873_s17 + $0x1de0] sm:$0xff] }
 0x25c   : > { %3320 = vmatmul.mubr.f32.gmra.mrb[6].mxu1 %v1061_v54  ;;  %v1103_v54 = vld [vmem:[%s10873_s17 + $0x1df8] sm:$0xff] }
 0x25d   : > { %5934 = vmatmul.mubr.f32.gmra.mrb[6].mxu0 %v1065_v60  ;;  %3325 = vmatprep.mubr.f32.mxu1 %v1069_v0  ;;  %v1110_v60 = vld [vmem:[%s10873_s17 + $0x1e30] sm:$0xff] }
 0x25e   : > { %5939 = vmatprep.mubr.f32.mxu0 %v1073_v5  ;;  %v1114_v0 = vld [vmem:[%s10873_s17 + $0x1e50] sm:$0xff] }
 0x25f   : > { %v1122_v5 = vld [vmem:[%s10873_s17 + $0x1e90] sm:$0xff] }
 0x260   : > { %3326 = vmatmul.mubr.f32.gmra.mrb[8].mxu1 %v1068_v6  ;;  %v1117_v6 = vld [vmem:[%s10873_s17 + $0x1e68] sm:$0xff] }
 0x261   : > { %5940 = vmatmul.mubr.f32.gmra.mrb[8].mxu0 %v1072_v8  ;;  %3331 = vmatprep.mubr.f32.mxu1 %v1076_v14  ;;  %v1121_v8 = vld [vmem:[%s10873_s17 + $0x1e88] sm:$0xff] }
 0x262   : > { %5945 = vmatprep.mubr.f32.mxu0 %v1080_v15  ;;  %v1125_v14 = vld [vmem:[%s10873_s17 + $0x1ea8] sm:$0xff] }
 0x263   : > { %v1129_v15 = vld [vmem:[%s10873_s17 + $0x1ec8] sm:$0xff] }
 0x264   : > { %3332 = vmatmul.mubr.f32.gmra.mrb[10].mxu1 %v1075_v16  ;;  %v1124_v16 = vld [vmem:[%s10873_s17 + $0x1ea0] sm:$0xff] }
 0x265   : > { %5946 = vmatmul.mubr.f32.gmra.mrb[10].mxu0 %v1079_v18  ;;  %3337 = vmatprep.mubr.f32.mxu1 %v1083_v20  ;;  %v1128_v18 = vld [vmem:[%s10873_s17 + $0x1ec0] sm:$0xff] }
 0x266   : > { %5951 = vmatprep.mubr.f32.mxu0 %v1087_v24  ;;  %v1132_v20 = vld [vmem:[%s10873_s17 + $0x1ee0] sm:$0xff] }
 0x267   : > { %v1136_v24 = vld [vmem:[%s10873_s17 + $0x1f00] sm:$0xff] }
 0x268   : > { %3338 = vmatmul.mubr.f32.gmra.mrb[12].mxu1 %v1082_v28  ;;  %v1131_v28 = vld [vmem:[%s10873_s17 + $0x1ed8] sm:$0xff] }
 0x269   : > { %5952 = vmatmul.mubr.f32.gmra.mrb[12].mxu0 %v1086_v29  ;;  %3343 = vmatprep.mubr.f32.mxu1 %v1090_v30  ;;  %v1135_v29 = vld [vmem:[%s10873_s17 + $0x1ef8] sm:$0xff] }
 0x26a   : > { %5957 = vmatprep.mubr.f32.mxu0 %v1094_v31  ;;  %v1139_v30 = vld [vmem:[%s10873_s17 + $0x1f18] sm:$0xff] }
 0x26b   : > { %v1143_v31 = vld [vmem:[%s10873_s17 + $0x1f38] sm:$0xff] }
 0x26c   : > { %3344 = vmatmul.mubr.f32.gmra.mrb[14].mxu1 %v1089_v32  ;;  %v1138_v32 = vld [vmem:[%s10873_s17 + $0x1f10] sm:$0xff] }
 0x26d   : > { %5958 = vmatmul.mubr.f32.gmra.mrb[14].mxu0 %v1093_v36  ;;  %3349 = vmatprep.mubr.f32.mxu1 %v1097_v39  ;;  %v1142_v36 = vld [vmem:[%s10873_s17 + $0x1f30] sm:$0xff] }
 0x26e   : > { %5963 = vmatprep.mubr.f32.mxu0 %v1101_v40  ;;  %v1146_v39 = vld [vmem:[%s10873_s17 + $0x1f50] sm:$0xff] }
 0x26f   : > { %v1150_v40 = vld [vmem:[%s10873_s17 + $0x1f70] sm:$0xff] }
 0x270   : > { %3350 = vmatmul.mubr.f32.gmra.mrb[16].mxu1 %v1096_v44  ;;  %v1145_v44 = vld [vmem:[%s10873_s17 + $0x1f48] sm:$0xff] }
 0x271   : > { %5964 = vmatmul.mubr.f32.gmra.mrb[16].mxu0 %v1100_v45  ;;  %3355 = vmatprep.mubr.f32.mxu1 %v1104_v46  ;;  %v1149_v45 = vld [vmem:[%s10873_s17 + $0x1f68] sm:$0xff] }
 0x272   : > { %5969 = vmatprep.mubr.f32.mxu0 %v1108_v48  ;;  %v1153_v46 = vld [vmem:[%s10873_s17 + $0x1f88] sm:$0xff] }
 0x273   : > { %v1157_v48 = vld [vmem:[%s10873_s17 + $0x1fa8] sm:$0xff] }
 0x274   : > { %3356 = vmatmul.mubr.f32.gmra.mrb[18].mxu1 %v1103_v54  ;;  %v1152_v54 = vld [vmem:[%s10873_s17 + $0x1f80] sm:$0xff] }
 0x275   : > { %5970 = vmatmul.mubr.f32.gmra.mrb[18].mxu0 %v1107_v55  ;;  %3361 = vmatprep.mubr.f32.mxu1 %v1111_v56  ;;  %v1773_v55 = vld [vmem:[%s16195_s1 + $0x3a8] sm:$0xff]  ;;  %v1775_v56 = vld [vmem:[%s16195_s1 + $0x3b8] sm:$0xff] }
 0x276   : > { %5975 = vmatprep.mubr.f32.mxu0 %v1115_v58  ;;  %v1156_v58 = vld [vmem:[%s10873_s17 + $0x1fa0] sm:$0xff] }
 0x278   : > { %3362 = vmatmul.mubr.f32.gmra.mrb[20].mxu1 %v1110_v60  ;;  %v1160_v60 = vld [vmem:[%s10873_s17 + $0x1fc0] sm:$0xff] }
 0x279   : > { %5976 = vmatmul.mubr.f32.gmra.mrb[20].mxu0 %v1114_v0  ;;  %3367 = vmatprep.mubr.f32.mxu1 %v1118_v4  ;;  %v9390_v0 = vpack.c.bf16 %v1775_v56, %v1773_v55  ;;  %v1164_v4 = vld [vmem:[%s10873_s17 + $0x1fe0] sm:$0xff] }
 0x27a   : > { %5981 = vmatprep.mubr.f32.mxu0 %v1122_v5  ;;  %v1772_v5 = vld [vmem:[%s16195_s1 + $0x3a0] sm:$0xff] }
 0x27b   : > { %9391 = vmatprep.subr.bf16.mxu1 %v9390_v0  ;;  %v1180_v56 = vld [vmem:[%s10873_s17 + $0x2060] sm:$0xff] }
 0x27c   : > { %3368 = vmatmul.mubr.f32.gmra.mrb[22].mxu1 %v1117_v6  ;;  %v1774_v6 = vld [vmem:[%s16195_s1 + $0x3b0] sm:$0xff] }
 0x27d   : > { %5982 = vmatmul.mubr.f32.gmra.mrb[22].mxu0 %v1121_v8  ;;  %3373 = vmatprep.mubr.f32.mxu1 %v1125_v14  ;;  %v9392_v8 = vpack.c.bf16 %v1774_v6, %v1772_v5  ;;  %v1159_v14 = vld [vmem:[%s10873_s17 + $0x1fb8] sm:$0xff] }
 0x27e   : > { %5987 = vmatprep.mubr.f32.mxu0 %v1129_v15  ;;  %v1163_v15 = vld [vmem:[%s10873_s17 + $0x1fd8] sm:$0xff] }
 0x27f   : > { %9393 = vmatpush1.bf16.msra.mxu1 %v9392_v8 }
 0x280   : > { %3374 = vmatmul.mubr.f32.gmra.mrb[24].mxu1 %v1124_v16  ;;  %v1167_v16 = vld [vmem:[%s10873_s17 + $0x1ff8] sm:$0xff] }
 0x281   : > { %5988 = vmatmul.mubr.f32.gmra.mrb[24].mxu0 %v1128_v18  ;;  %3379 = vmatprep.mubr.f32.mxu1 %v1132_v20  ;;  %v1171_v18 = vld [vmem:[%s10873_s17 + $0x2018] sm:$0xff]  ;;  %v1166_v20 = vld [vmem:[%s10873_s17 + $0x1ff0] sm:$0xff] }
 0x282   : > { %5993 = vmatprep.mubr.f32.mxu0 %v1136_v24  ;;  %v1170_v24 = vld [vmem:[%s10873_s17 + $0x2010] sm:$0xff] }
 0x284   : > { %3380 = vmatmul.mubr.f32.gmra.mrb[26].mxu1 %v1131_v28  ;;  %v1174_v28 = vld [vmem:[%s10873_s17 + $0x2030] sm:$0xff] }
 0x285   : > { %5994 = vmatmul.mubr.f32.gmra.mrb[26].mxu0 %v1135_v29  ;;  %3385 = vmatprep.mubr.f32.mxu1 %v1139_v30  ;;  %v1178_v30 = vld [vmem:[%s10873_s17 + $0x2050] sm:$0xff] }
 0x286   : > { %5999 = vmatprep.mubr.f32.mxu0 %v1143_v31 }
 0x288   : > { %3386 = vmatmul.mubr.f32.gmra.mrb[28].mxu1 %v1138_v32 }
 0x289   : > { %6000 = vmatmul.mubr.f32.gmra.mrb[28].mxu0 %v1142_v36  ;;  %3391 = vmatprep.mubr.f32.mxu1 %v1146_v39  ;;  %v1173_v39 = vld [vmem:[%s10873_s17 + $0x2028] sm:$0xff] }
 0x28a   : > { %6005 = vmatprep.mubr.f32.mxu0 %v1150_v40  ;;  %v1177_v40 = vld [vmem:[%s10873_s17 + $0x2048] sm:$0xff] }
 0x28c   : > { %3392 = vmatmul.mubr.f32.gmra.mrb[30].mxu1 %v1145_v44  ;;  %v1181_v44 = vld [vmem:[%s10873_s17 + $0x2068] sm:$0xff] }
 0x28d   : > { %6006 = vmatmul.mubr.f32.gmra.mrb[30].mxu0 %v1149_v45  ;;  %3397 = vmatprep.mubr.f32.mxu1 %v1153_v46  ;;  %v1185_v46 = vld [vmem:[%s10873_s17 + $0x2088] sm:$0xff] }
 0x28e   : > { %6011 = vmatprep.mubr.f32.mxu0 %v1157_v48 }
 0x290   : > { %3398 = vmatmul.mubr.f32.gmra.mrb[32].mxu1 %v1152_v54 }
 0x291   : > { %6012 = vmatmul.mubr.f32.gmra.mrb[32].mxu0 %v1156_v58  ;;  %3403 = vmatprep.mubr.f32.mxu1 %v1160_v60  ;;  %v1184_v58 = vld [vmem:[%s10873_s17 + $0x2080] sm:$0xff] }
 0x292   : > { %6017 = vmatprep.mubr.f32.mxu0 %v1164_v4  ;;  %v1188_v60 = vld [vmem:[%s10873_s17 + $0x20a0] sm:$0xff] }
 0x293   : > { %v1192_v4 = vld [vmem:[%s10873_s17 + $0x20c0] sm:$0xff] }
 0x294   : > { %3404 = vmatmul.mubr.f32.gmra.mrb[34].mxu1 %v1159_v14  ;;  %v1187_v14 = vld [vmem:[%s10873_s17 + $0x2098] sm:$0xff] }
 0x295   : > { %6018 = vmatmul.mubr.f32.gmra.mrb[34].mxu0 %v1163_v15  ;;  %3409 = vmatprep.mubr.f32.mxu1 %v1167_v16  ;;  %v1191_v15 = vld [vmem:[%s10873_s17 + $0x20b8] sm:$0xff] }
 0x296   : > { %6023 = vmatprep.mubr.f32.mxu0 %v1171_v18  ;;  %v1195_v16 = vld [vmem:[%s10873_s17 + $0x20d8] sm:$0xff] }
 0x297   : > { %v11836_v29 = vpop.f32.mrb[186].mxu1 }
 0x298   : > { %16249 = vst [vmem:[#allocation2_spill] sm:$0xff] %v11836_v29  ;;  %v11839_v31 = vpop.f32.mrb[186].mxu0  ;;  %v11841_v32 = vpop.f32.mrb[187].mxu1  ;;  %3410 = vmatmul.mubr.f32.gmra.mrb[186].mxu1 %v1166_v20  ;;  %v1199_v20 = vld [vmem:[%s10873_s17 + $0x20f8] sm:$0xff] }
 0x299   : > { %16250 = vst [vmem:[#allocation3_spill] sm:$0xff] %v11839_v31  ;;  %16251 = vst [vmem:[#allocation4_spill] sm:$0xff] %v11841_v32  ;;  %v11843_v36 = vpop.f32.mrb[187].mxu0  ;;  %6024 = vmatmul.mubr.f32.gmra.mrb[186].mxu0 %v1170_v24  ;;  %3415 = vmatprep.mubr.f32.mxu1 %v1174_v28  ;;  %v833_v32 = vld [vmem:[%s10873_s17 + $0x1588] sm:$0xff] }
 0x29a   : > { %16252 = vst [vmem:[#allocation5_spill] sm:$0xff] %v11843_v36  ;;  %6029 = vmatprep.mubr.f32.mxu0 %v1178_v30  ;;  %v826_v36 = vld [vmem:[%s10873_s17 + $0x1550] sm:$0xff] }
 0x29b   : > { %v11848_v45 = vpop.f32.mrb[188].mxu1 }
 0x29c   : > { %16253 = vst [vmem:[#allocation6_spill] sm:$0xff] %v11848_v45  ;;  %v11851_v48 = vpop.f32.mrb[188].mxu0  ;;  %v11853_v54 = vpop.f32.mrb[189].mxu1  ;;  %3416 = vmatmul.mubr.f32.gmra.mrb[188].mxu1 %v1173_v39  ;;  %v1194_v39 = vld [vmem:[%s10873_s17 + $0x20d0] sm:$0xff] }
 0x29d   : > { %16254 = vst [vmem:[#allocation7_spill] sm:$0xff] %v11851_v48  ;;  %16255 = vst [vmem:[#allocation8_spill] sm:$0xff] %v11853_v54  ;;  %v11855_v55 = vpop.f32.mrb[189].mxu0  ;;  %6030 = vmatmul.mubr.f32.gmra.mrb[188].mxu0 %v1177_v40  ;;  %3421 = vmatprep.mubr.f32.mxu1 %v1181_v44  ;;  %v1198_v40 = vld [vmem:[%s10873_s17 + $0x20f0] sm:$0xff]  ;;  %v819_v54 = vld [vmem:[%s10873_s17 + $0x1518] sm:$0xff] }
 0x29e   : > { %16256 = vst [vmem:[#allocation9_spill] sm:$0xff] %v11855_v55  ;;  %6035 = vmatprep.mubr.f32.mxu0 %v1185_v46  ;;  %v1202_v44 = vld [vmem:[%s10873_s17 + $0x2110] sm:$0xff]  ;;  %v812_v55 = vld [vmem:[%s10873_s17 + $0x14e0] sm:$0xff] }
 0x29f   : > { %v11860_v0 = vpop.f32.mrb[190].mxu1 }
 0x2a0   : > { %16257 = vst [vmem:[#allocation10_spill] sm:$0xff] %v11860_v0  ;;  %v11863_v5 = vpop.f32.mrb[190].mxu0  ;;  %v11865_v6 = vpop.f32.mrb[191].mxu1  ;;  %3422 = vmatmul.mubr.f32.gmra.mrb[190].mxu1 %v1180_v56  ;;  %v1206_v56 = vld [vmem:[%s10873_s17 + $0x2130] sm:$0xff] }
 0x2a1   : > { %16258 = vst [vmem:[#allocation11_spill] sm:$0xff] %v11863_v5  ;;  %16259 = vst [vmem:[#allocation12_spill] sm:$0xff] %v11865_v6  ;;  %v11867_v8 = vpop.f32.mrb[191].mxu0  ;;  %6036 = vmatmul.mubr.f32.gmra.mrb[190].mxu0 %v1184_v58  ;;  %3427 = vmatprep.mubr.f32.mxu1 %v1188_v60  ;;  %v805_v6 = vld [vmem:[%s10873_s17 + $0x14a8] sm:$0xff] }
 0x2a2   : > { %16260 = vst [vmem:[#allocation13_spill] sm:$0xff] %v11867_v8  ;;  %6041 = vmatprep.mubr.f32.mxu0 %v1192_v4  ;;  %v798_v8 = vld [vmem:[%s10873_s17 + $0x1470] sm:$0xff] }
 0x2a3   : > { %v11872_v18 = vpop.f32.mrb[192].mxu1 }
 0x2a4   : > { %16261 = vst [vmem:[#allocation14_spill] sm:$0xff] %v11872_v18  ;;  %v11875_v24 = vpop.f32.mrb[192].mxu0  ;;  %v11877_v28 = vpop.f32.mrb[193].mxu1  ;;  %3428 = vmatmul.mubr.f32.gmra.mrb[192].mxu1 %v1187_v14  ;;  %v1201_v14 = vld [vmem:[%s10873_s17 + $0x2108] sm:$0xff] }
 0x2a5   : > { %16262 = vst [vmem:[#allocation15_spill] sm:$0xff] %v11875_v24  ;;  %16263 = vst [vmem:[#allocation16_spill] sm:$0xff] %v11877_v28  ;;  %v11879_v30 = vpop.f32.mrb[193].mxu0  ;;  %6042 = vmatmul.mubr.f32.gmra.mrb[192].mxu0 %v1191_v15  ;;  %3433 = vmatprep.mubr.f32.mxu1 %v1195_v16  ;;  %v1205_v15 = vld [vmem:[%s10873_s17 + $0x2128] sm:$0xff]  ;;  %v1356_v24 = vld [vmem:[%s10873_s17 + $0x25e0] sm:$0xff] }
 0x2a6   : > { %16264 = vst [vmem:[#allocation17_spill] sm:$0xff] %v11879_v30  ;;  %6047 = vmatprep.mubr.f32.mxu0 %v1199_v20  ;;  %v1209_v16 = vld [vmem:[%s10873_s17 + $0x2148] sm:$0xff] }
 0x2a7   : > { %v11884_v46 = vpop.f32.mrb[194].mxu1 }
 0x2a8   : > { %16265 = vst [vmem:[#allocation18_spill] sm:$0xff] %v11884_v46  ;;  %v11887_v58 = vpop.f32.mrb[194].mxu0  ;;  %v11889_v60 = vpop.f32.mrb[195].mxu1  ;;  %3434 = vmatmul.mubr.f32.gmra.mrb[194].mxu1 %v1194_v39  ;;  %v1213_v46 = vld [vmem:[%s10873_s17 + $0x2168] sm:$0xff] }
 0x2a9   : > { %16266 = vst [vmem:[#allocation19_spill] sm:$0xff] %v11887_v58  ;;  %16267 = vst [vmem:[#allocation20_spill] sm:$0xff] %v11889_v60  ;;  %v11891_v4 = vpop.f32.mrb[195].mxu0  ;;  %6048 = vmatmul.mubr.f32.gmra.mrb[194].mxu0 %v1198_v40  ;;  %3439 = vmatprep.mubr.f32.mxu1 %v1202_v44  ;;  %v1208_v40 = vld [vmem:[%s10873_s17 + $0x2140] sm:$0xff] }
 0x2aa   : > { %16268 = vst [vmem:[#allocation21_spill] sm:$0xff] %v11891_v4  ;;  %6053 = vmatprep.mubr.f32.mxu0 %v1206_v56  ;;  %v1212_v44 = vld [vmem:[%s10873_s17 + $0x2160] sm:$0xff] }
 0x2ab   : > { %v11896_v20 = vpop.f32.mrb[196].mxu1  ;;  %v1216_v56 = vld [vmem:[%s10873_s17 + $0x2180] sm:$0xff] }
 0x2ac   : > { %16269 = vst [vmem:[#allocation22_spill] sm:$0xff] %v11896_v20  ;;  %v11899_v30 = vpop.f32.mrb[196].mxu0  ;;  %v11901_v58 = vpop.f32.mrb[197].mxu1  ;;  %3440 = vmatmul.mubr.f32.gmra.mrb[196].mxu1 %v1201_v14  ;;  %v1220_v20 = vld [vmem:[%s10873_s17 + $0x21a0] sm:$0xff] }
 0x2ad   : > { %16270 = vst [vmem:[#allocation23_spill] sm:$0xff] %v11899_v30  ;;  %16271 = vst [vmem:[#allocation24_spill] sm:$0xff] %v11901_v58  ;;  %v11903_v39 = vpop.f32.mrb[197].mxu0  ;;  %6054 = vmatmul.mubr.f32.gmra.mrb[196].mxu0 %v1205_v15  ;;  %3445 = vmatprep.mubr.f32.mxu1 %v1209_v16  ;;  %v1215_v15 = vld [vmem:[%s10873_s17 + $0x2178] sm:$0xff] }
 0x2ae   : > { %16272 = vst [vmem:[#allocation25_spill] sm:$0xff] %v11903_v39  ;;  %6059 = vmatprep.mubr.f32.mxu0 %v1213_v46  ;;  %v1219_v46 = vld [vmem:[%s10873_s17 + $0x2198] sm:$0xff] }
 0x2af   : > { %v11908_v4 = vpop.f32.mrb[198].mxu1  ;;  %v1223_v16 = vld [vmem:[%s10873_s17 + $0x21b8] sm:$0xff] }
 0x2b0   : > { %16273 = vst [vmem:[#allocation26_spill] sm:$0xff] %v11908_v4  ;;  %v11911_v60 = vpop.f32.mrb[198].mxu0  ;;  %v11913_v30 = vpop.f32.mrb[199].mxu1  ;;  %3446 = vmatmul.mubr.f32.gmra.mrb[198].mxu1 %v1208_v40  ;;  %v1227_v4 = vld [vmem:[%s10873_s17 + $0x21d8] sm:$0xff] }
 0x2b1   : > { %16274 = vst [vmem:[#allocation27_spill] sm:$0xff] %v11911_v60  ;;  %16275 = vst [vmem:[#allocation28_spill] sm:$0xff] %v11913_v30  ;;  %v11915_v14 = vpop.f32.mrb[199].mxu0  ;;  %6060 = vmatmul.mubr.f32.gmra.mrb[198].mxu0 %v1212_v44  ;;  %3451 = vmatprep.mubr.f32.mxu1 %v1216_v56  ;;  %v1222_v44 = vld [vmem:[%s10873_s17 + $0x21b0] sm:$0xff] }
 0x2b2   : > { %16276 = vst [vmem:[#allocation29_spill] sm:$0xff] %v11915_v14  ;;  %6065 = vmatprep.mubr.f32.mxu0 %v1220_v20  ;;  %v1226_v20 = vld [vmem:[%s10873_s17 + $0x21d0] sm:$0xff] }
 0x2b3   : > { %v11920_v39 = vpop.f32.mrb[200].mxu1  ;;  %v1230_v56 = vld [vmem:[%s10873_s17 + $0x21f0] sm:$0xff] }
 0x2b4   : > { %16277 = vst [vmem:[#allocation30_spill] sm:$0xff] %v11920_v39  ;;  %v11923_v58 = vpop.f32.mrb[200].mxu0  ;;  %v11925_v60 = vpop.f32.mrb[201].mxu1  ;;  %3452 = vmatmul.mubr.f32.gmra.mrb[200].mxu1 %v1215_v15  ;;  %v1234_v39 = vld [vmem:[%s10873_s17 + $0x2210] sm:$0xff] }
 0x2b5   : > { %16278 = vst [vmem:[#allocation31_spill] sm:$0xff] %v11923_v58  ;;  %16279 = vst [vmem:[#allocation32_spill] sm:$0xff] %v11925_v60  ;;  %v11927_v40 = vpop.f32.mrb[201].mxu0  ;;  %6066 = vmatmul.mubr.f32.gmra.mrb[200].mxu0 %v1219_v46  ;;  %3457 = vmatprep.mubr.f32.mxu1 %v1223_v16  ;;  %v1229_v46 = vld [vmem:[%s10873_s17 + $0x21e8] sm:$0xff] }
 0x2b6   : > { %16280 = vst [vmem:[#allocation33_spill] sm:$0xff] %v11927_v40  ;;  %6071 = vmatprep.mubr.f32.mxu0 %v1227_v4  ;;  %v1233_v4 = vld [vmem:[%s10873_s17 + $0x2208] sm:$0xff] }
 0x2b7   : > { %v11932_v14 = vpop.f32.mrb[202].mxu1  ;;  %v1237_v16 = vld [vmem:[%s10873_s17 + $0x2228] sm:$0xff] }
 0x2b8   : > { %16281 = vst [vmem:[#allocation34_spill] sm:$0xff] %v11932_v14  ;;  %v11935_v30 = vpop.f32.mrb[202].mxu0  ;;  %v11937_v58 = vpop.f32.mrb[203].mxu1  ;;  %3458 = vmatmul.mubr.f32.gmra.mrb[202].mxu1 %v1222_v44  ;;  %v1241_v14 = vld [vmem:[%s10873_s17 + $0x2248] sm:$0xff] }
 0x2b9   : > { %16282 = vst [vmem:[#allocation35_spill] sm:$0xff] %v11935_v30  ;;  %16283 = vst [vmem:[#allocation36_spill] sm:$0xff] %v11937_v58  ;;  %v11939_v15 = vpop.f32.mrb[203].mxu0  ;;  %6072 = vmatmul.mubr.f32.gmra.mrb[202].mxu0 %v1226_v20  ;;  %3463 = vmatprep.mubr.f32.mxu1 %v1230_v56  ;;  %v1236_v20 = vld [vmem:[%s10873_s17 + $0x2220] sm:$0xff] }
 0x2ba   : > { %16284 = vst [vmem:[#allocation37_spill] sm:$0xff] %v11939_v15  ;;  %6077 = vmatprep.mubr.f32.mxu0 %v1234_v39  ;;  %v1240_v39 = vld [vmem:[%s10873_s17 + $0x2240] sm:$0xff] }
 0x2bb   : > { %v11944_v40 = vpop.f32.mrb[204].mxu1  ;;  %v1244_v56 = vld [vmem:[%s10873_s17 + $0x2260] sm:$0xff] }
 0x2bc   : > { %16285 = vst [vmem:[#allocation38_spill] sm:$0xff] %v11944_v40  ;;  %v11947_v60 = vpop.f32.mrb[204].mxu0  ;;  %v11949_v30 = vpop.f32.mrb[205].mxu1  ;;  %3464 = vmatmul.mubr.f32.gmra.mrb[204].mxu1 %v1229_v46  ;;  %v1248_v40 = vld [vmem:[%s10873_s17 + $0x2280] sm:$0xff] }
 0x2bd   : > { %16286 = vst [vmem:[#allocation39_spill] sm:$0xff] %v11947_v60  ;;  %16287 = vst [vmem:[#allocation40_spill] sm:$0xff] %v11949_v30  ;;  %v11951_v44 = vpop.f32.mrb[205].mxu0  ;;  %6078 = vmatmul.mubr.f32.gmra.mrb[204].mxu0 %v1233_v4  ;;  %3469 = vmatprep.mubr.f32.mxu1 %v1237_v16  ;;  %v1243_v4 = vld [vmem:[%s10873_s17 + $0x2258] sm:$0xff] }
 0x2be   : > { %16288 = vst [vmem:[#allocation41_spill] sm:$0xff] %v11951_v44  ;;  %6083 = vmatprep.mubr.f32.mxu0 %v1241_v14  ;;  %v1247_v16 = vld [vmem:[%s10873_s17 + $0x2278] sm:$0xff] }
 0x2bf   : > { %v11956_v15 = vpop.f32.mrb[206].mxu1  ;;  %v1251_v14 = vld [vmem:[%s10873_s17 + $0x2298] sm:$0xff] }
 0x2c0   : > { %16289 = vst [vmem:[#allocation42_spill] sm:$0xff] %v11956_v15  ;;  %v11959_v58 = vpop.f32.mrb[206].mxu0  ;;  %v11961_v60 = vpop.f32.mrb[207].mxu1  ;;  %3470 = vmatmul.mubr.f32.gmra.mrb[206].mxu1 %v1236_v20  ;;  %v1255_v15 = vld [vmem:[%s10873_s17 + $0x22b8] sm:$0xff]  ;;  %v1777_v20 = vld [vmem:[%s16195_s1 + $0x3c8] sm:$0xff] }
 0x2c1   : > { %16290 = vst [vmem:[#allocation43_spill] sm:$0xff] %v11959_v58  ;;  %16291 = vst [vmem:[#allocation44_spill] sm:$0xff] %v11961_v60  ;;  %v11963_v46 = vpop.f32.mrb[207].mxu0  ;;  %6084 = vmatmul.mubr.f32.gmra.mrb[206].mxu0 %v1240_v39  ;;  %3475 = vmatprep.mubr.f32.mxu1 %v1244_v56  ;;  %v1250_v56 = vld [vmem:[%s10873_s17 + $0x2290] sm:$0xff] }
 0x2c2   : > { %16292 = vst [vmem:[#allocation45_spill] sm:$0xff] %v11963_v46  ;;  %6089 = vmatprep.mubr.f32.mxu0 %v1248_v40  ;;  %v1779_v40 = vld [vmem:[%s16195_s1 + $0x3d8] sm:$0xff]  ;;  %v1258_v46 = vld [vmem:[%s10873_s17 + $0x22d0] sm:$0xff] }
 0x2c3   : > { %v11968_v44 = vpop.f32.mrb[208].mxu1 }
 0x2c4   : > { %16293 = vst [vmem:[#allocation46_spill] sm:$0xff] %v11968_v44  ;;  %v11971_v30 = vpop.f32.mrb[208].mxu0  ;;  %v11973_v58 = vpop.f32.mrb[209].mxu1  ;;  %3476 = vmatmul.mubr.f32.gmra.mrb[208].mxu1 %v1243_v4  ;;  %v9394_v44 = vpack.c.bf16 %v1779_v40, %v1777_v20  ;;  %v1778_v4 = vld [vmem:[%s16195_s1 + $0x3d0] sm:$0xff] }
 0x2c5   : > { %16294 = vst [vmem:[#allocation47_spill] sm:$0xff] %v11971_v30  ;;  %16295 = vst [vmem:[#allocation48_spill] sm:$0xff] %v11973_v58  ;;  %v11981_v39 = vpop.f32.mrb[209].mxu0  ;;  %6090 = vmatmul.mubr.f32.gmra.mrb[208].mxu0 %v1247_v16  ;;  %3481 = vmatprep.mubr.f32.mxu1 %v1251_v14  ;;  %v1776_v30 = vld [vmem:[%s16195_s1 + $0x3c0] sm:$0xff]  ;;  %v1254_v58 = vld [vmem:[%s10873_s17 + $0x22b0] sm:$0xff] }
 0x2c6   : > { %16296 = vst [vmem:[#allocation49_spill] sm:$0xff] %v11981_v39  ;;  %6095 = vmatprep.mubr.f32.mxu0 %v1255_v15  ;;  %v9396_v60 = vpack.c.bf16 %v1778_v4, %v1776_v30  ;;  %v1262_v14 = vld [vmem:[%s10873_s17 + $0x22f0] sm:$0xff]  ;;  %9395 = vmatprep.subr.bf16.mxu1 %v9394_v44  ;;  %v1257_v15 = vld [vmem:[%s10873_s17 + $0x22c8] sm:$0xff] }
 0x2c7   : > { %v11992_v16 = vpop.f32.mrb[210].mxu1  ;;  %v1261_v30 = vld [vmem:[%s10873_s17 + $0x22e8] sm:$0xff] }
 0x2c8   : > { %16297 = vst [vmem:[#allocation50_spill] sm:$0xff] %v11992_v16  ;;  %v11995_v20 = vpop.f32.mrb[210].mxu0  ;;  %v11997_v40 = vpop.f32.mrb[211].mxu1  ;;  %3482 = vmatmul.mubr.f32.gmra.mrb[210].mxu1 %v1250_v56  ;;  %v1265_v4 = vld [vmem:[%s10873_s17 + $0x2308] sm:$0xff] }
 0x2c9   : > { %16298 = vst [vmem:[#allocation51_spill] sm:$0xff] %v11995_v20  ;;  %16299 = vst [vmem:[#allocation52_spill] sm:$0xff] %v11997_v40  ;;  %v11999_v39 = vpop.f32.mrb[211].mxu0  ;;  %6096 = vmatmul.mubr.f32.gmra.mrb[210].mxu0 %v1254_v58  ;;  %3487 = vmatprep.mubr.f32.mxu1 %v1258_v46  ;;  %v1269_v44 = vld [vmem:[%s10873_s17 + $0x2328] sm:$0xff]  ;;  %v1264_v58 = vld [vmem:[%s10873_s17 + $0x2300] sm:$0xff] }
 0x2ca   : > { %16300 = vst [vmem:[#allocation53_spill] sm:$0xff] %v11999_v39  ;;  %6101 = vmatprep.mubr.f32.mxu0 %v1262_v14  ;;  %9397 = vmatpush1.bf16.msra.mxu1 %v9396_v60  ;;  %v1268_v46 = vld [vmem:[%s10873_s17 + $0x2320] sm:$0xff] }
 0x2cb   : > { %v12004_v16 = vpop.f32.mrb[212].mxu1  ;;  %v1272_v60 = vld [vmem:[%s10873_s17 + $0x2340] sm:$0xff] }
 0x2cc   : > { %16301 = vst [vmem:[#allocation54_spill] sm:$0xff] %v12004_v16  ;;  %v12007_v20 = vpop.f32.mrb[212].mxu0  ;;  %v12009_v40 = vpop.f32.mrb[213].mxu1  ;;  %3488 = vmatmul.mubr.f32.gmra.mrb[212].mxu1 %v1257_v15  ;;  %v1276_v16 = vld [vmem:[%s10873_s17 + $0x2360] sm:$0xff] }
 0x2cd   : > { %16302 = vst [vmem:[#allocation55_spill] sm:$0xff] %v12007_v20  ;;  %16303 = vst [vmem:[#allocation56_spill] sm:$0xff] %v12009_v40  ;;  %v12011_v56 = vpop.f32.mrb[213].mxu0  ;;  %6102 = vmatmul.mubr.f32.gmra.mrb[212].mxu0 %v1261_v30  ;;  %3493 = vmatprep.mubr.f32.mxu1 %v1265_v4  ;;  %v1271_v30 = vld [vmem:[%s10873_s17 + $0x2338] sm:$0xff] }
 0x2ce   : > { %16304 = vst [vmem:[#allocation57_spill] sm:$0xff] %v12011_v56  ;;  %6107 = vmatprep.mubr.f32.mxu0 %v1269_v44  ;;  %v1275_v4 = vld [vmem:[%s10873_s17 + $0x2358] sm:$0xff] }
 0x2cf   : > { %v12016_v14 = vpop.f32.mrb[214].mxu1  ;;  %v1279_v44 = vld [vmem:[%s10873_s17 + $0x2378] sm:$0xff] }
 0x2d0   : > { %16305 = vst [vmem:[#allocation58_spill] sm:$0xff] %v12016_v14  ;;  %v12019_v39 = vpop.f32.mrb[214].mxu0  ;;  %v12021_v20 = vpop.f32.mrb[215].mxu1  ;;  %3494 = vmatmul.mubr.f32.gmra.mrb[214].mxu1 %v1264_v58  ;;  %v1283_v14 = vld [vmem:[%s10873_s17 + $0x2398] sm:$0xff] }
 0x2d1   : > { %16306 = vst [vmem:[#allocation59_spill] sm:$0xff] %v12019_v39  ;;  %16307 = vst [vmem:[#allocation60_spill] sm:$0xff] %v12021_v20  ;;  %v12023_v15 = vpop.f32.mrb[215].mxu0  ;;  %6108 = vmatmul.mubr.f32.gmra.mrb[214].mxu0 %v1268_v46  ;;  %3499 = vmatprep.mubr.f32.mxu1 %v1272_v60  ;;  %v1278_v46 = vld [vmem:[%s10873_s17 + $0x2370] sm:$0xff] }
 0x2d2   : > { %16308 = vst [vmem:[#allocation61_spill] sm:$0xff] %v12023_v15  ;;  %6113 = vmatprep.mubr.f32.mxu0 %v1276_v16  ;;  %v1282_v16 = vld [vmem:[%s10873_s17 + $0x2390] sm:$0xff] }
 0x2d3   : > { %v12028_v56 = vpop.f32.mrb[216].mxu1  ;;  %v1286_v60 = vld [vmem:[%s10873_s17 + $0x23b0] sm:$0xff] }
 0x2d4   : > { %16309 = vst [vmem:[#allocation62_spill] sm:$0xff] %v12028_v56  ;;  %v12031_v40 = vpop.f32.mrb[216].mxu0  ;;  %v12033_v39 = vpop.f32.mrb[217].mxu1  ;;  %3500 = vmatmul.mubr.f32.gmra.mrb[216].mxu1 %v1271_v30  ;;  %v1290_v56 = vld [vmem:[%s10873_s17 + $0x23d0] sm:$0xff] }
 0x2d5   : > { %16310 = vst [vmem:[#allocation63_spill] sm:$0xff] %v12031_v40  ;;  %16311 = vst [vmem:[#allocation64_spill] sm:$0xff] %v12033_v39  ;;  %v12035_v58 = vpop.f32.mrb[217].mxu0  ;;  %6114 = vmatmul.mubr.f32.gmra.mrb[216].mxu0 %v1275_v4  ;;  %3505 = vmatprep.mubr.f32.mxu1 %v1279_v44  ;;  %v1285_v4 = vld [vmem:[%s10873_s17 + $0x23a8] sm:$0xff] }
 0x2d6   : > { %16312 = vst [vmem:[#allocation65_spill] sm:$0xff] %v12035_v58  ;;  %6119 = vmatprep.mubr.f32.mxu0 %v1283_v14  ;;  %v1289_v14 = vld [vmem:[%s10873_s17 + $0x23c8] sm:$0xff] }
 0x2d7   : > { %v12040_v15 = vpop.f32.mrb[218].mxu1  ;;  %v1293_v44 = vld [vmem:[%s10873_s17 + $0x23e8] sm:$0xff] }
 0x2d8   : > { %16313 = vst [vmem:[#allocation66_spill] sm:$0xff] %v12040_v15  ;;  %v12043_v20 = vpop.f32.mrb[218].mxu0  ;;  %v12045_v40 = vpop.f32.mrb[219].mxu1  ;;  %3506 = vmatmul.mubr.f32.gmra.mrb[218].mxu1 %v1278_v46  ;;  %v1297_v15 = vld [vmem:[%s10873_s17 + $0x2408] sm:$0xff] }
 0x2d9   : > { %16314 = vst [vmem:[#allocation67_spill] sm:$0xff] %v12043_v20  ;;  %16315 = vst [vmem:[#allocation68_spill] sm:$0xff] %v12045_v40  ;;  %v12047_v30 = vpop.f32.mrb[219].mxu0  ;;  %6120 = vmatmul.mubr.f32.gmra.mrb[218].mxu0 %v1282_v16  ;;  %3511 = vmatprep.mubr.f32.mxu1 %v1286_v60  ;;  %v1292_v16 = vld [vmem:[%s10873_s17 + $0x23e0] sm:$0xff] }
 0x2da   : > { %16316 = vst [vmem:[#allocation69_spill] sm:$0xff] %v12047_v30  ;;  %6125 = vmatprep.mubr.f32.mxu0 %v1290_v56  ;;  %v1296_v56 = vld [vmem:[%s10873_s17 + $0x2400] sm:$0xff] }
 0x2db   : > { %v12052_v58 = vpop.f32.mrb[220].mxu1  ;;  %v1300_v60 = vld [vmem:[%s10873_s17 + $0x2420] sm:$0xff] }
 0x2dc   : > { %16317 = vst [vmem:[#allocation70_spill] sm:$0xff] %v12052_v58  ;;  %v12055_v39 = vpop.f32.mrb[220].mxu0  ;;  %v12057_v20 = vpop.f32.mrb[221].mxu1  ;;  %3512 = vmatmul.mubr.f32.gmra.mrb[220].mxu1 %v1285_v4  ;;  %v1304_v58 = vld [vmem:[%s10873_s17 + $0x2440] sm:$0xff] }
 0x2dd   : > { %16318 = vst [vmem:[#allocation71_spill] sm:$0xff] %v12055_v39  ;;  %16319 = vst [vmem:[#allocation72_spill] sm:$0xff] %v12057_v20  ;;  %v12059_v46 = vpop.f32.mrb[221].mxu0  ;;  %6126 = vmatmul.mubr.f32.gmra.mrb[220].mxu0 %v1289_v14  ;;  %3517 = vmatprep.mubr.f32.mxu1 %v1293_v44  ;;  %v1299_v14 = vld [vmem:[%s10873_s17 + $0x2418] sm:$0xff] }
 0x2de   : > { %16320 = vst [vmem:[#allocation73_spill] sm:$0xff] %v12059_v46  ;;  %6131 = vmatprep.mubr.f32.mxu0 %v1297_v15  ;;  %v1303_v15 = vld [vmem:[%s10873_s17 + $0x2438] sm:$0xff] }
 0x2df   : > { %v12064_v30 = vpop.f32.mrb[222].mxu1  ;;  %v1307_v44 = vld [vmem:[%s10873_s17 + $0x2458] sm:$0xff] }
 0x2e0   : > { %16321 = vst [vmem:[#allocation74_spill] sm:$0xff] %v12064_v30  ;;  %v12067_v40 = vpop.f32.mrb[222].mxu0  ;;  %v12069_v39 = vpop.f32.mrb[223].mxu1  ;;  %3518 = vmatmul.mubr.f32.gmra.mrb[222].mxu1 %v1292_v16  ;;  %v1311_v30 = vld [vmem:[%s10873_s17 + $0x2478] sm:$0xff] }
 0x2e1   : > { %16322 = vst [vmem:[#allocation75_spill] sm:$0xff] %v12067_v40  ;;  %16323 = vst [vmem:[#allocation76_spill] sm:$0xff] %v12069_v39  ;;  %v12071_v4 = vpop.f32.mrb[223].mxu0  ;;  %6132 = vmatmul.mubr.f32.gmra.mrb[222].mxu0 %v1296_v56  ;;  %3523 = vmatprep.mubr.f32.mxu1 %v1300_v60  ;;  %v1306_v56 = vld [vmem:[%s10873_s17 + $0x2450] sm:$0xff] }
 0x2e2   : > { %16324 = vst [vmem:[#allocation77_spill] sm:$0xff] %v12071_v4  ;;  %6137 = vmatprep.mubr.f32.mxu0 %v1304_v58  ;;  %v1310_v58 = vld [vmem:[%s10873_s17 + $0x2470] sm:$0xff] }
 0x2e3   : > { %v12076_v46 = vpop.f32.mrb[224].mxu1  ;;  %v1314_v60 = vld [vmem:[%s10873_s17 + $0x2490] sm:$0xff] }
 0x2e4   : > { %16325 = vst [vmem:[#allocation78_spill] sm:$0xff] %v12076_v46  ;;  %v12079_v20 = vpop.f32.mrb[224].mxu0  ;;  %v12081_v40 = vpop.f32.mrb[225].mxu1  ;;  %3524 = vmatmul.mubr.f32.gmra.mrb[224].mxu1 %v1299_v14  ;;  %v1318_v46 = vld [vmem:[%s10873_s17 + $0x24b0] sm:$0xff] }
 0x2e5   : > { %16326 = vst [vmem:[#allocation79_spill] sm:$0xff] %v12079_v20  ;;  %16327 = vst [vmem:[#allocation80_spill] sm:$0xff] %v12081_v40  ;;  %v12083_v16 = vpop.f32.mrb[225].mxu0  ;;  %6138 = vmatmul.mubr.f32.gmra.mrb[224].mxu0 %v1303_v15  ;;  %3529 = vmatprep.mubr.f32.mxu1 %v1307_v44  ;;  %v1313_v15 = vld [vmem:[%s10873_s17 + $0x2488] sm:$0xff] }
 0x2e6   : > { %16328 = vst [vmem:[#allocation81_spill] sm:$0xff] %v12083_v16  ;;  %6143 = vmatprep.mubr.f32.mxu0 %v1311_v30  ;;  %v1317_v30 = vld [vmem:[%s10873_s17 + $0x24a8] sm:$0xff] }
 0x2e7   : > { %v12088_v4 = vpop.f32.mrb[226].mxu1  ;;  %v1321_v44 = vld [vmem:[%s10873_s17 + $0x24c8] sm:$0xff] }
 0x2e8   : > { %16329 = vst [vmem:[#allocation82_spill] sm:$0xff] %v12088_v4  ;;  %v12091_v39 = vpop.f32.mrb[226].mxu0  ;;  %v12093_v20 = vpop.f32.mrb[227].mxu1  ;;  %3530 = vmatmul.mubr.f32.gmra.mrb[226].mxu1 %v1306_v56  ;;  %v1325_v4 = vld [vmem:[%s10873_s17 + $0x24e8] sm:$0xff] }
 0x2e9   : > { %16330 = vst [vmem:[#allocation83_spill] sm:$0xff] %v12091_v39  ;;  %16331 = vst [vmem:[#allocation84_spill] sm:$0xff] %v12093_v20  ;;  %v12095_v14 = vpop.f32.mrb[227].mxu0  ;;  %6144 = vmatmul.mubr.f32.gmra.mrb[226].mxu0 %v1310_v58  ;;  %3535 = vmatprep.mubr.f32.mxu1 %v1314_v60  ;;  %v1320_v58 = vld [vmem:[%s10873_s17 + $0x24c0] sm:$0xff] }
 0x2ea   : > { %16332 = vst [vmem:[#allocation85_spill] sm:$0xff] %v12095_v14  ;;  %6149 = vmatprep.mubr.f32.mxu0 %v1318_v46  ;;  %v1324_v46 = vld [vmem:[%s10873_s17 + $0x24e0] sm:$0xff] }
 0x2eb   : > { %v12100_v16 = vpop.f32.mrb[228].mxu1  ;;  %v1328_v60 = vld [vmem:[%s10873_s17 + $0x2500] sm:$0xff] }
 0x2ec   : > { %16333 = vst [vmem:[#allocation86_spill] sm:$0xff] %v12100_v16  ;;  %v12103_v40 = vpop.f32.mrb[228].mxu0  ;;  %v12105_v39 = vpop.f32.mrb[229].mxu1  ;;  %3536 = vmatmul.mubr.f32.gmra.mrb[228].mxu1 %v1313_v15  ;;  %v1332_v16 = vld [vmem:[%s10873_s17 + $0x2520] sm:$0xff] }
 0x2ed   : > { %16334 = vst [vmem:[#allocation87_spill] sm:$0xff] %v12103_v40  ;;  %16335 = vst [vmem:[#allocation88_spill] sm:$0xff] %v12105_v39  ;;  %v12107_v56 = vpop.f32.mrb[229].mxu0  ;;  %6150 = vmatmul.mubr.f32.gmra.mrb[228].mxu0 %v1317_v30  ;;  %3541 = vmatprep.mubr.f32.mxu1 %v1321_v44  ;;  %v1327_v30 = vld [vmem:[%s10873_s17 + $0x24f8] sm:$0xff] }
 0x2ee   : > { %16336 = vst [vmem:[#allocation89_spill] sm:$0xff] %v12107_v56  ;;  %6155 = vmatprep.mubr.f32.mxu0 %v1325_v4  ;;  %v1331_v4 = vld [vmem:[%s10873_s17 + $0x2518] sm:$0xff] }
 0x2ef   : > { %v12112_v14 = vpop.f32.mrb[230].mxu1  ;;  %v1335_v44 = vld [vmem:[%s10873_s17 + $0x2538] sm:$0xff] }
 0x2f0   : > { %16337 = vst [vmem:[#allocation90_spill] sm:$0xff] %v12112_v14  ;;  %v12115_v20 = vpop.f32.mrb[230].mxu0  ;;  %v12117_v40 = vpop.f32.mrb[231].mxu1  ;;  %3542 = vmatmul.mubr.f32.gmra.mrb[230].mxu1 %v1320_v58  ;;  %v1339_v14 = vld [vmem:[%s10873_s17 + $0x2558] sm:$0xff] }
 0x2f1   : > { %16338 = vst [vmem:[#allocation91_spill] sm:$0xff] %v12115_v20  ;;  %16339 = vst [vmem:[#allocation92_spill] sm:$0xff] %v12117_v40  ;;  %v12119_v15 = vpop.f32.mrb[231].mxu0  ;;  %6156 = vmatmul.mubr.f32.gmra.mrb[230].mxu0 %v1324_v46  ;;  %3547 = vmatprep.mubr.f32.mxu1 %v1328_v60  ;;  %v1334_v46 = vld [vmem:[%s10873_s17 + $0x2530] sm:$0xff] }
 0x2f2   : > { %16340 = vst [vmem:[#allocation93_spill] sm:$0xff] %v12119_v15  ;;  %6161 = vmatprep.mubr.f32.mxu0 %v1332_v16  ;;  %v1338_v16 = vld [vmem:[%s10873_s17 + $0x2550] sm:$0xff] }
 0x2f3   : > { %v12124_v56 = vpop.f32.mrb[232].mxu1  ;;  %v1342_v60 = vld [vmem:[%s10873_s17 + $0x2570] sm:$0xff] }
 0x2f4   : > { %16341 = vst [vmem:[#allocation94_spill] sm:$0xff] %v12124_v56  ;;  %v12127_v39 = vpop.f32.mrb[232].mxu0  ;;  %v12129_v20 = vpop.f32.mrb[233].mxu1  ;;  %3548 = vmatmul.mubr.f32.gmra.mrb[232].mxu1 %v1327_v30  ;;  %v1346_v56 = vld [vmem:[%s10873_s17 + $0x2590] sm:$0xff] }
 0x2f5   : > { %16342 = vst [vmem:[#allocation95_spill] sm:$0xff] %v12127_v39  ;;  %16343 = vst [vmem:[#allocation96_spill] sm:$0xff] %v12129_v20  ;;  %v12131_v58 = vpop.f32.mrb[233].mxu0  ;;  %6162 = vmatmul.mubr.f32.gmra.mrb[232].mxu0 %v1331_v4  ;;  %3553 = vmatprep.mubr.f32.mxu1 %v1335_v44  ;;  %v1341_v4 = vld [vmem:[%s10873_s17 + $0x2568] sm:$0xff]  ;;  %v1783_v44 = vld [vmem:[%s16195_s1 + $0x3f8] sm:$0xff] }
 0x2f6   : > { %16344 = vst [vmem:[#allocation97_spill] sm:$0xff] %v12131_v58  ;;  %6167 = vmatprep.mubr.f32.mxu0 %v1339_v14  ;;  %v1781_v14 = vld [vmem:[%s16195_s1 + $0x3e8] sm:$0xff]  ;;  %v1352_v20 = vld [vmem:[%s10873_s17 + $0x25c0] sm:$0xff] }
 0x2f7   : > { %v12136_v15 = vpop.f32.mrb[234].mxu1 }
 0x2f8   : > { %16345 = vst [vmem:[#allocation98_spill] sm:$0xff] %v12136_v15  ;;  %v12139_v40 = vpop.f32.mrb[234].mxu0  ;;  %v12141_v39 = vpop.f32.mrb[235].mxu1  ;;  %3554 = vmatmul.mubr.f32.gmra.mrb[234].mxu1 %v1334_v46  ;;  %v1345_v15 = vld [vmem:[%s10873_s17 + $0x2588] sm:$0xff] }
 0x2f9   : > { %16346 = vst [vmem:[#allocation99_spill] sm:$0xff] %v12139_v40  ;;  %16347 = vst [vmem:[#allocation100_spill] sm:$0xff] %v12141_v39  ;;  %v12143_v30 = vpop.f32.mrb[235].mxu0  ;;  %6168 = vmatmul.mubr.f32.gmra.mrb[234].mxu0 %v1338_v16  ;;  %3559 = vmatprep.mubr.f32.mxu1 %v1342_v60  ;;  %v1349_v40 = vld [vmem:[%s10873_s17 + $0x25a8] sm:$0xff]  ;;  %v9398_v39 = vpack.c.bf16 %v1783_v44, %v1781_v14  ;;  %v1780_v60 = vld [vmem:[%s16195_s1 + $0x3e0] sm:$0xff] }
 0x2fa   : > { %16348 = vst [vmem:[#allocation101_spill] sm:$0xff] %v12143_v30  ;;  %6173 = vmatprep.mubr.f32.mxu0 %v1346_v56  ;;  %v1353_v16 = vld [vmem:[%s10873_s17 + $0x25c8] sm:$0xff]  ;;  %v1782_v30 = vld [vmem:[%s16195_s1 + $0x3f0] sm:$0xff] }
 0x2fb   : > { %v12154_v46 = vpop.f32.mrb[236].mxu1  ;;  %9399 = vmatprep.subr.bf16.mxu1 %v9398_v39  ;;  %v9400_v14 = vpack.c.bf16 %v1782_v30, %v1780_v60  ;;  %v1367_v60 = vld [vmem:[%s10873_s17 + $0x2638] sm:$0xff] }
 0x2fc   : > { %16349 = vst [vmem:[#allocation102_spill] sm:$0xff] %v12154_v46  ;;  %v12163_v58 = vpop.f32.mrb[236].mxu0  ;;  %v12165_v56 = vpop.f32.mrb[237].mxu1  ;;  %3560 = vmatmul.mubr.f32.gmra.mrb[236].mxu1 %v1341_v4  ;;  %v1348_v46 = vld [vmem:[%s10873_s17 + $0x25a0] sm:$0xff]  ;;  %v1363_v4 = vld [vmem:[%s10873_s17 + $0x2618] sm:$0xff] }
 0x2fd   : > { %16350 = vst [vmem:[#allocation103_spill] sm:$0xff] %v12163_v58  ;;  %16351 = vst [vmem:[#allocation104_spill] sm:$0xff] %v12165_v56  ;;  %v12167_v44 = vpop.f32.mrb[237].mxu0  ;;  %6174 = vmatmul.mubr.f32.gmra.mrb[236].mxu0 %v1345_v15  ;;  %3565 = vmatprep.mubr.f32.mxu1 %v1349_v40  ;;  %v1360_v58 = vld [vmem:[%s10873_s17 + $0x2600] sm:$0xff]  ;;  %v1355_v40 = vld [vmem:[%s10873_s17 + $0x25d8] sm:$0xff] }
 0x2fe   : > { %16352 = vst [vmem:[#allocation105_spill] sm:$0xff] %v12167_v44  ;;  %6179 = vmatprep.mubr.f32.mxu0 %v1353_v16  ;;  %9401 = vmatpush1.bf16.msra.mxu1 %v9400_v14  ;;  %v1359_v15 = vld [vmem:[%s10873_s17 + $0x25f8] sm:$0xff] }
 0x2ff   : > { %v12172_v28 = vpop.f32.mrb[238].mxu1 }
 0x300   : > { %16353 = vst [vmem:[#allocation106_spill] sm:$0xff] %v12172_v28  ;;  %v12175_v56 = vpop.f32.mrb[238].mxu0  ;;  %v12177_v39 = vpop.f32.mrb[239].mxu1  ;;  %3566 = vmatmul.mubr.f32.gmra.mrb[238].mxu1 %v1348_v46 }
 0x301   : > { %16354 = vst [vmem:[#allocation107_spill] sm:$0xff] %v12175_v56  ;;  %16355 = vst [vmem:[#allocation108_spill] sm:$0xff] %v12177_v39  ;;  %v12179_v30 = vpop.f32.mrb[239].mxu0  ;;  %6180 = vmatmul.mubr.f32.gmra.mrb[238].mxu0 %v1352_v20  ;;  %3571 = vmatprep.mubr.f32.mxu1 %v1356_v24  ;;  %v1362_v24 = vld [vmem:[%s10873_s17 + $0x2610] sm:$0xff] }
 0x302   : > { %16356 = vst [vmem:[#allocation109_spill] sm:$0xff] %v12179_v30  ;;  %6185 = vmatprep.mubr.f32.mxu0 %v1360_v58  ;;  %v1366_v20 = vld [vmem:[%s10873_s17 + $0x2630] sm:$0xff] }
 0x303   : > { %v12184_v16 = vpop.f32.mrb[240].mxu1  ;;  %v1370_v58 = vld [vmem:[%s10873_s17 + $0x2650] sm:$0xff] }
 0x304   : > { %16357 = vst [vmem:[#allocation110_spill] sm:$0xff] %v12184_v16  ;;  %v12187_v14 = vpop.f32.mrb[240].mxu0  ;;  %v12189_v56 = vpop.f32.mrb[241].mxu1  ;;  %3572 = vmatmul.mubr.f32.gmra.mrb[240].mxu1 %v1355_v40  ;;  %v1374_v16 = vld [vmem:[%s10873_s17 + $0x2670] sm:$0xff] }
 0x305   : > { %16358 = vst [vmem:[#allocation111_spill] sm:$0xff] %v12187_v14  ;;  %16359 = vst [vmem:[#allocation112_spill] sm:$0xff] %v12189_v56  ;;  %v12191_v46 = vpop.f32.mrb[241].mxu0  ;;  %6186 = vmatmul.mubr.f32.gmra.mrb[240].mxu0 %v1359_v15  ;;  %3577 = vmatprep.mubr.f32.mxu1 %v1363_v4  ;;  %v1369_v15 = vld [vmem:[%s10873_s17 + $0x2648] sm:$0xff] }
 0x306   : > { %16360 = vst [vmem:[#allocation113_spill] sm:$0xff] %v12191_v46  ;;  %6191 = vmatprep.mubr.f32.mxu0 %v1367_v60  ;;  %v1373_v4 = vld [vmem:[%s10873_s17 + $0x2668] sm:$0xff] }
 0x307   : > { %v12196_v30 = vpop.f32.mrb[242].mxu1  ;;  %v1377_v60 = vld [vmem:[%s10873_s17 + $0x2688] sm:$0xff] }
 0x308   : > { %16361 = vst [vmem:[#allocation114_spill] sm:$0xff] %v12196_v30  ;;  %v12199_v39 = vpop.f32.mrb[242].mxu0  ;;  %v12201_v14 = vpop.f32.mrb[243].mxu1  ;;  %3578 = vmatmul.mubr.f32.gmra.mrb[242].mxu1 %v1362_v24  ;;  %v1381_v30 = vld [vmem:[%s10873_s17 + $0x26a8] sm:$0xff] }
 0x309   : > { %16362 = vst [vmem:[#allocation115_spill] sm:$0xff] %v12199_v39  ;;  %16363 = vst [vmem:[#allocation116_spill] sm:$0xff] %v12201_v14  ;;  %v12203_v40 = vpop.f32.mrb[243].mxu0  ;;  %6192 = vmatmul.mubr.f32.gmra.mrb[242].mxu0 %v1366_v20  ;;  %3583 = vmatprep.mubr.f32.mxu1 %v1370_v58  ;;  %v1376_v20 = vld [vmem:[%s10873_s17 + $0x2680] sm:$0xff] }
 0x30a   : > { %16364 = vst [vmem:[#allocation117_spill] sm:$0xff] %v12203_v40  ;;  %6197 = vmatprep.mubr.f32.mxu0 %v1374_v16  ;;  %v1380_v16 = vld [vmem:[%s10873_s17 + $0x26a0] sm:$0xff] }
 0x30b   : > { %v12208_v46 = vpop.f32.mrb[244].mxu1  ;;  %v1384_v58 = vld [vmem:[%s10873_s17 + $0x26c0] sm:$0xff] }
 0x30c   : > { %16365 = vst [vmem:[#allocation118_spill] sm:$0xff] %v12208_v46  ;;  %v12211_v56 = vpop.f32.mrb[244].mxu0  ;;  %v12213_v39 = vpop.f32.mrb[245].mxu1  ;;  %3584 = vmatmul.mubr.f32.gmra.mrb[244].mxu1 %v1369_v15  ;;  %v1388_v46 = vld [vmem:[%s10873_s17 + $0x26e0] sm:$0xff] }
 0x30d   : > { %16366 = vst [vmem:[#allocation119_spill] sm:$0xff] %v12211_v56  ;;  %16367 = vst [vmem:[#allocation120_spill] sm:$0xff] %v12213_v39  ;;  %v12215_v24 = vpop.f32.mrb[245].mxu0  ;;  %6198 = vmatmul.mubr.f32.gmra.mrb[244].mxu0 %v1373_v4  ;;  %3589 = vmatprep.mubr.f32.mxu1 %v1377_v60  ;;  %v1383_v4 = vld [vmem:[%s10873_s17 + $0x26b8] sm:$0xff] }
 0x30e   : > { %16368 = vst [vmem:[#allocation121_spill] sm:$0xff] %v12215_v24  ;;  %6203 = vmatprep.mubr.f32.mxu0 %v1381_v30  ;;  %v1387_v30 = vld [vmem:[%s10873_s17 + $0x26d8] sm:$0xff] }
 0x30f   : > { %v12220_v40 = vpop.f32.mrb[246].mxu1  ;;  %v1391_v60 = vld [vmem:[%s10873_s17 + $0x26f8] sm:$0xff] }
 0x310   : > { %16369 = vst [vmem:[#allocation122_spill] sm:$0xff] %v12220_v40  ;;  %v12223_v14 = vpop.f32.mrb[246].mxu0  ;;  %v12225_v56 = vpop.f32.mrb[247].mxu1  ;;  %3590 = vmatmul.mubr.f32.gmra.mrb[246].mxu1 %v1376_v20  ;;  %v1395_v40 = vld [vmem:[%s10873_s17 + $0x2718] sm:$0xff] }
 0x311   : > { %16370 = vst [vmem:[#allocation123_spill] sm:$0xff] %v12223_v14  ;;  %16371 = vst [vmem:[#allocation124_spill] sm:$0xff] %v12225_v56  ;;  %v12227_v15 = vpop.f32.mrb[247].mxu0  ;;  %6204 = vmatmul.mubr.f32.gmra.mrb[246].mxu0 %v1380_v16  ;;  %3595 = vmatprep.mubr.f32.mxu1 %v1384_v58  ;;  %v1390_v16 = vld [vmem:[%s10873_s17 + $0x26f0] sm:$0xff] }
 0x312   : > { %16372 = vst [vmem:[#allocation125_spill] sm:$0xff] %v12227_v15  ;;  %6209 = vmatprep.mubr.f32.mxu0 %v1388_v46  ;;  %v1394_v46 = vld [vmem:[%s10873_s17 + $0x2710] sm:$0xff] }
 0x313   : > { %v12232_v24 = vpop.f32.mrb[248].mxu1  ;;  %v1398_v58 = vld [vmem:[%s10873_s17 + $0x2730] sm:$0xff] }
 0x314   : > { %16373 = vst [vmem:[#allocation126_spill] sm:$0xff] %v12232_v24  ;;  %v12235_v39 = vpop.f32.mrb[248].mxu0  ;;  %v12237_v14 = vpop.f32.mrb[249].mxu1  ;;  %3596 = vmatmul.mubr.f32.gmra.mrb[248].mxu1 %v1383_v4  ;;  %v1402_v24 = vld [vmem:[%s10873_s17 + $0x2750] sm:$0xff] }
 0x315   : > { %16374 = vst [vmem:[#allocation127_spill] sm:$0xff] %v12235_v39  ;;  %16375 = vst [vmem:[#allocation128_spill] sm:$0xff] %v12237_v14  ;;  %v12239_v20 = vpop.f32.mrb[249].mxu0  ;;  %6210 = vmatmul.mubr.f32.gmra.mrb[248].mxu0 %v1387_v30  ;;  %3601 = vmatprep.mubr.f32.mxu1 %v1391_v60  ;;  %v1397_v30 = vld [vmem:[%s10873_s17 + $0x2728] sm:$0xff] }
 0x316   : > { %16376 = vst [vmem:[#allocation129_spill] sm:$0xff] %v12239_v20  ;;  %6215 = vmatprep.mubr.f32.mxu0 %v1395_v40  ;;  %v1401_v40 = vld [vmem:[%s10873_s17 + $0x2748] sm:$0xff] }
 0x317   : > { %v12244_v15 = vpop.f32.mrb[250].mxu1  ;;  %v1405_v60 = vld [vmem:[%s10873_s17 + $0x2768] sm:$0xff] }
 0x318   : > { %16377 = vst [vmem:[#allocation130_spill] sm:$0xff] %v12244_v15  ;;  %v12247_v56 = vpop.f32.mrb[250].mxu0  ;;  %v12249_v39 = vpop.f32.mrb[251].mxu1  ;;  %3602 = vmatmul.mubr.f32.gmra.mrb[250].mxu1 %v1390_v16  ;;  %v1409_v15 = vld [vmem:[%s10873_s17 + $0x2788] sm:$0xff] }
 0x319   : > { %16378 = vst [vmem:[#allocation131_spill] sm:$0xff] %v12247_v56  ;;  %16379 = vst [vmem:[#allocation132_spill] sm:$0xff] %v12249_v39  ;;  %v12251_v4 = vpop.f32.mrb[251].mxu0  ;;  %6216 = vmatmul.mubr.f32.gmra.mrb[250].mxu0 %v1394_v46  ;;  %3607 = vmatprep.mubr.f32.mxu1 %v1398_v58  ;;  %v1404_v46 = vld [vmem:[%s10873_s17 + $0x2760] sm:$0xff] }
 0x31a   : > { %16380 = vst [vmem:[#allocation133_spill] sm:$0xff] %v12251_v4  ;;  %6221 = vmatprep.mubr.f32.mxu0 %v1402_v24  ;;  %v1408_v24 = vld [vmem:[%s10873_s17 + $0x2780] sm:$0xff] }
 0x31b   : > { %v12256_v20 = vpop.f32.mrb[252].mxu1  ;;  %v1412_v58 = vld [vmem:[%s10873_s17 + $0x27a0] sm:$0xff] }
 0x31c   : > { %16381 = vst [vmem:[#allocation134_spill] sm:$0xff] %v12256_v20  ;;  %v12259_v14 = vpop.f32.mrb[252].mxu0  ;;  %v12261_v56 = vpop.f32.mrb[253].mxu1  ;;  %3608 = vmatmul.mubr.f32.gmra.mrb[252].mxu1 %v1397_v30  ;;  %v1416_v20 = vld [vmem:[%s10873_s17 + $0x27c0] sm:$0xff] }
 0x31d   : > { %16382 = vst [vmem:[#allocation135_spill] sm:$0xff] %v12259_v14  ;;  %16383 = vst [vmem:[#allocation136_spill] sm:$0xff] %v12261_v56  ;;  %v12263_v16 = vpop.f32.mrb[253].mxu0  ;;  %6222 = vmatmul.mubr.f32.gmra.mrb[252].mxu0 %v1401_v40  ;;  %3613 = vmatprep.mubr.f32.mxu1 %v1405_v60  ;;  %v1411_v40 = vld [vmem:[%s10873_s17 + $0x2798] sm:$0xff] }
 0x31e   : > { %16384 = vst [vmem:[#allocation137_spill] sm:$0xff] %v12263_v16  ;;  %6227 = vmatprep.mubr.f32.mxu0 %v1409_v15  ;;  %v1415_v15 = vld [vmem:[%s10873_s17 + $0x27b8] sm:$0xff] }
 0x31f   : > { %v12268_v4 = vpop.f32.mrb[254].mxu1  ;;  %v1419_v60 = vld [vmem:[%s10873_s17 + $0x27d8] sm:$0xff] }
 0x320   : > { %16385 = vst [vmem:[#allocation138_spill] sm:$0xff] %v12268_v4  ;;  %v12271_v39 = vpop.f32.mrb[254].mxu0  ;;  %v12273_v14 = vpop.f32.mrb[255].mxu1  ;;  %3614 = vmatmul.mubr.f32.gmra.mrb[254].mxu1 %v1404_v46  ;;  %v1423_v4 = vld [vmem:[%s10873_s17 + $0x27f8] sm:$0xff] }
 0x321   : > { %16386 = vst [vmem:[#allocation139_spill] sm:$0xff] %v12271_v39  ;;  %16387 = vst [vmem:[#allocation140_spill] sm:$0xff] %v12273_v14  ;;  %v12275_v30 = vpop.f32.mrb[255].mxu0  ;;  %6228 = vmatmul.mubr.f32.gmra.mrb[254].mxu0 %v1408_v24  ;;  %3619 = vmatprep.mubr.f32.mxu1 %v1412_v58  ;;  %v1418_v24 = vld [vmem:[%s10873_s17 + $0x27d0] sm:$0xff] }
 0x322   : > { %16388 = vst [vmem:[#allocation141_spill] sm:$0xff] %v12275_v30  ;;  %6233 = vmatprep.mubr.f32.mxu0 %v1416_v20  ;;  %v1422_v20 = vld [vmem:[%s10873_s17 + $0x27f0] sm:$0xff] }
 0x323   : > { %v12280_v16 = vpop.f32.mrb[0].mxu1  ;;  %v1426_v58 = vld [vmem:[%s10873_s17 + $0x2810] sm:$0xff] }
 0x324   : > { %16389 = vst [vmem:[#allocation142_spill] sm:$0xff] %v12280_v16  ;;  %v12283_v56 = vpop.f32.mrb[0].mxu0  ;;  %v12285_v39 = vpop.f32.mrb[1].mxu1  ;;  %3620 = vmatmul.mubr.f32.gmra.mrb[0].mxu1 %v1411_v40  ;;  %v1430_v16 = vld [vmem:[%s10873_s17 + $0x2830] sm:$0xff] }
 0x325   : > { %16390 = vst [vmem:[#allocation143_spill] sm:$0xff] %v12283_v56  ;;  %16391 = vst [vmem:[#allocation144_spill] sm:$0xff] %v12285_v39  ;;  %v12287_v46 = vpop.f32.mrb[1].mxu0  ;;  %6234 = vmatmul.mubr.f32.gmra.mrb[0].mxu0 %v1415_v15  ;;  %3625 = vmatprep.mubr.f32.mxu1 %v1419_v60  ;;  %v1425_v15 = vld [vmem:[%s10873_s17 + $0x2808] sm:$0xff] }
 0x326   : > { %16392 = vst [vmem:[#allocation145_spill] sm:$0xff] %v12287_v46  ;;  %6239 = vmatprep.mubr.f32.mxu0 %v1423_v4  ;;  %v1429_v4 = vld [vmem:[%s10873_s17 + $0x2828] sm:$0xff] }
 0x327   : > { %v12292_v30 = vpop.f32.mrb[2].mxu1  ;;  %v1433_v60 = vld [vmem:[%s10873_s17 + $0x2848] sm:$0xff] }
 0x328   : > { %16393 = vst [vmem:[#allocation146_spill] sm:$0xff] %v12292_v30  ;;  %v12295_v14 = vpop.f32.mrb[2].mxu0  ;;  %v12297_v56 = vpop.f32.mrb[3].mxu1  ;;  %3626 = vmatmul.mubr.f32.gmra.mrb[2].mxu1 %v1418_v24  ;;  %v1437_v30 = vld [vmem:[%s10873_s17 + $0x2868] sm:$0xff] }
 0x329   : > { %16394 = vst [vmem:[#allocation147_spill] sm:$0xff] %v12295_v14  ;;  %16395 = vst [vmem:[#allocation148_spill] sm:$0xff] %v12297_v56  ;;  %v12299_v40 = vpop.f32.mrb[3].mxu0  ;;  %6240 = vmatmul.mubr.f32.gmra.mrb[2].mxu0 %v1422_v20  ;;  %3631 = vmatprep.mubr.f32.mxu1 %v1426_v58  ;;  %v1432_v20 = vld [vmem:[%s10873_s17 + $0x2840] sm:$0xff] }
 0x32a   : > { %16396 = vst [vmem:[#allocation149_spill] sm:$0xff] %v12299_v40  ;;  %6245 = vmatprep.mubr.f32.mxu0 %v1430_v16  ;;  %v1436_v16 = vld [vmem:[%s10873_s17 + $0x2860] sm:$0xff] }
 0x32b   : > { %v12304_v46 = vpop.f32.mrb[4].mxu1  ;;  %v1440_v58 = vld [vmem:[%s10873_s17 + $0x2880] sm:$0xff] }
 0x32c   : > { %16397 = vst [vmem:[#allocation150_spill] sm:$0xff] %v12304_v46  ;;  %v12307_v39 = vpop.f32.mrb[4].mxu0  ;;  %v12309_v14 = vpop.f32.mrb[5].mxu1  ;;  %3632 = vmatmul.mubr.f32.gmra.mrb[4].mxu1 %v1425_v15  ;;  %v1444_v46 = vld [vmem:[%s10873_s17 + $0x28a0] sm:$0xff] }
 0x32d   : > { %16398 = vst [vmem:[#allocation151_spill] sm:$0xff] %v12307_v39  ;;  %16399 = vst [vmem:[#allocation152_spill] sm:$0xff] %v12309_v14  ;;  %v12311_v24 = vpop.f32.mrb[5].mxu0  ;;  %6246 = vmatmul.mubr.f32.gmra.mrb[4].mxu0 %v1429_v4  ;;  %3637 = vmatprep.mubr.f32.mxu1 %v1433_v60  ;;  %v1439_v4 = vld [vmem:[%s10873_s17 + $0x2878] sm:$0xff] }
 0x32e   : > { %16400 = vst [vmem:[#allocation153_spill] sm:$0xff] %v12311_v24  ;;  %6251 = vmatprep.mubr.f32.mxu0 %v1437_v30  ;;  %v1443_v30 = vld [vmem:[%s10873_s17 + $0x2898] sm:$0xff] }
 0x32f   : > { %v12316_v40 = vpop.f32.mrb[6].mxu1  ;;  %v1447_v60 = vld [vmem:[%s10873_s17 + $0x28b8] sm:$0xff] }
 0x330   : > { %16401 = vst [vmem:[#allocation154_spill] sm:$0xff] %v12316_v40  ;;  %v12319_v56 = vpop.f32.mrb[6].mxu0  ;;  %v12321_v39 = vpop.f32.mrb[7].mxu1  ;;  %3638 = vmatmul.mubr.f32.gmra.mrb[6].mxu1 %v1432_v20  ;;  %v1451_v40 = vld [vmem:[%s10873_s17 + $0x28d8] sm:$0xff] }
 0x331   : > { %16402 = vst [vmem:[#allocation155_spill] sm:$0xff] %v12319_v56  ;;  %16403 = vst [vmem:[#allocation156_spill] sm:$0xff] %v12321_v39  ;;  %v12323_v15 = vpop.f32.mrb[7].mxu0  ;;  %6252 = vmatmul.mubr.f32.gmra.mrb[6].mxu0 %v1436_v16  ;;  %3643 = vmatprep.mubr.f32.mxu1 %v1440_v58  ;;  %v1446_v16 = vld [vmem:[%s10873_s17 + $0x28b0] sm:$0xff] }
 0x332   : > { %16404 = vst [vmem:[#allocation157_spill] sm:$0xff] %v12323_v15  ;;  %6257 = vmatprep.mubr.f32.mxu0 %v1444_v46  ;;  %v1450_v46 = vld [vmem:[%s10873_s17 + $0x28d0] sm:$0xff] }
 0x333   : > { %v12328_v24 = vpop.f32.mrb[8].mxu1  ;;  %v1454_v58 = vld [vmem:[%s10873_s17 + $0x28f0] sm:$0xff] }
 0x334   : > { %16405 = vst [vmem:[#allocation158_spill] sm:$0xff] %v12328_v24  ;;  %v12331_v14 = vpop.f32.mrb[8].mxu0  ;;  %v12333_v56 = vpop.f32.mrb[9].mxu1  ;;  %3644 = vmatmul.mubr.f32.gmra.mrb[8].mxu1 %v1439_v4  ;;  %v1458_v24 = vld [vmem:[%s10873_s17 + $0x2910] sm:$0xff] }
 0x335   : > { %16406 = vst [vmem:[#allocation159_spill] sm:$0xff] %v12331_v14  ;;  %16407 = vst [vmem:[#allocation160_spill] sm:$0xff] %v12333_v56  ;;  %v12335_v20 = vpop.f32.mrb[9].mxu0  ;;  %6258 = vmatmul.mubr.f32.gmra.mrb[8].mxu0 %v1443_v30  ;;  %3649 = vmatprep.mubr.f32.mxu1 %v1447_v60  ;;  %v1453_v30 = vld [vmem:[%s10873_s17 + $0x28e8] sm:$0xff] }
 0x336   : > { %16408 = vst [vmem:[#allocation161_spill] sm:$0xff] %v12335_v20  ;;  %6263 = vmatprep.mubr.f32.mxu0 %v1451_v40  ;;  %v1457_v40 = vld [vmem:[%s10873_s17 + $0x2908] sm:$0xff] }
 0x337   : > { %v12340_v15 = vpop.f32.mrb[10].mxu1  ;;  %v1461_v60 = vld [vmem:[%s10873_s17 + $0x2928] sm:$0xff] }
 0x338   : > { %16409 = vst [vmem:[#allocation162_spill] sm:$0xff] %v12340_v15  ;;  %v12343_v39 = vpop.f32.mrb[10].mxu0  ;;  %v12345_v14 = vpop.f32.mrb[11].mxu1  ;;  %3650 = vmatmul.mubr.f32.gmra.mrb[10].mxu1 %v1446_v16  ;;  %v1465_v15 = vld [vmem:[%s10873_s17 + $0x2948] sm:$0xff] }
 0x339   : > { %16410 = vst [vmem:[#allocation163_spill] sm:$0xff] %v12343_v39  ;;  %16411 = vst [vmem:[#allocation164_spill] sm:$0xff] %v12345_v14  ;;  %v12347_v4 = vpop.f32.mrb[11].mxu0  ;;  %6264 = vmatmul.mubr.f32.gmra.mrb[10].mxu0 %v1450_v46  ;;  %3655 = vmatprep.mubr.f32.mxu1 %v1454_v58  ;;  %v1460_v46 = vld [vmem:[%s10873_s17 + $0x2920] sm:$0xff] }
 0x33a   : > { %16412 = vst [vmem:[#allocation165_spill] sm:$0xff] %v12347_v4  ;;  %6269 = vmatprep.mubr.f32.mxu0 %v1458_v24  ;;  %v1464_v24 = vld [vmem:[%s10873_s17 + $0x2940] sm:$0xff] }
 0x33b   : > { %v12352_v20 = vpop.f32.mrb[12].mxu1  ;;  %v1468_v58 = vld [vmem:[%s10873_s17 + $0x2960] sm:$0xff] }
 0x33c   : > { %16413 = vst [vmem:[#allocation166_spill] sm:$0xff] %v12352_v20  ;;  %v12355_v56 = vpop.f32.mrb[12].mxu0  ;;  %v12357_v39 = vpop.f32.mrb[13].mxu1  ;;  %3656 = vmatmul.mubr.f32.gmra.mrb[12].mxu1 %v1453_v30  ;;  %v1472_v20 = vld [vmem:[%s10873_s17 + $0x2980] sm:$0xff] }
 0x33d   : > { %16414 = vst [vmem:[#allocation167_spill] sm:$0xff] %v12355_v56  ;;  %16415 = vst [vmem:[#allocation168_spill] sm:$0xff] %v12357_v39  ;;  %v12359_v16 = vpop.f32.mrb[13].mxu0  ;;  %6270 = vmatmul.mubr.f32.gmra.mrb[12].mxu0 %v1457_v40  ;;  %3661 = vmatprep.mubr.f32.mxu1 %v1461_v60  ;;  %v1467_v40 = vld [vmem:[%s10873_s17 + $0x2958] sm:$0xff] }
 0x33e   : > { %16416 = vst [vmem:[#allocation169_spill] sm:$0xff] %v12359_v16  ;;  %6275 = vmatprep.mubr.f32.mxu0 %v1465_v15  ;;  %v1471_v15 = vld [vmem:[%s10873_s17 + $0x2978] sm:$0xff] }
 0x33f   : > { %v12364_v4 = vpop.f32.mrb[14].mxu1  ;;  %v1475_v60 = vld [vmem:[%s10873_s17 + $0x2998] sm:$0xff] }
 0x340   : > { %16417 = vst [vmem:[#allocation170_spill] sm:$0xff] %v12364_v4  ;;  %v12367_v14 = vpop.f32.mrb[14].mxu0  ;;  %v12369_v56 = vpop.f32.mrb[15].mxu1  ;;  %3662 = vmatmul.mubr.f32.gmra.mrb[14].mxu1 %v1460_v46  ;;  %v1479_v4 = vld [vmem:[%s10873_s17 + $0x29b8] sm:$0xff] }
 0x341   : > { %16418 = vst [vmem:[#allocation171_spill] sm:$0xff] %v12367_v14  ;;  %16419 = vst [vmem:[#allocation172_spill] sm:$0xff] %v12369_v56  ;;  %v12371_v30 = vpop.f32.mrb[15].mxu0  ;;  %6276 = vmatmul.mubr.f32.gmra.mrb[14].mxu0 %v1464_v24  ;;  %3667 = vmatprep.mubr.f32.mxu1 %v1468_v58  ;;  %v1474_v24 = vld [vmem:[%s10873_s17 + $0x2990] sm:$0xff] }
 0x342   : > { %16420 = vst [vmem:[#allocation173_spill] sm:$0xff] %v12371_v30  ;;  %6281 = vmatprep.mubr.f32.mxu0 %v1472_v20  ;;  %v1478_v20 = vld [vmem:[%s10873_s17 + $0x29b0] sm:$0xff] }
 0x343   : > { %v12376_v16 = vpop.f32.mrb[16].mxu1  ;;  %v1482_v58 = vld [vmem:[%s10873_s17 + $0x29d0] sm:$0xff] }
 0x344   : > { %16421 = vst [vmem:[#allocation174_spill] sm:$0xff] %v12376_v16  ;;  %v12379_v39 = vpop.f32.mrb[16].mxu0  ;;  %v12381_v14 = vpop.f32.mrb[17].mxu1  ;;  %3668 = vmatmul.mubr.f32.gmra.mrb[16].mxu1 %v1467_v40  ;;  %v1486_v16 = vld [vmem:[%s10873_s17 + $0x29f0] sm:$0xff] }
 0x345   : > { %16422 = vst [vmem:[#allocation175_spill] sm:$0xff] %v12379_v39  ;;  %16423 = vst [vmem:[#allocation176_spill] sm:$0xff] %v12381_v14  ;;  %v12383_v46 = vpop.f32.mrb[17].mxu0  ;;  %6282 = vmatmul.mubr.f32.gmra.mrb[16].mxu0 %v1471_v15  ;;  %3673 = vmatprep.mubr.f32.mxu1 %v1475_v60  ;;  %v1481_v15 = vld [vmem:[%s10873_s17 + $0x29c8] sm:$0xff] }
 0x346   : > { %16424 = vst [vmem:[#allocation177_spill] sm:$0xff] %v12383_v46  ;;  %6287 = vmatprep.mubr.f32.mxu0 %v1479_v4  ;;  %v1485_v4 = vld [vmem:[%s10873_s17 + $0x29e8] sm:$0xff] }
 0x347   : > { %v12388_v30 = vpop.f32.mrb[18].mxu1  ;;  %v1489_v60 = vld [vmem:[%s10873_s17 + $0x2a08] sm:$0xff] }
 0x348   : > { %16425 = vst [vmem:[#allocation178_spill] sm:$0xff] %v12388_v30  ;;  %v12391_v56 = vpop.f32.mrb[18].mxu0  ;;  %v12393_v39 = vpop.f32.mrb[19].mxu1  ;;  %3674 = vmatmul.mubr.f32.gmra.mrb[18].mxu1 %v1474_v24  ;;  %v1493_v30 = vld [vmem:[%s10873_s17 + $0x2a28] sm:$0xff] }
 0x349   : > { %16426 = vst [vmem:[#allocation179_spill] sm:$0xff] %v12391_v56  ;;  %16427 = vst [vmem:[#allocation180_spill] sm:$0xff] %v12393_v39  ;;  %v12395_v40 = vpop.f32.mrb[19].mxu0  ;;  %6288 = vmatmul.mubr.f32.gmra.mrb[18].mxu0 %v1478_v20  ;;  %3679 = vmatprep.mubr.f32.mxu1 %v1482_v58  ;;  %v1488_v20 = vld [vmem:[%s10873_s17 + $0x2a00] sm:$0xff] }
 0x34a   : > { %16428 = vst [vmem:[#allocation181_spill] sm:$0xff] %v12395_v40  ;;  %6293 = vmatprep.mubr.f32.mxu0 %v1486_v16  ;;  %v1492_v16 = vld [vmem:[%s10873_s17 + $0x2a20] sm:$0xff] }
 0x34b   : > { %v12400_v46 = vpop.f32.mrb[20].mxu1  ;;  %v1496_v58 = vld [vmem:[%s10873_s17 + $0x2a40] sm:$0xff] }
 0x34c   : > { %16429 = vst [vmem:[#allocation182_spill] sm:$0xff] %v12400_v46  ;;  %v12403_v14 = vpop.f32.mrb[20].mxu0  ;;  %v12405_v56 = vpop.f32.mrb[21].mxu1  ;;  %3680 = vmatmul.mubr.f32.gmra.mrb[20].mxu1 %v1481_v15  ;;  %v1500_v46 = vld [vmem:[%s10873_s17 + $0x2a60] sm:$0xff] }
 0x34d   : > { %16430 = vst [vmem:[#allocation183_spill] sm:$0xff] %v12403_v14  ;;  %16431 = vst [vmem:[#allocation184_spill] sm:$0xff] %v12405_v56  ;;  %v12407_v24 = vpop.f32.mrb[21].mxu0  ;;  %6294 = vmatmul.mubr.f32.gmra.mrb[20].mxu0 %v1485_v4  ;;  %3685 = vmatprep.mubr.f32.mxu1 %v1489_v60  ;;  %v1495_v4 = vld [vmem:[%s10873_s17 + $0x2a38] sm:$0xff] }
 0x34e   : > { %16432 = vst [vmem:[#allocation185_spill] sm:$0xff] %v12407_v24  ;;  %6299 = vmatprep.mubr.f32.mxu0 %v1493_v30  ;;  %v1499_v30 = vld [vmem:[%s10873_s17 + $0x2a58] sm:$0xff] }
 0x34f   : > { %v12412_v40 = vpop.f32.mrb[22].mxu1  ;;  %v1503_v60 = vld [vmem:[%s10873_s17 + $0x2a78] sm:$0xff] }
 0x350   : > { %16433 = vst [vmem:[#allocation186_spill] sm:$0xff] %v12412_v40  ;;  %v12415_v39 = vpop.f32.mrb[22].mxu0  ;;  %v12417_v14 = vpop.f32.mrb[23].mxu1  ;;  %3686 = vmatmul.mubr.f32.gmra.mrb[22].mxu1 %v1488_v20  ;;  %v1507_v40 = vld [vmem:[%s10873_s17 + $0x2a98] sm:$0xff] }
 0x351   : > { %16434 = vst [vmem:[#allocation187_spill] sm:$0xff] %v12415_v39  ;;  %16435 = vst [vmem:[#allocation188_spill] sm:$0xff] %v12417_v14  ;;  %v12419_v15 = vpop.f32.mrb[23].mxu0  ;;  %6300 = vmatmul.mubr.f32.gmra.mrb[22].mxu0 %v1492_v16  ;;  %3691 = vmatprep.mubr.f32.mxu1 %v1496_v58  ;;  %v1502_v16 = vld [vmem:[%s10873_s17 + $0x2a70] sm:$0xff] }
 0x352   : > { %16436 = vst [vmem:[#allocation189_spill] sm:$0xff] %v12419_v15  ;;  %6305 = vmatprep.mubr.f32.mxu0 %v1500_v46  ;;  %v1506_v46 = vld [vmem:[%s10873_s17 + $0x2a90] sm:$0xff] }
 0x353   : > { %v12424_v24 = vpop.f32.mrb[24].mxu1  ;;  %v1510_v58 = vld [vmem:[%s10873_s17 + $0x2ab0] sm:$0xff] }
 0x354   : > { %16437 = vst [vmem:[#allocation190_spill] sm:$0xff] %v12424_v24  ;;  %v12427_v56 = vpop.f32.mrb[24].mxu0  ;;  %v12429_v39 = vpop.f32.mrb[25].mxu1  ;;  %3692 = vmatmul.mubr.f32.gmra.mrb[24].mxu1 %v1495_v4  ;;  %v1514_v24 = vld [vmem:[%s10873_s17 + $0x2ad0] sm:$0xff] }
 0x355   : > { %16438 = vst [vmem:[#allocation191_spill] sm:$0xff] %v12427_v56  ;;  %16439 = vst [vmem:[#allocation192_spill] sm:$0xff] %v12429_v39  ;;  %v12431_v20 = vpop.f32.mrb[25].mxu0  ;;  %6306 = vmatmul.mubr.f32.gmra.mrb[24].mxu0 %v1499_v30  ;;  %3697 = vmatprep.mubr.f32.mxu1 %v1503_v60  ;;  %v1509_v30 = vld [vmem:[%s10873_s17 + $0x2aa8] sm:$0xff] }
 0x356   : > { %16440 = vst [vmem:[#allocation193_spill] sm:$0xff] %v12431_v20  ;;  %6311 = vmatprep.mubr.f32.mxu0 %v1507_v40  ;;  %v1513_v40 = vld [vmem:[%s10873_s17 + $0x2ac8] sm:$0xff] }
 0x357   : > { %v12436_v15 = vpop.f32.mrb[26].mxu1  ;;  %v1517_v60 = vld [vmem:[%s10873_s17 + $0x2ae8] sm:$0xff] }
 0x358   : > { %16441 = vst [vmem:[#allocation194_spill] sm:$0xff] %v12436_v15  ;;  %v12439_v14 = vpop.f32.mrb[26].mxu0  ;;  %v12441_v56 = vpop.f32.mrb[27].mxu1  ;;  %3698 = vmatmul.mubr.f32.gmra.mrb[26].mxu1 %v1502_v16  ;;  %v1521_v15 = vld [vmem:[%s10873_s17 + $0x2b08] sm:$0xff] }
 0x359   : > { %16442 = vst [vmem:[#allocation195_spill] sm:$0xff] %v12439_v14  ;;  %16443 = vst [vmem:[#allocation196_spill] sm:$0xff] %v12441_v56  ;;  %v12443_v4 = vpop.f32.mrb[27].mxu0  ;;  %6312 = vmatmul.mubr.f32.gmra.mrb[26].mxu0 %v1506_v46  ;;  %3703 = vmatprep.mubr.f32.mxu1 %v1510_v58  ;;  %v1516_v46 = vld [vmem:[%s10873_s17 + $0x2ae0] sm:$0xff] }
 0x35a   : > { %16444 = vst [vmem:[#allocation197_spill] sm:$0xff] %v12443_v4  ;;  %6317 = vmatprep.mubr.f32.mxu0 %v1514_v24  ;;  %v1520_v24 = vld [vmem:[%s10873_s17 + $0x2b00] sm:$0xff] }
 0x35b   : > { %v12448_v20 = vpop.f32.mrb[28].mxu1  ;;  %v1524_v58 = vld [vmem:[%s10873_s17 + $0x2b20] sm:$0xff] }
 0x35c   : > { %16445 = vst [vmem:[#allocation198_spill] sm:$0xff] %v12448_v20  ;;  %v12451_v39 = vpop.f32.mrb[28].mxu0  ;;  %v12453_v14 = vpop.f32.mrb[29].mxu1  ;;  %3704 = vmatmul.mubr.f32.gmra.mrb[28].mxu1 %v1509_v30  ;;  %v1528_v20 = vld [vmem:[%s10873_s17 + $0x2b40] sm:$0xff] }
 0x35d   : > { %16446 = vst [vmem:[#allocation199_spill] sm:$0xff] %v12451_v39  ;;  %16447 = vst [vmem:[#allocation200_spill] sm:$0xff] %v12453_v14  ;;  %v12455_v16 = vpop.f32.mrb[29].mxu0  ;;  %6318 = vmatmul.mubr.f32.gmra.mrb[28].mxu0 %v1513_v40  ;;  %3709 = vmatprep.mubr.f32.mxu1 %v1517_v60  ;;  %v1523_v40 = vld [vmem:[%s10873_s17 + $0x2b18] sm:$0xff] }
 0x35e   : > { %16448 = vst [vmem:[#allocation201_spill] sm:$0xff] %v12455_v16  ;;  %6323 = vmatprep.mubr.f32.mxu0 %v1521_v15  ;;  %v1527_v15 = vld [vmem:[%s10873_s17 + $0x2b38] sm:$0xff] }
 0x35f   : > { %v12460_v4 = vpop.f32.mrb[30].mxu1  ;;  %v1531_v60 = vld [vmem:[%s10873_s17 + $0x2b58] sm:$0xff] }
 0x360   : > { %16449 = vst [vmem:[#allocation202_spill] sm:$0xff] %v12460_v4  ;;  %v12463_v56 = vpop.f32.mrb[30].mxu0  ;;  %v12465_v39 = vpop.f32.mrb[31].mxu1  ;;  %3710 = vmatmul.mubr.f32.gmra.mrb[30].mxu1 %v1516_v46  ;;  %v1535_v4 = vld [vmem:[%s10873_s17 + $0x2b78] sm:$0xff] }
 0x361   : > { %16450 = vst [vmem:[#allocation203_spill] sm:$0xff] %v12463_v56  ;;  %16451 = vst [vmem:[#allocation204_spill] sm:$0xff] %v12465_v39  ;;  %v12467_v30 = vpop.f32.mrb[31].mxu0  ;;  %6324 = vmatmul.mubr.f32.gmra.mrb[30].mxu0 %v1520_v24  ;;  %3715 = vmatprep.mubr.f32.mxu1 %v1524_v58  ;;  %v1530_v24 = vld [vmem:[%s10873_s17 + $0x2b50] sm:$0xff] }
 0x362   : > { %16452 = vst [vmem:[#allocation205_spill] sm:$0xff] %v12467_v30  ;;  %6329 = vmatprep.mubr.f32.mxu0 %v1528_v20  ;;  %v1534_v20 = vld [vmem:[%s10873_s17 + $0x2b70] sm:$0xff] }
 0x363   : > { %v12472_v16 = vpop.f32.mrb[32].mxu1  ;;  %v1538_v58 = vld [vmem:[%s10873_s17 + $0x2b90] sm:$0xff] }
 0x364   : > { %16453 = vst [vmem:[#allocation206_spill] sm:$0xff] %v12472_v16  ;;  %v12475_v14 = vpop.f32.mrb[32].mxu0  ;;  %v12477_v56 = vpop.f32.mrb[33].mxu1  ;;  %3716 = vmatmul.mubr.f32.gmra.mrb[32].mxu1 %v1523_v40  ;;  %v1542_v16 = vld [vmem:[%s10873_s17 + $0x2bb0] sm:$0xff] }
 0x365   : > { %16454 = vst [vmem:[#allocation207_spill] sm:$0xff] %v12475_v14  ;;  %16455 = vst [vmem:[#allocation208_spill] sm:$0xff] %v12477_v56  ;;  %v12479_v46 = vpop.f32.mrb[33].mxu0  ;;  %6330 = vmatmul.mubr.f32.gmra.mrb[32].mxu0 %v1527_v15  ;;  %3721 = vmatprep.mubr.f32.mxu1 %v1531_v60  ;;  %v1537_v15 = vld [vmem:[%s10873_s17 + $0x2b88] sm:$0xff] }
 0x366   : > { %16456 = vst [vmem:[#allocation209_spill] sm:$0xff] %v12479_v46  ;;  %6335 = vmatprep.mubr.f32.mxu0 %v1535_v4  ;;  %v1541_v4 = vld [vmem:[%s10873_s17 + $0x2ba8] sm:$0xff] }
 0x367   : > { %v12484_v30 = vpop.f32.mrb[34].mxu1  ;;  %v1545_v60 = vld [vmem:[%s10873_s17 + $0x2bc8] sm:$0xff] }
 0x368   : > { %16457 = vst [vmem:[#allocation210_spill] sm:$0xff] %v12484_v30  ;;  %v12487_v39 = vpop.f32.mrb[34].mxu0  ;;  %v12489_v14 = vpop.f32.mrb[35].mxu1  ;;  %3722 = vmatmul.mubr.f32.gmra.mrb[34].mxu1 %v1530_v24  ;;  %v1549_v30 = vld [vmem:[%s10873_s17 + $0x2be8] sm:$0xff] }
 0x369   : > { %16458 = vst [vmem:[#allocation211_spill] sm:$0xff] %v12487_v39  ;;  %16459 = vst [vmem:[#allocation212_spill] sm:$0xff] %v12489_v14  ;;  %v12491_v40 = vpop.f32.mrb[35].mxu0  ;;  %6336 = vmatmul.mubr.f32.gmra.mrb[34].mxu0 %v1534_v20  ;;  %3726 = vmatprep.mubr.f32.mxu1 %v1538_v58  ;;  %v1544_v20 = vld [vmem:[%s10873_s17 + $0x2bc0] sm:$0xff] }
 0x36a   : > { %16460 = vst [vmem:[#allocation213_spill] sm:$0xff] %v12491_v40  ;;  %6340 = vmatprep.mubr.f32.mxu0 %v1542_v16  ;;  %v1548_v16 = vld [vmem:[%s10873_s17 + $0x2be0] sm:$0xff] }
 0x36b   : > { %v12496_v46 = vpop.f32.mrb[186].mxu1  ;;  %v1552_v58 = vld [vmem:[%s10873_s17 + $0x2c00] sm:$0xff] }
 0x36c   : > { %16461 = vst [vmem:[#allocation214_spill] sm:$0xff] %v12496_v46  ;;  %v12499_v56 = vpop.f32.mrb[186].mxu0  ;;  %v12501_v39 = vpop.f32.mrb[187].mxu1  ;;  %3727 = vmatmul.mubr.f32.gmra.mrb[186].mxu1 %v1537_v15  ;;  %v1556_v46 = vld [vmem:[%s10873_s17 + $0x2c20] sm:$0xff] }
 0x36d   : > { %16462 = vst [vmem:[#allocation215_spill] sm:$0xff] %v12499_v56  ;;  %16463 = vst [vmem:[#allocation216_spill] sm:$0xff] %v12501_v39  ;;  %v12503_v24 = vpop.f32.mrb[187].mxu0  ;;  %6341 = vmatmul.mubr.f32.gmra.mrb[186].mxu0 %v1541_v4  ;;  %3731 = vmatprep.mubr.f32.mxu1 %v1545_v60  ;;  %v1551_v4 = vld [vmem:[%s10873_s17 + $0x2bf8] sm:$0xff] }
 0x36e   : > { %16464 = vst [vmem:[#allocation217_spill] sm:$0xff] %v12503_v24  ;;  %6345 = vmatprep.mubr.f32.mxu0 %v1549_v30  ;;  %v1555_v30 = vld [vmem:[%s10873_s17 + $0x2c18] sm:$0xff] }
 0x36f   : > { %v12508_v40 = vpop.f32.mrb[188].mxu1  ;;  %v1559_v60 = vld [vmem:[%s10873_s17 + $0x2c38] sm:$0xff] }
 0x370   : > { %16465 = vst [vmem:[#allocation218_spill] sm:$0xff] %v12508_v40  ;;  %v12511_v14 = vpop.f32.mrb[188].mxu0  ;;  %v12513_v56 = vpop.f32.mrb[189].mxu1  ;;  %3732 = vmatmul.mubr.f32.gmra.mrb[188].mxu1 %v1544_v20  ;;  %v1563_v40 = vld [vmem:[%s10873_s17 + $0x2c58] sm:$0xff] }
 0x371   : > { %16466 = vst [vmem:[#allocation219_spill] sm:$0xff] %v12511_v14  ;;  %16467 = vst [vmem:[#allocation220_spill] sm:$0xff] %v12513_v56  ;;  %v12515_v15 = vpop.f32.mrb[189].mxu0  ;;  %6346 = vmatmul.mubr.f32.gmra.mrb[188].mxu0 %v1548_v16  ;;  %3736 = vmatprep.mubr.f32.mxu1 %v1552_v58  ;;  %v1558_v16 = vld [vmem:[%s10873_s17 + $0x2c30] sm:$0xff] }
 0x372   : > { %16468 = vst [vmem:[#allocation221_spill] sm:$0xff] %v12515_v15  ;;  %6350 = vmatprep.mubr.f32.mxu0 %v1556_v46  ;;  %v1562_v46 = vld [vmem:[%s10873_s17 + $0x2c50] sm:$0xff] }
 0x373   : > { %v12520_v24 = vpop.f32.mrb[190].mxu1  ;;  %v1566_v58 = vld [vmem:[%s10873_s17 + $0x2c70] sm:$0xff] }
 0x374   : > { %16469 = vst [vmem:[#allocation222_spill] sm:$0xff] %v12520_v24  ;;  %v12523_v39 = vpop.f32.mrb[190].mxu0  ;;  %v12525_v14 = vpop.f32.mrb[191].mxu1  ;;  %3737 = vmatmul.mubr.f32.gmra.mrb[190].mxu1 %v1551_v4  ;;  %v1570_v24 = vld [vmem:[%s10873_s17 + $0x2c90] sm:$0xff] }
 0x375   : > { %16470 = vst [vmem:[#allocation223_spill] sm:$0xff] %v12523_v39  ;;  %16471 = vst [vmem:[#allocation224_spill] sm:$0xff] %v12525_v14  ;;  %v12527_v20 = vpop.f32.mrb[191].mxu0  ;;  %6351 = vmatmul.mubr.f32.gmra.mrb[190].mxu0 %v1555_v30  ;;  %3741 = vmatprep.mubr.f32.mxu1 %v1559_v60  ;;  %v1565_v30 = vld [vmem:[%s10873_s17 + $0x2c68] sm:$0xff] }
 0x376   : > { %16472 = vst [vmem:[#allocation225_spill] sm:$0xff] %v12527_v20  ;;  %6355 = vmatprep.mubr.f32.mxu0 %v1563_v40  ;;  %v1569_v40 = vld [vmem:[%s10873_s17 + $0x2c88] sm:$0xff] }
 0x377   : > { %v12532_v15 = vpop.f32.mrb[192].mxu1  ;;  %v1573_v60 = vld [vmem:[%s10873_s17 + $0x2ca8] sm:$0xff] }
 0x378   : > { %16473 = vst [vmem:[#allocation226_spill] sm:$0xff] %v12532_v15  ;;  %v12535_v56 = vpop.f32.mrb[192].mxu0  ;;  %v12537_v39 = vpop.f32.mrb[193].mxu1  ;;  %3742 = vmatmul.mubr.f32.gmra.mrb[192].mxu1 %v1558_v16  ;;  %v1577_v15 = vld [vmem:[%s10873_s17 + $0x2cc8] sm:$0xff] }
 0x379   : > { %16474 = vst [vmem:[#allocation227_spill] sm:$0xff] %v12535_v56  ;;  %16475 = vst [vmem:[#allocation228_spill] sm:$0xff] %v12537_v39  ;;  %v12539_v4 = vpop.f32.mrb[193].mxu0  ;;  %6356 = vmatmul.mubr.f32.gmra.mrb[192].mxu0 %v1562_v46  ;;  %3746 = vmatprep.mubr.f32.mxu1 %v1566_v58  ;;  %v1572_v46 = vld [vmem:[%s10873_s17 + $0x2ca0] sm:$0xff] }
 0x37a   : > { %16476 = vst [vmem:[#allocation229_spill] sm:$0xff] %v12539_v4  ;;  %6360 = vmatprep.mubr.f32.mxu0 %v1570_v24  ;;  %v1576_v24 = vld [vmem:[%s10873_s17 + $0x2cc0] sm:$0xff] }
 0x37b   : > { %v12544_v20 = vpop.f32.mrb[194].mxu1  ;;  %v1580_v58 = vld [vmem:[%s10873_s17 + $0x2ce0] sm:$0xff] }
 0x37c   : > { %16477 = vst [vmem:[#allocation230_spill] sm:$0xff] %v12544_v20  ;;  %v12547_v14 = vpop.f32.mrb[194].mxu0  ;;  %v12549_v56 = vpop.f32.mrb[195].mxu1  ;;  %3747 = vmatmul.mubr.f32.gmra.mrb[194].mxu1 %v1565_v30  ;;  %v1584_v20 = vld [vmem:[%s10873_s17 + $0x2d00] sm:$0xff] }
 0x37d   : > { %16478 = vst [vmem:[#allocation231_spill] sm:$0xff] %v12547_v14  ;;  %16479 = vst [vmem:[#allocation232_spill] sm:$0xff] %v12549_v56  ;;  %v12551_v16 = vpop.f32.mrb[195].mxu0  ;;  %6361 = vmatmul.mubr.f32.gmra.mrb[194].mxu0 %v1569_v40  ;;  %3751 = vmatprep.mubr.f32.mxu1 %v1573_v60  ;;  %v1579_v40 = vld [vmem:[%s10873_s17 + $0x2cd8] sm:$0xff] }
 0x37e   : > { %16480 = vst [vmem:[#allocation233_spill] sm:$0xff] %v12551_v16  ;;  %6365 = vmatprep.mubr.f32.mxu0 %v1577_v15  ;;  %v1583_v15 = vld [vmem:[%s10873_s17 + $0x2cf8] sm:$0xff] }
 0x37f   : > { %v12556_v4 = vpop.f32.mrb[196].mxu1  ;;  %v1587_v60 = vld [vmem:[%s10873_s17 + $0x2d18] sm:$0xff] }
 0x380   : > { %16481 = vst [vmem:[#allocation234_spill] sm:$0xff] %v12556_v4  ;;  %v12559_v39 = vpop.f32.mrb[196].mxu0  ;;  %v12561_v14 = vpop.f32.mrb[197].mxu1  ;;  %3752 = vmatmul.mubr.f32.gmra.mrb[196].mxu1 %v1572_v46  ;;  %v1591_v4 = vld [vmem:[%s10873_s17 + $0x2d38] sm:$0xff] }
 0x381   : > { %16482 = vst [vmem:[#allocation235_spill] sm:$0xff] %v12559_v39  ;;  %16483 = vst [vmem:[#allocation236_spill] sm:$0xff] %v12561_v14  ;;  %v12563_v30 = vpop.f32.mrb[197].mxu0  ;;  %6366 = vmatmul.mubr.f32.gmra.mrb[196].mxu0 %v1576_v24  ;;  %3756 = vmatprep.mubr.f32.mxu1 %v1580_v58  ;;  %v1586_v24 = vld [vmem:[%s10873_s17 + $0x2d10] sm:$0xff] }
 0x382   : > { %16484 = vst [vmem:[#allocation237_spill] sm:$0xff] %v12563_v30  ;;  %6370 = vmatprep.mubr.f32.mxu0 %v1584_v20  ;;  %v1590_v20 = vld [vmem:[%s10873_s17 + $0x2d30] sm:$0xff] }
 0x383   : > { %v12568_v16 = vpop.f32.mrb[198].mxu1  ;;  %v1594_v58 = vld [vmem:[%s10873_s17 + $0x2d50] sm:$0xff] }
 0x384   : > { %16485 = vst [vmem:[#allocation238_spill] sm:$0xff] %v12568_v16  ;;  %v12571_v56 = vpop.f32.mrb[198].mxu0  ;;  %v12573_v39 = vpop.f32.mrb[199].mxu1  ;;  %3757 = vmatmul.mubr.f32.gmra.mrb[198].mxu1 %v1579_v40  ;;  %v1598_v16 = vld [vmem:[%s10873_s17 + $0x2d70] sm:$0xff] }
 0x385   : > { %16486 = vst [vmem:[#allocation239_spill] sm:$0xff] %v12571_v56  ;;  %16487 = vst [vmem:[#allocation240_spill] sm:$0xff] %v12573_v39  ;;  %v12575_v46 = vpop.f32.mrb[199].mxu0  ;;  %6371 = vmatmul.mubr.f32.gmra.mrb[198].mxu0 %v1583_v15  ;;  %3761 = vmatprep.mubr.f32.mxu1 %v1587_v60  ;;  %v1593_v15 = vld [vmem:[%s10873_s17 + $0x2d48] sm:$0xff] }
 0x386   : > { %16488 = vst [vmem:[#allocation241_spill] sm:$0xff] %v12575_v46  ;;  %6375 = vmatprep.mubr.f32.mxu0 %v1591_v4  ;;  %v1597_v4 = vld [vmem:[%s10873_s17 + $0x2d68] sm:$0xff] }
 0x387   : > { %v12580_v30 = vpop.f32.mrb[200].mxu1  ;;  %v1601_v60 = vld [vmem:[%s10873_s17 + $0x2d88] sm:$0xff] }
 0x388   : > { %16489 = vst [vmem:[#allocation242_spill] sm:$0xff] %v12580_v30  ;;  %v12583_v14 = vpop.f32.mrb[200].mxu0  ;;  %v12585_v56 = vpop.f32.mrb[201].mxu1  ;;  %3762 = vmatmul.mubr.f32.gmra.mrb[200].mxu1 %v1586_v24  ;;  %v1605_v30 = vld [vmem:[%s10873_s17 + $0x2da8] sm:$0xff] }
 0x389   : > { %16490 = vst [vmem:[#allocation243_spill] sm:$0xff] %v12583_v14  ;;  %16491 = vst [vmem:[#allocation244_spill] sm:$0xff] %v12585_v56  ;;  %v12587_v40 = vpop.f32.mrb[201].mxu0  ;;  %6376 = vmatmul.mubr.f32.gmra.mrb[200].mxu0 %v1590_v20  ;;  %3766 = vmatprep.mubr.f32.mxu1 %v1594_v58  ;;  %v1600_v20 = vld [vmem:[%s10873_s17 + $0x2d80] sm:$0xff] }
 0x38a   : > { %16492 = vst [vmem:[#allocation245_spill] sm:$0xff] %v12587_v40  ;;  %6380 = vmatprep.mubr.f32.mxu0 %v1598_v16  ;;  %v1604_v16 = vld [vmem:[%s10873_s17 + $0x2da0] sm:$0xff] }
 0x38b   : > { %v12592_v46 = vpop.f32.mrb[202].mxu1  ;;  %v1608_v58 = vld [vmem:[%s10873_s17 + $0x2dc0] sm:$0xff] }
 0x38c   : > { %16493 = vst [vmem:[#allocation246_spill] sm:$0xff] %v12592_v46  ;;  %v12595_v39 = vpop.f32.mrb[202].mxu0  ;;  %v12597_v14 = vpop.f32.mrb[203].mxu1  ;;  %3767 = vmatmul.mubr.f32.gmra.mrb[202].mxu1 %v1593_v15  ;;  %v1612_v46 = vld [vmem:[%s10873_s17 + $0x2de0] sm:$0xff] }
 0x38d   : > { %16494 = vst [vmem:[#allocation247_spill] sm:$0xff] %v12595_v39  ;;  %16495 = vst [vmem:[#allocation248_spill] sm:$0xff] %v12597_v14  ;;  %v12599_v24 = vpop.f32.mrb[203].mxu0  ;;  %6381 = vmatmul.mubr.f32.gmra.mrb[202].mxu0 %v1597_v4  ;;  %3771 = vmatprep.mubr.f32.mxu1 %v1601_v60  ;;  %v1607_v4 = vld [vmem:[%s10873_s17 + $0x2db8] sm:$0xff] }
 0x38e   : > { %16496 = vst [vmem:[#allocation249_spill] sm:$0xff] %v12599_v24  ;;  %6385 = vmatprep.mubr.f32.mxu0 %v1605_v30  ;;  %v1611_v30 = vld [vmem:[%s10873_s17 + $0x2dd8] sm:$0xff] }
 0x38f   : > { %v12604_v40 = vpop.f32.mrb[204].mxu1  ;;  %v1615_v60 = vld [vmem:[%s10873_s17 + $0x2df8] sm:$0xff] }
 0x390   : > { %16497 = vst [vmem:[#allocation250_spill] sm:$0xff] %v12604_v40  ;;  %v12607_v56 = vpop.f32.mrb[204].mxu0  ;;  %v12609_v39 = vpop.f32.mrb[205].mxu1  ;;  %3772 = vmatmul.mubr.f32.gmra.mrb[204].mxu1 %v1600_v20  ;;  %v1619_v40 = vld [vmem:[%s10873_s17 + $0x2e18] sm:$0xff] }
 0x391   : > { %16498 = vst [vmem:[#allocation251_spill] sm:$0xff] %v12607_v56  ;;  %16499 = vst [vmem:[#allocation252_spill] sm:$0xff] %v12609_v39  ;;  %v12611_v15 = vpop.f32.mrb[205].mxu0  ;;  %6386 = vmatmul.mubr.f32.gmra.mrb[204].mxu0 %v1604_v16  ;;  %3776 = vmatprep.mubr.f32.mxu1 %v1608_v58  ;;  %v1614_v16 = vld [vmem:[%s10873_s17 + $0x2df0] sm:$0xff] }
 0x392   : > { %16500 = vst [vmem:[#allocation253_spill] sm:$0xff] %v12611_v15  ;;  %6390 = vmatprep.mubr.f32.mxu0 %v1612_v46  ;;  %v1618_v46 = vld [vmem:[%s10873_s17 + $0x2e10] sm:$0xff] }
 0x393   : > { %v12616_v24 = vpop.f32.mrb[206].mxu1  ;;  %v1622_v58 = vld [vmem:[%s10873_s17 + $0x2e30] sm:$0xff] }
 0x394   : > { %16501 = vst [vmem:[#allocation254_spill] sm:$0xff] %v12616_v24  ;;  %v12619_v14 = vpop.f32.mrb[206].mxu0  ;;  %v12621_v56 = vpop.f32.mrb[207].mxu1  ;;  %3777 = vmatmul.mubr.f32.gmra.mrb[206].mxu1 %v1607_v4  ;;  %v1626_v24 = vld [vmem:[%s10873_s17 + $0x2e50] sm:$0xff] }
 0x395   : > { %16502 = vst [vmem:[#allocation255_spill] sm:$0xff] %v12619_v14  ;;  %16503 = vst [vmem:[#allocation256_spill] sm:$0xff] %v12621_v56  ;;  %v12623_v20 = vpop.f32.mrb[207].mxu0  ;;  %6391 = vmatmul.mubr.f32.gmra.mrb[206].mxu0 %v1611_v30  ;;  %3781 = vmatprep.mubr.f32.mxu1 %v1615_v60  ;;  %v1621_v30 = vld [vmem:[%s10873_s17 + $0x2e28] sm:$0xff] }
 0x396   : > { %16504 = vst [vmem:[#allocation257_spill] sm:$0xff] %v12623_v20  ;;  %6395 = vmatprep.mubr.f32.mxu0 %v1619_v40  ;;  %v1625_v40 = vld [vmem:[%s10873_s17 + $0x2e48] sm:$0xff] }
 0x397   : > { %v12628_v15 = vpop.f32.mrb[208].mxu1  ;;  %v1629_v60 = vld [vmem:[%s10873_s17 + $0x2e68] sm:$0xff] }
 0x398   : > { %16505 = vst [vmem:[#allocation258_spill] sm:$0xff] %v12628_v15  ;;  %v12631_v39 = vpop.f32.mrb[208].mxu0  ;;  %v12633_v14 = vpop.f32.mrb[209].mxu1  ;;  %3782 = vmatmul.mubr.f32.gmra.mrb[208].mxu1 %v1614_v16  ;;  %v1633_v15 = vld [vmem:[%s10873_s17 + $0x2e88] sm:$0xff] }
 0x399   : > { %16506 = vst [vmem:[#allocation259_spill] sm:$0xff] %v12631_v39  ;;  %16507 = vst [vmem:[#allocation260_spill] sm:$0xff] %v12633_v14  ;;  %v12635_v4 = vpop.f32.mrb[209].mxu0  ;;  %6396 = vmatmul.mubr.f32.gmra.mrb[208].mxu0 %v1618_v46  ;;  %3786 = vmatprep.mubr.f32.mxu1 %v1622_v58  ;;  %v1628_v46 = vld [vmem:[%s10873_s17 + $0x2e60] sm:$0xff] }
 0x39a   : > { %16508 = vst [vmem:[#allocation261_spill] sm:$0xff] %v12635_v4  ;;  %6400 = vmatprep.mubr.f32.mxu0 %v1626_v24  ;;  %v1632_v24 = vld [vmem:[%s10873_s17 + $0x2e80] sm:$0xff] }
 0x39b   : > { %v12640_v20 = vpop.f32.mrb[210].mxu1  ;;  %v1636_v58 = vld [vmem:[%s10873_s17 + $0x2ea0] sm:$0xff] }
 0x39c   : > { %16509 = vst [vmem:[#allocation262_spill] sm:$0xff] %v12640_v20  ;;  %v12643_v56 = vpop.f32.mrb[210].mxu0  ;;  %v12645_v39 = vpop.f32.mrb[211].mxu1  ;;  %3787 = vmatmul.mubr.f32.gmra.mrb[210].mxu1 %v1621_v30  ;;  %v1640_v20 = vld [vmem:[%s10873_s17 + $0x2ec0] sm:$0xff] }
 0x39d   : > { %16510 = vst [vmem:[#allocation263_spill] sm:$0xff] %v12643_v56  ;;  %16511 = vst [vmem:[#allocation264_spill] sm:$0xff] %v12645_v39  ;;  %v12647_v16 = vpop.f32.mrb[211].mxu0  ;;  %6401 = vmatmul.mubr.f32.gmra.mrb[210].mxu0 %v1625_v40  ;;  %3791 = vmatprep.mubr.f32.mxu1 %v1629_v60  ;;  %v1635_v40 = vld [vmem:[%s10873_s17 + $0x2e98] sm:$0xff] }
 0x39e   : > { %16512 = vst [vmem:[#allocation265_spill] sm:$0xff] %v12647_v16  ;;  %6405 = vmatprep.mubr.f32.mxu0 %v1633_v15  ;;  %v1639_v15 = vld [vmem:[%s10873_s17 + $0x2eb8] sm:$0xff] }
 0x39f   : > { %v12652_v4 = vpop.f32.mrb[212].mxu1  ;;  %v1643_v60 = vld [vmem:[%s10873_s17 + $0x2ed8] sm:$0xff] }
 0x3a0   : > { %16513 = vst [vmem:[#allocation266_spill] sm:$0xff] %v12652_v4  ;;  %v12655_v14 = vpop.f32.mrb[212].mxu0  ;;  %v12657_v56 = vpop.f32.mrb[213].mxu1  ;;  %3792 = vmatmul.mubr.f32.gmra.mrb[212].mxu1 %v1628_v46  ;;  %v1647_v4 = vld [vmem:[%s10873_s17 + $0x2ef8] sm:$0xff] }
 0x3a1   : > { %16514 = vst [vmem:[#allocation267_spill] sm:$0xff] %v12655_v14  ;;  %16515 = vst [vmem:[#allocation268_spill] sm:$0xff] %v12657_v56  ;;  %v12659_v30 = vpop.f32.mrb[213].mxu0  ;;  %6406 = vmatmul.mubr.f32.gmra.mrb[212].mxu0 %v1632_v24  ;;  %3796 = vmatprep.mubr.f32.mxu1 %v1636_v58  ;;  %v1642_v24 = vld [vmem:[%s10873_s17 + $0x2ed0] sm:$0xff] }
 0x3a2   : > { %16516 = vst [vmem:[#allocation269_spill] sm:$0xff] %v12659_v30  ;;  %6410 = vmatprep.mubr.f32.mxu0 %v1640_v20  ;;  %v1646_v20 = vld [vmem:[%s10873_s17 + $0x2ef0] sm:$0xff] }
 0x3a3   : > { %v12664_v16 = vpop.f32.mrb[214].mxu1  ;;  %v1650_v58 = vld [vmem:[%s10873_s17 + $0x2f10] sm:$0xff] }
 0x3a4   : > { %16517 = vst [vmem:[#allocation270_spill] sm:$0xff] %v12664_v16  ;;  %v12667_v39 = vpop.f32.mrb[214].mxu0  ;;  %v12669_v14 = vpop.f32.mrb[215].mxu1  ;;  %3797 = vmatmul.mubr.f32.gmra.mrb[214].mxu1 %v1635_v40  ;;  %v1654_v16 = vld [vmem:[%s10873_s17 + $0x2f30] sm:$0xff] }
 0x3a5   : > { %16518 = vst [vmem:[#allocation271_spill] sm:$0xff] %v12667_v39  ;;  %16519 = vst [vmem:[#allocation272_spill] sm:$0xff] %v12669_v14  ;;  %v12671_v46 = vpop.f32.mrb[215].mxu0  ;;  %6411 = vmatmul.mubr.f32.gmra.mrb[214].mxu0 %v1639_v15  ;;  %3801 = vmatprep.mubr.f32.mxu1 %v1643_v60  ;;  %v1649_v15 = vld [vmem:[%s10873_s17 + $0x2f08] sm:$0xff]  ;;  %v147_v60 = vld [vmem:[%s10873_s17 + $0x18] sm:$0xff] }
 0x3a6   : > { %16520 = vst [vmem:[#allocation273_spill] sm:$0xff] %v12671_v46  ;;  %6415 = vmatprep.mubr.f32.mxu0 %v1647_v4  ;;  %v1653_v4 = vld [vmem:[%s10873_s17 + $0x2f28] sm:$0xff] }
 0x3a7   : > { %v12676_v30 = vpop.f32.mrb[216].mxu1 }
 0x3a8   : > { %16521 = vst [vmem:[#allocation274_spill] sm:$0xff] %v12676_v30  ;;  %v12679_v56 = vpop.f32.mrb[216].mxu0  ;;  %v12681_v39 = vpop.f32.mrb[217].mxu1  ;;  %3802 = vmatmul.mubr.f32.gmra.mrb[216].mxu1 %v1642_v24  ;;  %v146_v24 = vld [vmem:[%s10873_s17 + $0x10] sm:$0xff] }
 0x3a9   : > { %16522 = vst [vmem:[#allocation275_spill] sm:$0xff] %v12679_v56  ;;  %16523 = vst [vmem:[#allocation276_spill] sm:$0xff] %v12681_v39  ;;  %v12683_v40 = vpop.f32.mrb[217].mxu0  ;;  %6416 = vmatmul.mubr.f32.gmra.mrb[216].mxu0 %v1646_v20  ;;  %3806 = vmatprep.mubr.f32.mxu1 %v1650_v58  ;;  %v16202_v20 = vmov 0.0   ;;  %v154_v58 = vld [vmem:[%s10873_s17 + $0x50] sm:$0xff] }
 0x3aa   : > { %16524 = vst [vmem:[#allocation277_spill] sm:$0xff] %v12683_v40  ;;  %6420 = vmatprep.mubr.f32.mxu0 %v1654_v16  ;;  %v150_v16 = vld [vmem:[%s10873_s17 + $0x30] sm:$0xff] }
 0x3ab   : > { %v12688_v46 = vpop.f32.mrb[218].mxu1 }
 0x3ac   : > { %16525 = vst [vmem:[#allocation278_spill] sm:$0xff] %v12688_v46  ;;  %v12690_v30 = vpop.f32.mrb[218].mxu0  ;;  %v12692_v14 = vpop.f32.mrb[219].mxu1  ;;  %3807 = vmatmul.mubr.f32.gmra.mrb[218].mxu1 %v1649_v15 }
 0x3ad   : > { %16526 = vst [vmem:[#allocation279_spill] sm:$0xff] %v12690_v30  ;;  %16527 = vst [vmem:[#allocation280_spill] sm:$0xff] %v12692_v14  ;;  %v12694_v56 = vpop.f32.mrb[219].mxu0  ;;  %6421 = vmatmul.mubr.f32.gmra.mrb[218].mxu0 %v1653_v4  ;;  %3876 = vmatprep.mubr.f32.mxu1 %v147_v60  ;;  %v153_v4 = vld [vmem:[%s10873_s17 + $0x48] sm:$0xff] }
 0x3ae   : > { %16528 = vst [vmem:[#allocation281_spill] sm:$0xff] %v12694_v56  ;;  %6490 = vmatprep.mubr.f32.mxu0 %v16202_v20  ;;  %v157_v60 = vld [vmem:[%s10873_s17 + $0x68] sm:$0xff] }
 0x3af   : > { %v12700_v46 = vpop.f32.mrb[220].mxu1  ;;  %v161_v56 = vld [vmem:[%s10873_s17 + $0x88] sm:$0xff] }
 0x3b0   : > { %16529 = vst [vmem:[#allocation282_spill] sm:$0xff] %v12700_v46  ;;  %v12702_v30 = vpop.f32.mrb[220].mxu0  ;;  %v12704_v14 = vpop.f32.mrb[221].mxu1  ;;  %3877 = vmatmul.mubr.f32.vlgmr.msra.gmra.mrb[220].mxu1 %v146_v24 }
 0x3b1   : > { %16530 = vst [vmem:[#allocation283_spill] sm:$0xff] %v12702_v30  ;;  %16531 = vst [vmem:[#allocation284_spill] sm:$0xff] %v12704_v14  ;;  %v12706_v15 = vpop.f32.mrb[221].mxu0  ;;  %9056 = vmatmul.mubr.msk.f32.vlgmr.msra.gmra.mrb[220].mxu0 %vm1856_vm0, %v150_v16  ;;  %3881 = vmatprep.mubr.f32.mxu1 %v154_v58  ;;  %v160_v16 = vld [vmem:[%s10873_s17 + $0x80] sm:$0xff] }
 0x3b2   : > { %16532 = vst [vmem:[#allocation285_spill] sm:$0xff] %v12706_v15  ;;  %6495 = vmatprep.mubr.f32.mxu0 %v16202_v20  ;;  %v164_v58 = vld [vmem:[%s10873_s17 + $0xa0] sm:$0xff] }
 0x3b3   : > { %v12713_v40 = vpop.f32.mrb[222].mxu1  ;;  %v168_v15 = vld [vmem:[%s10873_s17 + $0xc0] sm:$0xff] }
 0x3b4   : > { %16533 = vst [vmem:[#allocation286_spill] sm:$0xff] %v12713_v40  ;;  %v12715_v46 = vpop.f32.mrb[222].mxu0  ;;  %v12717_v30 = vpop.f32.mrb[223].mxu1  ;;  %3882 = vmatmul.mubr.f32.gmra.mrb[222].mxu1 %v153_v4 }
 0x3b5   : > { %16534 = vst [vmem:[#allocation287_spill] sm:$0xff] %v12715_v46  ;;  %16535 = vst [vmem:[#allocation288_spill] sm:$0xff] %v12717_v30  ;;  %v12719_v24 = vpop.f32.mrb[223].mxu0  ;;  %9057 = vmatmul.mubr.msk.f32.gmra.mrb[222].mxu0 %vm1856_vm0, %v157_v60  ;;  %3886 = vmatprep.mubr.f32.mxu1 %v161_v56  ;;  %v167_v56 = vld [vmem:[%s10873_s17 + $0xb8] sm:$0xff] }
 0x3b6   : > { %16536 = vst [vmem:[#allocation289_spill] sm:$0xff] %v12719_v24  ;;  %6500 = vmatprep.mubr.f32.mxu0 %v16202_v20  ;;  %v171_v60 = vld [vmem:[%s10873_s17 + $0xd8] sm:$0xff] }
 0x3b7   : > { %v12726_v14 = vpop.f32.mrb[224].mxu1  ;;  %v175_v24 = vld [vmem:[%s10873_s17 + $0xf8] sm:$0xff] }
 0x3b8   : > { %16537 = vst [vmem:[#allocation290_spill] sm:$0xff] %v12726_v14  ;;  %v12728_v40 = vpop.f32.mrb[224].mxu0  ;;  %v12730_v46 = vpop.f32.mrb[225].mxu1  ;;  %3887 = vmatmul.mubr.f32.gmra.mrb[224].mxu1 %v160_v16 }
 0x3b9   : > { %16538 = vst [vmem:[#allocation291_spill] sm:$0xff] %v12728_v40  ;;  %16539 = vst [vmem:[#allocation292_spill] sm:$0xff] %v12730_v46  ;;  %v12732_v4 = vpop.f32.mrb[225].mxu0  ;;  %9058 = vmatmul.mubr.msk.f32.gmra.mrb[224].mxu0 %vm1856_vm0, %v164_v58  ;;  %3891 = vmatprep.mubr.f32.mxu1 %v168_v15  ;;  %v174_v15 = vld [vmem:[%s10873_s17 + $0xf0] sm:$0xff] }
 0x3ba   : > { %16540 = vst [vmem:[#allocation293_spill] sm:$0xff] %v12732_v4  ;;  %6505 = vmatprep.mubr.f32.mxu0 %v16202_v20  ;;  %v178_v58 = vld [vmem:[%s10873_s17 + $0x110] sm:$0xff] }
 0x3bb   : > { %v12739_v30 = vpop.f32.mrb[226].mxu1  ;;  %v182_v4 = vld [vmem:[%s10873_s17 + $0x130] sm:$0xff] }
 0x3bc   : > { %16541 = vst [vmem:[#allocation294_spill] sm:$0xff] %v12739_v30  ;;  %v12741_v14 = vpop.f32.mrb[226].mxu0  ;;  %v12743_v40 = vpop.f32.mrb[227].mxu1  ;;  %3892 = vmatmul.mubr.f32.gmra.mrb[226].mxu1 %v167_v56 }
 0x3bd   : > { %16542 = vst [vmem:[#allocation295_spill] sm:$0xff] %v12741_v14  ;;  %16543 = vst [vmem:[#allocation296_spill] sm:$0xff] %v12743_v40  ;;  %v12745_v16 = vpop.f32.mrb[227].mxu0  ;;  %9059 = vmatmul.mubr.msk.f32.gmra.mrb[226].mxu0 %vm1856_vm0, %v171_v60  ;;  %3896 = vmatprep.mubr.f32.mxu1 %v175_v24  ;;  %v181_v24 = vld [vmem:[%s10873_s17 + $0x128] sm:$0xff] }
 0x3be   : > { %16544 = vst [vmem:[#allocation297_spill] sm:$0xff] %v12745_v16  ;;  %6510 = vmatprep.mubr.f32.mxu0 %v16202_v20  ;;  %v185_v60 = vld [vmem:[%s10873_s17 + $0x148] sm:$0xff] }
 0x3bf   : > { %v12752_v46 = vpop.f32.mrb[228].mxu1  ;;  %v189_v16 = vld [vmem:[%s10873_s17 + $0x168] sm:$0xff] }
 0x3c0   : > { %16545 = vst [vmem:[#allocation298_spill] sm:$0xff] %v12752_v46  ;;  %v12754_v30 = vpop.f32.mrb[228].mxu0  ;;  %v12756_v14 = vpop.f32.mrb[229].mxu1  ;;  %3897 = vmatmul.mubr.f32.gmra.mrb[228].mxu1 %v174_v15 }
 0x3c1   : > { %16546 = vst [vmem:[#allocation299_spill] sm:$0xff] %v12754_v30  ;;  %16547 = vst [vmem:[#allocation300_spill] sm:$0xff] %v12756_v14  ;;  %v12758_v56 = vpop.f32.mrb[229].mxu0  ;;  %9060 = vmatmul.mubr.msk.f32.gmra.mrb[228].mxu0 %vm1856_vm0, %v178_v58  ;;  %3901 = vmatprep.mubr.f32.mxu1 %v182_v4  ;;  %v188_v4 = vld [vmem:[%s10873_s17 + $0x160] sm:$0xff] }
 0x3c2   : > { %16548 = vst [vmem:[#allocation301_spill] sm:$0xff] %v12758_v56  ;;  %6515 = vmatprep.mubr.f32.mxu0 %v16202_v20  ;;  %v192_v58 = vld [vmem:[%s10873_s17 + $0x180] sm:$0xff] }
 0x3c3   : > { %v12765_v40 = vpop.f32.mrb[230].mxu1  ;;  %v196_v56 = vld [vmem:[%s10873_s17 + $0x1a0] sm:$0xff] }
 0x3c4   : > { %16549 = vst [vmem:[#allocation302_spill] sm:$0xff] %v12765_v40  ;;  %v12767_v46 = vpop.f32.mrb[230].mxu0  ;;  %v12769_v30 = vpop.f32.mrb[231].mxu1  ;;  %3902 = vmatmul.mubr.f32.gmra.mrb[230].mxu1 %v181_v24 }
 0x3c5   : > { %16550 = vst [vmem:[#allocation303_spill] sm:$0xff] %v12767_v46  ;;  %16551 = vst [vmem:[#allocation304_spill] sm:$0xff] %v12769_v30  ;;  %v12771_v15 = vpop.f32.mrb[231].mxu0  ;;  %9061 = vmatmul.mubr.msk.f32.gmra.mrb[230].mxu0 %vm1856_vm0, %v185_v60  ;;  %3906 = vmatprep.mubr.f32.mxu1 %v189_v16  ;;  %v195_v16 = vld [vmem:[%s10873_s17 + $0x198] sm:$0xff] }
 0x3c6   : > { %16552 = vst [vmem:[#allocation305_spill] sm:$0xff] %v12771_v15  ;;  %6520 = vmatprep.mubr.f32.mxu0 %v16202_v20  ;;  %v199_v60 = vld [vmem:[%s10873_s17 + $0x1b8] sm:$0xff] }
 0x3c7   : > { %v12778_v14 = vpop.f32.mrb[232].mxu1  ;;  %v203_v15 = vld [vmem:[%s10873_s17 + $0x1d8] sm:$0xff] }
 0x3c8   : > { %16553 = vst [vmem:[#allocation306_spill] sm:$0xff] %v12778_v14  ;;  %v12780_v40 = vpop.f32.mrb[232].mxu0  ;;  %v12782_v46 = vpop.f32.mrb[233].mxu1  ;;  %3907 = vmatmul.mubr.f32.gmra.mrb[232].mxu1 %v188_v4 }
 0x3c9   : > { %16554 = vst [vmem:[#allocation307_spill] sm:$0xff] %v12780_v40  ;;  %16555 = vst [vmem:[#allocation308_spill] sm:$0xff] %v12782_v46  ;;  %v12784_v24 = vpop.f32.mrb[233].mxu0  ;;  %9062 = vmatmul.mubr.msk.f32.gmra.mrb[232].mxu0 %vm1856_vm0, %v192_v58  ;;  %3911 = vmatprep.mubr.f32.mxu1 %v196_v56  ;;  %v202_v56 = vld [vmem:[%s10873_s17 + $0x1d0] sm:$0xff] }
 0x3ca   : > { %16556 = vst [vmem:[#allocation309_spill] sm:$0xff] %v12784_v24  ;;  %6525 = vmatprep.mubr.f32.mxu0 %v16202_v20  ;;  %v206_v58 = vld [vmem:[%s10873_s17 + $0x1f0] sm:$0xff] }
 0x3cb   : > { %v12791_v30 = vpop.f32.mrb[234].mxu1  ;;  %v210_v24 = vld [vmem:[%s10873_s17 + $0x210] sm:$0xff] }
 0x3cc   : > { %16557 = vst [vmem:[#allocation310_spill] sm:$0xff] %v12791_v30  ;;  %v12793_v14 = vpop.f32.mrb[234].mxu0  ;;  %v12795_v40 = vpop.f32.mrb[235].mxu1  ;;  %3912 = vmatmul.mubr.f32.gmra.mrb[234].mxu1 %v195_v16 }
 0x3cd   : > { %16558 = vst [vmem:[#allocation311_spill] sm:$0xff] %v12793_v14  ;;  %16559 = vst [vmem:[#allocation312_spill] sm:$0xff] %v12795_v40  ;;  %v12797_v4 = vpop.f32.mrb[235].mxu0  ;;  %9063 = vmatmul.mubr.msk.f32.gmra.mrb[234].mxu0 %vm1856_vm0, %v199_v60  ;;  %3916 = vmatprep.mubr.f32.mxu1 %v203_v15  ;;  %v209_v15 = vld [vmem:[%s10873_s17 + $0x208] sm:$0xff] }
 0x3ce   : > { %16560 = vst [vmem:[#allocation313_spill] sm:$0xff] %v12797_v4  ;;  %6530 = vmatprep.mubr.f32.mxu0 %v16202_v20  ;;  %v213_v60 = vld [vmem:[%s10873_s17 + $0x228] sm:$0xff] }
 0x3cf   : > { %v12804_v46 = vpop.f32.mrb[236].mxu1  ;;  %v217_v4 = vld [vmem:[%s10873_s17 + $0x248] sm:$0xff] }
 0x3d0   : > { %16561 = vst [vmem:[#allocation314_spill] sm:$0xff] %v12804_v46  ;;  %v12806_v30 = vpop.f32.mrb[236].mxu0  ;;  %v12808_v14 = vpop.f32.mrb[237].mxu1  ;;  %3917 = vmatmul.mubr.f32.gmra.mrb[236].mxu1 %v202_v56 }
 0x3d1   : > { %16562 = vst [vmem:[#allocation315_spill] sm:$0xff] %v12806_v30  ;;  %16563 = vst [vmem:[#allocation316_spill] sm:$0xff] %v12808_v14  ;;  %v12810_v16 = vpop.f32.mrb[237].mxu0  ;;  %9064 = vmatmul.mubr.msk.f32.gmra.mrb[236].mxu0 %vm1856_vm0, %v206_v58  ;;  %3921 = vmatprep.mubr.f32.mxu1 %v210_v24  ;;  %v216_v24 = vld [vmem:[%s10873_s17 + $0x240] sm:$0xff] }
 0x3d2   : > { %16564 = vst [vmem:[#allocation317_spill] sm:$0xff] %v12810_v16  ;;  %6535 = vmatprep.mubr.f32.mxu0 %v16202_v20  ;;  %v220_v58 = vld [vmem:[%s10873_s17 + $0x260] sm:$0xff] }
 0x3d3   : > { %v12817_v40 = vpop.f32.mrb[238].mxu1  ;;  %v224_v16 = vld [vmem:[%s10873_s17 + $0x280] sm:$0xff] }
 0x3d4   : > { %16565 = vst [vmem:[#allocation318_spill] sm:$0xff] %v12817_v40  ;;  %v12819_v46 = vpop.f32.mrb[238].mxu0  ;;  %v12821_v30 = vpop.f32.mrb[239].mxu1  ;;  %3922 = vmatmul.mubr.f32.gmra.mrb[238].mxu1 %v209_v15 }
 0x3d5   : > { %16566 = vst [vmem:[#allocation319_spill] sm:$0xff] %v12819_v46  ;;  %16567 = vst [vmem:[#allocation320_spill] sm:$0xff] %v12821_v30  ;;  %v12823_v56 = vpop.f32.mrb[239].mxu0  ;;  %9065 = vmatmul.mubr.msk.f32.gmra.mrb[238].mxu0 %vm1856_vm0, %v213_v60  ;;  %3926 = vmatprep.mubr.f32.mxu1 %v217_v4  ;;  %v223_v4 = vld [vmem:[%s10873_s17 + $0x278] sm:$0xff] }
 0x3d6   : > { %16568 = vst [vmem:[#allocation321_spill] sm:$0xff] %v12823_v56  ;;  %6540 = vmatprep.mubr.f32.mxu0 %v16202_v20  ;;  %v227_v60 = vld [vmem:[%s10873_s17 + $0x298] sm:$0xff] }
 0x3d7   : > { %v12830_v14 = vpop.f32.mrb[240].mxu1  ;;  %v231_v56 = vld [vmem:[%s10873_s17 + $0x2b8] sm:$0xff] }
 0x3d8   : > { %16569 = vst [vmem:[#allocation322_spill] sm:$0xff] %v12830_v14  ;;  %v12832_v40 = vpop.f32.mrb[240].mxu0  ;;  %v12834_v46 = vpop.f32.mrb[241].mxu1  ;;  %3927 = vmatmul.mubr.f32.gmra.mrb[240].mxu1 %v216_v24 }
 0x3d9   : > { %16570 = vst [vmem:[#allocation323_spill] sm:$0xff] %v12832_v40  ;;  %16571 = vst [vmem:[#allocation324_spill] sm:$0xff] %v12834_v46  ;;  %v12836_v15 = vpop.f32.mrb[241].mxu0  ;;  %9066 = vmatmul.mubr.msk.f32.gmra.mrb[240].mxu0 %vm1856_vm0, %v220_v58  ;;  %3931 = vmatprep.mubr.f32.mxu1 %v224_v16  ;;  %v230_v16 = vld [vmem:[%s10873_s17 + $0x2b0] sm:$0xff] }
 0x3da   : > { %16572 = vst [vmem:[#allocation325_spill] sm:$0xff] %v12836_v15  ;;  %6545 = vmatprep.mubr.f32.mxu0 %v16202_v20  ;;  %v234_v58 = vld [vmem:[%s10873_s17 + $0x2d0] sm:$0xff] }
 0x3db   : > { %v12843_v30 = vpop.f32.mrb[242].mxu1  ;;  %v238_v15 = vld [vmem:[%s10873_s17 + $0x2f0] sm:$0xff] }
 0x3dc   : > { %16573 = vst [vmem:[#allocation326_spill] sm:$0xff] %v12843_v30  ;;  %v12845_v14 = vpop.f32.mrb[242].mxu0  ;;  %v12847_v40 = vpop.f32.mrb[243].mxu1  ;;  %3932 = vmatmul.mubr.f32.gmra.mrb[242].mxu1 %v223_v4 }
 0x3dd   : > { %16574 = vst [vmem:[#allocation327_spill] sm:$0xff] %v12845_v14  ;;  %16575 = vst [vmem:[#allocation328_spill] sm:$0xff] %v12847_v40  ;;  %v12849_v24 = vpop.f32.mrb[243].mxu0  ;;  %9067 = vmatmul.mubr.msk.f32.gmra.mrb[242].mxu0 %vm1856_vm0, %v227_v60  ;;  %3936 = vmatprep.mubr.f32.mxu1 %v231_v56  ;;  %v237_v56 = vld [vmem:[%s10873_s17 + $0x2e8] sm:$0xff] }
 0x3de   : > { %16576 = vst [vmem:[#allocation329_spill] sm:$0xff] %v12849_v24  ;;  %6550 = vmatprep.mubr.f32.mxu0 %v16202_v20  ;;  %v241_v60 = vld [vmem:[%s10873_s17 + $0x308] sm:$0xff] }
 0x3df   : > { %v12856_v46 = vpop.f32.mrb[244].mxu1  ;;  %v245_v24 = vld [vmem:[%s10873_s17 + $0x328] sm:$0xff] }
 0x3e0   : > { %16577 = vst [vmem:[#allocation330_spill] sm:$0xff] %v12856_v46  ;;  %v12858_v30 = vpop.f32.mrb[244].mxu0  ;;  %v12860_v14 = vpop.f32.mrb[245].mxu1  ;;  %3937 = vmatmul.mubr.f32.gmra.mrb[244].mxu1 %v230_v16 }
 0x3e1   : > { %16578 = vst [vmem:[#allocation331_spill] sm:$0xff] %v12858_v30  ;;  %16579 = vst [vmem:[#allocation332_spill] sm:$0xff] %v12860_v14  ;;  %v12862_v4 = vpop.f32.mrb[245].mxu0  ;;  %9068 = vmatmul.mubr.msk.f32.gmra.mrb[244].mxu0 %vm1856_vm0, %v234_v58  ;;  %3941 = vmatprep.mubr.f32.mxu1 %v238_v15  ;;  %v244_v15 = vld [vmem:[%s10873_s17 + $0x320] sm:$0xff] }
 0x3e2   : > { %16580 = vst [vmem:[#allocation333_spill] sm:$0xff] %v12862_v4  ;;  %6555 = vmatprep.mubr.f32.mxu0 %v16202_v20  ;;  %v248_v58 = vld [vmem:[%s10873_s17 + $0x340] sm:$0xff] }
 0x3e3   : > { %v12869_v40 = vpop.f32.mrb[246].mxu1  ;;  %v252_v4 = vld [vmem:[%s10873_s17 + $0x360] sm:$0xff] }
 0x3e4   : > { %16581 = vst [vmem:[#allocation334_spill] sm:$0xff] %v12869_v40  ;;  %v12871_v46 = vpop.f32.mrb[246].mxu0  ;;  %v12873_v30 = vpop.f32.mrb[247].mxu1  ;;  %3942 = vmatmul.mubr.f32.gmra.mrb[246].mxu1 %v237_v56 }
 0x3e5   : > { %16582 = vst [vmem:[#allocation335_spill] sm:$0xff] %v12871_v46  ;;  %16583 = vst [vmem:[#allocation336_spill] sm:$0xff] %v12873_v30  ;;  %v12875_v16 = vpop.f32.mrb[247].mxu0  ;;  %9069 = vmatmul.mubr.msk.f32.gmra.mrb[246].mxu0 %vm1856_vm0, %v241_v60  ;;  %3946 = vmatprep.mubr.f32.mxu1 %v245_v24  ;;  %v251_v24 = vld [vmem:[%s10873_s17 + $0x358] sm:$0xff] }
 0x3e6   : > { %16584 = vst [vmem:[#allocation337_spill] sm:$0xff] %v12875_v16  ;;  %6560 = vmatprep.mubr.f32.mxu0 %v16202_v20  ;;  %v255_v60 = vld [vmem:[%s10873_s17 + $0x378] sm:$0xff] }
 0x3e7   : > { %v12882_v14 = vpop.f32.mrb[248].mxu1  ;;  %v259_v16 = vld [vmem:[%s10873_s17 + $0x398] sm:$0xff] }
 0x3e8   : > { %16585 = vst [vmem:[#allocation338_spill] sm:$0xff] %v12882_v14  ;;  %v12884_v40 = vpop.f32.mrb[248].mxu0  ;;  %v12886_v46 = vpop.f32.mrb[249].mxu1  ;;  %3947 = vmatmul.mubr.f32.gmra.mrb[248].mxu1 %v244_v15 }
 0x3e9   : > { %16586 = vst [vmem:[#allocation339_spill] sm:$0xff] %v12884_v40  ;;  %16587 = vst [vmem:[#allocation340_spill] sm:$0xff] %v12886_v46  ;;  %v12888_v56 = vpop.f32.mrb[249].mxu0  ;;  %9070 = vmatmul.mubr.msk.f32.gmra.mrb[248].mxu0 %vm1856_vm0, %v248_v58  ;;  %3951 = vmatprep.mubr.f32.mxu1 %v252_v4  ;;  %v258_v4 = vld [vmem:[%s10873_s17 + $0x390] sm:$0xff] }
 0x3ea   : > { %16588 = vst [vmem:[#allocation341_spill] sm:$0xff] %v12888_v56  ;;  %6565 = vmatprep.mubr.f32.mxu0 %v16202_v20  ;;  %v262_v58 = vld [vmem:[%s10873_s17 + $0x3b0] sm:$0xff] }
 0x3eb   : > { %v12895_v30 = vpop.f32.mrb[250].mxu1  ;;  %v266_v56 = vld [vmem:[%s10873_s17 + $0x3d0] sm:$0xff] }
 0x3ec   : > { %16589 = vst [vmem:[#allocation342_spill] sm:$0xff] %v12895_v30  ;;  %v12897_v14 = vpop.f32.mrb[250].mxu0  ;;  %v12899_v40 = vpop.f32.mrb[251].mxu1  ;;  %3952 = vmatmul.mubr.f32.gmra.mrb[250].mxu1 %v251_v24 }
 0x3ed   : > { %16590 = vst [vmem:[#allocation343_spill] sm:$0xff] %v12897_v14  ;;  %16591 = vst [vmem:[#allocation344_spill] sm:$0xff] %v12899_v40  ;;  %v12901_v15 = vpop.f32.mrb[251].mxu0  ;;  %9071 = vmatmul.mubr.msk.f32.gmra.mrb[250].mxu0 %vm1856_vm0, %v255_v60  ;;  %3956 = vmatprep.mubr.f32.mxu1 %v259_v16  ;;  %v265_v16 = vld [vmem:[%s10873_s17 + $0x3c8] sm:$0xff] }
 0x3ee   : > { %16592 = vst [vmem:[#allocation345_spill] sm:$0xff] %v12901_v15  ;;  %6570 = vmatprep.mubr.f32.mxu0 %v16202_v20  ;;  %v269_v60 = vld [vmem:[%s10873_s17 + $0x3e8] sm:$0xff] }
 0x3ef   : > { %v12908_v46 = vpop.f32.mrb[252].mxu1  ;;  %v273_v15 = vld [vmem:[%s10873_s17 + $0x408] sm:$0xff] }
 0x3f0   : > { %16593 = vst [vmem:[#allocation346_spill] sm:$0xff] %v12908_v46  ;;  %v12910_v30 = vpop.f32.mrb[252].mxu0  ;;  %v12912_v14 = vpop.f32.mrb[253].mxu1  ;;  %3957 = vmatmul.mubr.f32.gmra.mrb[252].mxu1 %v258_v4 }
 0x3f1   : > { %16594 = vst [vmem:[#allocation347_spill] sm:$0xff] %v12910_v30  ;;  %16595 = vst [vmem:[#allocation348_spill] sm:$0xff] %v12912_v14  ;;  %v12914_v24 = vpop.f32.mrb[253].mxu0  ;;  %9072 = vmatmul.mubr.msk.f32.gmra.mrb[252].mxu0 %vm1856_vm0, %v262_v58  ;;  %3961 = vmatprep.mubr.f32.mxu1 %v266_v56  ;;  %v272_v56 = vld [vmem:[%s10873_s17 + $0x400] sm:$0xff] }
 0x3f2   : > { %16596 = vst [vmem:[#allocation349_spill] sm:$0xff] %v12914_v24  ;;  %6575 = vmatprep.mubr.f32.mxu0 %v16202_v20  ;;  %v276_v58 = vld [vmem:[%s10873_s17 + $0x420] sm:$0xff] }
 0x3f3   : > { %v12921_v46 = vpop.f32.mrb[254].mxu1 }
 0x3f4   : > { %16597 = vst [vmem:[#allocation350_spill] sm:$0xff] %v12921_v46  ;;  %v12923_v30 = vpop.f32.mrb[254].mxu0  ;;  %v12925_v4 = vpop.f32.mrb[255].mxu1  ;;  %3962 = vmatmul.mubr.f32.gmra.mrb[254].mxu1 %v265_v16  ;;  %v280_v46 = vld [vmem:[%s10873_s17 + $0x440] sm:$0xff]  ;;  %v283_v16 = vld [vmem:[%s10873_s17 + $0x458] sm:$0xff] }
 0x3f5   : > { %16598 = vst [vmem:[#allocation351_spill] sm:$0xff] %v12923_v30  ;;  %16599 = vst [vmem:[#allocation352_spill] sm:$0xff] %v12925_v4  ;;  %v12927_v24 = vpop.f32.mrb[255].mxu0  ;;  %9073 = vmatmul.mubr.msk.f32.gmra.mrb[254].mxu0 %vm1856_vm0, %v269_v60  ;;  %3966 = vmatprep.mubr.f32.mxu1 %v273_v15  ;;  %v279_v30 = vld [vmem:[%s10873_s17 + $0x438] sm:$0xff]  ;;  %v286_v15 = vld [vmem:[%s10873_s17 + $0x470] sm:$0xff] }
 0x3f6   : > { %16600 = vst [vmem:[#allocation353_spill] sm:$0xff] %v12927_v24  ;;  %6580 = vmatprep.mubr.f32.mxu0 %v16202_v20  ;;  %v287_v60 = vld [vmem:[%s10873_s17 + $0x478] sm:$0xff]  ;;  %v388_v24 = vld [vmem:[%s10873_s17 + $0x7a0] sm:$0xff] }
 0x3f8   : > { %3967 = vmatmul.mubr.f32.gmra.mrb[36].mxu1 %v272_v56  ;;  %v290_v56 = vld [vmem:[%s10873_s17 + $0x490] sm:$0xff] }
 0x3f9   : > { %9074 = vmatmul.mubr.msk.f32.gmra.mrb[36].mxu0 %vm1856_vm0, %v276_v58  ;;  %3971 = vmatprep.mubr.f32.mxu1 %v280_v46  ;;  %v294_v58 = vld [vmem:[%s10873_s17 + $0x4b0] sm:$0xff]  ;;  %v293_v46 = vld [vmem:[%s10873_s17 + $0x4a8] sm:$0xff] }
 0x3fa   : > { %6585 = vmatprep.mubr.f32.mxu0 %v16202_v20 }
 0x3fc   : > { %3972 = vmatmul.mubr.f32.gmra.mrb[38].mxu1 %v279_v30  ;;  %v297_v30 = vld [vmem:[%s10873_s17 + $0x4c8] sm:$0xff] }
 0x3fd   : > { %9075 = vmatmul.mubr.msk.f32.gmra.mrb[38].mxu0 %vm1856_vm0, %v283_v16  ;;  %3976 = vmatprep.mubr.f32.mxu1 %v287_v60  ;;  %v301_v16 = vld [vmem:[%s10873_s17 + $0x4e8] sm:$0xff]  ;;  %v300_v60 = vld [vmem:[%s10873_s17 + $0x4e0] sm:$0xff] }
 0x3fe   : > { %6590 = vmatprep.mubr.f32.mxu0 %v16202_v20 }
 0x400   : > { %3977 = vmatmul.mubr.f32.gmra.mrb[40].mxu1 %v286_v15  ;;  %v304_v15 = vld [vmem:[%s10873_s17 + $0x500] sm:$0xff] }
 0x401   : > { %9076 = vmatmul.mubr.msk.f32.gmra.mrb[40].mxu0 %vm1856_vm0, %v290_v56  ;;  %3981 = vmatprep.mubr.f32.mxu1 %v294_v58  ;;  %v308_v56 = vld [vmem:[%s10873_s17 + $0x520] sm:$0xff]  ;;  %v307_v58 = vld [vmem:[%s10873_s17 + $0x518] sm:$0xff] }
 0x402   : > { %6595 = vmatprep.mubr.f32.mxu0 %v16202_v20 }
 0x404   : > { %3982 = vmatmul.mubr.f32.gmra.mrb[42].mxu1 %v293_v46  ;;  %v311_v46 = vld [vmem:[%s10873_s17 + $0x538] sm:$0xff] }
 0x405   : > { %9077 = vmatmul.mubr.msk.f32.gmra.mrb[42].mxu0 %vm1856_vm0, %v297_v30  ;;  %3986 = vmatprep.mubr.f32.mxu1 %v301_v16  ;;  %v315_v30 = vld [vmem:[%s10873_s17 + $0x558] sm:$0xff]  ;;  %v314_v16 = vld [vmem:[%s10873_s17 + $0x550] sm:$0xff] }
 0x406   : > { %6600 = vmatprep.mubr.f32.mxu0 %v16202_v20 }
 0x408   : > { %3987 = vmatmul.mubr.f32.gmra.mrb[44].mxu1 %v300_v60  ;;  %v318_v60 = vld [vmem:[%s10873_s17 + $0x570] sm:$0xff] }
 0x409   : > { %9078 = vmatmul.mubr.msk.f32.gmra.mrb[44].mxu0 %vm1856_vm0, %v304_v15  ;;  %3991 = vmatprep.mubr.f32.mxu1 %v308_v56  ;;  %v322_v15 = vld [vmem:[%s10873_s17 + $0x590] sm:$0xff]  ;;  %v321_v56 = vld [vmem:[%s10873_s17 + $0x588] sm:$0xff] }
 0x40a   : > { %6605 = vmatprep.mubr.f32.mxu0 %v16202_v20 }
 0x40c   : > { %3992 = vmatmul.mubr.f32.gmra.mrb[46].mxu1 %v307_v58  ;;  %v325_v58 = vld [vmem:[%s10873_s17 + $0x5a8] sm:$0xff] }
 0x40d   : > { %9079 = vmatmul.mubr.msk.f32.gmra.mrb[46].mxu0 %vm1856_vm0, %v311_v46  ;;  %3996 = vmatprep.mubr.f32.mxu1 %v315_v30  ;;  %v329_v46 = vld [vmem:[%s10873_s17 + $0x5c8] sm:$0xff]  ;;  %v328_v30 = vld [vmem:[%s10873_s17 + $0x5c0] sm:$0xff] }
 0x40e   : > { %6610 = vmatprep.mubr.f32.mxu0 %v16202_v20 }
 0x410   : > { %3997 = vmatmul.mubr.f32.gmra.mrb[48].mxu1 %v314_v16  ;;  %v332_v16 = vld [vmem:[%s10873_s17 + $0x5e0] sm:$0xff] }
 0x411   : > { %9080 = vmatmul.mubr.msk.f32.gmra.mrb[48].mxu0 %vm1856_vm0, %v318_v60  ;;  %4001 = vmatprep.mubr.f32.mxu1 %v322_v15  ;;  %v336_v60 = vld [vmem:[%s10873_s17 + $0x600] sm:$0xff]  ;;  %v335_v15 = vld [vmem:[%s10873_s17 + $0x5f8] sm:$0xff] }
 0x412   : > { %6615 = vmatprep.mubr.f32.mxu0 %v16202_v20 }
 0x414   : > { %4002 = vmatmul.mubr.f32.gmra.mrb[50].mxu1 %v321_v56  ;;  %v339_v56 = vld [vmem:[%s10873_s17 + $0x618] sm:$0xff] }
 0x415   : > { %9081 = vmatmul.mubr.msk.f32.gmra.mrb[50].mxu0 %vm1856_vm0, %v325_v58  ;;  %4006 = vmatprep.mubr.f32.mxu1 %v329_v46  ;;  %v343_v58 = vld [vmem:[%s10873_s17 + $0x638] sm:$0xff]  ;;  %v342_v46 = vld [vmem:[%s10873_s17 + $0x630] sm:$0xff] }
 0x416   : > { %6620 = vmatprep.mubr.f32.mxu0 %v16202_v20 }
 0x418   : > { %4007 = vmatmul.mubr.f32.gmra.mrb[52].mxu1 %v328_v30  ;;  %v346_v30 = vld [vmem:[%s10873_s17 + $0x650] sm:$0xff] }
 0x419   : > { %9082 = vmatmul.mubr.msk.f32.gmra.mrb[52].mxu0 %vm1856_vm0, %v332_v16  ;;  %4011 = vmatprep.mubr.f32.mxu1 %v336_v60  ;;  %v350_v16 = vld [vmem:[%s10873_s17 + $0x670] sm:$0xff]  ;;  %v349_v60 = vld [vmem:[%s10873_s17 + $0x668] sm:$0xff] }
 0x41a   : > { %6625 = vmatprep.mubr.f32.mxu0 %v16202_v20 }
 0x41c   : > { %4012 = vmatmul.mubr.f32.gmra.mrb[54].mxu1 %v335_v15  ;;  %v353_v15 = vld [vmem:[%s10873_s17 + $0x688] sm:$0xff] }
 0x41d   : > { %9083 = vmatmul.mubr.msk.f32.gmra.mrb[54].mxu0 %vm1856_vm0, %v339_v56  ;;  %4016 = vmatprep.mubr.f32.mxu1 %v343_v58  ;;  %v357_v56 = vld [vmem:[%s10873_s17 + $0x6a8] sm:$0xff]  ;;  %v356_v58 = vld [vmem:[%s10873_s17 + $0x6a0] sm:$0xff] }
 0x41e   : > { %6630 = vmatprep.mubr.f32.mxu0 %v16202_v20 }
 0x420   : > { %4017 = vmatmul.mubr.f32.gmra.mrb[56].mxu1 %v342_v46  ;;  %v360_v46 = vld [vmem:[%s10873_s17 + $0x6c0] sm:$0xff] }
 0x421   : > { %9084 = vmatmul.mubr.msk.f32.gmra.mrb[56].mxu0 %vm1856_vm0, %v346_v30  ;;  %4021 = vmatprep.mubr.f32.mxu1 %v350_v16  ;;  %v364_v30 = vld [vmem:[%s10873_s17 + $0x6e0] sm:$0xff]  ;;  %v363_v16 = vld [vmem:[%s10873_s17 + $0x6d8] sm:$0xff] }
 0x422   : > { %6635 = vmatprep.mubr.f32.mxu0 %v16202_v20 }
 0x424   : > { %4022 = vmatmul.mubr.f32.gmra.mrb[58].mxu1 %v349_v60  ;;  %v367_v60 = vld [vmem:[%s10873_s17 + $0x6f8] sm:$0xff] }
 0x425   : > { %9085 = vmatmul.mubr.msk.f32.gmra.mrb[58].mxu0 %vm1856_vm0, %v353_v15  ;;  %4026 = vmatprep.mubr.f32.mxu1 %v357_v56  ;;  %v371_v15 = vld [vmem:[%s10873_s17 + $0x718] sm:$0xff]  ;;  %v370_v56 = vld [vmem:[%s10873_s17 + $0x710] sm:$0xff] }
 0x426   : > { %6640 = vmatprep.mubr.f32.mxu0 %v16202_v20 }
 0x428   : > { %4027 = vmatmul.mubr.f32.gmra.mrb[60].mxu1 %v356_v58  ;;  %v374_v58 = vld [vmem:[%s10873_s17 + $0x730] sm:$0xff] }
 0x429   : > { %9086 = vmatmul.mubr.msk.f32.gmra.mrb[60].mxu0 %vm1856_vm0, %v360_v46  ;;  %4031 = vmatprep.mubr.f32.mxu1 %v364_v30  ;;  %v378_v46 = vld [vmem:[%s10873_s17 + $0x750] sm:$0xff]  ;;  %v377_v30 = vld [vmem:[%s10873_s17 + $0x748] sm:$0xff] }
 0x42a   : > { %6645 = vmatprep.mubr.f32.mxu0 %v16202_v20 }
 0x42c   : > { %4032 = vmatmul.mubr.f32.gmra.mrb[62].mxu1 %v363_v16  ;;  %v381_v16 = vld [vmem:[%s10873_s17 + $0x768] sm:$0xff] }
 0x42d   : > { %9087 = vmatmul.mubr.msk.f32.gmra.mrb[62].mxu0 %vm1856_vm0, %v367_v60  ;;  %4036 = vmatprep.mubr.f32.mxu1 %v371_v15  ;;  %v385_v60 = vld [vmem:[%s10873_s17 + $0x788] sm:$0xff]  ;;  %v384_v15 = vld [vmem:[%s10873_s17 + $0x780] sm:$0xff] }
 0x42e   : > { %6650 = vmatprep.mubr.f32.mxu0 %v16202_v20 }
 0x430   : > { %4037 = vmatmul.mubr.f32.gmra.mrb[64].mxu1 %v370_v56  ;;  %v392_v56 = vld [vmem:[%s10873_s17 + $0x7c0] sm:$0xff] }
 0x431   : > { %9088 = vmatmul.mubr.msk.f32.gmra.mrb[64].mxu0 %vm1856_vm0, %v374_v58  ;;  %4041 = vmatprep.mubr.f32.mxu1 %v378_v46  ;;  %v391_v58 = vld [vmem:[%s10873_s17 + $0x7b8] sm:$0xff] }
 0x432   : > { %6655 = vmatprep.mubr.f32.mxu0 %v16202_v20  ;;  %v395_v46 = vld [vmem:[%s10873_s17 + $0x7d8] sm:$0xff] }
 0x434   : > { %4042 = vmatmul.mubr.f32.gmra.mrb[66].mxu1 %v377_v30  ;;  %v399_v30 = vld [vmem:[%s10873_s17 + $0x7f8] sm:$0xff] }
 0x435   : > { %9089 = vmatmul.mubr.msk.f32.gmra.mrb[66].mxu0 %vm1856_vm0, %v381_v16  ;;  %4046 = vmatprep.mubr.f32.mxu1 %v385_v60 }
 0x436   : > { %6660 = vmatprep.mubr.f32.mxu0 %v16202_v20 }
 0x438   : > { %4047 = vmatmul.mubr.f32.gmra.mrb[68].mxu1 %v384_v15  ;;  %v402_v15 = vld [vmem:[%s10873_s17 + $0x810] sm:$0xff] }
 0x439   : > { %9090 = vmatmul.mubr.msk.f32.gmra.mrb[68].mxu0 %vm1856_vm0, %v388_v24  ;;  %4051 = vmatprep.mubr.f32.mxu1 %v392_v56  ;;  %v398_v24 = vld [vmem:[%s10873_s17 + $0x7f0] sm:$0xff] }
 0x43a   : > { %6665 = vmatprep.mubr.f32.mxu0 %v16202_v20  ;;  %v406_v56 = vld [vmem:[%s10873_s17 + $0x830] sm:$0xff] }
 0x43b   : > { %v3723_v4 = vpop.f32.mrb[34].mxu1 }
 0x43c   : > { %v6337_v16 = vpop.f32.mrb[34].mxu0  ;;  %v13019_v60 = vpop.f32.mrb[35].mxu1  ;;  %4052 = vmatmul.mubr.f32.gmra.mrb[70].mxu1 %v391_v58  ;;  %v405_v58 = vld [vmem:[%s10873_s17 + $0x828] sm:$0xff] }
 0x43d   : > { %16601 = vst [vmem:[#allocation354_spill] sm:$0xff] %v13019_v60  ;;  %v13021_v14 = vpop.f32.mrb[35].mxu0  ;;  %9091 = vmatmul.mubr.msk.f32.gmra.mrb[70].mxu0 %vm1856_vm0, %v395_v46  ;;  %4056 = vmatprep.mubr.f32.mxu1 %v399_v30  ;;  %v409_v46 = vld [vmem:[%s10873_s17 + $0x848] sm:$0xff] }
 0x43e   : > { %16602 = vst [vmem:[#allocation355_spill] sm:$0xff] %v13021_v14  ;;  %6670 = vmatprep.mubr.f32.mxu0 %v16202_v20  ;;  %v413_v30 = vld [vmem:[%s10873_s17 + $0x868] sm:$0xff] }
 0x43f   : > { %v3728_v40 = vpop.f32.mrb[186].mxu1 }
 0x440   : > { %v6342_v39 = vpop.f32.mrb[186].mxu0  ;;  %v13028_v4 = vpop.f32.mrb[187].mxu1  ;;  %4057 = vmatmul.mubr.f32.gmra.mrb[72].mxu1 %v398_v24  ;;  %v412_v24 = vld [vmem:[%s10873_s17 + $0x860] sm:$0xff] }
 0x441   : > { %16603 = vst [vmem:[#allocation356_spill] sm:$0xff] %v13028_v4  ;;  %v13030_v16 = vpop.f32.mrb[187].mxu0  ;;  %9092 = vmatmul.mubr.msk.f32.gmra.mrb[72].mxu0 %vm1856_vm0, %v402_v15  ;;  %4062 = vmatprep.mubr.f32.mxu1 %v406_v56  ;;  %v416_v15 = vld [vmem:[%s10873_s17 + $0x880] sm:$0xff] }
 0x442   : > { %16604 = vst [vmem:[#allocation357_spill] sm:$0xff] %v13030_v16  ;;  %6676 = vmatprep.mubr.f32.mxu0 %v16202_v20  ;;  %v420_v56 = vld [vmem:[%s10873_s17 + $0x8a0] sm:$0xff] }
 0x443   : > { %v3733_v14 = vpop.f32.mrb[188].mxu1 }
 0x444   : > { %v6347_v60 = vpop.f32.mrb[188].mxu0  ;;  %v13037_v40 = vpop.f32.mrb[189].mxu1  ;;  %4063 = vmatmul.mubr.f32.gmra.mrb[74].mxu1 %v405_v58  ;;  %v419_v58 = vld [vmem:[%s10873_s17 + $0x898] sm:$0xff] }
 0x445   : > { %16605 = vst [vmem:[#allocation358_spill] sm:$0xff] %v13037_v40  ;;  %v13039_v39 = vpop.f32.mrb[189].mxu0  ;;  %9093 = vmatmul.mubr.msk.f32.gmra.mrb[74].mxu0 %vm1856_vm0, %v409_v46  ;;  %4068 = vmatprep.mubr.f32.mxu1 %v413_v30  ;;  %v423_v46 = vld [vmem:[%s10873_s17 + $0x8b8] sm:$0xff] }
 0x446   : > { %16606 = vst [vmem:[#allocation359_spill] sm:$0xff] %v13039_v39  ;;  %6682 = vmatprep.mubr.f32.mxu0 %v16202_v20  ;;  %v427_v30 = vld [vmem:[%s10873_s17 + $0x8d8] sm:$0xff] }
 0x447   : > { %v3738_v16 = vpop.f32.mrb[190].mxu1 }
 0x448   : > { %v6352_v4 = vpop.f32.mrb[190].mxu0  ;;  %v13046_v14 = vpop.f32.mrb[191].mxu1  ;;  %4069 = vmatmul.mubr.f32.gmra.mrb[76].mxu1 %v412_v24  ;;  %v426_v24 = vld [vmem:[%s10873_s17 + $0x8d0] sm:$0xff] }
 0x449   : > { %16607 = vst [vmem:[#allocation360_spill] sm:$0xff] %v13046_v14  ;;  %v13048_v60 = vpop.f32.mrb[191].mxu0  ;;  %9094 = vmatmul.mubr.msk.f32.gmra.mrb[76].mxu0 %vm1856_vm0, %v416_v15  ;;  %4074 = vmatprep.mubr.f32.mxu1 %v420_v56  ;;  %v430_v15 = vld [vmem:[%s10873_s17 + $0x8f0] sm:$0xff] }
 0x44a   : > { %16608 = vst [vmem:[#allocation361_spill] sm:$0xff] %v13048_v60  ;;  %6688 = vmatprep.mubr.f32.mxu0 %v16202_v20  ;;  %v434_v56 = vld [vmem:[%s10873_s17 + $0x910] sm:$0xff] }
 0x44b   : > { %v3743_v39 = vpop.f32.mrb[192].mxu1 }
 0x44c   : > { %v6357_v40 = vpop.f32.mrb[192].mxu0  ;;  %v13055_v16 = vpop.f32.mrb[193].mxu1  ;;  %4075 = vmatmul.mubr.f32.gmra.mrb[78].mxu1 %v419_v58  ;;  %v433_v58 = vld [vmem:[%s10873_s17 + $0x908] sm:$0xff] }
 0x44d   : > { %16609 = vst [vmem:[#allocation362_spill] sm:$0xff] %v13055_v16  ;;  %v13057_v4 = vpop.f32.mrb[193].mxu0  ;;  %9095 = vmatmul.mubr.msk.f32.gmra.mrb[78].mxu0 %vm1856_vm0, %v423_v46  ;;  %4080 = vmatprep.mubr.f32.mxu1 %v427_v30  ;;  %v437_v46 = vld [vmem:[%s10873_s17 + $0x928] sm:$0xff] }
 0x44e   : > { %16610 = vst [vmem:[#allocation363_spill] sm:$0xff] %v13057_v4  ;;  %6694 = vmatprep.mubr.f32.mxu0 %v16202_v20  ;;  %v441_v30 = vld [vmem:[%s10873_s17 + $0x948] sm:$0xff] }
 0x44f   : > { %v3748_v60 = vpop.f32.mrb[194].mxu1 }
 0x450   : > { %v6362_v14 = vpop.f32.mrb[194].mxu0  ;;  %v13064_v39 = vpop.f32.mrb[195].mxu1  ;;  %4081 = vmatmul.mubr.f32.gmra.mrb[80].mxu1 %v426_v24  ;;  %v440_v24 = vld [vmem:[%s10873_s17 + $0x940] sm:$0xff] }
 0x451   : > { %16611 = vst [vmem:[#allocation364_spill] sm:$0xff] %v13064_v39  ;;  %v13066_v40 = vpop.f32.mrb[195].mxu0  ;;  %9096 = vmatmul.mubr.msk.f32.gmra.mrb[80].mxu0 %vm1856_vm0, %v430_v15  ;;  %4086 = vmatprep.mubr.f32.mxu1 %v434_v56  ;;  %v444_v15 = vld [vmem:[%s10873_s17 + $0x960] sm:$0xff] }
 0x452   : > { %16612 = vst [vmem:[#allocation365_spill] sm:$0xff] %v13066_v40  ;;  %6700 = vmatprep.mubr.f32.mxu0 %v16202_v20  ;;  %v448_v56 = vld [vmem:[%s10873_s17 + $0x980] sm:$0xff] }
 0x453   : > { %v3753_v4 = vpop.f32.mrb[196].mxu1 }
 0x454   : > { %v6367_v16 = vpop.f32.mrb[196].mxu0  ;;  %v13073_v60 = vpop.f32.mrb[197].mxu1  ;;  %4087 = vmatmul.mubr.f32.gmra.mrb[82].mxu1 %v433_v58  ;;  %v447_v58 = vld [vmem:[%s10873_s17 + $0x978] sm:$0xff] }
 0x455   : > { %16613 = vst [vmem:[#allocation366_spill] sm:$0xff] %v13073_v60  ;;  %v13075_v14 = vpop.f32.mrb[197].mxu0  ;;  %9097 = vmatmul.mubr.msk.f32.gmra.mrb[82].mxu0 %vm1856_vm0, %v437_v46  ;;  %4092 = vmatprep.mubr.f32.mxu1 %v441_v30  ;;  %v451_v46 = vld [vmem:[%s10873_s17 + $0x998] sm:$0xff] }
 0x456   : > { %16614 = vst [vmem:[#allocation367_spill] sm:$0xff] %v13075_v14  ;;  %6706 = vmatprep.mubr.f32.mxu0 %v16202_v20  ;;  %v455_v30 = vld [vmem:[%s10873_s17 + $0x9b8] sm:$0xff] }
 0x457   : > { %v3758_v40 = vpop.f32.mrb[198].mxu1 }
 0x458   : > { %v6372_v39 = vpop.f32.mrb[198].mxu0  ;;  %v13082_v4 = vpop.f32.mrb[199].mxu1  ;;  %4093 = vmatmul.mubr.f32.gmra.mrb[84].mxu1 %v440_v24  ;;  %v454_v24 = vld [vmem:[%s10873_s17 + $0x9b0] sm:$0xff] }
 0x459   : > { %16615 = vst [vmem:[#allocation368_spill] sm:$0xff] %v13082_v4  ;;  %v13084_v16 = vpop.f32.mrb[199].mxu0  ;;  %9098 = vmatmul.mubr.msk.f32.gmra.mrb[84].mxu0 %vm1856_vm0, %v444_v15  ;;  %4098 = vmatprep.mubr.f32.mxu1 %v448_v56  ;;  %v458_v15 = vld [vmem:[%s10873_s17 + $0x9d0] sm:$0xff] }
 0x45a   : > { %16616 = vst [vmem:[#allocation369_spill] sm:$0xff] %v13084_v16  ;;  %6712 = vmatprep.mubr.f32.mxu0 %v16202_v20  ;;  %v462_v56 = vld [vmem:[%s10873_s17 + $0x9f0] sm:$0xff] }
 0x45b   : > { %v3763_v14 = vpop.f32.mrb[200].mxu1 }
 0x45c   : > { %v6377_v60 = vpop.f32.mrb[200].mxu0  ;;  %v13091_v40 = vpop.f32.mrb[201].mxu1  ;;  %4099 = vmatmul.mubr.f32.gmra.mrb[86].mxu1 %v447_v58  ;;  %v461_v58 = vld [vmem:[%s10873_s17 + $0x9e8] sm:$0xff] }
 0x45d   : > { %16617 = vst [vmem:[#allocation370_spill] sm:$0xff] %v13091_v40  ;;  %v13093_v39 = vpop.f32.mrb[201].mxu0  ;;  %9099 = vmatmul.mubr.msk.f32.gmra.mrb[86].mxu0 %vm1856_vm0, %v451_v46  ;;  %4104 = vmatprep.mubr.f32.mxu1 %v455_v30  ;;  %v465_v46 = vld [vmem:[%s10873_s17 + $0xa08] sm:$0xff] }
 0x45e   : > { %16618 = vst [vmem:[#allocation371_spill] sm:$0xff] %v13093_v39  ;;  %6718 = vmatprep.mubr.f32.mxu0 %v16202_v20  ;;  %v469_v30 = vld [vmem:[%s10873_s17 + $0xa28] sm:$0xff] }
 0x45f   : > { %v3768_v16 = vpop.f32.mrb[202].mxu1 }
 0x460   : > { %v6382_v4 = vpop.f32.mrb[202].mxu0  ;;  %v13100_v14 = vpop.f32.mrb[203].mxu1  ;;  %4105 = vmatmul.mubr.f32.gmra.mrb[88].mxu1 %v454_v24  ;;  %v468_v24 = vld [vmem:[%s10873_s17 + $0xa20] sm:$0xff] }
 0x461   : > { %16619 = vst [vmem:[#allocation372_spill] sm:$0xff] %v13100_v14  ;;  %v13102_v60 = vpop.f32.mrb[203].mxu0  ;;  %9100 = vmatmul.mubr.msk.f32.gmra.mrb[88].mxu0 %vm1856_vm0, %v458_v15  ;;  %4110 = vmatprep.mubr.f32.mxu1 %v462_v56  ;;  %v472_v15 = vld [vmem:[%s10873_s17 + $0xa40] sm:$0xff] }
 0x462   : > { %16620 = vst [vmem:[#allocation373_spill] sm:$0xff] %v13102_v60  ;;  %6724 = vmatprep.mubr.f32.mxu0 %v16202_v20  ;;  %v476_v56 = vld [vmem:[%s10873_s17 + $0xa60] sm:$0xff] }
 0x463   : > { %v3773_v39 = vpop.f32.mrb[204].mxu1 }
 0x464   : > { %v6387_v40 = vpop.f32.mrb[204].mxu0  ;;  %v13109_v16 = vpop.f32.mrb[205].mxu1  ;;  %4111 = vmatmul.mubr.f32.gmra.mrb[90].mxu1 %v461_v58  ;;  %v475_v58 = vld [vmem:[%s10873_s17 + $0xa58] sm:$0xff] }
 0x465   : > { %16621 = vst [vmem:[#allocation374_spill] sm:$0xff] %v13109_v16  ;;  %v13111_v4 = vpop.f32.mrb[205].mxu0  ;;  %9101 = vmatmul.mubr.msk.f32.gmra.mrb[90].mxu0 %vm1856_vm0, %v465_v46  ;;  %4116 = vmatprep.mubr.f32.mxu1 %v469_v30  ;;  %v479_v46 = vld [vmem:[%s10873_s17 + $0xa78] sm:$0xff] }
 0x466   : > { %16622 = vst [vmem:[#allocation375_spill] sm:$0xff] %v13111_v4  ;;  %6730 = vmatprep.mubr.f32.mxu0 %v16202_v20  ;;  %v483_v30 = vld [vmem:[%s10873_s17 + $0xa98] sm:$0xff] }
 0x467   : > { %v3778_v60 = vpop.f32.mrb[206].mxu1 }
 0x468   : > { %v6392_v14 = vpop.f32.mrb[206].mxu0  ;;  %v13118_v39 = vpop.f32.mrb[207].mxu1  ;;  %4117 = vmatmul.mubr.f32.gmra.mrb[92].mxu1 %v468_v24  ;;  %v482_v24 = vld [vmem:[%s10873_s17 + $0xa90] sm:$0xff] }
 0x469   : > { %16623 = vst [vmem:[#allocation376_spill] sm:$0xff] %v13118_v39  ;;  %v13120_v40 = vpop.f32.mrb[207].mxu0  ;;  %9102 = vmatmul.mubr.msk.f32.gmra.mrb[92].mxu0 %vm1856_vm0, %v472_v15  ;;  %4122 = vmatprep.mubr.f32.mxu1 %v476_v56  ;;  %v486_v15 = vld [vmem:[%s10873_s17 + $0xab0] sm:$0xff] }
 0x46a   : > { %16624 = vst [vmem:[#allocation377_spill] sm:$0xff] %v13120_v40  ;;  %6736 = vmatprep.mubr.f32.mxu0 %v16202_v20  ;;  %v490_v56 = vld [vmem:[%s10873_s17 + $0xad0] sm:$0xff] }
 0x46b   : > { %v3783_v4 = vpop.f32.mrb[208].mxu1 }
 0x46c   : > { %v6397_v16 = vpop.f32.mrb[208].mxu0  ;;  %v13127_v60 = vpop.f32.mrb[209].mxu1  ;;  %4123 = vmatmul.mubr.f32.gmra.mrb[94].mxu1 %v475_v58  ;;  %v489_v58 = vld [vmem:[%s10873_s17 + $0xac8] sm:$0xff] }
 0x46d   : > { %16625 = vst [vmem:[#allocation378_spill] sm:$0xff] %v13127_v60  ;;  %v13129_v14 = vpop.f32.mrb[209].mxu0  ;;  %9103 = vmatmul.mubr.msk.f32.gmra.mrb[94].mxu0 %vm1856_vm0, %v479_v46  ;;  %4128 = vmatprep.mubr.f32.mxu1 %v483_v30  ;;  %v493_v46 = vld [vmem:[%s10873_s17 + $0xae8] sm:$0xff] }
 0x46e   : > { %16626 = vst [vmem:[#allocation379_spill] sm:$0xff] %v13129_v14  ;;  %6742 = vmatprep.mubr.f32.mxu0 %v16202_v20  ;;  %v497_v30 = vld [vmem:[%s10873_s17 + $0xb08] sm:$0xff] }
 0x46f   : > { %v3788_v40 = vpop.f32.mrb[210].mxu1 }
 0x470   : > { %v6402_v39 = vpop.f32.mrb[210].mxu0  ;;  %v13136_v4 = vpop.f32.mrb[211].mxu1  ;;  %4129 = vmatmul.mubr.f32.gmra.mrb[96].mxu1 %v482_v24  ;;  %v496_v24 = vld [vmem:[%s10873_s17 + $0xb00] sm:$0xff] }
 0x471   : > { %16627 = vst [vmem:[#allocation380_spill] sm:$0xff] %v13136_v4  ;;  %v13138_v16 = vpop.f32.mrb[211].mxu0  ;;  %9104 = vmatmul.mubr.msk.f32.gmra.mrb[96].mxu0 %vm1856_vm0, %v486_v15  ;;  %4134 = vmatprep.mubr.f32.mxu1 %v490_v56  ;;  %v500_v15 = vld [vmem:[%s10873_s17 + $0xb20] sm:$0xff] }
 0x472   : > { %16628 = vst [vmem:[#allocation381_spill] sm:$0xff] %v13138_v16  ;;  %6748 = vmatprep.mubr.f32.mxu0 %v16202_v20  ;;  %v504_v56 = vld [vmem:[%s10873_s17 + $0xb40] sm:$0xff] }
 0x473   : > { %v3793_v14 = vpop.f32.mrb[212].mxu1 }
 0x474   : > { %v6407_v60 = vpop.f32.mrb[212].mxu0  ;;  %v13145_v40 = vpop.f32.mrb[213].mxu1  ;;  %4135 = vmatmul.mubr.f32.gmra.mrb[98].mxu1 %v489_v58  ;;  %v503_v58 = vld [vmem:[%s10873_s17 + $0xb38] sm:$0xff] }
 0x475   : > { %16629 = vst [vmem:[#allocation382_spill] sm:$0xff] %v13145_v40  ;;  %v13147_v39 = vpop.f32.mrb[213].mxu0  ;;  %9105 = vmatmul.mubr.msk.f32.gmra.mrb[98].mxu0 %vm1856_vm0, %v493_v46  ;;  %4140 = vmatprep.mubr.f32.mxu1 %v497_v30  ;;  %v507_v46 = vld [vmem:[%s10873_s17 + $0xb58] sm:$0xff] }
 0x476   : > { %16630 = vst [vmem:[#allocation383_spill] sm:$0xff] %v13147_v39  ;;  %6754 = vmatprep.mubr.f32.mxu0 %v16202_v20  ;;  %v511_v30 = vld [vmem:[%s10873_s17 + $0xb78] sm:$0xff] }
 0x477   : > { %v3798_v16 = vpop.f32.mrb[214].mxu1 }
 0x478   : > { %v6412_v4 = vpop.f32.mrb[214].mxu0  ;;  %v13154_v14 = vpop.f32.mrb[215].mxu1  ;;  %4141 = vmatmul.mubr.f32.gmra.mrb[100].mxu1 %v496_v24  ;;  %v510_v24 = vld [vmem:[%s10873_s17 + $0xb70] sm:$0xff] }
 0x479   : > { %16631 = vst [vmem:[#allocation384_spill] sm:$0xff] %v13154_v14  ;;  %v13156_v60 = vpop.f32.mrb[215].mxu0  ;;  %9106 = vmatmul.mubr.msk.f32.gmra.mrb[100].mxu0 %vm1856_vm0, %v500_v15  ;;  %4146 = vmatprep.mubr.f32.mxu1 %v504_v56  ;;  %v514_v15 = vld [vmem:[%s10873_s17 + $0xb90] sm:$0xff] }
 0x47a   : > { %16632 = vst [vmem:[#allocation385_spill] sm:$0xff] %v13156_v60  ;;  %6760 = vmatprep.mubr.f32.mxu0 %v16202_v20  ;;  %v518_v56 = vld [vmem:[%s10873_s17 + $0xbb0] sm:$0xff] }
 0x47b   : > { %v3803_v39 = vpop.f32.mrb[216].mxu1 }
 0x47c   : > { %v6417_v40 = vpop.f32.mrb[216].mxu0  ;;  %v13163_v16 = vpop.f32.mrb[217].mxu1  ;;  %4147 = vmatmul.mubr.f32.gmra.mrb[102].mxu1 %v503_v58  ;;  %v517_v58 = vld [vmem:[%s10873_s17 + $0xba8] sm:$0xff] }
 0x47d   : > { %16633 = vst [vmem:[#allocation386_spill] sm:$0xff] %v13163_v16  ;;  %v13165_v4 = vpop.f32.mrb[217].mxu0  ;;  %9107 = vmatmul.mubr.msk.f32.gmra.mrb[102].mxu0 %vm1856_vm0, %v507_v46  ;;  %4152 = vmatprep.mubr.f32.mxu1 %v511_v30  ;;  %v521_v46 = vld [vmem:[%s10873_s17 + $0xbc8] sm:$0xff] }
 0x47e   : > { %16634 = vst [vmem:[#allocation387_spill] sm:$0xff] %v13165_v4  ;;  %6766 = vmatprep.mubr.f32.mxu0 %v16202_v20  ;;  %v525_v30 = vld [vmem:[%s10873_s17 + $0xbe8] sm:$0xff] }
 0x47f   : > { %v3808_v60 = vpop.f32.mrb[218].mxu1 }
 0x480   : > { %v6422_v14 = vpop.f32.mrb[218].mxu0  ;;  %v13172_v39 = vpop.f32.mrb[219].mxu1  ;;  %4153 = vmatmul.mubr.f32.gmra.mrb[104].mxu1 %v510_v24 }
 0x481   : > { %16635 = vst [vmem:[#allocation388_spill] sm:$0xff] %v13172_v39  ;;  %v13174_v40 = vpop.f32.mrb[219].mxu0  ;;  %9108 = vmatmul.mubr.msk.f32.gmra.mrb[104].mxu0 %vm1856_vm0, %v514_v15  ;;  %4158 = vmatprep.mubr.f32.mxu1 %v518_v56  ;;  %v524_v15 = vld [vmem:[%s10873_s17 + $0xbe0] sm:$0xff] }
 0x482   : > { %16636 = vst [vmem:[#allocation389_spill] sm:$0xff] %v13174_v40  ;;  %6772 = vmatprep.mubr.f32.mxu0 %v16202_v20  ;;  %v528_v40 = vld [vmem:[%s10873_s17 + $0xc00] sm:$0xff] }
 0x483   : > { %v3878_v4 = vpop.f32.mrb[220].mxu1  ;;  %v532_v39 = vld [vmem:[%s10873_s17 + $0xc20] sm:$0xff] }
 0x484   : > { %v3879_v60 = vadd.f32 %v3878_v4, %v11296_v9  ;;  %v6492_v14 = vpop.f32.mrb[220].mxu0  ;;  %v3880_v16 = vpop.f32.mrb[221].mxu1  ;;  %4159 = vmatmul.mubr.f32.gmra.mrb[106].mxu1 %v517_v58 }
 0x485   : > { %v6494_v24 = vpop.f32.mrb[221].mxu0  ;;  %9109 = vmatmul.mubr.msk.f32.gmra.mrb[106].mxu0 %vm1856_vm0, %v521_v46  ;;  %4164 = vmatprep.mubr.f32.mxu1 %v525_v30  ;;  %v535_v30 = vld [vmem:[%s10873_s17 + $0xc38] sm:$0xff] }
 0x486   : > { %v5186_v56 = vadd.f32 %v11299_v11, %v3879_v60  ;;  %6778 = vmatprep.mubr.f32.mxu0 %v16202_v20  ;;  %v531_v11 = vld [vmem:[%s10873_s17 + $0xc18] sm:$0xff] }
 0x487   : > { %v3883_v28 = vpop.f32.mrb[222].mxu1  ;;  %v539_v60 = vld [vmem:[%s10873_s17 + $0xc58] sm:$0xff] }
 0x488   : > { %v13188_v44 = vadd.f32 %v6492_v14, %v5186_v56  ;;  %v3884_v9 = vadd.f32 %v3883_v28, %v11304_v17  ;;  %v6497_v16 = vpop.f32.mrb[222].mxu0  ;;  %v3885_v4 = vpop.f32.mrb[223].mxu1  ;;  %4165 = vmatmul.mubr.f32.gmra.mrb[108].mxu1 %v524_v15  ;;  %v542_v56 = vld [vmem:[%s10873_s17 + $0xc70] sm:$0xff] }
 0x489   : > { %v6499_v58 = vpop.f32.mrb[223].mxu0  ;;  %9110 = vmatmul.mubr.msk.f32.gmra.mrb[108].mxu0 %vm1856_vm0, %v528_v40  ;;  %4170 = vmatprep.mubr.f32.mxu1 %v532_v39 }
 0x48a   : > { %v5191_v46 = vadd.f32 %v11307_v19, %v3884_v9  ;;  %6784 = vmatprep.mubr.f32.mxu0 %v16202_v20  ;;  %v538_v19 = vld [vmem:[%s10873_s17 + $0xc50] sm:$0xff] }
 0x48b   : > { %v3888_v14 = vpop.f32.mrb[224].mxu1  ;;  %v546_v9 = vld [vmem:[%s10873_s17 + $0xc90] sm:$0xff] }
 0x48c   : > { %v13197_v24 = vadd.f32 %v6497_v16, %v5191_v46  ;;  %v3889_v17 = vadd.f32 %v3888_v14, %v11312_v25  ;;  %v6502_v28 = vpop.f32.mrb[224].mxu0  ;;  %v3890_v15 = vpop.f32.mrb[225].mxu1  ;;  %4171 = vmatmul.mubr.f32.gmra.mrb[110].mxu1 %v531_v11  ;;  %v553_v14 = vld [vmem:[%s10873_s17 + $0xcc8] sm:$0xff] }
 0x48d   : > { %v6504_v40 = vpop.f32.mrb[225].mxu0  ;;  %9111 = vmatmul.mubr.msk.f32.gmra.mrb[110].mxu0 %vm1856_vm0, %v535_v30  ;;  %4176 = vmatprep.mubr.f32.mxu1 %v539_v60  ;;  %v549_v60 = vld [vmem:[%s10873_s17 + $0xca8] sm:$0xff] }
 0x48e   : > { %v5196_v39 = vadd.f32 %v11315_v27, %v3889_v17  ;;  %6790 = vmatprep.mubr.f32.mxu0 %v16202_v20  ;;  %v545_v27 = vld [vmem:[%s10873_s17 + $0xc88] sm:$0xff] }
 0x48f   : > { %v3893_v16 = vpop.f32.mrb[226].mxu1 }
 0x490   : > { %v13206_v4 = vadd.f32 %v6502_v28, %v5196_v39  ;;  %v3894_v25 = vadd.f32 %v3893_v16, %v11320_v33  ;;  %v6507_v58 = vpop.f32.mrb[226].mxu0  ;;  %v3895_v11 = vpop.f32.mrb[227].mxu1  ;;  %4177 = vmatmul.mubr.f32.gmra.mrb[112].mxu1 %v538_v19 }
 0x491   : > { %v6509_v46 = vpop.f32.mrb[227].mxu0  ;;  %9112 = vmatmul.mubr.msk.f32.gmra.mrb[112].mxu0 %vm1856_vm0, %v542_v56  ;;  %4182 = vmatprep.mubr.f32.mxu1 %v546_v9  ;;  %v556_v56 = vld [vmem:[%s10873_s17 + $0xce0] sm:$0xff] }
 0x492   : > { %v5201_v30 = vadd.f32 %v11323_v35, %v3894_v25  ;;  %6796 = vmatprep.mubr.f32.mxu0 %v16202_v20  ;;  %v552_v35 = vld [vmem:[%s10873_s17 + $0xcc0] sm:$0xff] }
 0x493   : > { %v3898_v17 = vpop.f32.mrb[228].mxu1  ;;  %v560_v9 = vld [vmem:[%s10873_s17 + $0xd00] sm:$0xff] }
 0x494   : > { %v13215_v28 = vadd.f32 %v6507_v58, %v5201_v30  ;;  %v3899_v33 = vadd.f32 %v3898_v17, %v11328_v41  ;;  %v6512_v15 = vpop.f32.mrb[228].mxu0  ;;  %v3900_v40 = vpop.f32.mrb[229].mxu1  ;;  %4183 = vmatmul.mubr.f32.gmra.mrb[114].mxu1 %v545_v27  ;;  %v563_v30 = vld [vmem:[%s10873_s17 + $0xd18] sm:$0xff] }
 0x495   : > { %v6514_v19 = vpop.f32.mrb[229].mxu0  ;;  %9113 = vmatmul.mubr.msk.f32.gmra.mrb[114].mxu0 %vm1856_vm0, %v549_v60  ;;  %4188 = vmatprep.mubr.f32.mxu1 %v553_v14  ;;  %v567_v60 = vld [vmem:[%s10873_s17 + $0xd38] sm:$0xff] }
 0x496   : > { %v5206_v39 = vadd.f32 %v11331_v43, %v3899_v33  ;;  %6802 = vmatprep.mubr.f32.mxu0 %v16202_v20  ;;  %v559_v43 = vld [vmem:[%s10873_s17 + $0xcf8] sm:$0xff] }
 0x497   : > { %v3903_v16 = vpop.f32.mrb[230].mxu1 }
 0x498   : > { %v13224_v25 = vadd.f32 %v6512_v15, %v5206_v39  ;;  %v3904_v41 = vadd.f32 %v3903_v16, %v11336_v49  ;;  %v6517_v58 = vpop.f32.mrb[230].mxu0  ;;  %v3905_v11 = vpop.f32.mrb[231].mxu1  ;;  %4189 = vmatmul.mubr.f32.gmra.mrb[116].mxu1 %v552_v35  ;;  %v570_v35 = vld [vmem:[%s10873_s17 + $0xd50] sm:$0xff] }
 0x499   : > { %v6519_v46 = vpop.f32.mrb[231].mxu0  ;;  %9114 = vmatmul.mubr.msk.f32.gmra.mrb[116].mxu0 %vm1856_vm0, %v556_v56  ;;  %4194 = vmatprep.mubr.f32.mxu1 %v560_v9  ;;  %v574_v39 = vld [vmem:[%s10873_s17 + $0xd70] sm:$0xff] }
 0x49a   : > { %v5211_v27 = vadd.f32 %v11339_v51, %v3904_v41  ;;  %6808 = vmatprep.mubr.f32.mxu0 %v16202_v20  ;;  %v566_v51 = vld [vmem:[%s10873_s17 + $0xd30] sm:$0xff]  ;;  %v577_v46 = vld [vmem:[%s10873_s17 + $0xd88] sm:$0xff] }
 0x49b   : > { %v3908_v14 = vpop.f32.mrb[232].mxu1 }
 0x49c   : > { %v13233_v17 = vadd.f32 %v6517_v58, %v5211_v27  ;;  %v3909_v49 = vadd.f32 %v3908_v14, %v11344_v57  ;;  %v6522_v33 = vpop.f32.mrb[232].mxu0  ;;  %v3910_v15 = vpop.f32.mrb[233].mxu1  ;;  %4195 = vmatmul.mubr.f32.gmra.mrb[118].mxu1 %v559_v43  ;;  %v581_v43 = vld [vmem:[%s10873_s17 + $0xda8] sm:$0xff] }
 0x49d   : > { %v6524_v40 = vpop.f32.mrb[233].mxu0  ;;  %9115 = vmatmul.mubr.msk.f32.gmra.mrb[118].mxu0 %vm1856_vm0, %v563_v30  ;;  %4200 = vmatprep.mubr.f32.mxu1 %v567_v60  ;;  %v584_v15 = vld [vmem:[%s10873_s17 + $0xdc0] sm:$0xff] }
 0x49e   : > { %v5216_v19 = vadd.f32 %v11347_v59, %v3909_v49  ;;  %6814 = vmatprep.mubr.f32.mxu0 %v16202_v20  ;;  %v573_v59 = vld [vmem:[%s10873_s17 + $0xd68] sm:$0xff]  ;;  %v588_v40 = vld [vmem:[%s10873_s17 + $0xde0] sm:$0xff] }
 0x49f   : > { %v3913_v56 = vpop.f32.mrb[234].mxu1 }
 0x4a0   : > { %v13242_v9 = vadd.f32 %v6522_v33, %v5216_v19  ;;  %v3914_v57 = vadd.f32 %v3913_v56, %v11352_v1  ;;  %v6527_v16 = vpop.f32.mrb[234].mxu0  ;;  %v3915_v41 = vpop.f32.mrb[235].mxu1  ;;  %4201 = vmatmul.mubr.f32.gmra.mrb[120].mxu1 %v566_v51 }
 0x4a1   : > { %v6529_v58 = vpop.f32.mrb[235].mxu0  ;;  %9116 = vmatmul.mubr.msk.f32.gmra.mrb[120].mxu0 %vm1856_vm0, %v570_v35  ;;  %4206 = vmatprep.mubr.f32.mxu1 %v574_v39  ;;  %v595_v41 = vld [vmem:[%s10873_s17 + $0xe18] sm:$0xff] }
 0x4a2   : > { %v5221_v11 = vadd.f32 %v11355_v3, %v3914_v57  ;;  %6820 = vmatprep.mubr.f32.mxu0 %v16202_v20  ;;  %v580_v3 = vld [vmem:[%s10873_s17 + $0xda0] sm:$0xff] }
 0x4a3   : > { %v3918_v27 = vpop.f32.mrb[236].mxu1 }
 0x4a4   : > { %v13251_v30 = vadd.f32 %v6527_v16, %v5221_v11  ;;  %v3919_v1 = vadd.f32 %v3918_v27, %v11360_v10  ;;  %v6532_v60 = vpop.f32.mrb[236].mxu0  ;;  %v3920_v14 = vpop.f32.mrb[237].mxu1  ;;  %4207 = vmatmul.mubr.f32.gmra.mrb[122].mxu1 %v573_v59  ;;  %v591_v16 = vld [vmem:[%s10873_s17 + $0xdf8] sm:$0xff] }
 0x4a5   : > { %v6534_v49 = vpop.f32.mrb[237].mxu0  ;;  %9117 = vmatmul.mubr.msk.f32.gmra.mrb[122].mxu0 %vm1856_vm0, %v577_v46  ;;  %4212 = vmatprep.mubr.f32.mxu1 %v581_v43 }
 0x4a6   : > { %v5226_v33 = vadd.f32 %v11363_v13, %v3919_v1  ;;  %6826 = vmatprep.mubr.f32.mxu0 %v16202_v20  ;;  %v587_v13 = vld [vmem:[%s10873_s17 + $0xdd8] sm:$0xff]  ;;  %v598_v1 = vld [vmem:[%s10873_s17 + $0xe30] sm:$0xff] }
 0x4a7   : > { %v3923_v51 = vpop.f32.mrb[238].mxu1 }
 0x4a8   : > { %v13260_v19 = vadd.f32 %v6532_v60, %v5226_v33  ;;  %v3924_v10 = vadd.f32 %v3923_v51, %v11368_v21  ;;  %v6537_v35 = vpop.f32.mrb[238].mxu0  ;;  %v3925_v39 = vpop.f32.mrb[239].mxu1  ;;  %4213 = vmatmul.mubr.f32.gmra.mrb[124].mxu1 %v580_v3  ;;  %v602_v60 = vld [vmem:[%s10873_s17 + $0xe50] sm:$0xff]  ;;  %v605_v51 = vld [vmem:[%s10873_s17 + $0xe68] sm:$0xff] }
 0x4a9   : > { %v6539_v56 = vpop.f32.mrb[239].mxu0  ;;  %9118 = vmatmul.mubr.msk.f32.gmra.mrb[124].mxu0 %vm1856_vm0, %v584_v15  ;;  %4218 = vmatprep.mubr.f32.mxu1 %v588_v40 }
 0x4aa   : > { %v5231_v57 = vadd.f32 %v11371_v23, %v3924_v10  ;;  %6832 = vmatprep.mubr.f32.mxu0 %v16202_v20  ;;  %v594_v23 = vld [vmem:[%s10873_s17 + $0xe10] sm:$0xff]  ;;  %v609_v10 = vld [vmem:[%s10873_s17 + $0xe88] sm:$0xff] }
 0x4ab   : > { %v3928_v58 = vpop.f32.mrb[240].mxu1 }
 0x4ac   : > { %v13269_v59 = vadd.f32 %v6537_v35, %v5231_v57  ;;  %v3929_v21 = vadd.f32 %v3928_v58, %v11388_v38  ;;  %v6542_v11 = vpop.f32.mrb[240].mxu0  ;;  %v3930_v46 = vpop.f32.mrb[241].mxu1  ;;  %4219 = vmatmul.mubr.f32.gmra.mrb[126].mxu1 %v587_v13  ;;  %v616_v58 = vld [vmem:[%s10873_s17 + $0xec0] sm:$0xff] }
 0x4ad   : > { %v6544_v43 = vpop.f32.mrb[241].mxu0  ;;  %9119 = vmatmul.mubr.msk.f32.gmra.mrb[126].mxu0 %vm1856_vm0, %v591_v16  ;;  %4224 = vmatprep.mubr.f32.mxu1 %v595_v41  ;;  %v612_v41 = vld [vmem:[%s10873_s17 + $0xea0] sm:$0xff] }
 0x4ae   : > { %v5236_v27 = vadd.f32 %v11391_v42, %v3929_v21  ;;  %6838 = vmatprep.mubr.f32.mxu0 %v16202_v20  ;;  %v601_v42 = vld [vmem:[%s10873_s17 + $0xe48] sm:$0xff] }
 0x4af   : > { %v3933_v14 = vpop.f32.mrb[242].mxu1 }
 0x4b0   : > { %v13278_v49 = vadd.f32 %v6542_v11, %v5236_v27  ;;  %v3934_v38 = vadd.f32 %v3933_v14, %v11396_v50  ;;  %v6547_v3 = vpop.f32.mrb[242].mxu0  ;;  %v3935_v33 = vpop.f32.mrb[243].mxu1  ;;  %4225 = vmatmul.mubr.f32.gmra.mrb[128].mxu1 %v594_v23 }
 0x4b1   : > { %v6549_v15 = vpop.f32.mrb[243].mxu0  ;;  %9120 = vmatmul.mubr.msk.f32.gmra.mrb[128].mxu0 %vm1856_vm0, %v598_v1  ;;  %4230 = vmatprep.mubr.f32.mxu1 %v602_v60  ;;  %v619_v1 = vld [vmem:[%s10873_s17 + $0xed8] sm:$0xff] }
 0x4b2   : > { %v5241_v40 = vadd.f32 %v11399_v53, %v3934_v38  ;;  %6844 = vmatprep.mubr.f32.mxu0 %v16202_v20  ;;  %v608_v53 = vld [vmem:[%s10873_s17 + $0xe80] sm:$0xff]  ;;  %v623_v60 = vld [vmem:[%s10873_s17 + $0xef8] sm:$0xff] }
 0x4b3   : > { %v3938_v35 = vpop.f32.mrb[244].mxu1 }
 0x4b4   : > { %v13287_v39 = vadd.f32 %v6547_v3, %v5241_v40  ;;  %v3939_v50 = vadd.f32 %v3938_v35, %v11404_v61  ;;  %v6552_v56 = vpop.f32.mrb[244].mxu0  ;;  %v3940_v13 = vpop.f32.mrb[245].mxu1  ;;  %4231 = vmatmul.mubr.f32.gmra.mrb[130].mxu1 %v601_v42  ;;  %v626_v40 = vld [vmem:[%s10873_s17 + $0xf10] sm:$0xff] }
 0x4b5   : > { %v6554_v57 = vpop.f32.mrb[245].mxu0  ;;  %9121 = vmatmul.mubr.msk.f32.gmra.mrb[130].mxu0 %vm1856_vm0, %v605_v51  ;;  %4236 = vmatprep.mubr.f32.mxu1 %v609_v10  ;;  %v630_v51 = vld [vmem:[%s10873_s17 + $0xf30] sm:$0xff] }
 0x4b6   : > { %v5246_v16 = vadd.f32 %v11407_v63, %v3939_v50  ;;  %6850 = vmatprep.mubr.f32.mxu0 %v16202_v20  ;;  %v615_v63 = vld [vmem:[%s10873_s17 + $0xeb8] sm:$0xff] }
 0x4b7   : > { %v3943_v21 = vpop.f32.mrb[246].mxu1 }
 0x4b8   : > { %v13296_v11 = vadd.f32 %v6552_v56, %v5246_v16  ;;  %v3944_v61 = vadd.f32 %v3943_v21, %v11412_v7  ;;  %v6557_v46 = vpop.f32.mrb[246].mxu0  ;;  %v3945_v43 = vpop.f32.mrb[247].mxu1  ;;  %4237 = vmatmul.mubr.f32.gmra.mrb[132].mxu1 %v608_v53  ;;  %v633_v53 = vld [vmem:[%s10873_s17 + $0xf48] sm:$0xff] }
 0x4b9   : > { %v6559_v23 = vpop.f32.mrb[247].mxu0  ;;  %9122 = vmatmul.mubr.msk.f32.gmra.mrb[132].mxu0 %vm1856_vm0, %v612_v41  ;;  %4242 = vmatprep.mubr.f32.mxu1 %v616_v58  ;;  %v637_v16 = vld [vmem:[%s10873_s17 + $0xf68] sm:$0xff] }
 0x4ba   : > { %v5251_v27 = vadd.f32 %v11415_v12, %v3944_v61  ;;  %6856 = vmatprep.mubr.f32.mxu0 %v16202_v20  ;;  %v622_v12 = vld [vmem:[%s10873_s17 + $0xef0] sm:$0xff]  ;;  %v640_v23 = vld [vmem:[%s10873_s17 + $0xf80] sm:$0xff] }
 0x4bb   : > { %v3948_v14 = vpop.f32.mrb[248].mxu1 }
 0x4bc   : > { %v13305_v38 = vadd.f32 %v6557_v46, %v5251_v27  ;;  %v3949_v7 = vadd.f32 %v3948_v14, %v11420_v22  ;;  %v6562_v3 = vpop.f32.mrb[248].mxu0  ;;  %v3950_v33 = vpop.f32.mrb[249].mxu1  ;;  %4243 = vmatmul.mubr.f32.gmra.mrb[134].mxu1 %v615_v63  ;;  %v644_v63 = vld [vmem:[%s10873_s17 + $0xfa0] sm:$0xff] }
 0x4bd   : > { %v6564_v15 = vpop.f32.mrb[249].mxu0  ;;  %9123 = vmatmul.mubr.msk.f32.gmra.mrb[134].mxu0 %vm1856_vm0, %v619_v1  ;;  %4248 = vmatprep.mubr.f32.mxu1 %v623_v60  ;;  %v647_v33 = vld [vmem:[%s10873_s17 + $0xfb8] sm:$0xff] }
 0x4be   : > { %v5256_v42 = vadd.f32 %v11423_v26, %v3949_v7  ;;  %6862 = vmatprep.mubr.f32.mxu0 %v16202_v20  ;;  %v629_v26 = vld [vmem:[%s10873_s17 + $0xf28] sm:$0xff]  ;;  %v651_v15 = vld [vmem:[%s10873_s17 + $0xfd8] sm:$0xff] }
 0x4bf   : > { %v3953_v10 = vpop.f32.mrb[250].mxu1 }
 0x4c0   : > { %v13314_v35 = vadd.f32 %v6562_v3, %v5256_v42  ;;  %v3954_v22 = vadd.f32 %v3953_v10, %v11428_v34  ;;  %v6567_v50 = vpop.f32.mrb[250].mxu0  ;;  %v3955_v56 = vpop.f32.mrb[251].mxu1  ;;  %4249 = vmatmul.mubr.f32.gmra.mrb[136].mxu1 %v622_v12 }
 0x4c1   : > { %v6569_v13 = vpop.f32.mrb[251].mxu0  ;;  %9124 = vmatmul.mubr.msk.f32.gmra.mrb[136].mxu0 %vm1856_vm0, %v626_v40  ;;  %4254 = vmatprep.mubr.f32.mxu1 %v630_v51 }
 0x4c2   : > { %v5261_v57 = vadd.f32 %v11431_v37, %v3954_v22  ;;  %6868 = vmatprep.mubr.f32.mxu0 %v16202_v20  ;;  %v636_v37 = vld [vmem:[%s10873_s17 + $0xf60] sm:$0xff]  ;;  %v650_v22 = vld [vmem:[%s10873_s17 + $0xfd0] sm:$0xff] }
 0x4c3   : > { %v3958_v41 = vpop.f32.mrb[252].mxu1 }
 0x4c4   : > { %v13323_v58 = vadd.f32 %v6567_v50, %v5261_v57  ;;  %v3959_v34 = vadd.f32 %v3958_v41, %v11436_v47  ;;  %v6572_v21 = vpop.f32.mrb[252].mxu0  ;;  %v3960_v61 = vpop.f32.mrb[253].mxu1  ;;  %4255 = vmatmul.mubr.f32.gmra.mrb[138].mxu1 %v629_v26  ;;  %v658_v50 = vld [vmem:[%s10873_s17 + $0x1010] sm:$0xff]  ;;  %v661_v41 = vld [vmem:[%s10873_s17 + $0x1028] sm:$0xff] }
 0x4c5   : > { %v6574_v46 = vpop.f32.mrb[253].mxu0  ;;  %9125 = vmatmul.mubr.msk.f32.gmra.mrb[138].mxu0 %vm1856_vm0, %v633_v53  ;;  %4260 = vmatprep.mubr.f32.mxu1 %v637_v16  ;;  %v657_v16 = vld [vmem:[%s10873_s17 + $0x1008] sm:$0xff] }
 0x4c6   : > { %v5266_v43 = vadd.f32 %v11439_v52, %v3959_v34  ;;  %6874 = vmatprep.mubr.f32.mxu0 %v16202_v20  ;;  %v643_v52 = vld [vmem:[%s10873_s17 + $0xf98] sm:$0xff]  ;;  %v665_v34 = vld [vmem:[%s10873_s17 + $0x1048] sm:$0xff] }
 0x4c7   : > { %v3963_v27 = vpop.f32.mrb[254].mxu1 }
 0x4c8   : > { %v13332_v1 = vadd.f32 %v6572_v21, %v5266_v43  ;;  %v3964_v47 = vadd.f32 %v3963_v27, %v11444_v62  ;;  %v6577_v60 = vpop.f32.mrb[254].mxu0  ;;  %v3965_v14 = vpop.f32.mrb[255].mxu1  ;;  %4261 = vmatmul.mubr.f32.gmra.mrb[140].mxu1 %v636_v37  ;;  %v672_v27 = vld [vmem:[%s10873_s17 + $0x1080] sm:$0xff] }
 0x4c9   : > { %v6579_v7 = vpop.f32.mrb[255].mxu0  ;;  %9126 = vmatmul.mubr.msk.f32.gmra.mrb[140].mxu0 %vm1856_vm0, %v640_v23  ;;  %4266 = vmatprep.mubr.f32.mxu1 %v644_v63  ;;  %v664_v23 = vld [vmem:[%s10873_s17 + $0x1040] sm:$0xff] }
 0x4ca   : > { %v5271_v3 = vadd.f32 %v11447_v2, %v3964_v47  ;;  %6880 = vmatprep.mubr.f32.mxu0 %v16202_v20  ;;  %v654_v2 = vld [vmem:[%s10873_s17 + $0xff0] sm:$0xff]  ;;  %v668_v63 = vld [vmem:[%s10873_s17 + $0x1060] sm:$0xff] }
 0x4cb   : > { %v3968_v12 = vpop.f32.mrb[36].mxu1 }
 0x4cc   : > { %v13341_v42 = vadd.f32 %v6577_v60, %v5271_v3  ;;  %v6582_v62 = vpop.f32.mrb[36].mxu0  ;;  %v3970_v40 = vpop.f32.mrb[37].mxu1  ;;  %4267 = vmatmul.mubr.f32.gmra.mrb[142].mxu1 %v643_v52  ;;  %v671_v3 = vld [vmem:[%s10873_s17 + $0x1078] sm:$0xff] }
 0x4cd   : > { %v6584_v51 = vpop.f32.mrb[37].mxu0  ;;  %9127 = vmatmul.mubr.msk.f32.gmra.mrb[142].mxu0 %vm1856_vm0, %v647_v33  ;;  %v13344_v10 = vadd.f32 %v6582_v62, %v3968_v12  ;;  %4272 = vmatprep.mubr.f32.mxu1 %v651_v15  ;;  %v675_v33 = vld [vmem:[%s10873_s17 + $0x1098] sm:$0xff] }
 0x4ce   : > { %6886 = vmatprep.mubr.f32.mxu0 %v16202_v20  ;;  %v679_v15 = vld [vmem:[%s10873_s17 + $0x10b8] sm:$0xff] }
 0x4cf   : > { %7913 = vrot.lane.b32.xlu0 %v13344_v10, %s10557_s6  ;;  %v3973_v56 = vpop.f32.mrb[38].mxu1 }
 0x4d0   : > { %v6587_v13 = vpop.f32.mrb[38].mxu0  ;;  %v3975_v26 = vpop.f32.mrb[39].mxu1  ;;  %4273 = vmatmul.mubr.f32.gmra.mrb[144].mxu1 %v650_v22 }
 0x4d1   : > { %v13352_v57 = vadd.f32 %v6587_v13, %v3973_v56  ;;  %v6589_v53 = vpop.f32.mrb[39].mxu0  ;;  %9128 = vmatmul.mubr.msk.f32.gmra.mrb[144].mxu0 %vm1856_vm0, %v654_v2  ;;  %4278 = vmatprep.mubr.f32.mxu1 %v658_v50  ;;  %v678_v2 = vld [vmem:[%s10873_s17 + $0x10b0] sm:$0xff] }
 0x4d2   : > { %6892 = vmatprep.mubr.f32.mxu0 %v16202_v20  ;;  %v682_v50 = vld [vmem:[%s10873_s17 + $0x10d0] sm:$0xff] }
 0x4d3   : > { %7915 = vrot.lane.b32.xlu0 %v13352_v57, %s10557_s6  ;;  %v3978_v21 = vpop.f32.mrb[40].mxu1  ;;  %v686_v56 = vld [vmem:[%s10873_s17 + $0x10f0] sm:$0xff] }
 0x4d4   : > { %v6592_v61 = vpop.f32.mrb[40].mxu0  ;;  %v3980_v46 = vpop.f32.mrb[41].mxu1  ;;  %4279 = vmatmul.mubr.f32.gmra.mrb[146].mxu1 %v657_v16 }
 0x4d5   : > { %v6594_v37 = vpop.f32.mrb[41].mxu0  ;;  %9129 = vmatmul.mubr.msk.f32.gmra.mrb[146].mxu0 %vm1856_vm0, %v661_v41  ;;  %v13362_v43 = vadd.f32 %v6592_v61, %v3978_v21  ;;  %4284 = vmatprep.mubr.f32.mxu1 %v665_v34  ;;  %v685_v34 = vld [vmem:[%s10873_s17 + $0x10e8] sm:$0xff] }
 0x4d6   : > { %6898 = vmatprep.mubr.f32.mxu0 %v16202_v20  ;;  %v689_v21 = vld [vmem:[%s10873_s17 + $0x1108] sm:$0xff] }
 0x4d7   : > { %7917 = vrot.lane.b32.xlu1 %v13362_v43, %s10557_s6  ;;  %v3983_v47 = vpop.f32.mrb[42].mxu1  ;;  %v693_v61 = vld [vmem:[%s10873_s17 + $0x1128] sm:$0xff] }
 0x4d8   : > { %v6597_v60 = vpop.f32.mrb[42].mxu0  ;;  %v3985_v14 = vpop.f32.mrb[43].mxu1  ;;  %4285 = vmatmul.mubr.f32.gmra.mrb[148].mxu1 %v664_v23 }
 0x4d9   : > { %v13370_v7 = vadd.f32 %v6597_v60, %v3983_v47  ;;  %v6599_v52 = vpop.f32.mrb[43].mxu0  ;;  %9130 = vmatmul.mubr.msk.f32.gmra.mrb[148].mxu0 %vm1856_vm0, %v668_v63  ;;  %4290 = vmatprep.mubr.f32.mxu1 %v672_v27  ;;  %v692_v47 = vld [vmem:[%s10873_s17 + $0x1120] sm:$0xff] }
 0x4da   : > { %6904 = vmatprep.mubr.f32.mxu0 %v16202_v20  ;;  %v696_v60 = vld [vmem:[%s10873_s17 + $0x1140] sm:$0xff] }
 0x4db   : > { %7919 = vrot.lane.b32.xlu1 %v13370_v7, %s10557_s6  ;;  %v3988_v12 = vpop.f32.mrb[44].mxu1  ;;  %v700_v14 = vld [vmem:[%s10873_s17 + $0x1160] sm:$0xff] }
 0x4dc   : > { %v6602_v62 = vpop.f32.mrb[44].mxu0  ;;  %v3990_v40 = vpop.f32.mrb[45].mxu1  ;;  %4291 = vmatmul.mubr.f32.gmra.mrb[150].mxu1 %v671_v3 }
 0x4dd   : > { %v13379_v51 = vadd.f32 %v6602_v62, %v3988_v12  ;;  %v6604_v22 = vpop.f32.mrb[45].mxu0  ;;  %9131 = vmatmul.mubr.msk.f32.gmra.mrb[150].mxu0 %vm1856_vm0, %v675_v33  ;;  %4296 = vmatprep.mubr.f32.mxu1 %v679_v15  ;;  %v699_v62 = vld [vmem:[%s10873_s17 + $0x1158] sm:$0xff] }
 0x4de   : > { %6910 = vmatprep.mubr.f32.mxu0 %v16202_v20  ;;  %v703_v40 = vld [vmem:[%s10873_s17 + $0x1178] sm:$0xff] }
 0x4df   : > { %7921 = vrot.lane.b32.xlu0 %v13379_v51, %s10557_s6  ;;  %v3993_v13 = vpop.f32.mrb[46].mxu1  ;;  %v707_v22 = vld [vmem:[%s10873_s17 + $0x1198] sm:$0xff] }
 0x4e0   : > { %v6607_v26 = vpop.f32.mrb[46].mxu0  ;;  %v3995_v53 = vpop.f32.mrb[47].mxu1  ;;  %4297 = vmatmul.mubr.f32.gmra.mrb[152].mxu1 %v678_v2 }
 0x4e1   : > { %v13388_v16 = vadd.f32 %v6607_v26, %v3993_v13  ;;  %v6609_v41 = vpop.f32.mrb[47].mxu0  ;;  %9132 = vmatmul.mubr.msk.f32.gmra.mrb[152].mxu0 %vm1856_vm0, %v682_v50  ;;  %4302 = vmatprep.mubr.f32.mxu1 %v686_v56  ;;  %v706_v53 = vld [vmem:[%s10873_s17 + $0x1190] sm:$0xff] }
 0x4e2   : > { %6916 = vmatprep.mubr.f32.mxu0 %v16202_v20  ;;  %v710_v41 = vld [vmem:[%s10873_s17 + $0x11b0] sm:$0xff] }
 0x4e3   : > { %7923 = vrot.lane.b32.xlu1 %v13388_v16, %s10557_s6  ;;  %v3998_v46 = vpop.f32.mrb[48].mxu1 }
 0x4e4   : > { %v6612_v37 = vpop.f32.mrb[48].mxu0  ;;  %v4000_v23 = vpop.f32.mrb[49].mxu1  ;;  %4303 = vmatmul.mubr.f32.gmra.mrb[154].mxu1 %v685_v34  ;;  %v714_v34 = vld [vmem:[%s10873_s17 + $0x11d0] sm:$0xff] }
 0x4e5   : > { %v13397_v63 = vadd.f32 %v6612_v37, %v3998_v46  ;;  %v6614_v27 = vpop.f32.mrb[49].mxu0  ;;  %9133 = vmatmul.mubr.msk.f32.gmra.mrb[154].mxu0 %vm1856_vm0, %v689_v21  ;;  %4308 = vmatprep.mubr.f32.mxu1 %v693_v61 }
 0x4e6   : > { %6922 = vmatprep.mubr.f32.mxu0 %v16202_v20  ;;  %v713_v27 = vld [vmem:[%s10873_s17 + $0x11c8] sm:$0xff] }
 0x4e7   : > { %7925 = vrot.lane.b32.xlu0 %v13397_v63, %s10557_s6  ;;  %v4003_v52 = vpop.f32.mrb[50].mxu1 }
 0x4e8   : > { %v6617_v3 = vpop.f32.mrb[50].mxu0  ;;  %v4005_v33 = vpop.f32.mrb[51].mxu1  ;;  %4309 = vmatmul.mubr.f32.gmra.mrb[156].mxu1 %v692_v47  ;;  %v717_v47 = vld [vmem:[%s10873_s17 + $0x11e8] sm:$0xff] }
 0x4e9   : > { %v13406_v15 = vadd.f32 %v6617_v3, %v4003_v52  ;;  %v6619_v12 = vpop.f32.mrb[51].mxu0  ;;  %9134 = vmatmul.mubr.msk.f32.gmra.mrb[156].mxu0 %vm1856_vm0, %v696_v60  ;;  %4314 = vmatprep.mubr.f32.mxu1 %v700_v14  ;;  %v721_v60 = vld [vmem:[%s10873_s17 + $0x1208] sm:$0xff] }
 0x4ea   : > { %6928 = vmatprep.mubr.f32.mxu0 %v16202_v20 }
 0x4eb   : > { %7927 = vrot.lane.b32.xlu1 %v13406_v15, %s10557_s6  ;;  %v4008_v2 = vpop.f32.mrb[52].mxu1 }
 0x4ec   : > { %v6622_v50 = vpop.f32.mrb[52].mxu0  ;;  %v4010_v56 = vpop.f32.mrb[53].mxu1  ;;  %4315 = vmatmul.mubr.f32.gmra.mrb[158].mxu1 %v699_v62  ;;  %v720_v62 = vld [vmem:[%s10873_s17 + $0x1200] sm:$0xff] }
 0x4ed   : > { %v13415_v13 = vadd.f32 %v6622_v50, %v4008_v2  ;;  %v6624_v26 = vpop.f32.mrb[53].mxu0  ;;  %9135 = vmatmul.mubr.msk.f32.gmra.mrb[158].mxu0 %vm1856_vm0, %v703_v40  ;;  %4320 = vmatprep.mubr.f32.mxu1 %v707_v22  ;;  %v724_v40 = vld [vmem:[%s10873_s17 + $0x1220] sm:$0xff] }
 0x4ee   : > { %6934 = vmatprep.mubr.f32.mxu0 %v16202_v20  ;;  %v728_v22 = vld [vmem:[%s10873_s17 + $0x1240] sm:$0xff] }
 0x4ef   : > { %7929 = vrot.lane.b32.xlu0 %v13415_v13, %s10557_s6  ;;  %v4013_v21 = vpop.f32.mrb[54].mxu1 }
 0x4f0   : > { %v6627_v61 = vpop.f32.mrb[54].mxu0  ;;  %v4015_v46 = vpop.f32.mrb[55].mxu1  ;;  %4321 = vmatmul.mubr.f32.gmra.mrb[160].mxu1 %v706_v53 }
 0x4f1   : > { %v13424_v37 = vadd.f32 %v6627_v61, %v4013_v21  ;;  %v6629_v23 = vpop.f32.mrb[55].mxu0  ;;  %9136 = vmatmul.mubr.msk.f32.gmra.mrb[160].mxu0 %vm1856_vm0, %v710_v41  ;;  %4326 = vmatprep.mubr.f32.mxu1 %v714_v34  ;;  %v727_v41 = vld [vmem:[%s10873_s17 + $0x1238] sm:$0xff] }
 0x4f2   : > { %6940 = vmatprep.mubr.f32.mxu0 %v16202_v20  ;;  %v731_v34 = vld [vmem:[%s10873_s17 + $0x1258] sm:$0xff] }
 0x4f3   : > { %7931 = vrot.lane.b32.xlu1 %v13424_v37, %s10557_s6  ;;  %v4018_v14 = vpop.f32.mrb[56].mxu1  ;;  %v735_v21 = vld [vmem:[%s10873_s17 + $0x1278] sm:$0xff] }
 0x4f4   : > { %v6632_v52 = vpop.f32.mrb[56].mxu0  ;;  %v4020_v3 = vpop.f32.mrb[57].mxu1  ;;  %4327 = vmatmul.mubr.f32.gmra.mrb[162].mxu1 %v713_v27 }
 0x4f5   : > { %v13433_v33 = vadd.f32 %v6632_v52, %v4018_v14  ;;  %v6634_v12 = vpop.f32.mrb[57].mxu0  ;;  %9137 = vmatmul.mubr.msk.f32.gmra.mrb[162].mxu0 %vm1856_vm0, %v717_v47  ;;  %4332 = vmatprep.mubr.f32.mxu1 %v721_v60  ;;  %v734_v60 = vld [vmem:[%s10873_s17 + $0x1270] sm:$0xff] }
 0x4f6   : > { %6946 = vmatprep.mubr.f32.mxu0 %v16202_v20  ;;  %v738_v14 = vld [vmem:[%s10873_s17 + $0x1290] sm:$0xff] }
 0x4f7   : > { %7933 = vrot.lane.b32.xlu0 %v13433_v33, %s10557_s6  ;;  %v4023_v2 = vpop.f32.mrb[58].mxu1  ;;  %v742_v52 = vld [vmem:[%s10873_s17 + $0x12b0] sm:$0xff] }
 0x4f8   : > { %v6637_v50 = vpop.f32.mrb[58].mxu0  ;;  %v4025_v56 = vpop.f32.mrb[59].mxu1  ;;  %4333 = vmatmul.mubr.f32.gmra.mrb[164].mxu1 %v720_v62 }
 0x4f9   : > { %v13442_v26 = vadd.f32 %v6637_v50, %v4023_v2  ;;  %v6639_v53 = vpop.f32.mrb[59].mxu0  ;;  %9138 = vmatmul.mubr.msk.f32.gmra.mrb[164].mxu0 %vm1856_vm0, %v724_v40  ;;  %4338 = vmatprep.mubr.f32.mxu1 %v728_v22  ;;  %v741_v2 = vld [vmem:[%s10873_s17 + $0x12a8] sm:$0xff] }
 0x4fa   : > { %6952 = vmatprep.mubr.f32.mxu0 %v16202_v20  ;;  %v745_v50 = vld [vmem:[%s10873_s17 + $0x12c8] sm:$0xff] }
 0x4fb   : > { %7935 = vrot.lane.b32.xlu1 %v13442_v26, %s10557_s6  ;;  %v4028_v61 = vpop.f32.mrb[60].mxu1  ;;  %v749_v56 = vld [vmem:[%s10873_s17 + $0x12e8] sm:$0xff] }
 0x4fc   : > { %v6642_v46 = vpop.f32.mrb[60].mxu0  ;;  %v4030_v23 = vpop.f32.mrb[61].mxu1  ;;  %4339 = vmatmul.mubr.f32.gmra.mrb[166].mxu1 %v727_v41 }
 0x4fd   : > { %v13451_v27 = vadd.f32 %v6642_v46, %v4028_v61  ;;  %v6644_v47 = vpop.f32.mrb[61].mxu0  ;;  %9139 = vmatmul.mubr.msk.f32.gmra.mrb[166].mxu0 %vm1856_vm0, %v731_v34  ;;  %4344 = vmatprep.mubr.f32.mxu1 %v735_v21  ;;  %v748_v46 = vld [vmem:[%s10873_s17 + $0x12e0] sm:$0xff] }
 0x4fe   : > { %6958 = vmatprep.mubr.f32.mxu0 %v16202_v20  ;;  %v752_v23 = vld [vmem:[%s10873_s17 + $0x1300] sm:$0xff] }
 0x4ff   : > { %7937 = vrot.lane.b32.xlu0 %v13451_v27, %s10557_s6  ;;  %v4033_v3 = vpop.f32.mrb[62].mxu1  ;;  %v756_v47 = vld [vmem:[%s10873_s17 + $0x1320] sm:$0xff] }
 0x500   : > { %v6647_v12 = vpop.f32.mrb[62].mxu0  ;;  %v4035_v62 = vpop.f32.mrb[63].mxu1  ;;  %4345 = vmatmul.mubr.f32.gmra.mrb[168].mxu1 %v734_v60 }
 0x501   : > { %v13460_v40 = vadd.f32 %v6647_v12, %v4033_v3  ;;  %v6649_v22 = vpop.f32.mrb[63].mxu0  ;;  %9140 = vmatmul.mubr.msk.f32.gmra.mrb[168].mxu0 %vm1856_vm0, %v738_v14  ;;  %4350 = vmatprep.mubr.f32.mxu1 %v742_v52  ;;  %v755_v62 = vld [vmem:[%s10873_s17 + $0x1318] sm:$0xff] }
 0x502   : > { %6964 = vmatprep.mubr.f32.mxu0 %v16202_v20  ;;  %v759_v22 = vld [vmem:[%s10873_s17 + $0x1338] sm:$0xff] }
 0x503   : > { %7939 = vrot.lane.b32.xlu1 %v13460_v40, %s10557_s6  ;;  %v4038_v53 = vpop.f32.mrb[64].mxu1 }
 0x504   : > { %v6652_v41 = vpop.f32.mrb[64].mxu0  ;;  %v4040_v34 = vpop.f32.mrb[65].mxu1  ;;  %4351 = vmatmul.mubr.f32.gmra.mrb[170].mxu1 %v741_v2  ;;  %v763_v2 = vld [vmem:[%s10873_s17 + $0x1358] sm:$0xff] }
 0x505   : > { %v13469_v21 = vadd.f32 %v6652_v41, %v4038_v53  ;;  %v6654_v61 = vpop.f32.mrb[65].mxu0  ;;  %9141 = vmatmul.mubr.msk.f32.gmra.mrb[170].mxu0 %vm1856_vm0, %v745_v50  ;;  %4356 = vmatprep.mubr.f32.mxu1 %v749_v56 }
 0x506   : > { %6970 = vmatprep.mubr.f32.mxu0 %v16202_v20  ;;  %v762_v61 = vld [vmem:[%s10873_s17 + $0x1350] sm:$0xff] }
 0x507   : > { %7941 = vrot.lane.b32.xlu0 %v13469_v21, %s10557_s6  ;;  %v4043_v60 = vpop.f32.mrb[66].mxu1 }
 0x508   : > { %v6657_v14 = vpop.f32.mrb[66].mxu0  ;;  %v4045_v52 = vpop.f32.mrb[67].mxu1  ;;  %4357 = vmatmul.mubr.f32.gmra.mrb[172].mxu1 %v748_v46  ;;  %v766_v46 = vld [vmem:[%s10873_s17 + $0x1370] sm:$0xff] }
 0x509   : > { %v13478_v3 = vadd.f32 %v6657_v14, %v4043_v60  ;;  %v6659_v12 = vpop.f32.mrb[67].mxu0  ;;  %9142 = vmatmul.mubr.msk.f32.gmra.mrb[172].mxu0 %vm1856_vm0, %v752_v23  ;;  %4362 = vmatprep.mubr.f32.mxu1 %v756_v47  ;;  %v770_v23 = vld [vmem:[%s10873_s17 + $0x1390] sm:$0xff] }
 0x50a   : > { %6976 = vmatprep.mubr.f32.mxu0 %v16202_v20 }
 0x50b   : > { %7943 = vrot.lane.b32.xlu1 %v13478_v3, %s10557_s6  ;;  %v4048_v50 = vpop.f32.mrb[68].mxu1 }
 0x50c   : > { %v6662_v56 = vpop.f32.mrb[68].mxu0  ;;  %v4050_v53 = vpop.f32.mrb[69].mxu1  ;;  %4363 = vmatmul.mubr.f32.gmra.mrb[174].mxu1 %v755_v62  ;;  %v769_v62 = vld [vmem:[%s10873_s17 + $0x1388] sm:$0xff] }
 0x50d   : > { %v13487_v41 = vadd.f32 %v6662_v56, %v4048_v50  ;;  %v6664_v34 = vpop.f32.mrb[69].mxu0  ;;  %9143 = vmatmul.mubr.msk.f32.gmra.mrb[174].mxu0 %vm1856_vm0, %v759_v22  ;;  %4368 = vmatprep.mubr.f32.mxu1 %v763_v2  ;;  %v773_v22 = vld [vmem:[%s10873_s17 + $0x13a8] sm:$0xff] }
 0x50e   : > { %6982 = vmatprep.mubr.f32.mxu0 %v16202_v20  ;;  %v777_v2 = vld [vmem:[%s10873_s17 + $0x13c8] sm:$0xff] }
 0x50f   : > { %7945 = vrot.lane.b32.xlu0 %v13487_v41, %s10557_s6  ;;  %v4053_v47 = vpop.f32.mrb[70].mxu1 }
 0x510   : > { %v6667_v60 = vpop.f32.mrb[70].mxu0  ;;  %v4055_v14 = vpop.f32.mrb[71].mxu1  ;;  %4369 = vmatmul.mubr.f32.gmra.mrb[176].mxu1 %v762_v61 }
 0x511   : > { %v13496_v52 = vadd.f32 %v6667_v60, %v4053_v47  ;;  %v6669_v12 = vpop.f32.mrb[71].mxu0  ;;  %9144 = vmatmul.mubr.msk.f32.gmra.mrb[176].mxu0 %vm1856_vm0, %v766_v46  ;;  %4374 = vmatprep.mubr.f32.mxu1 %v770_v23  ;;  %v776_v46 = vld [vmem:[%s10873_s17 + $0x13c0] sm:$0xff] }
 0x512   : > { %6988 = vmatprep.mubr.f32.mxu0 %v16202_v20  ;;  %v780_v47 = vld [vmem:[%s10873_s17 + $0x13e0] sm:$0xff] }
 0x513   : > { %7947 = vrot.lane.b32.xlu1 %v13496_v52, %s10557_s6  ;;  %v4058_v50 = vpop.f32.mrb[72].mxu1  ;;  %v784_v60 = vld [vmem:[%s10873_s17 + $0x1400] sm:$0xff] }
 0x514   : > { %v6672_v56 = vpop.f32.mrb[72].mxu0  ;;  %v4060_v53 = vpop.f32.mrb[73].mxu1  ;;  %4375 = vmatmul.mubr.f32.gmra.mrb[178].mxu1 %v769_v62 }
 0x515   : > { %v13505_v34 = vadd.f32 %v6672_v56, %v4058_v50  ;;  %v6674_v61 = vpop.f32.mrb[73].mxu0  ;;  %9145 = vmatmul.mubr.msk.f32.gmra.mrb[178].mxu0 %vm1856_vm0, %v773_v22  ;;  %4380 = vmatprep.mubr.f32.mxu1 %v777_v2  ;;  %v783_v2 = vld [vmem:[%s10873_s17 + $0x13f8] sm:$0xff] }
 0x516   : > { %v13509_v23 = vadd.f32 %v6674_v61, %v4060_v53  ;;  %6994 = vmatprep.mubr.f32.mxu0 %v16202_v20  ;;  %v787_v53 = vld [vmem:[%s10873_s17 + $0x1418] sm:$0xff] }
 0x517   : > { %7949 = vrot.lane.b32.xlu0 %v13505_v34, %s10557_s6  ;;  %v4064_v14 = vpop.f32.mrb[74].mxu1  ;;  %v791_v61 = vld [vmem:[%s10873_s17 + $0x1438] sm:$0xff] }
 0x518   : > { %v6678_v12 = vpop.f32.mrb[74].mxu0  ;;  %v4066_v62 = vpop.f32.mrb[75].mxu1  ;;  %4381 = vmatmul.mubr.f32.gmra.mrb[180].mxu1 %v776_v46 }
 0x519   : > { %v13516_v50 = vadd.f32 %v6678_v12, %v4064_v14  ;;  %v6680_v22 = vpop.f32.mrb[75].mxu0  ;;  %9146 = vmatmul.mubr.msk.f32.gmra.mrb[180].mxu0 %vm1856_vm0, %v780_v47  ;;  %4386 = vmatprep.mubr.f32.mxu1 %v784_v60  ;;  %v790_v60 = vld [vmem:[%s10873_s17 + $0x1430] sm:$0xff] }
 0x51a   : > { %v13520_v56 = vadd.f32 %v6680_v22, %v4066_v62  ;;  %7000 = vmatprep.mubr.f32.mxu0 %v16202_v20  ;;  %v794_v22 = vld [vmem:[%s10873_s17 + $0x1450] sm:$0xff] }
 0x51b   : > { %7951 = vrot.lane.b32.xlu1 %v13516_v50, %s10557_s6  ;;  %v4070_v46 = vpop.f32.mrb[76].mxu1 }
 0x51c   : > { %v6684_v14 = vpop.f32.mrb[76].mxu0  ;;  %v4072_v12 = vpop.f32.mrb[77].mxu1  ;;  %4387 = vmatmul.mubr.f32.gmra.mrb[182].mxu1 %v783_v2 }
 0x51d   : > { %v13527_v18 = vadd.f32 %v6684_v14, %v4070_v46  ;;  %v6686_v47 = vpop.f32.mrb[77].mxu0  ;;  %9147 = vmatmul.mubr.msk.f32.gmra.mrb[182].mxu0 %vm1856_vm0, %v787_v53  ;;  %4392 = vmatprep.mubr.f32.mxu1 %v791_v61  ;;  %v797_v61 = vld [vmem:[%s10873_s17 + $0x1468] sm:$0xff] }
 0x51e   : > { %v13531_v62 = vadd.f32 %v6686_v47, %v4072_v12  ;;  %7006 = vmatprep.mubr.f32.mxu0 %v16202_v20  ;;  %v801_v47 = vld [vmem:[%s10873_s17 + $0x1488] sm:$0xff] }
 0x51f   : > { %16637 = vst [vmem:[#allocation390_spill] sm:$0xff] %v13527_v18  ;;  %7953 = vrot.lane.b32.xlu0 %v13527_v18, %s10557_s6  ;;  %v4076_v2 = vpop.f32.mrb[78].mxu1  ;;  %v861_v18 = vld [vmem:[%s10873_s17 + $0x1668] sm:$0xff] }
 0x520   : > { %v6690_v46 = vpop.f32.mrb[78].mxu0  ;;  %v4078_v14 = vpop.f32.mrb[79].mxu1  ;;  %4393 = vmatmul.mubr.f32.gmra.mrb[184].mxu1 %v790_v60 }
 0x521   : > { %v13538_v5 = vadd.f32 %v6690_v46, %v4076_v2  ;;  %v6692_v53 = vpop.f32.mrb[79].mxu0  ;;  %9148 = vmatmul.mubr.msk.f32.gmra.mrb[184].mxu0 %vm1856_vm0, %v794_v22  ;;  %4398 = vmatprep.mubr.f32.mxu1 %v798_v8  ;;  %v804_v8 = vld [vmem:[%s10873_s17 + $0x14a0] sm:$0xff] }
 0x522   : > { %v13542_v12 = vadd.f32 %v6692_v53, %v4078_v14  ;;  %7012 = vmatprep.mubr.f32.mxu0 %v16202_v20  ;;  %v808_v53 = vld [vmem:[%s10873_s17 + $0x14c0] sm:$0xff] }
 0x523   : > { %16638 = vst [vmem:[#allocation391_spill] sm:$0xff] %v13538_v5  ;;  %7955 = vrot.lane.b32.xlu1 %v13538_v5, %s10557_s6  ;;  %v4082_v60 = vpop.f32.mrb[80].mxu1  ;;  %v16647_v5 = vmov 0.0  }
 0x524   : > { %v6696_v2 = vpop.f32.mrb[80].mxu0  ;;  %v4084_v46 = vpop.f32.mrb[81].mxu1  ;;  %4399 = vmatmul.mubr.f32.gmra.mrb[34].mxu1 %v797_v61 }
 0x525   : > { %v13549_v0 = vadd.f32 %v6696_v2, %v4082_v60  ;;  %v6698_v22 = vpop.f32.mrb[81].mxu0  ;;  %9149 = vmatmul.mubr.msk.f32.gmra.mrb[34].mxu0 %vm1856_vm0, %v801_v47  ;;  %4404 = vmatprep.mubr.f32.mxu1 %v805_v6  ;;  %v811_v6 = vld [vmem:[%s10873_s17 + $0x14d8] sm:$0xff] }
 0x526   : > { %v13553_v14 = vadd.f32 %v6698_v22, %v4084_v46  ;;  %7018 = vmatprep.mubr.f32.mxu0 %v16202_v20  ;;  %v815_v22 = vld [vmem:[%s10873_s17 + $0x14f8] sm:$0xff] }
 0x527   : > { %16639 = vst [vmem:[#allocation392_spill] sm:$0xff] %v13549_v0  ;;  %7957 = vrot.lane.b32.xlu0 %v13549_v0, %s10557_s6  ;;  %v4088_v61 = vpop.f32.mrb[82].mxu1  ;;  %v854_v0 = vld [vmem:[%s10873_s17 + $0x1630] sm:$0xff] }
 0x528   : > { %v6702_v60 = vpop.f32.mrb[82].mxu0  ;;  %v4090_v2 = vpop.f32.mrb[83].mxu1  ;;  %4405 = vmatmul.mubr.f32.gmra.mrb[186].mxu1 %v804_v8 }
 0x529   : > { %v13560_v48 = vadd.f32 %v6702_v60, %v4088_v61  ;;  %v6704_v47 = vpop.f32.mrb[83].mxu0  ;;  %9150 = vmatmul.mubr.msk.f32.gmra.mrb[186].mxu0 %vm1856_vm0, %v808_v53  ;;  %4410 = vmatprep.mubr.f32.mxu1 %v812_v55  ;;  %v818_v55 = vld [vmem:[%s10873_s17 + $0x1510] sm:$0xff] }
 0x52a   : > { %v13564_v46 = vadd.f32 %v6704_v47, %v4090_v2  ;;  %7024 = vmatprep.mubr.f32.mxu0 %v16202_v20  ;;  %v822_v47 = vld [vmem:[%s10873_s17 + $0x1530] sm:$0xff] }
 0x52b   : > { %16640 = vst [vmem:[#allocation393_spill] sm:$0xff] %v13560_v48  ;;  %7959 = vrot.lane.b32.xlu1 %v13560_v48, %s10557_s6  ;;  %v4094_v8 = vpop.f32.mrb[84].mxu1  ;;  %v850_v48 = vld [vmem:[%s10873_s17 + $0x1610] sm:$0xff] }
 0x52c   : > { %v6708_v61 = vpop.f32.mrb[84].mxu0  ;;  %v4096_v60 = vpop.f32.mrb[85].mxu1  ;;  %4411 = vmatmul.mubr.f32.gmra.mrb[188].mxu1 %v811_v6 }
 0x52d   : > { %v13571_v45 = vadd.f32 %v6708_v61, %v4094_v8  ;;  %v6710_v53 = vpop.f32.mrb[85].mxu0  ;;  %9151 = vmatmul.mubr.msk.f32.gmra.mrb[188].mxu0 %vm1856_vm0, %v815_v22  ;;  %4416 = vmatprep.mubr.f32.mxu1 %v819_v54  ;;  %v825_v54 = vld [vmem:[%s10873_s17 + $0x1548] sm:$0xff] }
 0x52e   : > { %v13575_v2 = vadd.f32 %v6710_v53, %v4096_v60  ;;  %7030 = vmatprep.mubr.f32.mxu0 %v16202_v20  ;;  %v829_v53 = vld [vmem:[%s10873_s17 + $0x1568] sm:$0xff] }
 0x52f   : > { %16641 = vst [vmem:[#allocation394_spill] sm:$0xff] %v13571_v45  ;;  %7961 = vrot.lane.b32.xlu0 %v13571_v45, %s10557_s6  ;;  %v4100_v6 = vpop.f32.mrb[86].mxu1 }
 0x530   : > { %v6714_v8 = vpop.f32.mrb[86].mxu0  ;;  %v4102_v61 = vpop.f32.mrb[87].mxu1  ;;  %4417 = vmatmul.mubr.f32.gmra.mrb[190].mxu1 %v818_v55 }
 0x531   : > { %v13582_v31 = vadd.f32 %v6714_v8, %v4100_v6  ;;  %v6716_v22 = vpop.f32.mrb[87].mxu0  ;;  %9152 = vmatmul.mubr.msk.f32.gmra.mrb[190].mxu0 %vm1856_vm0, %v822_v47  ;;  %4422 = vmatprep.mubr.f32.mxu1 %v826_v36  ;;  %v832_v36 = vld [vmem:[%s10873_s17 + $0x1580] sm:$0xff] }
 0x532   : > { %v13586_v60 = vadd.f32 %v6716_v22, %v4102_v61  ;;  %7036 = vmatprep.mubr.f32.mxu0 %v16202_v20  ;;  %v836_v22 = vld [vmem:[%s10873_s17 + $0x15a0] sm:$0xff] }
 0x533   : > { %16642 = vst [vmem:[#allocation395_spill] sm:$0xff] %v13582_v31  ;;  %7963 = vrot.lane.b32.xlu1 %v13582_v31, %s10557_s6  ;;  %v4106_v55 = vpop.f32.mrb[88].mxu1  ;;  %v840_v31 = vld [vmem:[%s10873_s17 + $0x15c0] sm:$0xff] }
 0x534   : > { %v6720_v6 = vpop.f32.mrb[88].mxu0  ;;  %v4108_v8 = vpop.f32.mrb[89].mxu1  ;;  %4423 = vmatmul.mubr.f32.gmra.mrb[192].mxu1 %v825_v54 }
 0x535   : > { %v13593_v29 = vadd.f32 %v6720_v6, %v4106_v55  ;;  %v6722_v47 = vpop.f32.mrb[89].mxu0  ;;  %9153 = vmatmul.mubr.msk.f32.gmra.mrb[192].mxu0 %vm1856_vm0, %v829_v53  ;;  %4428 = vmatprep.mubr.f32.mxu1 %v833_v32  ;;  %v839_v32 = vld [vmem:[%s10873_s17 + $0x15b8] sm:$0xff] }
 0x536   : > { %v13597_v61 = vadd.f32 %v6722_v47, %v4108_v8  ;;  %7042 = vmatprep.mubr.f32.mxu0 %v16202_v20  ;;  %v843_v47 = vld [vmem:[%s10873_s17 + $0x15d8] sm:$0xff] }
 0x537   : > { %16643 = vst [vmem:[#allocation396_spill] sm:$0xff] %v13593_v29  ;;  %7965 = vrot.lane.b32.xlu0 %v13593_v29, %s10557_s6  ;;  %v4112_v54 = vpop.f32.mrb[90].mxu1  ;;  %v847_v29 = vld [vmem:[%s10873_s17 + $0x15f8] sm:$0xff] }
 0x538   : > { %v6726_v55 = vpop.f32.mrb[90].mxu0  ;;  %v4114_v6 = vpop.f32.mrb[91].mxu1  ;;  %4429 = vmatmul.mubr.f32.gmra.mrb[194].mxu1 %v832_v36 }
 0x539   : > { %v13604_v45 = vadd.f32 %v6726_v55, %v4112_v54  ;;  %v6728_v53 = vpop.f32.mrb[91].mxu0  ;;  %9154 = vmatmul.mubr.msk.f32.gmra.mrb[194].mxu0 %vm1856_vm0, %v836_v22  ;;  %4434 = vmatprep.mubr.f32.mxu1 %v840_v31 }
 0x53a   : > { %v13608_v8 = vadd.f32 %v6728_v53, %v4114_v6  ;;  %7048 = vmatprep.mubr.f32.mxu0 %v16202_v20  ;;  %v846_v6 = vld [vmem:[%s10873_s17 + $0x15f0] sm:$0xff] }
 0x53b   : > { %16644 = vst [vmem:[#allocation397_spill] sm:$0xff] %v13604_v45  ;;  %7967 = vrot.lane.b32.xlu1 %v13604_v45, %s10557_s6  ;;  %v4118_v36 = vpop.f32.mrb[92].mxu1 }
 0x53c   : > { %v6732_v54 = vpop.f32.mrb[92].mxu0  ;;  %v4120_v55 = vpop.f32.mrb[93].mxu1  ;;  %4435 = vmatmul.mubr.f32.gmra.mrb[196].mxu1 %v839_v32 }
 0x53d   : > { %v13615_v22 = vadd.f32 %v6732_v54, %v4118_v36  ;;  %v6734_v31 = vpop.f32.mrb[93].mxu0  ;;  %9155 = vmatmul.mubr.msk.f32.gmra.mrb[196].mxu0 %vm1856_vm0, %v843_v47  ;;  %4440 = vmatprep.mubr.f32.mxu1 %v847_v29 }
 0x53e   : > { %v13619_v53 = vadd.f32 %v6734_v31, %v4120_v55  ;;  %7054 = vmatprep.mubr.f32.mxu0 %v16202_v20  ;;  %v853_v31 = vld [vmem:[%s10873_s17 + $0x1628] sm:$0xff] }
 0x53f   : > { %16645 = vst [vmem:[#allocation398_spill] sm:$0xff] %v13615_v22  ;;  %7969 = vrot.lane.b32.xlu0 %v13615_v22, %s10557_s6  ;;  %v4124_v32 = vpop.f32.mrb[94].mxu1  ;;  %v857_v22 = vld [vmem:[%s10873_s17 + $0x1648] sm:$0xff] }
 0x540   : > { %v6738_v36 = vpop.f32.mrb[94].mxu0  ;;  %4441 = vmatmul.mubr.f32.gmra.mrb[198].mxu1 %v846_v6  ;;  %v4126_v54 = vpop.f32.mrb[95].mxu1 }
 0x541   : > { %v13627_v47 = vadd.f32 %v6738_v36, %v4124_v32  ;;  %v6740_v29 = vpop.f32.mrb[95].mxu0  ;;  %9156 = vmatmul.mubr.msk.f32.gmra.mrb[198].mxu0 %vm1856_vm0, %v850_v48  ;;  %v7914_v55 = vpop.permute.xlu0 %7913  ;;  %4446 = vmatprep.mubr.f32.mxu1 %v854_v0 }
 0x542   : > { %v8453_v20 = vadd.f32 %v7914_v55, %v13188_v44  ;;  %v13632_v45 = vadd.f32 %v6740_v29, %v4126_v54  ;;  %7060 = vmatprep.mubr.f32.mxu0 %v16647_v5  ;;  %v860_v29 = vld [vmem:[%s10873_s17 + $0x1660] sm:$0xff] }
 0x543   : > { %16646 = vst [vmem:[#allocation399_spill] sm:$0xff] %v13627_v47  ;;  %7971 = vrot.lane.b32.xlu1 %v13627_v47, %s10557_s6  ;;  %v4130_v48 = vpop.f32.mrb[96].mxu1 }
 0x544   : > { %v8633_v0 = vadd.f32 %v13509_v23, %v8453_v20  ;;  %v6744_v44 = vpop.f32.mrb[96].mxu0  ;;  %4447 = vmatmul.mubr.f32.gmra.mrb[200].mxu1 %v853_v31  ;;  %v4132_v6 = vpop.f32.mrb[97].mxu1  ;;  %v864_v20 = vld [vmem:[%s10873_s17 + $0x1680] sm:$0xff] }
 0x545   : > { %v13645_v32 = vadd.f32 %v6744_v44, %v4130_v48  ;;  %v6746_v36 = vpop.f32.mrb[97].mxu0  ;;  %9157 = vmatmul.mubr.msk.f32.gmra.mrb[200].mxu0 %vm1856_vm0, %v857_v22  ;;  %v7916_v54 = vpop.permute.xlu0 %7915  ;;  %4452 = vmatprep.mubr.f32.mxu1 %v861_v18  ;;  %v868_v23 = vld [vmem:[%s10873_s17 + $0x16a0] sm:$0xff] }
 0x546   : > { %8814 = vst.msk [vmem:[%s13640_s11] sm:$0xff] %vm8813_vm1, %v8633_v0  ;;  %v8454_v55 = vadd.f32 %v7916_v54, %v13197_v24  ;;  %v13652_v47 = vadd.f32 %v6746_v36, %v4132_v6  ;;  %7066 = vmatprep.mubr.f32.mxu0 %v16647_v5  ;;  %v867_v6 = vld [vmem:[%s10873_s17 + $0x1698] sm:$0xff] }
 0x547   : > { %7973 = vrot.lane.b32.xlu0 %v13645_v32, %s10557_s6  ;;  %v4136_v22 = vpop.f32.mrb[98].mxu1 }
 0x548   : > { %v8634_v18 = vadd.f32 %v13520_v56, %v8454_v55  ;;  %v6750_v31 = vpop.f32.mrb[98].mxu0  ;;  %4453 = vmatmul.mubr.f32.gmra.mrb[202].mxu1 %v860_v29  ;;  %v4138_v48 = vpop.f32.mrb[99].mxu1  ;;  %v871_v56 = vld [vmem:[%s10873_s17 + $0x16b8] sm:$0xff] }
 0x549   : > { %v13660_v24 = vadd.f32 %v6750_v31, %v4136_v22  ;;  %v6752_v0 = vpop.f32.mrb[99].mxu0  ;;  %9158 = vmatmul.mubr.msk.f32.gmra.mrb[202].mxu0 %vm1856_vm0, %v864_v20  ;;  %v7918_v44 = vpop.permute.xlu1 %7917  ;;  %4458 = vmatprep.mubr.f32.mxu1 %v868_v23  ;;  %v875_v29 = vld [vmem:[%s10873_s17 + $0x16d8] sm:$0xff] }
 0x54a   : > { %8815 = vst.msk [vmem:[%s13640_s11 + $0x8] sm:$0xff] %vm8813_vm1, %v8634_v18  ;;  %v8455_v36 = vadd.f32 %v7918_v44, %v13206_v4  ;;  %v13667_v54 = vadd.f32 %v6752_v0, %v4138_v48  ;;  %7072 = vmatprep.mubr.f32.mxu0 %v16647_v5  ;;  %v874_v48 = vld [vmem:[%s10873_s17 + $0x16d0] sm:$0xff] }
 0x54b   : > { %7975 = vrot.lane.b32.xlu1 %v13660_v24, %s10557_s6  ;;  %v4142_v55 = vpop.f32.mrb[100].mxu1 }
 0x54c   : > { %v8635_v20 = vadd.f32 %v13531_v62, %v8455_v36  ;;  %v6756_v23 = vpop.f32.mrb[100].mxu0  ;;  %4459 = vmatmul.mubr.f32.gmra.mrb[204].mxu1 %v867_v6  ;;  %v4144_v22 = vpop.f32.mrb[101].mxu1  ;;  %v878_v62 = vld [vmem:[%s10873_s17 + $0x16f0] sm:$0xff] }
 0x54d   : > { %v13675_v4 = vadd.f32 %v6756_v23, %v4142_v55  ;;  %v6758_v18 = vpop.f32.mrb[101].mxu0  ;;  %9159 = vmatmul.mubr.msk.f32.gmra.mrb[204].mxu0 %vm1856_vm0, %v871_v56  ;;  %v7920_v31 = vpop.permute.xlu1 %7919  ;;  %4464 = vmatprep.mubr.f32.mxu1 %v875_v29  ;;  %v882_v6 = vld [vmem:[%s10873_s17 + $0x1710] sm:$0xff] }
 0x54e   : > { %8816 = vst.msk [vmem:[%s13640_s11 + $0x10] sm:$0xff] %vm8813_vm1, %v8635_v20  ;;  %v8456_v0 = vadd.f32 %v7920_v31, %v13215_v28  ;;  %v13682_v44 = vadd.f32 %v6758_v18, %v4144_v22  ;;  %7078 = vmatprep.mubr.f32.mxu0 %v16647_v5  ;;  %v881_v22 = vld [vmem:[%s10873_s17 + $0x1708] sm:$0xff] }
 0x54f   : > { %7977 = vrot.lane.b32.xlu0 %v13675_v4, %s10557_s6  ;;  %v4148_v36 = vpop.f32.mrb[102].mxu1 }
 0x550   : > { %v8636_v56 = vadd.f32 %v13542_v12, %v8456_v0  ;;  %v6762_v29 = vpop.f32.mrb[102].mxu0  ;;  %4465 = vmatmul.mubr.f32.gmra.mrb[206].mxu1 %v874_v48  ;;  %v4150_v55 = vpop.f32.mrb[103].mxu1  ;;  %v885_v12 = vld [vmem:[%s10873_s17 + $0x1728] sm:$0xff] }
 0x551   : > { %v13690_v28 = vadd.f32 %v6762_v29, %v4148_v36  ;;  %v6764_v20 = vpop.f32.mrb[103].mxu0  ;;  %9160 = vmatmul.mubr.msk.f32.gmra.mrb[206].mxu0 %vm1856_vm0, %v878_v62  ;;  %v7922_v23 = vpop.permute.xlu0 %7921  ;;  %4470 = vmatprep.mubr.f32.mxu1 %v882_v6  ;;  %v889_v48 = vld [vmem:[%s10873_s17 + $0x1748] sm:$0xff] }
 0x552   : > { %8817 = vst.msk [vmem:[%s13640_s11 + $0x18] sm:$0xff] %vm8813_vm1, %v8636_v56  ;;  %v8457_v18 = vadd.f32 %v7922_v23, %v13224_v25  ;;  %v13697_v31 = vadd.f32 %v6764_v20, %v4150_v55  ;;  %7084 = vmatprep.mubr.f32.mxu0 %v16647_v5  ;;  %v888_v55 = vld [vmem:[%s10873_s17 + $0x1740] sm:$0xff] }
 0x553   : > { %7979 = vrot.lane.b32.xlu1 %v13690_v28, %s10557_s6  ;;  %v4154_v0 = vpop.f32.mrb[104].mxu1 }
 0x554   : > { %v8637_v62 = vadd.f32 %v13553_v14, %v8457_v18  ;;  %v6768_v6 = vpop.f32.mrb[104].mxu0  ;;  %4471 = vmatmul.mubr.f32.gmra.mrb[208].mxu1 %v881_v22  ;;  %v4156_v36 = vpop.f32.mrb[105].mxu1  ;;  %v892_v14 = vld [vmem:[%s10873_s17 + $0x1760] sm:$0xff] }
 0x555   : > { %v13705_v25 = vadd.f32 %v6768_v6, %v4154_v0  ;;  %v6770_v56 = vpop.f32.mrb[105].mxu0  ;;  %9161 = vmatmul.mubr.msk.f32.gmra.mrb[208].mxu0 %vm1856_vm0, %v885_v12  ;;  %v7924_v29 = vpop.permute.xlu1 %7923  ;;  %4476 = vmatprep.mubr.f32.mxu1 %v889_v48  ;;  %v896_v22 = vld [vmem:[%s10873_s17 + $0x1780] sm:$0xff] }
 0x556   : > { %8818 = vst.msk [vmem:[%s13640_s11 + $0x20] sm:$0xff] %vm8813_vm1, %v8637_v62  ;;  %v8458_v20 = vadd.f32 %v7924_v29, %v13233_v17  ;;  %v13712_v23 = vadd.f32 %v6770_v56, %v4156_v36  ;;  %7090 = vmatprep.mubr.f32.mxu0 %v16647_v5  ;;  %v895_v36 = vld [vmem:[%s10873_s17 + $0x1778] sm:$0xff] }
 0x557   : > { %7981 = vrot.lane.b32.xlu0 %v13705_v25, %s10557_s6  ;;  %v4160_v18 = vpop.f32.mrb[106].mxu1 }
 0x558   : > { %v8638_v12 = vadd.f32 %v13564_v46, %v8458_v20  ;;  %v6774_v48 = vpop.f32.mrb[106].mxu0  ;;  %4477 = vmatmul.mubr.f32.gmra.mrb[210].mxu1 %v888_v55  ;;  %v4162_v0 = vpop.f32.mrb[107].mxu1  ;;  %v899_v46 = vld [vmem:[%s10873_s17 + $0x1798] sm:$0xff] }
 0x559   : > { %v13720_v17 = vadd.f32 %v6774_v48, %v4160_v18  ;;  %v6776_v62 = vpop.f32.mrb[107].mxu0  ;;  %9162 = vmatmul.mubr.msk.f32.gmra.mrb[210].mxu0 %vm1856_vm0, %v892_v14  ;;  %v7926_v6 = vpop.permute.xlu0 %7925  ;;  %4482 = vmatprep.mubr.f32.mxu1 %v896_v22  ;;  %v903_v55 = vld [vmem:[%s10873_s17 + $0x17b8] sm:$0xff] }
 0x55a   : > { %8819 = vst.msk [vmem:[%s13640_s11 + $0x28] sm:$0xff] %vm8813_vm1, %v8638_v12  ;;  %v8459_v56 = vadd.f32 %v7926_v6, %v13242_v9  ;;  %v13727_v29 = vadd.f32 %v6776_v62, %v4162_v0  ;;  %7096 = vmatprep.mubr.f32.mxu0 %v16647_v5  ;;  %v902_v0 = vld [vmem:[%s10873_s17 + $0x17b0] sm:$0xff] }
 0x55b   : > { %7983 = vrot.lane.b32.xlu1 %v13720_v17, %s10557_s6  ;;  %v4166_v20 = vpop.f32.mrb[108].mxu1 }
 0x55c   : > { %v8639_v14 = vadd.f32 %v13575_v2, %v8459_v56  ;;  %v6780_v22 = vpop.f32.mrb[108].mxu0  ;;  %4483 = vmatmul.mubr.f32.gmra.mrb[212].mxu1 %v895_v36  ;;  %v4168_v18 = vpop.f32.mrb[109].mxu1  ;;  %v906_v2 = vld [vmem:[%s10873_s17 + $0x17d0] sm:$0xff] }
 0x55d   : > { %v13735_v9 = vadd.f32 %v6780_v22, %v4166_v20  ;;  %v6782_v12 = vpop.f32.mrb[109].mxu0  ;;  %9163 = vmatmul.mubr.msk.f32.gmra.mrb[212].mxu0 %vm1856_vm0, %v899_v46  ;;  %v7928_v48 = vpop.permute.xlu1 %7927  ;;  %4488 = vmatprep.mubr.f32.mxu1 %v903_v55  ;;  %v910_v36 = vld [vmem:[%s10873_s17 + $0x17f0] sm:$0xff] }
 0x55e   : > { %8820 = vst.msk [vmem:[%s13640_s11 + $0x30] sm:$0xff] %vm8813_vm1, %v8639_v14  ;;  %v8460_v62 = vadd.f32 %v7928_v48, %v13251_v30  ;;  %v13742_v6 = vadd.f32 %v6782_v12, %v4168_v18  ;;  %7102 = vmatprep.mubr.f32.mxu0 %v16647_v5  ;;  %v909_v18 = vld [vmem:[%s10873_s17 + $0x17e8] sm:$0xff] }
 0x55f   : > { %7985 = vrot.lane.b32.xlu0 %v13735_v9, %s10557_s6  ;;  %v4172_v56 = vpop.f32.mrb[110].mxu1 }
 0x560   : > { %v8640_v46 = vadd.f32 %v13586_v60, %v8460_v62  ;;  %v6786_v55 = vpop.f32.mrb[110].mxu0  ;;  %4489 = vmatmul.mubr.f32.gmra.mrb[214].mxu1 %v902_v0  ;;  %v4174_v20 = vpop.f32.mrb[111].mxu1  ;;  %v913_v60 = vld [vmem:[%s10873_s17 + $0x1808] sm:$0xff] }
 0x561   : > { %v13750_v30 = vadd.f32 %v6786_v55, %v4172_v56  ;;  %v6788_v14 = vpop.f32.mrb[111].mxu0  ;;  %9164 = vmatmul.mubr.msk.f32.gmra.mrb[214].mxu0 %vm1856_vm0, %v906_v2  ;;  %v7930_v22 = vpop.permute.xlu0 %7929  ;;  %4494 = vmatprep.mubr.f32.mxu1 %v910_v36  ;;  %v917_v0 = vld [vmem:[%s10873_s17 + $0x1828] sm:$0xff] }
 0x562   : > { %8821 = vst.msk [vmem:[%s13640_s11 + $0x38] sm:$0xff] %vm8813_vm1, %v8640_v46  ;;  %v8461_v12 = vadd.f32 %v7930_v22, %v13260_v19  ;;  %v13757_v48 = vadd.f32 %v6788_v14, %v4174_v20  ;;  %7108 = vmatprep.mubr.f32.mxu0 %v16647_v5  ;;  %v916_v20 = vld [vmem:[%s10873_s17 + $0x1820] sm:$0xff] }
 0x563   : > { %7987 = vrot.lane.b32.xlu1 %v13750_v30, %s10557_s6  ;;  %v4178_v62 = vpop.f32.mrb[112].mxu1 }
 0x564   : > { %v8641_v2 = vadd.f32 %v13597_v61, %v8461_v12  ;;  %v6792_v36 = vpop.f32.mrb[112].mxu0  ;;  %4495 = vmatmul.mubr.f32.gmra.mrb[216].mxu1 %v909_v18  ;;  %v4180_v56 = vpop.f32.mrb[113].mxu1  ;;  %v920_v61 = vld [vmem:[%s10873_s17 + $0x1840] sm:$0xff] }
 0x565   : > { %v13765_v19 = vadd.f32 %v6792_v36, %v4178_v62  ;;  %v6794_v46 = vpop.f32.mrb[113].mxu0  ;;  %9165 = vmatmul.mubr.msk.f32.gmra.mrb[216].mxu0 %vm1856_vm0, %v913_v60  ;;  %v7932_v55 = vpop.permute.xlu1 %7931  ;;  %4500 = vmatprep.mubr.f32.mxu1 %v917_v0  ;;  %v924_v18 = vld [vmem:[%s10873_s17 + $0x1860] sm:$0xff] }
 0x566   : > { %8822 = vst.msk [vmem:[%s13640_s11 + $0x40] sm:$0xff] %vm8813_vm1, %v8641_v2  ;;  %v8462_v14 = vadd.f32 %v7932_v55, %v13269_v59  ;;  %v13772_v22 = vadd.f32 %v6794_v46, %v4180_v56  ;;  %7114 = vmatprep.mubr.f32.mxu0 %v16647_v5  ;;  %v923_v56 = vld [vmem:[%s10873_s17 + $0x1858] sm:$0xff] }
 0x567   : > { %7989 = vrot.lane.b32.xlu0 %v13765_v19, %s10557_s6  ;;  %v4184_v12 = vpop.f32.mrb[114].mxu1 }
 0x568   : > { %v8642_v60 = vadd.f32 %v13608_v8, %v8462_v14  ;;  %v6798_v0 = vpop.f32.mrb[114].mxu0  ;;  %4501 = vmatmul.mubr.f32.gmra.mrb[218].mxu1 %v916_v20  ;;  %v4186_v62 = vpop.f32.mrb[115].mxu1  ;;  %v927_v8 = vld [vmem:[%s10873_s17 + $0x1878] sm:$0xff] }
 0x569   : > { %v13780_v59 = vadd.f32 %v6798_v0, %v4184_v12  ;;  %v6800_v2 = vpop.f32.mrb[115].mxu0  ;;  %9166 = vmatmul.mubr.msk.f32.gmra.mrb[218].mxu0 %vm1856_vm0, %v920_v61  ;;  %v7934_v36 = vpop.permute.xlu0 %7933  ;;  %4506 = vmatprep.mubr.f32.mxu1 %v924_v18  ;;  %v931_v20 = vld [vmem:[%s10873_s17 + $0x1898] sm:$0xff] }
 0x56a   : > { %8823 = vst.msk [vmem:[%s13640_s11 + $0x48] sm:$0xff] %vm8813_vm1, %v8642_v60  ;;  %v8463_v46 = vadd.f32 %v7934_v36, %v13278_v49  ;;  %v13787_v55 = vadd.f32 %v6800_v2, %v4186_v62  ;;  %7120 = vmatprep.mubr.f32.mxu0 %v16647_v5  ;;  %v930_v62 = vld [vmem:[%s10873_s17 + $0x1890] sm:$0xff] }
 0x56b   : > { %7991 = vrot.lane.b32.xlu1 %v13780_v59, %s10557_s6  ;;  %v4190_v14 = vpop.f32.mrb[116].mxu1 }
 0x56c   : > { %v8643_v61 = vadd.f32 %v13619_v53, %v8463_v46  ;;  %v6804_v18 = vpop.f32.mrb[116].mxu0  ;;  %4507 = vmatmul.mubr.f32.gmra.mrb[220].mxu1 %v923_v56  ;;  %v4192_v12 = vpop.f32.mrb[117].mxu1  ;;  %v934_v53 = vld [vmem:[%s10873_s17 + $0x18b0] sm:$0xff] }
 0x56d   : > { %v13795_v49 = vadd.f32 %v6804_v18, %v4190_v14  ;;  %v6806_v60 = vpop.f32.mrb[117].mxu0  ;;  %9167 = vmatmul.mubr.msk.f32.gmra.mrb[220].mxu0 %vm1856_vm0, %v927_v8  ;;  %v7936_v0 = vpop.permute.xlu1 %7935  ;;  %4512 = vmatprep.mubr.f32.mxu1 %v931_v20  ;;  %v938_v56 = vld [vmem:[%s10873_s17 + $0x18d0] sm:$0xff] }
 0x56e   : > { %8824 = vst.msk [vmem:[%s13640_s11 + $0x50] sm:$0xff] %vm8813_vm1, %v8643_v61  ;;  %v8464_v2 = vadd.f32 %v7936_v0, %v13287_v39  ;;  %v13802_v36 = vadd.f32 %v6806_v60, %v4192_v12  ;;  %7126 = vmatprep.mubr.f32.mxu0 %v16647_v5  ;;  %v937_v12 = vld [vmem:[%s10873_s17 + $0x18c8] sm:$0xff] }
 0x56f   : > { %7993 = vrot.lane.b32.xlu0 %v13795_v49, %s10557_s6  ;;  %v4196_v46 = vpop.f32.mrb[118].mxu1 }
 0x570   : > { %v8644_v8 = vadd.f32 %v13632_v45, %v8464_v2  ;;  %v6810_v20 = vpop.f32.mrb[118].mxu0  ;;  %4513 = vmatmul.mubr.f32.gmra.mrb[222].mxu1 %v930_v62  ;;  %v4198_v14 = vpop.f32.mrb[119].mxu1  ;;  %v941_v45 = vld [vmem:[%s10873_s17 + $0x18e8] sm:$0xff] }
 0x571   : > { %v13810_v39 = vadd.f32 %v6810_v20, %v4196_v46  ;;  %v6812_v61 = vpop.f32.mrb[119].mxu0  ;;  %9168 = vmatmul.mubr.msk.f32.gmra.mrb[222].mxu0 %vm1856_vm0, %v934_v53  ;;  %v7938_v18 = vpop.permute.xlu0 %7937  ;;  %4518 = vmatprep.mubr.f32.mxu1 %v938_v56  ;;  %v945_v62 = vld [vmem:[%s10873_s17 + $0x1908] sm:$0xff] }
 0x572   : > { %8825 = vst.msk [vmem:[%s13640_s11 + $0x58] sm:$0xff] %vm8813_vm1, %v8644_v8  ;;  %v8465_v60 = vadd.f32 %v7938_v18, %v13296_v11  ;;  %v13817_v0 = vadd.f32 %v6812_v61, %v4198_v14  ;;  %7132 = vmatprep.mubr.f32.mxu0 %v16647_v5  ;;  %v944_v14 = vld [vmem:[%s10873_s17 + $0x1900] sm:$0xff] }
 0x573   : > { %7995 = vrot.lane.b32.xlu1 %v13810_v39, %s10557_s6  ;;  %v4202_v2 = vpop.f32.mrb[120].mxu1 }
 0x574   : > { %v8645_v53 = vadd.f32 %v13652_v47, %v8465_v60  ;;  %v6816_v56 = vpop.f32.mrb[120].mxu0  ;;  %4519 = vmatmul.mubr.f32.gmra.mrb[224].mxu1 %v937_v12  ;;  %v4204_v46 = vpop.f32.mrb[121].mxu1  ;;  %v948_v47 = vld [vmem:[%s10873_s17 + $0x1920] sm:$0xff] }
 0x575   : > { %v13825_v11 = vadd.f32 %v6816_v56, %v4202_v2  ;;  %v6818_v8 = vpop.f32.mrb[121].mxu0  ;;  %9169 = vmatmul.mubr.msk.f32.gmra.mrb[224].mxu0 %vm1856_vm0, %v941_v45  ;;  %v7940_v20 = vpop.permute.xlu1 %7939  ;;  %4524 = vmatprep.mubr.f32.mxu1 %v945_v62  ;;  %v952_v12 = vld [vmem:[%s10873_s17 + $0x1940] sm:$0xff] }
 0x576   : > { %8826 = vst.msk [vmem:[%s13640_s11 + $0x60] sm:$0xff] %vm8813_vm1, %v8645_v53  ;;  %v8466_v61 = vadd.f32 %v7940_v20, %v13305_v38  ;;  %v13832_v18 = vadd.f32 %v6818_v8, %v4204_v46  ;;  %7138 = vmatprep.mubr.f32.mxu0 %v16647_v5  ;;  %v951_v46 = vld [vmem:[%s10873_s17 + $0x1938] sm:$0xff] }
 0x577   : > { %7997 = vrot.lane.b32.xlu0 %v13825_v11, %s10557_s6  ;;  %v4208_v60 = vpop.f32.mrb[122].mxu1 }
 0x578   : > { %v8646_v45 = vadd.f32 %v13667_v54, %v8466_v61  ;;  %v6822_v62 = vpop.f32.mrb[122].mxu0  ;;  %4525 = vmatmul.mubr.f32.gmra.mrb[226].mxu1 %v944_v14  ;;  %v4210_v2 = vpop.f32.mrb[123].mxu1  ;;  %v955_v54 = vld [vmem:[%s10873_s17 + $0x1958] sm:$0xff] }
 0x579   : > { %v13840_v38 = vadd.f32 %v6822_v62, %v4208_v60  ;;  %v6824_v53 = vpop.f32.mrb[123].mxu0  ;;  %9170 = vmatmul.mubr.msk.f32.gmra.mrb[226].mxu0 %vm1856_vm0, %v948_v47  ;;  %v7942_v56 = vpop.permute.xlu0 %7941  ;;  %4530 = vmatprep.mubr.f32.mxu1 %v952_v12  ;;  %v959_v14 = vld [vmem:[%s10873_s17 + $0x1978] sm:$0xff] }
 0x57a   : > { %8827 = vst.msk [vmem:[%s13640_s11 + $0x68] sm:$0xff] %vm8813_vm1, %v8646_v45  ;;  %v8467_v8 = vadd.f32 %v7942_v56, %v13314_v35  ;;  %v13847_v20 = vadd.f32 %v6824_v53, %v4210_v2  ;;  %7144 = vmatprep.mubr.f32.mxu0 %v16647_v5  ;;  %v958_v2 = vld [vmem:[%s10873_s17 + $0x1970] sm:$0xff] }
 0x57b   : > { %7999 = vrot.lane.b32.xlu1 %v13840_v38, %s10557_s6  ;;  %v4214_v61 = vpop.f32.mrb[124].mxu1 }
 0x57c   : > { %v8647_v47 = vadd.f32 %v13682_v44, %v8467_v8  ;;  %v6828_v12 = vpop.f32.mrb[124].mxu0  ;;  %4531 = vmatmul.mubr.f32.gmra.mrb[228].mxu1 %v951_v46  ;;  %v4216_v60 = vpop.f32.mrb[125].mxu1  ;;  %v962_v44 = vld [vmem:[%s10873_s17 + $0x1990] sm:$0xff] }
 0x57d   : > { %v13855_v35 = vadd.f32 %v6828_v12, %v4214_v61  ;;  %v6830_v45 = vpop.f32.mrb[125].mxu0  ;;  %9171 = vmatmul.mubr.msk.f32.gmra.mrb[228].mxu0 %vm1856_vm0, %v955_v54  ;;  %v7944_v62 = vpop.permute.xlu1 %7943  ;;  %4536 = vmatprep.mubr.f32.mxu1 %v959_v14  ;;  %v966_v46 = vld [vmem:[%s10873_s17 + $0x19b0] sm:$0xff] }
 0x57e   : > { %8828 = vst.msk [vmem:[%s13640_s11 + $0x70] sm:$0xff] %vm8813_vm1, %v8647_v47  ;;  %v8468_v53 = vadd.f32 %v7944_v62, %v13323_v58  ;;  %v13862_v56 = vadd.f32 %v6830_v45, %v4216_v60  ;;  %7150 = vmatprep.mubr.f32.mxu0 %v16647_v5  ;;  %v965_v60 = vld [vmem:[%s10873_s17 + $0x19a8] sm:$0xff] }
 0x57f   : > { %8001 = vrot.lane.b32.xlu0 %v13855_v35, %s10557_s6  ;;  %v4220_v8 = vpop.f32.mrb[126].mxu1 }
 0x580   : > { %v8648_v54 = vadd.f32 %v13697_v31, %v8468_v53  ;;  %v6834_v14 = vpop.f32.mrb[126].mxu0  ;;  %4537 = vmatmul.mubr.f32.gmra.mrb[230].mxu1 %v958_v2  ;;  %v4222_v61 = vpop.f32.mrb[127].mxu1  ;;  %v969_v31 = vld [vmem:[%s10873_s17 + $0x19c8] sm:$0xff] }
 0x581   : > { %v13870_v58 = vadd.f32 %v6834_v14, %v4220_v8  ;;  %v6836_v47 = vpop.f32.mrb[127].mxu0  ;;  %9172 = vmatmul.mubr.msk.f32.gmra.mrb[230].mxu0 %vm1856_vm0, %v962_v44  ;;  %v7946_v12 = vpop.permute.xlu0 %7945  ;;  %4542 = vmatprep.mubr.f32.mxu1 %v966_v46  ;;  %v973_v2 = vld [vmem:[%s10873_s17 + $0x19e8] sm:$0xff] }
 0x582   : > { %8829 = vst.msk [vmem:[%s13640_s11 + $0x78] sm:$0xff] %vm8813_vm1, %v8648_v54  ;;  %v8469_v45 = vadd.f32 %v7946_v12, %v13332_v1  ;;  %v13877_v62 = vadd.f32 %v6836_v47, %v4222_v61  ;;  %7156 = vmatprep.mubr.f32.mxu0 %v16647_v5  ;;  %v972_v61 = vld [vmem:[%s10873_s17 + $0x19e0] sm:$0xff] }
 0x583   : > { %8003 = vrot.lane.b32.xlu1 %v13870_v58, %s10557_s6  ;;  %v4226_v53 = vpop.f32.mrb[128].mxu1 }
 0x584   : > { %v8649_v44 = vadd.f32 %v13712_v23, %v8469_v45  ;;  %v6840_v46 = vpop.f32.mrb[128].mxu0  ;;  %4543 = vmatmul.mubr.f32.gmra.mrb[232].mxu1 %v965_v60  ;;  %v4228_v8 = vpop.f32.mrb[129].mxu1  ;;  %v976_v23 = vld [vmem:[%s10873_s17 + $0x1a00] sm:$0xff] }
 0x585   : > { %v13885_v1 = vadd.f32 %v6840_v46, %v4226_v53  ;;  %v6842_v54 = vpop.f32.mrb[129].mxu0  ;;  %9173 = vmatmul.mubr.msk.f32.gmra.mrb[232].mxu0 %vm1856_vm0, %v969_v31  ;;  %v7948_v14 = vpop.permute.xlu1 %7947  ;;  %4548 = vmatprep.mubr.f32.mxu1 %v973_v2  ;;  %v980_v60 = vld [vmem:[%s10873_s17 + $0x1a20] sm:$0xff] }
 0x586   : > { %8830 = vst.msk [vmem:[%s13640_s11 + $0x80] sm:$0xff] %vm8813_vm1, %v8649_v44  ;;  %v8470_v47 = vadd.f32 %v7948_v14, %v13341_v42  ;;  %v13892_v12 = vadd.f32 %v6842_v54, %v4228_v8  ;;  %7162 = vmatprep.mubr.f32.mxu0 %v16647_v5  ;;  %v979_v8 = vld [vmem:[%s10873_s17 + $0x1a18] sm:$0xff] }
 0x587   : > { %8005 = vrot.lane.b32.xlu0 %v13885_v1, %s10557_s6  ;;  %v4232_v45 = vpop.f32.mrb[130].mxu1 }
 0x588   : > { %v8650_v31 = vadd.f32 %v13727_v29, %v8470_v47  ;;  %v6846_v2 = vpop.f32.mrb[130].mxu0  ;;  %4549 = vmatmul.mubr.f32.gmra.mrb[234].mxu1 %v972_v61  ;;  %v4234_v53 = vpop.f32.mrb[131].mxu1  ;;  %v983_v29 = vld [vmem:[%s10873_s17 + $0x1a38] sm:$0xff] }
 0x589   : > { %v13900_v42 = vadd.f32 %v6846_v2, %v4232_v45  ;;  %v6848_v44 = vpop.f32.mrb[131].mxu0  ;;  %9174 = vmatmul.mubr.msk.f32.gmra.mrb[234].mxu0 %vm1856_vm0, %v976_v23  ;;  %v7950_v46 = vpop.permute.xlu0 %7949  ;;  %4554 = vmatprep.mubr.f32.mxu1 %v980_v60  ;;  %v987_v61 = vld [vmem:[%s10873_s17 + $0x1a58] sm:$0xff] }
 0x58a   : > { %8831 = vst.msk [vmem:[%s13640_s11 + $0x88] sm:$0xff] %vm8813_vm1, %v8650_v31  ;;  %v8471_v54 = vadd.f32 %v13344_v10, %v7950_v46  ;;  %v13907_v14 = vadd.f32 %v6848_v44, %v4234_v53  ;;  %7168 = vmatprep.mubr.f32.mxu0 %v16647_v5  ;;  %v986_v53 = vld [vmem:[%s10873_s17 + $0x1a50] sm:$0xff] }
 0x58b   : > { %8007 = vrot.lane.b32.xlu1 %v13900_v42, %s10557_s6  ;;  %v4238_v47 = vpop.f32.mrb[132].mxu1 }
 0x58c   : > { %v8651_v23 = vadd.f32 %v13742_v6, %v8471_v54  ;;  %v6852_v60 = vpop.f32.mrb[132].mxu0  ;;  %4555 = vmatmul.mubr.f32.gmra.mrb[236].mxu1 %v979_v8  ;;  %v4240_v45 = vpop.f32.mrb[133].mxu1  ;;  %v990_v6 = vld [vmem:[%s10873_s17 + $0x1a70] sm:$0xff] }
 0x58d   : > { %v13915_v10 = vadd.f32 %v6852_v60, %v4238_v47  ;;  %v6854_v31 = vpop.f32.mrb[133].mxu0  ;;  %9175 = vmatmul.mubr.msk.f32.gmra.mrb[236].mxu0 %vm1856_vm0, %v983_v29  ;;  %v7952_v2 = vpop.permute.xlu1 %7951  ;;  %4560 = vmatprep.mubr.f32.mxu1 %v987_v61  ;;  %v994_v8 = vld [vmem:[%s10873_s17 + $0x1a90] sm:$0xff] }
 0x58e   : > { %8832 = vst.msk [vmem:[%s13640_s11 + $0x90] sm:$0xff] %vm8813_vm1, %v8651_v23  ;;  %v8472_v44 = vadd.f32 %v13352_v57, %v7952_v2  ;;  %v13922_v46 = vadd.f32 %v6854_v31, %v4240_v45  ;;  %7174 = vmatprep.mubr.f32.mxu0 %v16647_v5  ;;  %v993_v45 = vld [vmem:[%s10873_s17 + $0x1a88] sm:$0xff] }
 0x58f   : > { %8009 = vrot.lane.b32.xlu0 %v13915_v10, %s10557_s6  ;;  %v4244_v54 = vpop.f32.mrb[134].mxu1 }
 0x590   : > { %v8652_v29 = vadd.f32 %v13757_v48, %v8472_v44  ;;  %v6858_v61 = vpop.f32.mrb[134].mxu0  ;;  %4561 = vmatmul.mubr.f32.gmra.mrb[238].mxu1 %v986_v53  ;;  %v4246_v47 = vpop.f32.mrb[135].mxu1  ;;  %v997_v48 = vld [vmem:[%s10873_s17 + $0x1aa8] sm:$0xff] }
 0x591   : > { %v13930_v57 = vadd.f32 %v6858_v61, %v4244_v54  ;;  %v6860_v23 = vpop.f32.mrb[135].mxu0  ;;  %9176 = vmatmul.mubr.msk.f32.gmra.mrb[238].mxu0 %vm1856_vm0, %v990_v6  ;;  %v7954_v60 = vpop.permute.xlu0 %7953  ;;  %4566 = vmatprep.mubr.f32.mxu1 %v994_v8  ;;  %v1001_v53 = vld [vmem:[%s10873_s17 + $0x1ac8] sm:$0xff] }
 0x592   : > { %8833 = vst.msk [vmem:[%s13640_s11 + $0x98] sm:$0xff] %vm8813_vm1, %v8652_v29  ;;  %v8473_v31 = vadd.f32 %v13362_v43, %v7954_v60  ;;  %v13937_v2 = vadd.f32 %v6860_v23, %v4246_v47  ;;  %7180 = vmatprep.mubr.f32.mxu0 %v16647_v5  ;;  %v1000_v47 = vld [vmem:[%s10873_s17 + $0x1ac0] sm:$0xff] }
 0x593   : > { %8011 = vrot.lane.b32.xlu1 %v13930_v57, %s10557_s6  ;;  %v4250_v44 = vpop.f32.mrb[136].mxu1 }
 0x594   : > { %v8653_v6 = vadd.f32 %v13772_v22, %v8473_v31  ;;  %v6864_v8 = vpop.f32.mrb[136].mxu0  ;;  %4567 = vmatmul.mubr.f32.gmra.mrb[240].mxu1 %v993_v45  ;;  %v4252_v54 = vpop.f32.mrb[137].mxu1  ;;  %v1004_v22 = vld [vmem:[%s10873_s17 + $0x1ae0] sm:$0xff] }
 0x595   : > { %v13945_v43 = vadd.f32 %v6864_v8, %v4250_v44  ;;  %v6866_v29 = vpop.f32.mrb[137].mxu0  ;;  %9177 = vmatmul.mubr.msk.f32.gmra.mrb[240].mxu0 %vm1856_vm0, %v997_v48  ;;  %v7956_v61 = vpop.permute.xlu1 %7955  ;;  %4572 = vmatprep.mubr.f32.mxu1 %v1001_v53  ;;  %v1008_v45 = vld [vmem:[%s10873_s17 + $0x1b00] sm:$0xff] }
 0x596   : > { %8834 = vst.msk [vmem:[%s13640_s11 + $0xa0] sm:$0xff] %vm8813_vm1, %v8653_v6  ;;  %v8474_v23 = vadd.f32 %v13370_v7, %v7956_v61  ;;  %v13952_v60 = vadd.f32 %v6866_v29, %v4252_v54  ;;  %7186 = vmatprep.mubr.f32.mxu0 %v16647_v5  ;;  %v1007_v54 = vld [vmem:[%s10873_s17 + $0x1af8] sm:$0xff] }
 0x597   : > { %8013 = vrot.lane.b32.xlu0 %v13945_v43, %s10557_s6  ;;  %v4256_v31 = vpop.f32.mrb[138].mxu1 }
 0x598   : > { %v8654_v48 = vadd.f32 %v13787_v55, %v8474_v23  ;;  %v6870_v53 = vpop.f32.mrb[138].mxu0  ;;  %4573 = vmatmul.mubr.f32.gmra.mrb[242].mxu1 %v1000_v47  ;;  %v4258_v44 = vpop.f32.mrb[139].mxu1  ;;  %v1011_v55 = vld [vmem:[%s10873_s17 + $0x1b18] sm:$0xff] }
 0x599   : > { %v13960_v7 = vadd.f32 %v6870_v53, %v4256_v31  ;;  %v6872_v6 = vpop.f32.mrb[139].mxu0  ;;  %9178 = vmatmul.mubr.msk.f32.gmra.mrb[242].mxu0 %vm1856_vm0, %v1004_v22  ;;  %v7958_v8 = vpop.permute.xlu0 %7957  ;;  %4578 = vmatprep.mubr.f32.mxu1 %v1008_v45  ;;  %v1015_v47 = vld [vmem:[%s10873_s17 + $0x1b38] sm:$0xff] }
 0x59a   : > { %8835 = vst.msk [vmem:[%s13640_s11 + $0xa8] sm:$0xff] %vm8813_vm1, %v8654_v48  ;;  %v8475_v29 = vadd.f32 %v13379_v51, %v7958_v8  ;;  %v13967_v61 = vadd.f32 %v6872_v6, %v4258_v44  ;;  %7192 = vmatprep.mubr.f32.mxu0 %v16647_v5  ;;  %v1014_v44 = vld [vmem:[%s10873_s17 + $0x1b30] sm:$0xff] }
 0x59b   : > { %8015 = vrot.lane.b32.xlu1 %v13960_v7, %s10557_s6  ;;  %v4262_v23 = vpop.f32.mrb[140].mxu1 }
 0x59c   : > { %v8655_v22 = vadd.f32 %v13802_v36, %v8475_v29  ;;  %v6876_v45 = vpop.f32.mrb[140].mxu0  ;;  %4579 = vmatmul.mubr.f32.gmra.mrb[244].mxu1 %v1007_v54  ;;  %v4264_v31 = vpop.f32.mrb[141].mxu1  ;;  %v1018_v36 = vld [vmem:[%s10873_s17 + $0x1b50] sm:$0xff] }
 0x59d   : > { %v13975_v51 = vadd.f32 %v6876_v45, %v4262_v23  ;;  %v6878_v48 = vpop.f32.mrb[141].mxu0  ;;  %9179 = vmatmul.mubr.msk.f32.gmra.mrb[244].mxu0 %vm1856_vm0, %v1011_v55  ;;  %v7960_v53 = vpop.permute.xlu1 %7959  ;;  %4584 = vmatprep.mubr.f32.mxu1 %v1015_v47  ;;  %v1022_v54 = vld [vmem:[%s10873_s17 + $0x1b70] sm:$0xff] }
 0x59e   : > { %8836 = vst.msk [vmem:[%s13640_s11 + $0xb0] sm:$0xff] %vm8813_vm1, %v8655_v22  ;;  %v8476_v6 = vadd.f32 %v13388_v16, %v7960_v53  ;;  %v13982_v8 = vadd.f32 %v6878_v48, %v4264_v31  ;;  %7198 = vmatprep.mubr.f32.mxu0 %v16647_v5  ;;  %v1021_v31 = vld [vmem:[%s10873_s17 + $0x1b68] sm:$0xff] }
 0x59f   : > { %8017 = vrot.lane.b32.xlu0 %v13975_v51, %s10557_s6  ;;  %v4268_v29 = vpop.f32.mrb[142].mxu1 }
 0x5a0   : > { %v8656_v55 = vadd.f32 %v13817_v0, %v8476_v6  ;;  %v6882_v47 = vpop.f32.mrb[142].mxu0  ;;  %4585 = vmatmul.mubr.f32.gmra.mrb[246].mxu1 %v1014_v44  ;;  %v4270_v23 = vpop.f32.mrb[143].mxu1  ;;  %v1025_v0 = vld [vmem:[%s10873_s17 + $0x1b88] sm:$0xff] }
 0x5a1   : > { %v13990_v16 = vadd.f32 %v6882_v47, %v4268_v29  ;;  %v6884_v22 = vpop.f32.mrb[143].mxu0  ;;  %9180 = vmatmul.mubr.msk.f32.gmra.mrb[246].mxu0 %vm1856_vm0, %v1018_v36  ;;  %v7962_v45 = vpop.permute.xlu0 %7961  ;;  %4590 = vmatprep.mubr.f32.mxu1 %v1022_v54  ;;  %v1029_v44 = vld [vmem:[%s10873_s17 + $0x1ba8] sm:$0xff] }
 0x5a2   : > { %8837 = vst.msk [vmem:[%s13640_s11 + $0xb8] sm:$0xff] %vm8813_vm1, %v8656_v55  ;;  %v8477_v48 = vadd.f32 %v13397_v63, %v7962_v45  ;;  %v13997_v53 = vadd.f32 %v6884_v22, %v4270_v23  ;;  %7204 = vmatprep.mubr.f32.mxu0 %v16647_v5  ;;  %v1028_v23 = vld [vmem:[%s10873_s17 + $0x1ba0] sm:$0xff] }
 0x5a3   : > { %8019 = vrot.lane.b32.xlu1 %v13990_v16, %s10557_s6  ;;  %v4274_v6 = vpop.f32.mrb[144].mxu1 }
 0x5a4   : > { %v8657_v36 = vadd.f32 %v13832_v18, %v8477_v48  ;;  %v6888_v54 = vpop.f32.mrb[144].mxu0  ;;  %4591 = vmatmul.mubr.f32.gmra.mrb[248].mxu1 %v1021_v31  ;;  %v4276_v29 = vpop.f32.mrb[145].mxu1  ;;  %v1032_v18 = vld [vmem:[%s10873_s17 + $0x1bc0] sm:$0xff] }
 0x5a5   : > { %v14005_v63 = vadd.f32 %v6888_v54, %v4274_v6  ;;  %v6890_v55 = vpop.f32.mrb[145].mxu0  ;;  %9181 = vmatmul.mubr.msk.f32.gmra.mrb[248].mxu0 %vm1856_vm0, %v1025_v0  ;;  %v7964_v47 = vpop.permute.xlu1 %7963  ;;  %4596 = vmatprep.mubr.f32.mxu1 %v1029_v44  ;;  %v1036_v31 = vld [vmem:[%s10873_s17 + $0x1be0] sm:$0xff] }
 0x5a6   : > { %8838 = vst.msk [vmem:[%s13640_s11 + $0xc0] sm:$0xff] %vm8813_vm1, %v8657_v36  ;;  %v8478_v22 = vadd.f32 %v13406_v15, %v7964_v47  ;;  %v14012_v45 = vadd.f32 %v6890_v55, %v4276_v29  ;;  %7210 = vmatprep.mubr.f32.mxu0 %v16647_v5  ;;  %v1035_v29 = vld [vmem:[%s10873_s17 + $0x1bd8] sm:$0xff] }
 0x5a7   : > { %8021 = vrot.lane.b32.xlu0 %v14005_v63, %s10557_s6  ;;  %v4280_v48 = vpop.f32.mrb[146].mxu1 }
 0x5a8   : > { %v8658_v0 = vadd.f32 %v13847_v20, %v8478_v22  ;;  %v6894_v44 = vpop.f32.mrb[146].mxu0  ;;  %4597 = vmatmul.mubr.f32.gmra.mrb[250].mxu1 %v1028_v23  ;;  %v4282_v6 = vpop.f32.mrb[147].mxu1  ;;  %v1039_v20 = vld [vmem:[%s10873_s17 + $0x1bf8] sm:$0xff] }
 0x5a9   : > { %v14020_v15 = vadd.f32 %v6894_v44, %v4280_v48  ;;  %v6896_v36 = vpop.f32.mrb[147].mxu0  ;;  %9182 = vmatmul.mubr.msk.f32.gmra.mrb[250].mxu0 %vm1856_vm0, %v1032_v18  ;;  %v7966_v54 = vpop.permute.xlu0 %7965  ;;  %4602 = vmatprep.mubr.f32.mxu1 %v1036_v31  ;;  %v1043_v23 = vld [vmem:[%s10873_s17 + $0x1c18] sm:$0xff] }
 0x5aa   : > { %8839 = vst.msk [vmem:[%s13640_s11 + $0xc8] sm:$0xff] %vm8813_vm1, %v8658_v0  ;;  %v8479_v55 = vadd.f32 %v13415_v13, %v7966_v54  ;;  %v14027_v47 = vadd.f32 %v6896_v36, %v4282_v6  ;;  %7216 = vmatprep.mubr.f32.mxu0 %v16647_v5  ;;  %v1042_v6 = vld [vmem:[%s10873_s17 + $0x1c10] sm:$0xff] }
 0x5ab   : > { %8023 = vrot.lane.b32.xlu1 %v14020_v15, %s10557_s6  ;;  %v4286_v22 = vpop.f32.mrb[148].mxu1 }
 0x5ac   : > { %v8659_v18 = vadd.f32 %v13862_v56, %v8479_v55  ;;  %v6900_v31 = vpop.f32.mrb[148].mxu0  ;;  %4603 = vmatmul.mubr.f32.gmra.mrb[252].mxu1 %v1035_v29  ;;  %v4288_v48 = vpop.f32.mrb[149].mxu1  ;;  %v1046_v56 = vld [vmem:[%s10873_s17 + $0x1c30] sm:$0xff] }
 0x5ad   : > { %v14035_v13 = vadd.f32 %v6900_v31, %v4286_v22  ;;  %v6902_v0 = vpop.f32.mrb[149].mxu0  ;;  %9183 = vmatmul.mubr.msk.f32.gmra.mrb[252].mxu0 %vm1856_vm0, %v1039_v20  ;;  %v7968_v44 = vpop.permute.xlu1 %7967  ;;  %4608 = vmatprep.mubr.f32.mxu1 %v1043_v23  ;;  %v1050_v29 = vld [vmem:[%s10873_s17 + $0x1c50] sm:$0xff] }
 0x5ae   : > { %8840 = vst.msk [vmem:[%s13640_s11 + $0xd0] sm:$0xff] %vm8813_vm1, %v8659_v18  ;;  %v8480_v36 = vadd.f32 %v13424_v37, %v7968_v44  ;;  %v14042_v54 = vadd.f32 %v6902_v0, %v4288_v48  ;;  %7222 = vmatprep.mubr.f32.mxu0 %v16647_v5  ;;  %v1049_v48 = vld [vmem:[%s10873_s17 + $0x1c48] sm:$0xff] }
 0x5af   : > { %8025 = vrot.lane.b32.xlu0 %v14035_v13, %s10557_s6  ;;  %v4292_v55 = vpop.f32.mrb[150].mxu1 }
 0x5b0   : > { %v8660_v20 = vadd.f32 %v13877_v62, %v8480_v36  ;;  %v6906_v23 = vpop.f32.mrb[150].mxu0  ;;  %4609 = vmatmul.mubr.f32.gmra.mrb[254].mxu1 %v1042_v6  ;;  %v4294_v22 = vpop.f32.mrb[151].mxu1  ;;  %v1053_v62 = vld [vmem:[%s10873_s17 + $0x1c68] sm:$0xff] }
 0x5b1   : > { %v14050_v37 = vadd.f32 %v6906_v23, %v4292_v55  ;;  %v6908_v18 = vpop.f32.mrb[151].mxu0  ;;  %9184 = vmatmul.mubr.msk.f32.gmra.mrb[254].mxu0 %vm1856_vm0, %v1046_v56  ;;  %v7970_v31 = vpop.permute.xlu0 %7969  ;;  %4614 = vmatprep.mubr.f32.mxu1 %v1050_v29  ;;  %v1057_v6 = vld [vmem:[%s10873_s17 + $0x1c88] sm:$0xff] }
 0x5b2   : > { %8841 = vst.msk [vmem:[%s13640_s11 + $0xd8] sm:$0xff] %vm8813_vm1, %v8660_v20  ;;  %v8481_v0 = vadd.f32 %v13433_v33, %v7970_v31  ;;  %v14057_v44 = vadd.f32 %v6908_v18, %v4294_v22  ;;  %7228 = vmatprep.mubr.f32.mxu0 %v16647_v5  ;;  %v1056_v22 = vld [vmem:[%s10873_s17 + $0x1c80] sm:$0xff] }
 0x5b3   : > { %8027 = vrot.lane.b32.xlu1 %v14050_v37, %s10557_s6  ;;  %v4298_v36 = vpop.f32.mrb[152].mxu1 }
 0x5b4   : > { %v8661_v56 = vadd.f32 %v13892_v12, %v8481_v0  ;;  %v6912_v29 = vpop.f32.mrb[152].mxu0  ;;  %v4300_v55 = vpop.f32.mrb[153].mxu1  ;;  %4615 = vmatmul.mubr.f32.gmra.mrb[152].mxu1 %v1049_v48  ;;  %v1060_v12 = vld [vmem:[%s10873_s17 + $0x1ca0] sm:$0xff] }
 0x5b5   : > { %v14065_v33 = vadd.f32 %v6912_v29, %v4298_v36  ;;  %v6914_v20 = vpop.f32.mrb[153].mxu0  ;;  %9185 = vmatmul.mubr.msk.f32.gmra.mrb[36].mxu0 %vm1856_vm0, %v1053_v62  ;;  %v7972_v23 = vpop.permute.xlu1 %7971  ;;  %4620 = vmatprep.mubr.f32.mxu1 %v1057_v6  ;;  %v1064_v48 = vld [vmem:[%s10873_s17 + $0x1cc0] sm:$0xff] }
 0x5b6   : > { %8842 = vst.msk [vmem:[%s13640_s11 + $0xe0] sm:$0xff] %vm8813_vm1, %v8661_v56  ;;  %v8482_v18 = vadd.f32 %v13442_v26, %v7972_v23  ;;  %v14072_v31 = vadd.f32 %v6914_v20, %v4300_v55  ;;  %7234 = vmatprep.mubr.f32.mxu0 %v16647_v5  ;;  %v1063_v55 = vld [vmem:[%s10873_s17 + $0x1cb8] sm:$0xff] }
 0x5b7   : > { %8029 = vrot.lane.b32.xlu0 %v14065_v33, %s10557_s6  ;;  %v4304_v0 = vpop.f32.mrb[154].mxu1 }
 0x5b8   : > { %v8662_v62 = vadd.f32 %v13907_v14, %v8482_v18  ;;  %v6918_v6 = vpop.f32.mrb[154].mxu0  ;;  %v4306_v36 = vpop.f32.mrb[155].mxu1  ;;  %4621 = vmatmul.mubr.f32.gmra.mrb[154].mxu1 %v1056_v22  ;;  %v1067_v14 = vld [vmem:[%s10873_s17 + $0x1cd8] sm:$0xff] }
 0x5b9   : > { %v14080_v26 = vadd.f32 %v6918_v6, %v4304_v0  ;;  %v6920_v56 = vpop.f32.mrb[155].mxu0  ;;  %9186 = vmatmul.mubr.msk.f32.gmra.mrb[38].mxu0 %vm1856_vm0, %v1060_v12  ;;  %v7974_v29 = vpop.permute.xlu0 %7973  ;;  %4626 = vmatprep.mubr.f32.mxu1 %v1064_v48  ;;  %v1071_v22 = vld [vmem:[%s10873_s17 + $0x1cf8] sm:$0xff] }
 0x5ba   : > { %8843 = vst.msk [vmem:[%s13640_s11 + $0xe8] sm:$0xff] %vm8813_vm1, %v8662_v62  ;;  %v8483_v20 = vadd.f32 %v13451_v27, %v7974_v29  ;;  %v14087_v23 = vadd.f32 %v6920_v56, %v4306_v36  ;;  %7240 = vmatprep.mubr.f32.mxu0 %v16647_v5  ;;  %v1070_v36 = vld [vmem:[%s10873_s17 + $0x1cf0] sm:$0xff] }
 0x5bb   : > { %8031 = vrot.lane.b32.xlu1 %v14080_v26, %s10557_s6  ;;  %v4310_v18 = vpop.f32.mrb[156].mxu1 }
 0x5bc   : > { %v8663_v12 = vadd.f32 %v13922_v46, %v8483_v20  ;;  %v6924_v48 = vpop.f32.mrb[156].mxu0  ;;  %v4312_v0 = vpop.f32.mrb[157].mxu1  ;;  %4627 = vmatmul.mubr.f32.gmra.mrb[156].mxu1 %v1063_v55  ;;  %v1074_v46 = vld [vmem:[%s10873_s17 + $0x1d10] sm:$0xff] }
 0x5bd   : > { %v14095_v27 = vadd.f32 %v6924_v48, %v4310_v18  ;;  %v6926_v62 = vpop.f32.mrb[157].mxu0  ;;  %9187 = vmatmul.mubr.msk.f32.gmra.mrb[40].mxu0 %vm1856_vm0, %v1067_v14  ;;  %v7976_v6 = vpop.permute.xlu1 %7975  ;;  %4632 = vmatprep.mubr.f32.mxu1 %v1071_v22  ;;  %v1078_v55 = vld [vmem:[%s10873_s17 + $0x1d30] sm:$0xff] }
 0x5be   : > { %8844 = vst.msk [vmem:[%s13640_s11 + $0xf0] sm:$0xff] %vm8813_vm1, %v8663_v12  ;;  %v8484_v56 = vadd.f32 %v13460_v40, %v7976_v6  ;;  %v14102_v29 = vadd.f32 %v6926_v62, %v4312_v0  ;;  %7246 = vmatprep.mubr.f32.mxu0 %v16647_v5  ;;  %v1077_v0 = vld [vmem:[%s10873_s17 + $0x1d28] sm:$0xff] }
 0x5bf   : > { %8033 = vrot.lane.b32.xlu0 %v14095_v27, %s10557_s6  ;;  %v4316_v20 = vpop.f32.mrb[158].mxu1 }
 0x5c0   : > { %v8664_v14 = vadd.f32 %v13937_v2, %v8484_v56  ;;  %v6930_v22 = vpop.f32.mrb[158].mxu0  ;;  %v4318_v18 = vpop.f32.mrb[159].mxu1  ;;  %4633 = vmatmul.mubr.f32.gmra.mrb[158].mxu1 %v1070_v36  ;;  %v1081_v2 = vld [vmem:[%s10873_s17 + $0x1d48] sm:$0xff] }
 0x5c1   : > { %v14110_v40 = vadd.f32 %v6930_v22, %v4316_v20  ;;  %v6932_v12 = vpop.f32.mrb[159].mxu0  ;;  %9188 = vmatmul.mubr.msk.f32.gmra.mrb[42].mxu0 %vm1856_vm0, %v1074_v46  ;;  %v7978_v48 = vpop.permute.xlu0 %7977  ;;  %4638 = vmatprep.mubr.f32.mxu1 %v1078_v55  ;;  %v1085_v36 = vld [vmem:[%s10873_s17 + $0x1d68] sm:$0xff] }
 0x5c2   : > { %8845 = vst.msk [vmem:[%s13640_s11 + $0xf8] sm:$0xff] %vm8813_vm1, %v8664_v14  ;;  %v8485_v62 = vadd.f32 %v13469_v21, %v7978_v48  ;;  %v14117_v6 = vadd.f32 %v6932_v12, %v4318_v18  ;;  %7252 = vmatprep.mubr.f32.mxu0 %v16647_v5  ;;  %v1084_v18 = vld [vmem:[%s10873_s17 + $0x1d60] sm:$0xff] }
 0x5c3   : > { %16648 = vst [vmem:[#allocation400_spill] sm:$0xff] %v14110_v40  ;;  %8035 = vrot.lane.b32.xlu1 %v14110_v40, %s10557_s6  ;;  %v4322_v56 = vpop.f32.mrb[160].mxu1 }
 0x5c4   : > { %v8665_v46 = vadd.f32 %v13952_v60, %v8485_v62  ;;  %v6936_v55 = vpop.f32.mrb[160].mxu0  ;;  %v4324_v20 = vpop.f32.mrb[161].mxu1  ;;  %4639 = vmatmul.mubr.f32.gmra.mrb[160].mxu1 %v1077_v0  ;;  %v1088_v60 = vld [vmem:[%s10873_s17 + $0x1d80] sm:$0xff] }
 0x5c5   : > { %v14125_v21 = vadd.f32 %v6936_v55, %v4322_v56  ;;  %v6938_v14 = vpop.f32.mrb[161].mxu0  ;;  %9189 = vmatmul.mubr.msk.f32.gmra.mrb[44].mxu0 %vm1856_vm0, %v1081_v2  ;;  %v7980_v22 = vpop.permute.xlu1 %7979  ;;  %4644 = vmatprep.mubr.f32.mxu1 %v1085_v36  ;;  %v1092_v0 = vld [vmem:[%s10873_s17 + $0x1da0] sm:$0xff] }
 0x5c6   : > { %8846 = vst.msk [vmem:[%s13640_s11 + $0x100] sm:$0xff] %vm8813_vm1, %v8665_v46  ;;  %v8486_v12 = vadd.f32 %v13478_v3, %v7980_v22  ;;  %v14132_v48 = vadd.f32 %v6938_v14, %v4324_v20  ;;  %7258 = vmatprep.mubr.f32.mxu0 %v16647_v5  ;;  %v1091_v20 = vld [vmem:[%s10873_s17 + $0x1d98] sm:$0xff] }
 0x5c7   : > { %16649 = vst [vmem:[#allocation401_spill] sm:$0xff] %v14125_v21  ;;  %8037 = vrot.lane.b32.xlu0 %v14125_v21, %s10557_s6  ;;  %v4328_v62 = vpop.f32.mrb[162].mxu1 }
 0x5c8   : > { %v8666_v2 = vadd.f32 %v13967_v61, %v8486_v12  ;;  %v6942_v36 = vpop.f32.mrb[162].mxu0  ;;  %v4330_v56 = vpop.f32.mrb[163].mxu1  ;;  %4645 = vmatmul.mubr.f32.gmra.mrb[162].mxu1 %v1084_v18  ;;  %v1095_v61 = vld [vmem:[%s10873_s17 + $0x1db8] sm:$0xff] }
 0x5c9   : > { %v14140_v3 = vadd.f32 %v6942_v36, %v4328_v62  ;;  %v6944_v46 = vpop.f32.mrb[163].mxu0  ;;  %9190 = vmatmul.mubr.msk.f32.gmra.mrb[46].mxu0 %vm1856_vm0, %v1088_v60  ;;  %v7982_v55 = vpop.permute.xlu0 %7981  ;;  %4650 = vmatprep.mubr.f32.mxu1 %v1092_v0  ;;  %v1099_v18 = vld [vmem:[%s10873_s17 + $0x1dd8] sm:$0xff] }
 0x5ca   : > { %8847 = vst.msk [vmem:[%s13640_s11 + $0x108] sm:$0xff] %vm8813_vm1, %v8666_v2  ;;  %v8487_v14 = vadd.f32 %v13487_v41, %v7982_v55  ;;  %v14147_v22 = vadd.f32 %v6944_v46, %v4330_v56  ;;  %7264 = vmatprep.mubr.f32.mxu0 %v16647_v5  ;;  %v1098_v56 = vld [vmem:[%s10873_s17 + $0x1dd0] sm:$0xff] }
 0x5cb   : > { %16650 = vst [vmem:[#allocation402_spill] sm:$0xff] %v14140_v3  ;;  %8039 = vrot.lane.b32.xlu1 %v14140_v3, %s10557_s6  ;;  %v4334_v12 = vpop.f32.mrb[164].mxu1  ;;  %v16673_v3 = vld [vmem:[#allocation398_spill] sm:$0xff] }
 0x5cc   : > { %v8667_v60 = vadd.f32 %v13982_v8, %v8487_v14  ;;  %v6948_v0 = vpop.f32.mrb[164].mxu0  ;;  %v4336_v62 = vpop.f32.mrb[165].mxu1  ;;  %4651 = vmatmul.mubr.f32.gmra.mrb[164].mxu1 %v1091_v20  ;;  %v1102_v8 = vld [vmem:[%s10873_s17 + $0x1df0] sm:$0xff] }
 0x5cd   : > { %v14155_v41 = vadd.f32 %v6948_v0, %v4334_v12  ;;  %v6950_v2 = vpop.f32.mrb[165].mxu0  ;;  %9191 = vmatmul.mubr.msk.f32.gmra.mrb[48].mxu0 %vm1856_vm0, %v1095_v61  ;;  %v7984_v36 = vpop.permute.xlu1 %7983  ;;  %4656 = vmatprep.mubr.f32.mxu1 %v1099_v18  ;;  %v1106_v20 = vld [vmem:[%s10873_s17 + $0x1e10] sm:$0xff] }
 0x5ce   : > { %8848 = vst.msk [vmem:[%s13640_s11 + $0x110] sm:$0xff] %vm8813_vm1, %v8667_v60  ;;  %v8488_v46 = vadd.f32 %v13496_v52, %v7984_v36  ;;  %v14162_v55 = vadd.f32 %v6950_v2, %v4336_v62  ;;  %7270 = vmatprep.mubr.f32.mxu0 %v16647_v5  ;;  %v1105_v62 = vld [vmem:[%s10873_s17 + $0x1e08] sm:$0xff] }
 0x5cf   : > { %16651 = vst [vmem:[#allocation403_spill] sm:$0xff] %v14155_v41  ;;  %8041 = vrot.lane.b32.xlu0 %v14155_v41, %s10557_s6  ;;  %v4340_v14 = vpop.f32.mrb[166].mxu1 }
 0x5d0   : > { %v8668_v61 = vadd.f32 %v13997_v53, %v8488_v46  ;;  %v6954_v18 = vpop.f32.mrb[166].mxu0  ;;  %v4342_v12 = vpop.f32.mrb[167].mxu1  ;;  %4657 = vmatmul.mubr.f32.gmra.mrb[166].mxu1 %v1098_v56  ;;  %v1109_v53 = vld [vmem:[%s10873_s17 + $0x1e28] sm:$0xff] }
 0x5d1   : > { %v14170_v52 = vadd.f32 %v6954_v18, %v4340_v14  ;;  %v6956_v60 = vpop.f32.mrb[167].mxu0  ;;  %9192 = vmatmul.mubr.msk.f32.gmra.mrb[50].mxu0 %vm1856_vm0, %v1102_v8  ;;  %v7986_v0 = vpop.permute.xlu0 %7985  ;;  %4662 = vmatprep.mubr.f32.mxu1 %v1106_v20  ;;  %v1113_v56 = vld [vmem:[%s10873_s17 + $0x1e48] sm:$0xff] }
 0x5d2   : > { %8849 = vst.msk [vmem:[%s13640_s11 + $0x118] sm:$0xff] %vm8813_vm1, %v8668_v61  ;;  %v8489_v2 = vadd.f32 %v13505_v34, %v7986_v0  ;;  %v14177_v36 = vadd.f32 %v6956_v60, %v4342_v12  ;;  %7276 = vmatprep.mubr.f32.mxu0 %v16647_v5  ;;  %v1112_v12 = vld [vmem:[%s10873_s17 + $0x1e40] sm:$0xff] }
 0x5d3   : > { %16652 = vst [vmem:[#allocation404_spill] sm:$0xff] %v14170_v52  ;;  %8043 = vrot.lane.b32.xlu1 %v14170_v52, %s10557_s6  ;;  %v4346_v46 = vpop.f32.mrb[168].mxu1  ;;  %v1175_v52 = vld [vmem:[%s10873_s17 + $0x2038] sm:$0xff] }
 0x5d4   : > { %v8669_v8 = vadd.f32 %v14012_v45, %v8489_v2  ;;  %v6960_v20 = vpop.f32.mrb[168].mxu0  ;;  %v4348_v14 = vpop.f32.mrb[169].mxu1  ;;  %4663 = vmatmul.mubr.f32.gmra.mrb[168].mxu1 %v1105_v62  ;;  %v1116_v45 = vld [vmem:[%s10873_s17 + $0x1e60] sm:$0xff] }
 0x5d5   : > { %v14185_v34 = vadd.f32 %v6960_v20, %v4346_v46  ;;  %v6962_v61 = vpop.f32.mrb[169].mxu0  ;;  %9193 = vmatmul.mubr.msk.f32.gmra.mrb[52].mxu0 %vm1856_vm0, %v1109_v53  ;;  %v7988_v18 = vpop.permute.xlu1 %7987  ;;  %4668 = vmatprep.mubr.f32.mxu1 %v1113_v56  ;;  %v1120_v62 = vld [vmem:[%s10873_s17 + $0x1e80] sm:$0xff] }
 0x5d6   : > { %8850 = vst.msk [vmem:[%s13640_s11 + $0x120] sm:$0xff] %vm8813_vm1, %v8669_v8  ;;  %v8490_v60 = vadd.f32 %v13516_v50, %v7988_v18  ;;  %v14192_v0 = vadd.f32 %v6962_v61, %v4348_v14  ;;  %7282 = vmatprep.mubr.f32.mxu0 %v16647_v5  ;;  %v1119_v14 = vld [vmem:[%s10873_s17 + $0x1e78] sm:$0xff]  ;;  %v16655_v61 = vld [vmem:[#allocation390_spill] sm:$0xff] }
 0x5d7   : > { %16653 = vst [vmem:[#allocation405_spill] sm:$0xff] %v14185_v34  ;;  %8045 = vrot.lane.b32.xlu0 %v14185_v34, %s10557_s6  ;;  %v4352_v2 = vpop.f32.mrb[170].mxu1 }
 0x5d8   : > { %v8670_v53 = vadd.f32 %v14027_v47, %v8490_v60  ;;  %v6966_v56 = vpop.f32.mrb[170].mxu0  ;;  %v4354_v46 = vpop.f32.mrb[171].mxu1  ;;  %4669 = vmatmul.mubr.f32.gmra.mrb[170].mxu1 %v1112_v12  ;;  %v1123_v47 = vld [vmem:[%s10873_s17 + $0x1e98] sm:$0xff] }
 0x5d9   : > { %v14200_v50 = vadd.f32 %v6966_v56, %v4352_v2  ;;  %v6968_v8 = vpop.f32.mrb[171].mxu0  ;;  %9194 = vmatmul.mubr.msk.f32.gmra.mrb[54].mxu0 %vm1856_vm0, %v1116_v45  ;;  %v7990_v20 = vpop.permute.xlu0 %7989  ;;  %4674 = vmatprep.mubr.f32.mxu1 %v1120_v62  ;;  %v1127_v12 = vld [vmem:[%s10873_s17 + $0x1eb8] sm:$0xff] }
 0x5da   : > { %8851 = vst.msk [vmem:[%s13640_s11 + $0x128] sm:$0xff] %vm8813_vm1, %v8670_v53  ;;  %v8491_v18 = vadd.f32 %v16655_v61, %v7990_v20  ;;  %v14207_v34 = vadd.f32 %v6968_v8, %v4354_v46  ;;  %7288 = vmatprep.mubr.f32.mxu0 %v16647_v5  ;;  %v1126_v8 = vld [vmem:[%s10873_s17 + $0x1eb0] sm:$0xff]  ;;  %v16657_v20 = vld [vmem:[#allocation391_spill] sm:$0xff] }
 0x5db   : > { %16654 = vst [vmem:[#allocation406_spill] sm:$0xff] %v14200_v50  ;;  %8047 = vrot.lane.b32.xlu1 %v14200_v50, %s10557_s6  ;;  %v4358_v60 = vpop.f32.mrb[172].mxu1 }
 0x5dc   : > { %v8671_v45 = vadd.f32 %v14042_v54, %v8491_v18  ;;  %v6972_v62 = vpop.f32.mrb[172].mxu0  ;;  %v4360_v2 = vpop.f32.mrb[173].mxu1  ;;  %4675 = vmatmul.mubr.f32.gmra.mrb[172].mxu1 %v1119_v14  ;;  %v1130_v54 = vld [vmem:[%s10873_s17 + $0x1ed0] sm:$0xff] }
 0x5dd   : > { %v14215_v53 = vadd.f32 %v6972_v62, %v4358_v60  ;;  %v6974_v56 = vpop.f32.mrb[173].mxu0  ;;  %9195 = vmatmul.mubr.msk.f32.gmra.mrb[56].mxu0 %vm1856_vm0, %v1123_v47  ;;  %v7992_v46 = vpop.permute.xlu1 %7991  ;;  %4680 = vmatprep.mubr.f32.mxu1 %v1127_v12  ;;  %v1134_v14 = vld [vmem:[%s10873_s17 + $0x1ef0] sm:$0xff] }
 0x5de   : > { %8852 = vst.msk [vmem:[%s13640_s11 + $0x130] sm:$0xff] %vm8813_vm1, %v8671_v45  ;;  %v8492_v61 = vadd.f32 %v16657_v20, %v7992_v46  ;;  %v14222_v50 = vadd.f32 %v6974_v56, %v4360_v2  ;;  %7294 = vmatprep.mubr.f32.mxu0 %v16647_v5  ;;  %v1133_v56 = vld [vmem:[%s10873_s17 + $0x1ee8] sm:$0xff]  ;;  %v16659_v46 = vld [vmem:[#allocation392_spill] sm:$0xff] }
 0x5df   : > { %16656 = vst [vmem:[#allocation390_spill] sm:$0xff] %v14215_v53  ;;  %8049 = vrot.lane.b32.xlu0 %v14215_v53, %s10557_s6  ;;  %v4364_v18 = vpop.f32.mrb[174].mxu1 }
 0x5e0   : > { %v8672_v47 = vadd.f32 %v14057_v44, %v8492_v61  ;;  %v6978_v12 = vpop.f32.mrb[174].mxu0  ;;  %v4366_v60 = vpop.f32.mrb[175].mxu1  ;;  %4681 = vmatmul.mubr.f32.gmra.mrb[174].mxu1 %v1126_v8  ;;  %v1137_v44 = vld [vmem:[%s10873_s17 + $0x1f08] sm:$0xff] }
 0x5e1   : > { %v14230_v45 = vadd.f32 %v6978_v12, %v4364_v18  ;;  %v6980_v62 = vpop.f32.mrb[175].mxu0  ;;  %9196 = vmatmul.mubr.msk.f32.gmra.mrb[58].mxu0 %vm1856_vm0, %v1130_v54  ;;  %v7994_v2 = vpop.permute.xlu0 %7993  ;;  %4686 = vmatprep.mubr.f32.mxu1 %v1134_v14  ;;  %v1141_v8 = vld [vmem:[%s10873_s17 + $0x1f28] sm:$0xff] }
 0x5e2   : > { %8853 = vst.msk [vmem:[%s13640_s11 + $0x138] sm:$0xff] %vm8813_vm1, %v8672_v47  ;;  %v8493_v20 = vadd.f32 %v16659_v46, %v7994_v2  ;;  %v14237_v53 = vadd.f32 %v6980_v62, %v4366_v60  ;;  %7300 = vmatprep.mubr.f32.mxu0 %v16647_v5  ;;  %v1140_v62 = vld [vmem:[%s10873_s17 + $0x1f20] sm:$0xff]  ;;  %v16661_v2 = vld [vmem:[#allocation393_spill] sm:$0xff] }
 0x5e3   : > { %16658 = vst [vmem:[#allocation391_spill] sm:$0xff] %v14230_v45  ;;  %8051 = vrot.lane.b32.xlu1 %v14230_v45, %s10557_s6  ;;  %v4370_v61 = vpop.f32.mrb[176].mxu1 }
 0x5e4   : > { %v8673_v54 = vadd.f32 %v14072_v31, %v8493_v20  ;;  %v6984_v14 = vpop.f32.mrb[176].mxu0  ;;  %v4372_v18 = vpop.f32.mrb[177].mxu1  ;;  %4687 = vmatmul.mubr.f32.gmra.mrb[176].mxu1 %v1133_v56  ;;  %v1144_v31 = vld [vmem:[%s10873_s17 + $0x1f40] sm:$0xff] }
 0x5e5   : > { %v14245_v47 = vadd.f32 %v6984_v14, %v4370_v61  ;;  %v6986_v12 = vpop.f32.mrb[177].mxu0  ;;  %9197 = vmatmul.mubr.msk.f32.gmra.mrb[60].mxu0 %vm1856_vm0, %v1137_v44  ;;  %v7996_v60 = vpop.permute.xlu1 %7995  ;;  %4692 = vmatprep.mubr.f32.mxu1 %v1141_v8  ;;  %v1148_v56 = vld [vmem:[%s10873_s17 + $0x1f60] sm:$0xff] }
 0x5e6   : > { %8854 = vst.msk [vmem:[%s13640_s11 + $0x140] sm:$0xff] %vm8813_vm1, %v8673_v54  ;;  %v8494_v46 = vadd.f32 %v16661_v2, %v7996_v60  ;;  %v14252_v45 = vadd.f32 %v6986_v12, %v4372_v18  ;;  %7306 = vmatprep.mubr.f32.mxu0 %v16647_v5  ;;  %v1147_v12 = vld [vmem:[%s10873_s17 + $0x1f58] sm:$0xff]  ;;  %v16663_v60 = vld [vmem:[#allocation394_spill] sm:$0xff] }
 0x5e7   : > { %16660 = vst [vmem:[#allocation392_spill] sm:$0xff] %v14245_v47  ;;  %8053 = vrot.lane.b32.xlu0 %v14245_v47, %s10557_s6  ;;  %v4376_v20 = vpop.f32.mrb[178].mxu1 }
 0x5e8   : > { %v8674_v44 = vadd.f32 %v14087_v23, %v8494_v46  ;;  %v6990_v8 = vpop.f32.mrb[178].mxu0  ;;  %v4378_v61 = vpop.f32.mrb[179].mxu1  ;;  %4693 = vmatmul.mubr.f32.gmra.mrb[178].mxu1 %v1140_v62  ;;  %v1151_v23 = vld [vmem:[%s10873_s17 + $0x1f78] sm:$0xff] }
 0x5e9   : > { %v14260_v54 = vadd.f32 %v6990_v8, %v4376_v20  ;;  %v6992_v14 = vpop.f32.mrb[179].mxu0  ;;  %9198 = vmatmul.mubr.msk.f32.gmra.mrb[62].mxu0 %vm1856_vm0, %v1144_v31  ;;  %v7998_v18 = vpop.permute.xlu0 %7997  ;;  %4698 = vmatprep.mubr.f32.mxu1 %v1148_v56  ;;  %v1155_v62 = vld [vmem:[%s10873_s17 + $0x1f98] sm:$0xff] }
 0x5ea   : > { %8855 = vst.msk [vmem:[%s13640_s11 + $0x148] sm:$0xff] %vm8813_vm1, %v8674_v44  ;;  %v8495_v2 = vadd.f32 %v16663_v60, %v7998_v18  ;;  %v14267_v47 = vadd.f32 %v6992_v14, %v4378_v61  ;;  %7312 = vmatprep.mubr.f32.mxu0 %v16647_v5  ;;  %v1154_v14 = vld [vmem:[%s10873_s17 + $0x1f90] sm:$0xff]  ;;  %v16665_v18 = vld [vmem:[#allocation395_spill] sm:$0xff] }
 0x5eb   : > { %16662 = vst [vmem:[#allocation393_spill] sm:$0xff] %v14260_v54  ;;  %8055 = vrot.lane.b32.xlu1 %v14260_v54, %s10557_s6  ;;  %v4382_v46 = vpop.f32.mrb[180].mxu1 }
 0x5ec   : > { %v8675_v31 = vadd.f32 %v14102_v29, %v8495_v2  ;;  %v6996_v56 = vpop.f32.mrb[180].mxu0  ;;  %v4384_v20 = vpop.f32.mrb[181].mxu1  ;;  %4699 = vmatmul.mubr.f32.gmra.mrb[180].mxu1 %v1147_v12  ;;  %v1158_v29 = vld [vmem:[%s10873_s17 + $0x1fb0] sm:$0xff] }
 0x5ed   : > { %v14275_v44 = vadd.f32 %v6996_v56, %v4382_v46  ;;  %v6998_v8 = vpop.f32.mrb[181].mxu0  ;;  %9199 = vmatmul.mubr.msk.f32.gmra.mrb[64].mxu0 %vm1856_vm0, %v1151_v23  ;;  %v8000_v61 = vpop.permute.xlu1 %7999  ;;  %4704 = vmatprep.mubr.f32.mxu1 %v1155_v62  ;;  %v1162_v12 = vld [vmem:[%s10873_s17 + $0x1fd0] sm:$0xff] }
 0x5ee   : > { %8856 = vst.msk [vmem:[%s13640_s11 + $0x150] sm:$0xff] %vm8813_vm1, %v8675_v31  ;;  %v8496_v60 = vadd.f32 %v16665_v18, %v8000_v61  ;;  %v14282_v54 = vadd.f32 %v6998_v8, %v4384_v20  ;;  %7318 = vmatprep.mubr.f32.mxu0 %v16647_v5  ;;  %v1161_v8 = vld [vmem:[%s10873_s17 + $0x1fc8] sm:$0xff]  ;;  %v16667_v61 = vld [vmem:[#allocation396_spill] sm:$0xff] }
 0x5ef   : > { %16664 = vst [vmem:[#allocation394_spill] sm:$0xff] %v14275_v44  ;;  %8057 = vrot.lane.b32.xlu0 %v14275_v44, %s10557_s6  ;;  %v4388_v2 = vpop.f32.mrb[182].mxu1 }
 0x5f0   : > { %v8676_v23 = vadd.f32 %v14117_v6, %v8496_v60  ;;  %v7002_v62 = vpop.f32.mrb[182].mxu0  ;;  %v4390_v46 = vpop.f32.mrb[183].mxu1  ;;  %4705 = vmatmul.mubr.f32.gmra.mrb[182].mxu1 %v1154_v14  ;;  %v1165_v6 = vld [vmem:[%s10873_s17 + $0x1fe8] sm:$0xff] }
 0x5f1   : > { %v14290_v31 = vadd.f32 %v7002_v62, %v4388_v2  ;;  %v7004_v56 = vpop.f32.mrb[183].mxu0  ;;  %9200 = vmatmul.mubr.msk.f32.gmra.mrb[66].mxu0 %vm1856_vm0, %v1158_v29  ;;  %v8002_v20 = vpop.permute.xlu0 %8001  ;;  %4710 = vmatprep.mubr.f32.mxu1 %v1162_v12  ;;  %v1169_v14 = vld [vmem:[%s10873_s17 + $0x2008] sm:$0xff] }
 0x5f2   : > { %8857 = vst.msk [vmem:[%s13640_s11 + $0x158] sm:$0xff] %vm8813_vm1, %v8676_v23  ;;  %v8497_v18 = vadd.f32 %v16667_v61, %v8002_v20  ;;  %v14297_v44 = vadd.f32 %v7004_v56, %v4390_v46  ;;  %7324 = vmatprep.mubr.f32.mxu0 %v16647_v5  ;;  %v1168_v56 = vld [vmem:[%s10873_s17 + $0x2000] sm:$0xff]  ;;  %v16669_v20 = vld [vmem:[#allocation397_spill] sm:$0xff] }
 0x5f3   : > { %16666 = vst [vmem:[#allocation395_spill] sm:$0xff] %v14290_v31  ;;  %8059 = vrot.lane.b32.xlu1 %v14290_v31, %s10557_s6  ;;  %v4394_v60 = vpop.f32.mrb[184].mxu1 }
 0x5f4   : > { %v8677_v29 = vadd.f32 %v14132_v48, %v8497_v18  ;;  %v7008_v12 = vpop.f32.mrb[184].mxu0  ;;  %v4396_v2 = vpop.f32.mrb[185].mxu1  ;;  %4711 = vmatmul.mubr.f32.gmra.mrb[184].mxu1 %v1161_v8  ;;  %v1172_v48 = vld [vmem:[%s10873_s17 + $0x2020] sm:$0xff] }
 0x5f5   : > { %v14305_v23 = vadd.f32 %v7008_v12, %v4394_v60  ;;  %v7010_v62 = vpop.f32.mrb[185].mxu0  ;;  %9201 = vmatmul.mubr.msk.f32.gmra.mrb[68].mxu0 %vm1856_vm0, %v1165_v6  ;;  %v8004_v46 = vpop.permute.xlu1 %8003  ;;  %4716 = vmatprep.mubr.f32.mxu1 %v1169_v14  ;;  %v1176_v8 = vld [vmem:[%s10873_s17 + $0x2040] sm:$0xff] }
 0x5f6   : > { %8858 = vst.msk [vmem:[%s13640_s11 + $0x160] sm:$0xff] %vm8813_vm1, %v8677_v29  ;;  %v8498_v61 = vadd.f32 %v16669_v20, %v8004_v46  ;;  %v14312_v31 = vadd.f32 %v7010_v62, %v4396_v2  ;;  %7330 = vmatprep.mubr.f32.mxu0 %v16647_v5  ;;  %v16670_v14 = vld [vmem:[#allocation2_spill] sm:$0xff]  ;;  %v16671_v46 = vld [vmem:[#allocation4_spill] sm:$0xff] }
 0x5f7   : > { %16668 = vst [vmem:[#allocation396_spill] sm:$0xff] %v14305_v23  ;;  %8061 = vrot.lane.b32.xlu0 %v14305_v23, %s10557_s6  ;;  %v4400_v18 = vpop.f32.mrb[34].mxu1  ;;  %v16672_v23 = vld [vmem:[#allocation3_spill] sm:$0xff] }
 0x5f8   : > { %v8678_v6 = vadd.f32 %v14147_v22, %v8498_v61  ;;  %v4401_v60 = vadd.f32 %v4400_v18, %v16670_v14  ;;  %v7014_v29 = vpop.f32.mrb[34].mxu0  ;;  %v4402_v12 = vpop.f32.mrb[35].mxu1  ;;  %4717 = vmatmul.mubr.f32.gmra.mrb[34].mxu1 %v1168_v56  ;;  %v1179_v61 = vld [vmem:[%s10873_s17 + $0x2058] sm:$0xff] }
 0x5f9   : > { %v7016_v2 = vpop.f32.mrb[35].mxu0  ;;  %9202 = vmatmul.mubr.msk.f32.gmra.mrb[70].mxu0 %vm1856_vm0, %v1172_v48  ;;  %v8006_v62 = vpop.permute.xlu0 %8005  ;;  %v4403_v20 = vadd.f32 %v4402_v12, %v16671_v46  ;;  %4722 = vmatprep.mubr.f32.mxu1 %v1176_v8  ;;  %v1183_v18 = vld [vmem:[%s10873_s17 + $0x2078] sm:$0xff]  ;;  %v16676_v12 = vld [vmem:[#allocation6_spill] sm:$0xff] }
 0x5fa   : > { %8859 = vst.msk [vmem:[%s13640_s11 + $0x168] sm:$0xff] %vm8813_vm1, %v8678_v6  ;;  %v5708_v41 = vadd.f32 %v16672_v23, %v4401_v60  ;;  %v8499_v22 = vadd.f32 %v16673_v3, %v8006_v62  ;;  %7336 = vmatprep.mubr.f32.mxu0 %v16647_v5  ;;  %v16674_v56 = vld [vmem:[#allocation5_spill] sm:$0xff]  ;;  %v16677_v62 = vld [vmem:[#allocation8_spill] sm:$0xff] }
 0x5fb   : > { %v5710_v14 = vadd.f32 %v16674_v56, %v4403_v20  ;;  %v4406_v48 = vpop.f32.mrb[186].mxu1  ;;  %v1182_v20 = vld [vmem:[%s10873_s17 + $0x2070] sm:$0xff] }
 0x5fc   : > { %v14332_v21 = vadd.f32 %v7014_v29, %v5708_v41  ;;  %v8679_v8 = vadd.f32 %v14162_v55, %v8499_v22  ;;  %v4407_v46 = vadd.f32 %v4406_v48, %v16676_v12  ;;  %v7020_v6 = vpop.f32.mrb[186].mxu0  ;;  %v4408_v23 = vpop.f32.mrb[187].mxu1  ;;  %4723 = vmatmul.mubr.f32.gmra.mrb[186].mxu1 %v1175_v52  ;;  %v16678_v41 = vld [vmem:[#allocation7_spill] sm:$0xff]  ;;  %v1186_v52 = vld [vmem:[%s10873_s17 + $0x2090] sm:$0xff]  ;;  %v16680_v48 = vld [vmem:[#allocation9_spill] sm:$0xff] }
 0x5fd   : > { %v7022_v3 = vpop.f32.mrb[187].mxu0  ;;  %9203 = vmatmul.mubr.msk.f32.gmra.mrb[72].mxu0 %vm1856_vm0, %v1179_v61  ;;  %v8008_v60 = vpop.permute.xlu1 %8007  ;;  %v4409_v40 = vadd.f32 %v4408_v23, %v16677_v62  ;;  %4728 = vmatprep.mubr.f32.mxu1 %v1183_v18  ;;  %v14339_v56 = vadd.f32 %v7016_v2, %v5710_v14  ;;  %v16679_v29 = vld [vmem:[#allocation399_spill] sm:$0xff]  ;;  %v1190_v61 = vld [vmem:[%s10873_s17 + $0x20b0] sm:$0xff] }
 0x5fe   : > { %16675 = vst [vmem:[#allocation397_spill] sm:$0xff] %v14332_v21  ;;  %8860 = vst.msk [vmem:[%s13640_s11 + $0x170] sm:$0xff] %vm8813_vm1, %v8679_v8  ;;  %v5714_v55 = vadd.f32 %v16678_v41, %v4407_v46  ;;  %v8500_v22 = vadd.f32 %v16679_v29, %v8008_v60  ;;  %8063 = vrot.lane.b32.xlu1 %v14332_v21, %s10557_s6  ;;  %7342 = vmatprep.mubr.f32.mxu0 %v16647_v5  ;;  %v16681_v8 = vld [vmem:[#allocation10_spill] sm:$0xff]  ;;  %v16682_v29 = vld [vmem:[#allocation12_spill] sm:$0xff] }
 0x5ff   : > { %v5716_v18 = vadd.f32 %v16680_v48, %v4409_v40  ;;  %v4412_v12 = vpop.f32.mrb[188].mxu1  ;;  %v1189_v40 = vld [vmem:[%s10873_s17 + $0x20a8] sm:$0xff] }
 0x600   : > { %v14351_v2 = vadd.f32 %v7020_v6, %v5714_v55  ;;  %v8680_v14 = vadd.f32 %v14177_v36, %v8500_v22  ;;  %v4413_v46 = vadd.f32 %v4412_v12, %v16681_v8  ;;  %v7026_v23 = vpop.f32.mrb[188].mxu0  ;;  %v4414_v60 = vpop.f32.mrb[189].mxu1  ;;  %4729 = vmatmul.mubr.f32.gmra.mrb[188].mxu1 %v1182_v20  ;;  %v16683_v36 = vld [vmem:[#allocation11_spill] sm:$0xff] }
 0x601   : > { %v7028_v62 = vpop.f32.mrb[189].mxu0  ;;  %9204 = vmatmul.mubr.msk.f32.gmra.mrb[74].mxu0 %vm1856_vm0, %v1186_v52  ;;  %v8010_v41 = vpop.permute.xlu0 %8009  ;;  %v4415_v21 = vadd.f32 %v4414_v60, %v16682_v29  ;;  %4734 = vmatprep.mubr.f32.mxu1 %v1190_v61  ;;  %v14358_v48 = vadd.f32 %v7022_v3, %v5716_v18  ;;  %v1193_v20 = vld [vmem:[%s10873_s17 + $0x20c8] sm:$0xff]  ;;  %v16684_v52 = vld [vmem:[#allocation13_spill] sm:$0xff]  ;;  %v16686_v29 = vld [vmem:[#allocation16_spill] sm:$0xff] }
 0x602   : > { %8861 = vst.msk [vmem:[%s13640_s11 + $0x178] sm:$0xff] %vm8813_vm1, %v8680_v14  ;;  %v5720_v6 = vadd.f32 %v16683_v36, %v4413_v46  ;;  %v8501_v55 = vadd.f32 %v13645_v32, %v8010_v41  ;;  %8065 = vrot.lane.b32.xlu0 %v14351_v2, %s10557_s6  ;;  %7348 = vmatprep.mubr.f32.mxu0 %v16647_v5  ;;  %v1197_v22 = vld [vmem:[%s10873_s17 + $0x20e8] sm:$0xff]  ;;  %v16685_v14 = vld [vmem:[#allocation14_spill] sm:$0xff] }
 0x603   : > { %v5722_v61 = vadd.f32 %v16684_v52, %v4415_v21  ;;  %v4418_v12 = vpop.f32.mrb[190].mxu1  ;;  %v1196_v21 = vld [vmem:[%s10873_s17 + $0x20e0] sm:$0xff] }
 0x604   : > { %v14370_v3 = vadd.f32 %v7026_v23, %v5720_v6  ;;  %v8681_v18 = vadd.f32 %v14192_v0, %v8501_v55  ;;  %v4419_v8 = vadd.f32 %v4418_v12, %v16685_v14  ;;  %v7032_v32 = vpop.f32.mrb[190].mxu0  ;;  %v4420_v46 = vpop.f32.mrb[191].mxu1  ;;  %4735 = vmatmul.mubr.f32.gmra.mrb[190].mxu1 %v1189_v40  ;;  %v16687_v0 = vld [vmem:[#allocation15_spill] sm:$0xff]  ;;  %v1200_v40 = vld [vmem:[%s10873_s17 + $0x2100] sm:$0xff] }
 0x605   : > { %v7034_v60 = vpop.f32.mrb[191].mxu0  ;;  %9205 = vmatmul.mubr.msk.f32.gmra.mrb[76].mxu0 %vm1856_vm0, %v1193_v20  ;;  %v8012_v41 = vpop.permute.xlu1 %8011  ;;  %v4421_v36 = vadd.f32 %v4420_v46, %v16686_v29  ;;  %4740 = vmatprep.mubr.f32.mxu1 %v1197_v22  ;;  %v14377_v52 = vadd.f32 %v7028_v62, %v5722_v61  ;;  %v1204_v55 = vld [vmem:[%s10873_s17 + $0x2120] sm:$0xff]  ;;  %v16688_v20 = vld [vmem:[#allocation17_spill] sm:$0xff]  ;;  %v16690_v29 = vld [vmem:[#allocation20_spill] sm:$0xff] }
 0x606   : > { %8862 = vst.msk [vmem:[%s13640_s11 + $0x180] sm:$0xff] %vm8813_vm1, %v8681_v18  ;;  %v5726_v23 = vadd.f32 %v16687_v0, %v4419_v8  ;;  %v8502_v6 = vadd.f32 %v13660_v24, %v8012_v41  ;;  %8067 = vrot.lane.b32.xlu1 %v14370_v3, %s10557_s6  ;;  %7354 = vmatprep.mubr.f32.mxu0 %v16647_v5  ;;  %v16689_v18 = vld [vmem:[#allocation18_spill] sm:$0xff] }
 0x607   : > { %v5728_v22 = vadd.f32 %v16688_v20, %v4421_v36  ;;  %v4424_v12 = vpop.f32.mrb[192].mxu1  ;;  %v1203_v36 = vld [vmem:[%s10873_s17 + $0x2118] sm:$0xff] }
 0x608   : > { %v14389_v62 = vadd.f32 %v7032_v32, %v5726_v23  ;;  %v8682_v61 = vadd.f32 %v14207_v34, %v8502_v6  ;;  %v4425_v14 = vadd.f32 %v4424_v12, %v16689_v18  ;;  %v7038_v24 = vpop.f32.mrb[192].mxu0  ;;  %v4426_v8 = vpop.f32.mrb[193].mxu1  ;;  %4741 = vmatmul.mubr.f32.gmra.mrb[192].mxu1 %v1196_v21  ;;  %v16691_v34 = vld [vmem:[#allocation19_spill] sm:$0xff]  ;;  %v1207_v21 = vld [vmem:[%s10873_s17 + $0x2138] sm:$0xff] }
 0x609   : > { %v7040_v46 = vpop.f32.mrb[193].mxu0  ;;  %9206 = vmatmul.mubr.msk.f32.gmra.mrb[78].mxu0 %vm1856_vm0, %v1200_v40  ;;  %v8014_v41 = vpop.permute.xlu0 %8013  ;;  %v4427_v0 = vadd.f32 %v4426_v8, %v16690_v29  ;;  %4746 = vmatprep.mubr.f32.mxu1 %v1204_v55  ;;  %v14396_v20 = vadd.f32 %v7034_v60, %v5728_v22  ;;  %v1211_v6 = vld [vmem:[%s10873_s17 + $0x2158] sm:$0xff]  ;;  %v16694_v29 = vld [vmem:[#allocation24_spill] sm:$0xff] }
 0x60a   : > { %8863 = vst.msk [vmem:[%s13640_s11 + $0x188] sm:$0xff] %vm8813_vm1, %v8682_v61  ;;  %v5732_v32 = vadd.f32 %v16691_v34, %v4425_v14  ;;  %v8503_v23 = vadd.f32 %v13675_v4, %v8014_v41  ;;  %8069 = vrot.lane.b32.xlu0 %v14389_v62, %s10557_s6  ;;  %7360 = vmatprep.mubr.f32.mxu0 %v16647_v5  ;;  %v16692_v40 = vld [vmem:[#allocation21_spill] sm:$0xff]  ;;  %v16693_v61 = vld [vmem:[#allocation22_spill] sm:$0xff] }
 0x60b   : > { %v5734_v55 = vadd.f32 %v16692_v40, %v4427_v0  ;;  %v4430_v12 = vpop.f32.mrb[194].mxu1  ;;  %v1210_v0 = vld [vmem:[%s10873_s17 + $0x2150] sm:$0xff] }
 0x60c   : > { %v14408_v60 = vadd.f32 %v7038_v24, %v5732_v32  ;;  %v8683_v22 = vadd.f32 %v14222_v50, %v8503_v23  ;;  %v4431_v18 = vadd.f32 %v4430_v12, %v16693_v61  ;;  %v7044_v4 = vpop.f32.mrb[194].mxu0  ;;  %v4432_v14 = vpop.f32.mrb[195].mxu1  ;;  %4747 = vmatmul.mubr.f32.gmra.mrb[194].mxu1 %v1203_v36  ;;  %v16695_v50 = vld [vmem:[#allocation23_spill] sm:$0xff]  ;;  %v1214_v36 = vld [vmem:[%s10873_s17 + $0x2170] sm:$0xff] }
 0x60d   : > { %v7046_v8 = vpop.f32.mrb[195].mxu0  ;;  %9207 = vmatmul.mubr.msk.f32.gmra.mrb[80].mxu0 %vm1856_vm0, %v1207_v21  ;;  %v8016_v41 = vpop.permute.xlu1 %8015  ;;  %v4433_v34 = vadd.f32 %v4432_v14, %v16694_v29  ;;  %4752 = vmatprep.mubr.f32.mxu1 %v1211_v6  ;;  %v14415_v40 = vadd.f32 %v7040_v46, %v5734_v55  ;;  %v1218_v23 = vld [vmem:[%s10873_s17 + $0x2190] sm:$0xff]  ;;  %v16696_v21 = vld [vmem:[#allocation25_spill] sm:$0xff] }
 0x60e   : > { %8864 = vst.msk [vmem:[%s13640_s11 + $0x190] sm:$0xff] %vm8813_vm1, %v8683_v22  ;;  %v5738_v24 = vadd.f32 %v16695_v50, %v4431_v18  ;;  %v8504_v32 = vadd.f32 %v13690_v28, %v8016_v41  ;;  %8071 = vrot.lane.b32.xlu1 %v14408_v60, %s10557_s6  ;;  %7366 = vmatprep.mubr.f32.mxu0 %v16647_v5  ;;  %v16697_v22 = vld [vmem:[#allocation26_spill] sm:$0xff]  ;;  %v16698_v29 = vld [vmem:[#allocation28_spill] sm:$0xff] }
 0x60f   : > { %v5740_v6 = vadd.f32 %v16696_v21, %v4433_v34  ;;  %v4436_v12 = vpop.f32.mrb[196].mxu1  ;;  %v1217_v34 = vld [vmem:[%s10873_s17 + $0x2188] sm:$0xff] }
 0x610   : > { %v14427_v46 = vadd.f32 %v7044_v4, %v5738_v24  ;;  %v8684_v55 = vadd.f32 %v14237_v53, %v8504_v32  ;;  %v4437_v61 = vadd.f32 %v4436_v12, %v16697_v22  ;;  %v7050_v28 = vpop.f32.mrb[196].mxu0  ;;  %v4438_v18 = vpop.f32.mrb[197].mxu1  ;;  %4753 = vmatmul.mubr.f32.gmra.mrb[196].mxu1 %v1210_v0  ;;  %v16699_v53 = vld [vmem:[#allocation27_spill] sm:$0xff] }
 0x611   : > { %v7052_v14 = vpop.f32.mrb[197].mxu0  ;;  %9208 = vmatmul.mubr.msk.f32.gmra.mrb[82].mxu0 %vm1856_vm0, %v1214_v36  ;;  %v8018_v41 = vpop.permute.xlu0 %8017  ;;  %v4439_v50 = vadd.f32 %v4438_v18, %v16698_v29  ;;  %4758 = vmatprep.mubr.f32.mxu1 %v1218_v23  ;;  %v14434_v21 = vadd.f32 %v7046_v8, %v5740_v6  ;;  %v1221_v0 = vld [vmem:[%s10873_s17 + $0x21a8] sm:$0xff]  ;;  %v16700_v36 = vld [vmem:[#allocation29_spill] sm:$0xff]  ;;  %v16702_v29 = vld [vmem:[#allocation32_spill] sm:$0xff] }
 0x612   : > { %8865 = vst.msk [vmem:[%s13640_s11 + $0x198] sm:$0xff] %vm8813_vm1, %v8684_v55  ;;  %v5744_v4 = vadd.f32 %v16699_v53, %v4437_v61  ;;  %v8505_v24 = vadd.f32 %v13705_v25, %v8018_v41  ;;  %8073 = vrot.lane.b32.xlu0 %v14427_v46, %s10557_s6  ;;  %7372 = vmatprep.mubr.f32.mxu0 %v16647_v5  ;;  %v1225_v32 = vld [vmem:[%s10873_s17 + $0x21c8] sm:$0xff]  ;;  %v16701_v55 = vld [vmem:[#allocation30_spill] sm:$0xff] }
 0x613   : > { %v5746_v23 = vadd.f32 %v16700_v36, %v4439_v50  ;;  %v4442_v12 = vpop.f32.mrb[198].mxu1  ;;  %v1224_v50 = vld [vmem:[%s10873_s17 + $0x21c0] sm:$0xff] }
 0x614   : > { %v14446_v8 = vadd.f32 %v7050_v28, %v5744_v4  ;;  %v8685_v6 = vadd.f32 %v14252_v45, %v8505_v24  ;;  %v4443_v22 = vadd.f32 %v4442_v12, %v16701_v55  ;;  %v7056_v25 = vpop.f32.mrb[198].mxu0  ;;  %v4444_v61 = vpop.f32.mrb[199].mxu1  ;;  %4759 = vmatmul.mubr.f32.gmra.mrb[198].mxu1 %v1217_v34  ;;  %v16703_v45 = vld [vmem:[#allocation31_spill] sm:$0xff]  ;;  %v1228_v34 = vld [vmem:[%s10873_s17 + $0x21e0] sm:$0xff] }
 0x615   : > { %v7058_v18 = vpop.f32.mrb[199].mxu0  ;;  %9209 = vmatmul.mubr.msk.f32.gmra.mrb[84].mxu0 %vm1856_vm0, %v1221_v0  ;;  %v8020_v41 = vpop.permute.xlu1 %8019  ;;  %v4445_v53 = vadd.f32 %v4444_v61, %v16702_v29  ;;  %4764 = vmatprep.mubr.f32.mxu1 %v1225_v32  ;;  %v14453_v36 = vadd.f32 %v7052_v14, %v5746_v23  ;;  %v1232_v24 = vld [vmem:[%s10873_s17 + $0x2200] sm:$0xff]  ;;  %v16704_v0 = vld [vmem:[#allocation33_spill] sm:$0xff]  ;;  %v16706_v29 = vld [vmem:[#allocation36_spill] sm:$0xff] }
 0x616   : > { %8866 = vst.msk [vmem:[%s13640_s11 + $0x1a0] sm:$0xff] %vm8813_vm1, %v8685_v6  ;;  %v5750_v28 = vadd.f32 %v16703_v45, %v4443_v22  ;;  %v8506_v4 = vadd.f32 %v13720_v17, %v8020_v41  ;;  %8075 = vrot.lane.b32.xlu1 %v14446_v8, %s10557_s6  ;;  %7378 = vmatprep.mubr.f32.mxu0 %v16647_v5  ;;  %v16705_v6 = vld [vmem:[#allocation34_spill] sm:$0xff] }
 0x617   : > { %v5752_v32 = vadd.f32 %v16704_v0, %v4445_v53  ;;  %v4448_v12 = vpop.f32.mrb[200].mxu1  ;;  %v1231_v53 = vld [vmem:[%s10873_s17 + $0x21f8] sm:$0xff] }
 0x618   : > { %v14465_v14 = vadd.f32 %v7056_v25, %v5750_v28  ;;  %v8686_v23 = vadd.f32 %v14267_v47, %v8506_v4  ;;  %v4449_v55 = vadd.f32 %v4448_v12, %v16705_v6  ;;  %v7062_v17 = vpop.f32.mrb[200].mxu0  ;;  %v4450_v22 = vpop.f32.mrb[201].mxu1  ;;  %4765 = vmatmul.mubr.f32.gmra.mrb[200].mxu1 %v1224_v50  ;;  %v16707_v47 = vld [vmem:[#allocation35_spill] sm:$0xff]  ;;  %v1235_v50 = vld [vmem:[%s10873_s17 + $0x2218] sm:$0xff] }
 0x619   : > { %v7064_v61 = vpop.f32.mrb[201].mxu0  ;;  %9210 = vmatmul.mubr.msk.f32.gmra.mrb[86].mxu0 %vm1856_vm0, %v1228_v34  ;;  %v8022_v41 = vpop.permute.xlu0 %8021  ;;  %v4451_v45 = vadd.f32 %v4450_v22, %v16706_v29  ;;  %4770 = vmatprep.mubr.f32.mxu1 %v1232_v24  ;;  %v14472_v0 = vadd.f32 %v7058_v18, %v5752_v32  ;;  %v1239_v4 = vld [vmem:[%s10873_s17 + $0x2238] sm:$0xff]  ;;  %v16710_v29 = vld [vmem:[#allocation40_spill] sm:$0xff] }
 0x61a   : > { %8867 = vst.msk [vmem:[%s13640_s11 + $0x1a8] sm:$0xff] %vm8813_vm1, %v8686_v23  ;;  %v5756_v25 = vadd.f32 %v16707_v47, %v4449_v55  ;;  %v8507_v28 = vadd.f32 %v13735_v9, %v8022_v41  ;;  %8077 = vrot.lane.b32.xlu0 %v14465_v14, %s10557_s6  ;;  %7384 = vmatprep.mubr.f32.mxu0 %v16647_v5  ;;  %v16708_v34 = vld [vmem:[#allocation37_spill] sm:$0xff]  ;;  %v16709_v23 = vld [vmem:[#allocation38_spill] sm:$0xff] }
 0x61b   : > { %v5758_v24 = vadd.f32 %v16708_v34, %v4451_v45  ;;  %v4454_v12 = vpop.f32.mrb[202].mxu1  ;;  %v1238_v45 = vld [vmem:[%s10873_s17 + $0x2230] sm:$0xff] }
 0x61c   : > { %v14484_v18 = vadd.f32 %v7062_v17, %v5756_v25  ;;  %v8687_v32 = vadd.f32 %v14282_v54, %v8507_v28  ;;  %v4455_v6 = vadd.f32 %v4454_v12, %v16709_v23  ;;  %v7068_v9 = vpop.f32.mrb[202].mxu0  ;;  %v4456_v55 = vpop.f32.mrb[203].mxu1  ;;  %4771 = vmatmul.mubr.f32.gmra.mrb[202].mxu1 %v1231_v53  ;;  %v16711_v54 = vld [vmem:[#allocation39_spill] sm:$0xff]  ;;  %v1242_v53 = vld [vmem:[%s10873_s17 + $0x2250] sm:$0xff] }
 0x61d   : > { %v7070_v22 = vpop.f32.mrb[203].mxu0  ;;  %9211 = vmatmul.mubr.msk.f32.gmra.mrb[88].mxu0 %vm1856_vm0, %v1235_v50  ;;  %v8024_v41 = vpop.permute.xlu1 %8023  ;;  %v4457_v47 = vadd.f32 %v4456_v55, %v16710_v29  ;;  %4776 = vmatprep.mubr.f32.mxu1 %v1239_v4  ;;  %v14491_v34 = vadd.f32 %v7064_v61, %v5758_v24  ;;  %v1246_v28 = vld [vmem:[%s10873_s17 + $0x2270] sm:$0xff]  ;;  %v16712_v50 = vld [vmem:[#allocation41_spill] sm:$0xff] }
 0x61e   : > { %8868 = vst.msk [vmem:[%s13640_s11 + $0x1b0] sm:$0xff] %vm8813_vm1, %v8687_v32  ;;  %v5762_v17 = vadd.f32 %v16711_v54, %v4455_v6  ;;  %v8508_v25 = vadd.f32 %v13750_v30, %v8024_v41  ;;  %8079 = vrot.lane.b32.xlu1 %v14484_v18, %s10557_s6  ;;  %7390 = vmatprep.mubr.f32.mxu0 %v16647_v5  ;;  %v16713_v32 = vld [vmem:[#allocation42_spill] sm:$0xff]  ;;  %v16714_v29 = vld [vmem:[#allocation44_spill] sm:$0xff] }
 0x61f   : > { %v5764_v4 = vadd.f32 %v16712_v50, %v4457_v47  ;;  %v4460_v12 = vpop.f32.mrb[204].mxu1  ;;  %v1245_v47 = vld [vmem:[%s10873_s17 + $0x2268] sm:$0xff] }
 0x620   : > { %v14503_v61 = vadd.f32 %v7068_v9, %v5762_v17  ;;  %v8688_v24 = vadd.f32 %v14297_v44, %v8508_v25  ;;  %v4461_v23 = vadd.f32 %v4460_v12, %v16713_v32  ;;  %v7074_v30 = vpop.f32.mrb[204].mxu0  ;;  %v4462_v6 = vpop.f32.mrb[205].mxu1  ;;  %4777 = vmatmul.mubr.f32.gmra.mrb[204].mxu1 %v1238_v45  ;;  %v16715_v44 = vld [vmem:[#allocation43_spill] sm:$0xff] }
 0x621   : > { %v7076_v55 = vpop.f32.mrb[205].mxu0  ;;  %9212 = vmatmul.mubr.msk.f32.gmra.mrb[90].mxu0 %vm1856_vm0, %v1242_v53  ;;  %v8026_v41 = vpop.permute.xlu0 %8025  ;;  %v4463_v54 = vadd.f32 %v4462_v6, %v16714_v29  ;;  %4782 = vmatprep.mubr.f32.mxu1 %v1246_v28  ;;  %v14510_v50 = vadd.f32 %v7070_v22, %v5764_v4  ;;  %v1249_v45 = vld [vmem:[%s10873_s17 + $0x2288] sm:$0xff]  ;;  %v16716_v53 = vld [vmem:[#allocation45_spill] sm:$0xff]  ;;  %v16718_v29 = vld [vmem:[#allocation48_spill] sm:$0xff] }
 0x622   : > { %8869 = vst.msk [vmem:[%s13640_s11 + $0x1b8] sm:$0xff] %vm8813_vm1, %v8688_v24  ;;  %v5768_v9 = vadd.f32 %v16715_v44, %v4461_v23  ;;  %v8509_v17 = vadd.f32 %v13765_v19, %v8026_v41  ;;  %8081 = vrot.lane.b32.xlu0 %v14503_v61, %s10557_s6  ;;  %7396 = vmatprep.mubr.f32.mxu0 %v16647_v5  ;;  %v1253_v25 = vld [vmem:[%s10873_s17 + $0x22a8] sm:$0xff]  ;;  %v16717_v24 = vld [vmem:[#allocation46_spill] sm:$0xff] }
 0x623   : > { %v5770_v28 = vadd.f32 %v16716_v53, %v4463_v54  ;;  %v4466_v12 = vpop.f32.mrb[206].mxu1  ;;  %v1252_v54 = vld [vmem:[%s10873_s17 + $0x22a0] sm:$0xff] }
 0x624   : > { %v14522_v22 = vadd.f32 %v7074_v30, %v5768_v9  ;;  %v8689_v4 = vadd.f32 %v14312_v31, %v8509_v17  ;;  %v4467_v32 = vadd.f32 %v4466_v12, %v16717_v24  ;;  %v7080_v19 = vpop.f32.mrb[206].mxu0  ;;  %v4468_v23 = vpop.f32.mrb[207].mxu1  ;;  %4783 = vmatmul.mubr.f32.gmra.mrb[206].mxu1 %v1245_v47  ;;  %v16719_v31 = vld [vmem:[#allocation47_spill] sm:$0xff]  ;;  %v1256_v47 = vld [vmem:[%s10873_s17 + $0x22c0] sm:$0xff] }
 0x625   : > { %v7082_v6 = vpop.f32.mrb[207].mxu0  ;;  %9213 = vmatmul.mubr.msk.f32.gmra.mrb[92].mxu0 %vm1856_vm0, %v1249_v45  ;;  %v8028_v41 = vpop.permute.xlu1 %8027  ;;  %v4469_v44 = vadd.f32 %v4468_v23, %v16718_v29  ;;  %4788 = vmatprep.mubr.f32.mxu1 %v1253_v25  ;;  %v14529_v53 = vadd.f32 %v7076_v55, %v5770_v28  ;;  %v1260_v17 = vld [vmem:[%s10873_s17 + $0x22e0] sm:$0xff]  ;;  %v16720_v45 = vld [vmem:[#allocation49_spill] sm:$0xff]  ;;  %v16722_v29 = vld [vmem:[#allocation52_spill] sm:$0xff] }
 0x626   : > { %8870 = vst.msk [vmem:[%s13640_s11 + $0x1c0] sm:$0xff] %vm8813_vm1, %v8689_v4  ;;  %v5774_v30 = vadd.f32 %v16719_v31, %v4467_v32  ;;  %v8510_v9 = vadd.f32 %v13780_v59, %v8028_v41  ;;  %8083 = vrot.lane.b32.xlu1 %v14522_v22, %s10557_s6  ;;  %7402 = vmatprep.mubr.f32.mxu0 %v16647_v5  ;;  %v16721_v4 = vld [vmem:[#allocation50_spill] sm:$0xff] }
 0x627   : > { %v5776_v25 = vadd.f32 %v16720_v45, %v4469_v44  ;;  %v4472_v12 = vpop.f32.mrb[208].mxu1  ;;  %v1259_v44 = vld [vmem:[%s10873_s17 + $0x22d8] sm:$0xff] }
 0x628   : > { %v14541_v55 = vadd.f32 %v7080_v19, %v5774_v30  ;;  %v8690_v28 = vadd.f32 %v8510_v9, %v14339_v56  ;;  %v4473_v24 = vadd.f32 %v4472_v12, %v16721_v4  ;;  %v7086_v59 = vpop.f32.mrb[208].mxu0  ;;  %v4474_v32 = vpop.f32.mrb[209].mxu1  ;;  %4789 = vmatmul.mubr.f32.gmra.mrb[208].mxu1 %v1252_v54  ;;  %v16723_v56 = vld [vmem:[#allocation51_spill] sm:$0xff]  ;;  %v1263_v54 = vld [vmem:[%s10873_s17 + $0x22f8] sm:$0xff] }
 0x629   : > { %v7088_v23 = vpop.f32.mrb[209].mxu0  ;;  %9214 = vmatmul.mubr.msk.f32.gmra.mrb[94].mxu0 %vm1856_vm0, %v1256_v47  ;;  %v8030_v41 = vpop.permute.xlu0 %8029  ;;  %v4475_v31 = vadd.f32 %v4474_v32, %v16722_v29  ;;  %4794 = vmatprep.mubr.f32.mxu1 %v1260_v17  ;;  %v14548_v45 = vadd.f32 %v7082_v6, %v5776_v25  ;;  %v1267_v9 = vld [vmem:[%s10873_s17 + $0x2318] sm:$0xff]  ;;  %v16726_v29 = vld [vmem:[#allocation56_spill] sm:$0xff] }
 0x62a   : > { %8871 = vst.msk [vmem:[%s13640_s11 + $0x1c8] sm:$0xff] %vm8813_vm1, %v8690_v28  ;;  %v5780_v19 = vadd.f32 %v16723_v56, %v4473_v24  ;;  %v8511_v30 = vadd.f32 %v13795_v49, %v8030_v41  ;;  %8085 = vrot.lane.b32.xlu0 %v14541_v55, %s10557_s6  ;;  %7408 = vmatprep.mubr.f32.mxu0 %v16647_v5  ;;  %v16724_v47 = vld [vmem:[#allocation53_spill] sm:$0xff]  ;;  %v16725_v28 = vld [vmem:[#allocation54_spill] sm:$0xff] }
 0x62b   : > { %v5782_v17 = vadd.f32 %v16724_v47, %v4475_v31  ;;  %v4478_v12 = vpop.f32.mrb[210].mxu1  ;;  %v1266_v31 = vld [vmem:[%s10873_s17 + $0x2310] sm:$0xff] }
 0x62c   : > { %v14560_v6 = vadd.f32 %v7086_v59, %v5780_v19  ;;  %v8691_v25 = vadd.f32 %v8511_v30, %v14358_v48  ;;  %v4479_v4 = vadd.f32 %v4478_v12, %v16725_v28  ;;  %v7092_v49 = vpop.f32.mrb[210].mxu0  ;;  %v4480_v24 = vpop.f32.mrb[211].mxu1  ;;  %4795 = vmatmul.mubr.f32.gmra.mrb[210].mxu1 %v1259_v44  ;;  %v16727_v48 = vld [vmem:[#allocation55_spill] sm:$0xff]  ;;  %v1270_v44 = vld [vmem:[%s10873_s17 + $0x2330] sm:$0xff] }
 0x62d   : > { %v7094_v32 = vpop.f32.mrb[211].mxu0  ;;  %9215 = vmatmul.mubr.msk.f32.gmra.mrb[96].mxu0 %vm1856_vm0, %v1263_v54  ;;  %v8032_v41 = vpop.permute.xlu1 %8031  ;;  %v4481_v56 = vadd.f32 %v4480_v24, %v16726_v29  ;;  %4800 = vmatprep.mubr.f32.mxu1 %v1267_v9  ;;  %v14567_v47 = vadd.f32 %v7088_v23, %v5782_v17  ;;  %v1274_v30 = vld [vmem:[%s10873_s17 + $0x2350] sm:$0xff]  ;;  %v16728_v54 = vld [vmem:[#allocation57_spill] sm:$0xff] }
 0x62e   : > { %8872 = vst.msk [vmem:[%s13640_s11 + $0x1d0] sm:$0xff] %vm8813_vm1, %v8691_v25  ;;  %v5786_v59 = vadd.f32 %v16727_v48, %v4479_v4  ;;  %v8512_v19 = vadd.f32 %v13810_v39, %v8032_v41  ;;  %8087 = vrot.lane.b32.xlu1 %v14560_v6, %s10557_s6  ;;  %7414 = vmatprep.mubr.f32.mxu0 %v16647_v5  ;;  %v16729_v25 = vld [vmem:[#allocation58_spill] sm:$0xff]  ;;  %v16730_v29 = vld [vmem:[#allocation60_spill] sm:$0xff] }
 0x62f   : > { %v5788_v9 = vadd.f32 %v16728_v54, %v4481_v56  ;;  %v4484_v12 = vpop.f32.mrb[212].mxu1  ;;  %v1273_v56 = vld [vmem:[%s10873_s17 + $0x2348] sm:$0xff] }
 0x630   : > { %v14579_v23 = vadd.f32 %v7092_v49, %v5786_v59  ;;  %v8692_v17 = vadd.f32 %v8512_v19, %v14377_v52  ;;  %v4485_v28 = vadd.f32 %v4484_v12, %v16729_v25  ;;  %v7098_v39 = vpop.f32.mrb[212].mxu0  ;;  %v4486_v4 = vpop.f32.mrb[213].mxu1  ;;  %4801 = vmatmul.mubr.f32.gmra.mrb[212].mxu1 %v1266_v31  ;;  %v16731_v52 = vld [vmem:[#allocation59_spill] sm:$0xff] }
 0x631   : > { %v7100_v24 = vpop.f32.mrb[213].mxu0  ;;  %9216 = vmatmul.mubr.msk.f32.gmra.mrb[98].mxu0 %vm1856_vm0, %v1270_v44  ;;  %v8034_v41 = vpop.permute.xlu0 %8033  ;;  %v4487_v48 = vadd.f32 %v4486_v4, %v16730_v29  ;;  %4806 = vmatprep.mubr.f32.mxu1 %v1274_v30  ;;  %v14586_v54 = vadd.f32 %v7094_v32, %v5788_v9  ;;  %v1277_v31 = vld [vmem:[%s10873_s17 + $0x2368] sm:$0xff]  ;;  %v16732_v44 = vld [vmem:[#allocation61_spill] sm:$0xff]  ;;  %v16734_v29 = vld [vmem:[#allocation64_spill] sm:$0xff] }
 0x632   : > { %8873 = vst.msk [vmem:[%s13640_s11 + $0x1d8] sm:$0xff] %vm8813_vm1, %v8692_v17  ;;  %v5792_v49 = vadd.f32 %v16731_v52, %v4485_v28  ;;  %v8513_v59 = vadd.f32 %v13825_v11, %v8034_v41  ;;  %8089 = vrot.lane.b32.xlu0 %v14579_v23, %s10557_s6  ;;  %7420 = vmatprep.mubr.f32.mxu0 %v16647_v5  ;;  %v1281_v19 = vld [vmem:[%s10873_s17 + $0x2388] sm:$0xff]  ;;  %v16733_v17 = vld [vmem:[#allocation62_spill] sm:$0xff] }
 0x633   : > { %v5794_v30 = vadd.f32 %v16732_v44, %v4487_v48  ;;  %v4490_v12 = vpop.f32.mrb[214].mxu1  ;;  %v1280_v48 = vld [vmem:[%s10873_s17 + $0x2380] sm:$0xff] }
 0x634   : > { %v14598_v32 = vadd.f32 %v7098_v39, %v5792_v49  ;;  %v8693_v9 = vadd.f32 %v8513_v59, %v14396_v20  ;;  %v4491_v25 = vadd.f32 %v4490_v12, %v16733_v17  ;;  %v7104_v11 = vpop.f32.mrb[214].mxu0  ;;  %v4492_v28 = vpop.f32.mrb[215].mxu1  ;;  %4807 = vmatmul.mubr.f32.gmra.mrb[214].mxu1 %v1273_v56  ;;  %v16735_v20 = vld [vmem:[#allocation63_spill] sm:$0xff]  ;;  %v1284_v56 = vld [vmem:[%s10873_s17 + $0x23a0] sm:$0xff] }
 0x635   : > { %v7106_v4 = vpop.f32.mrb[215].mxu0  ;;  %9217 = vmatmul.mubr.msk.f32.gmra.mrb[100].mxu0 %vm1856_vm0, %v1277_v31  ;;  %v8036_v41 = vpop.permute.xlu1 %8035  ;;  %v4493_v52 = vadd.f32 %v4492_v28, %v16734_v29  ;;  %4812 = vmatprep.mubr.f32.mxu1 %v1281_v19  ;;  %v14605_v44 = vadd.f32 %v7100_v24, %v5794_v30  ;;  %v1288_v59 = vld [vmem:[%s10873_s17 + $0x23c0] sm:$0xff]  ;;  %v16736_v31 = vld [vmem:[#allocation65_spill] sm:$0xff]  ;;  %v16738_v29 = vld [vmem:[#allocation68_spill] sm:$0xff] }
 0x636   : > { %8874 = vst.msk [vmem:[%s13640_s11 + $0x1e0] sm:$0xff] %vm8813_vm1, %v8693_v9  ;;  %v5798_v39 = vadd.f32 %v16735_v20, %v4491_v25  ;;  %v8514_v49 = vadd.f32 %v13840_v38, %v8036_v41  ;;  %8091 = vrot.lane.b32.xlu1 %v14598_v32, %s10557_s6  ;;  %7426 = vmatprep.mubr.f32.mxu0 %v16647_v5  ;;  %v16737_v9 = vld [vmem:[#allocation66_spill] sm:$0xff] }
 0x637   : > { %v5800_v19 = vadd.f32 %v16736_v31, %v4493_v52  ;;  %v4496_v12 = vpop.f32.mrb[216].mxu1  ;;  %v1287_v52 = vld [vmem:[%s10873_s17 + $0x23b8] sm:$0xff] }
 0x638   : > { %v14617_v24 = vadd.f32 %v7104_v11, %v5798_v39  ;;  %v8694_v30 = vadd.f32 %v8514_v49, %v14415_v40  ;;  %v4497_v17 = vadd.f32 %v4496_v12, %v16737_v9  ;;  %v7110_v38 = vpop.f32.mrb[216].mxu0  ;;  %v4498_v25 = vpop.f32.mrb[217].mxu1  ;;  %4813 = vmatmul.mubr.f32.gmra.mrb[216].mxu1 %v1280_v48  ;;  %v16739_v40 = vld [vmem:[#allocation67_spill] sm:$0xff]  ;;  %v1291_v48 = vld [vmem:[%s10873_s17 + $0x23d8] sm:$0xff] }
 0x639   : > { %v7112_v28 = vpop.f32.mrb[217].mxu0  ;;  %9218 = vmatmul.mubr.msk.f32.gmra.mrb[102].mxu0 %vm1856_vm0, %v1284_v56  ;;  %v8038_v41 = vpop.permute.xlu0 %8037  ;;  %v4499_v20 = vadd.f32 %v4498_v25, %v16738_v29  ;;  %4818 = vmatprep.mubr.f32.mxu1 %v1288_v59  ;;  %v14624_v31 = vadd.f32 %v7106_v4, %v5800_v19  ;;  %v1295_v49 = vld [vmem:[%s10873_s17 + $0x23f8] sm:$0xff]  ;;  %v16742_v29 = vld [vmem:[#allocation72_spill] sm:$0xff] }
 0x63a   : > { %8875 = vst.msk [vmem:[%s13640_s11 + $0x1e8] sm:$0xff] %vm8813_vm1, %v8694_v30  ;;  %v5804_v11 = vadd.f32 %v16739_v40, %v4497_v17  ;;  %v8515_v39 = vadd.f32 %v13855_v35, %v8038_v41  ;;  %8093 = vrot.lane.b32.xlu0 %v14617_v24, %s10557_s6  ;;  %7432 = vmatprep.mubr.f32.mxu0 %v16647_v5  ;;  %v16740_v56 = vld [vmem:[#allocation69_spill] sm:$0xff]  ;;  %v16741_v30 = vld [vmem:[#allocation70_spill] sm:$0xff] }
 0x63b   : > { %v5806_v59 = vadd.f32 %v16740_v56, %v4499_v20  ;;  %v4502_v12 = vpop.f32.mrb[218].mxu1  ;;  %v1294_v20 = vld [vmem:[%s10873_s17 + $0x23f0] sm:$0xff] }
 0x63c   : > { %v14636_v4 = vadd.f32 %v7110_v38, %v5804_v11  ;;  %v8695_v19 = vadd.f32 %v8515_v39, %v14434_v21  ;;  %v4503_v9 = vadd.f32 %v4502_v12, %v16741_v30  ;;  %v7116_v35 = vpop.f32.mrb[218].mxu0  ;;  %v4504_v17 = vpop.f32.mrb[219].mxu1  ;;  %4819 = vmatmul.mubr.f32.gmra.mrb[218].mxu1 %v1287_v52  ;;  %v16743_v21 = vld [vmem:[#allocation71_spill] sm:$0xff]  ;;  %v1298_v52 = vld [vmem:[%s10873_s17 + $0x2410] sm:$0xff] }
 0x63d   : > { %v7118_v25 = vpop.f32.mrb[219].mxu0  ;;  %9219 = vmatmul.mubr.msk.f32.gmra.mrb[104].mxu0 %vm1856_vm0, %v1291_v48  ;;  %v8040_v41 = vpop.permute.xlu1 %8039  ;;  %v4505_v40 = vadd.f32 %v4504_v17, %v16742_v29  ;;  %4824 = vmatprep.mubr.f32.mxu1 %v1295_v49  ;;  %v14643_v56 = vadd.f32 %v7112_v28, %v5806_v59  ;;  %v1302_v39 = vld [vmem:[%s10873_s17 + $0x2430] sm:$0xff]  ;;  %v16744_v48 = vld [vmem:[#allocation73_spill] sm:$0xff] }
 0x63e   : > { %8876 = vst.msk [vmem:[%s13640_s11 + $0x1f0] sm:$0xff] %vm8813_vm1, %v8695_v19  ;;  %v5810_v38 = vadd.f32 %v16743_v21, %v4503_v9  ;;  %v8516_v11 = vadd.f32 %v13870_v58, %v8040_v41  ;;  %8095 = vrot.lane.b32.xlu1 %v14636_v4, %s10557_s6  ;;  %7438 = vmatprep.mubr.f32.mxu0 %v16647_v5  ;;  %v16745_v19 = vld [vmem:[#allocation74_spill] sm:$0xff]  ;;  %v16746_v29 = vld [vmem:[#allocation76_spill] sm:$0xff] }
 0x63f   : > { %v5812_v49 = vadd.f32 %v16744_v48, %v4505_v40  ;;  %v4508_v12 = vpop.f32.mrb[220].mxu1  ;;  %v1301_v40 = vld [vmem:[%s10873_s17 + $0x2428] sm:$0xff] }
 0x640   : > { %v14655_v28 = vadd.f32 %v7116_v35, %v5810_v38  ;;  %v8696_v59 = vadd.f32 %v8516_v11, %v14453_v36  ;;  %v4509_v30 = vadd.f32 %v4508_v12, %v16745_v19  ;;  %v7122_v58 = vpop.f32.mrb[220].mxu0  ;;  %v4510_v9 = vpop.f32.mrb[221].mxu1  ;;  %4825 = vmatmul.mubr.f32.gmra.mrb[220].mxu1 %v1294_v20  ;;  %v16747_v36 = vld [vmem:[#allocation75_spill] sm:$0xff] }
 0x641   : > { %v7124_v17 = vpop.f32.mrb[221].mxu0  ;;  %9220 = vmatmul.mubr.msk.f32.gmra.mrb[106].mxu0 %vm1856_vm0, %v1298_v52  ;;  %v8042_v41 = vpop.permute.xlu0 %8041  ;;  %v4511_v21 = vadd.f32 %v4510_v9, %v16746_v29  ;;  %4830 = vmatprep.mubr.f32.mxu1 %v1302_v39  ;;  %v14662_v48 = vadd.f32 %v7118_v25, %v5812_v49  ;;  %v1305_v20 = vld [vmem:[%s10873_s17 + $0x2448] sm:$0xff]  ;;  %v16748_v52 = vld [vmem:[#allocation77_spill] sm:$0xff]  ;;  %v16750_v29 = vld [vmem:[#allocation80_spill] sm:$0xff] }
 0x642   : > { %8877 = vst.msk [vmem:[%s13640_s11 + $0x1f8] sm:$0xff] %vm8813_vm1, %v8696_v59  ;;  %v5816_v35 = vadd.f32 %v16747_v36, %v4509_v30  ;;  %v8517_v38 = vadd.f32 %v13885_v1, %v8042_v41  ;;  %8097 = vrot.lane.b32.xlu0 %v14655_v28, %s10557_s6  ;;  %7444 = vmatprep.mubr.f32.mxu0 %v16647_v5  ;;  %v1309_v11 = vld [vmem:[%s10873_s17 + $0x2468] sm:$0xff]  ;;  %v16749_v59 = vld [vmem:[#allocation78_spill] sm:$0xff] }
 0x643   : > { %v5818_v39 = vadd.f32 %v16748_v52, %v4511_v21  ;;  %v4514_v12 = vpop.f32.mrb[222].mxu1  ;;  %v1308_v21 = vld [vmem:[%s10873_s17 + $0x2460] sm:$0xff] }
 0x644   : > { %v14674_v25 = vadd.f32 %v7122_v58, %v5816_v35  ;;  %v8697_v49 = vadd.f32 %v8517_v38, %v14472_v0  ;;  %v4515_v19 = vadd.f32 %v4514_v12, %v16749_v59  ;;  %v7128_v1 = vpop.f32.mrb[222].mxu0  ;;  %v4516_v30 = vpop.f32.mrb[223].mxu1  ;;  %4831 = vmatmul.mubr.f32.gmra.mrb[222].mxu1 %v1301_v40  ;;  %v16751_v0 = vld [vmem:[#allocation79_spill] sm:$0xff]  ;;  %v1312_v40 = vld [vmem:[%s10873_s17 + $0x2480] sm:$0xff] }
 0x645   : > { %v7130_v9 = vpop.f32.mrb[223].mxu0  ;;  %9221 = vmatmul.mubr.msk.f32.gmra.mrb[108].mxu0 %vm1856_vm0, %v1305_v20  ;;  %v8044_v41 = vpop.permute.xlu1 %8043  ;;  %v4517_v36 = vadd.f32 %v4516_v30, %v16750_v29  ;;  %4836 = vmatprep.mubr.f32.mxu1 %v1309_v11  ;;  %v14681_v52 = vadd.f32 %v7124_v17, %v5818_v39  ;;  %v1316_v38 = vld [vmem:[%s10873_s17 + $0x24a0] sm:$0xff]  ;;  %v16752_v20 = vld [vmem:[#allocation81_spill] sm:$0xff]  ;;  %v16754_v29 = vld [vmem:[#allocation84_spill] sm:$0xff] }
 0x646   : > { %8878 = vst.msk [vmem:[%s13640_s11 + $0x200] sm:$0xff] %vm8813_vm1, %v8697_v49  ;;  %v5822_v58 = vadd.f32 %v16751_v0, %v4515_v19  ;;  %v8518_v35 = vadd.f32 %v13900_v42, %v8044_v41  ;;  %8099 = vrot.lane.b32.xlu1 %v14674_v25, %s10557_s6  ;;  %7450 = vmatprep.mubr.f32.mxu0 %v16647_v5  ;;  %v16753_v49 = vld [vmem:[#allocation82_spill] sm:$0xff] }
 0x647   : > { %v5824_v11 = vadd.f32 %v16752_v20, %v4517_v36  ;;  %v4520_v12 = vpop.f32.mrb[224].mxu1  ;;  %v1315_v36 = vld [vmem:[%s10873_s17 + $0x2498] sm:$0xff] }
 0x648   : > { %v14693_v17 = vadd.f32 %v7128_v1, %v5822_v58  ;;  %v8698_v39 = vadd.f32 %v8518_v35, %v14491_v34  ;;  %v4521_v59 = vadd.f32 %v4520_v12, %v16753_v49  ;;  %v7134_v42 = vpop.f32.mrb[224].mxu0  ;;  %v4522_v19 = vpop.f32.mrb[225].mxu1  ;;  %4837 = vmatmul.mubr.f32.gmra.mrb[224].mxu1 %v1308_v21  ;;  %v16755_v34 = vld [vmem:[#allocation83_spill] sm:$0xff]  ;;  %v1319_v21 = vld [vmem:[%s10873_s17 + $0x24b8] sm:$0xff] }
 0x649   : > { %v7136_v30 = vpop.f32.mrb[225].mxu0  ;;  %9222 = vmatmul.mubr.msk.f32.gmra.mrb[110].mxu0 %vm1856_vm0, %v1312_v40  ;;  %v8046_v41 = vpop.permute.xlu0 %8045  ;;  %v4523_v0 = vadd.f32 %v4522_v19, %v16754_v29  ;;  %4842 = vmatprep.mubr.f32.mxu1 %v1316_v38  ;;  %v14700_v20 = vadd.f32 %v7130_v9, %v5824_v11  ;;  %v1323_v35 = vld [vmem:[%s10873_s17 + $0x24d8] sm:$0xff]  ;;  %v16758_v29 = vld [vmem:[#allocation88_spill] sm:$0xff] }
 0x64a   : > { %8879 = vst.msk [vmem:[%s13640_s11 + $0x208] sm:$0xff] %vm8813_vm1, %v8698_v39  ;;  %v5828_v1 = vadd.f32 %v16755_v34, %v4521_v59  ;;  %v8519_v58 = vadd.f32 %v13915_v10, %v8046_v41  ;;  %8101 = vrot.lane.b32.xlu0 %v14693_v17, %s10557_s6  ;;  %7456 = vmatprep.mubr.f32.mxu0 %v16647_v5  ;;  %v16756_v40 = vld [vmem:[#allocation85_spill] sm:$0xff]  ;;  %v16757_v39 = vld [vmem:[#allocation86_spill] sm:$0xff] }
 0x64b   : > { %v5830_v38 = vadd.f32 %v16756_v40, %v4523_v0  ;;  %v4526_v12 = vpop.f32.mrb[226].mxu1  ;;  %v1322_v0 = vld [vmem:[%s10873_s17 + $0x24d0] sm:$0xff] }
 0x64c   : > { %v14712_v9 = vadd.f32 %v7134_v42, %v5828_v1  ;;  %v8699_v11 = vadd.f32 %v8519_v58, %v14510_v50  ;;  %v4527_v49 = vadd.f32 %v4526_v12, %v16757_v39  ;;  %v7140_v10 = vpop.f32.mrb[226].mxu0  ;;  %v4528_v59 = vpop.f32.mrb[227].mxu1  ;;  %4843 = vmatmul.mubr.f32.gmra.mrb[226].mxu1 %v1315_v36  ;;  %v16759_v50 = vld [vmem:[#allocation87_spill] sm:$0xff]  ;;  %v1326_v36 = vld [vmem:[%s10873_s17 + $0x24f0] sm:$0xff] }
 0x64d   : > { %v7142_v19 = vpop.f32.mrb[227].mxu0  ;;  %9223 = vmatmul.mubr.msk.f32.gmra.mrb[112].mxu0 %vm1856_vm0, %v1319_v21  ;;  %v8048_v41 = vpop.permute.xlu1 %8047  ;;  %v4529_v34 = vadd.f32 %v4528_v59, %v16758_v29  ;;  %4848 = vmatprep.mubr.f32.mxu1 %v1323_v35  ;;  %v14719_v40 = vadd.f32 %v7136_v30, %v5830_v38  ;;  %v1330_v58 = vld [vmem:[%s10873_s17 + $0x2510] sm:$0xff]  ;;  %v16760_v21 = vld [vmem:[#allocation89_spill] sm:$0xff] }
 0x64e   : > { %8880 = vst.msk [vmem:[%s13640_s11 + $0x210] sm:$0xff] %vm8813_vm1, %v8699_v11  ;;  %v5834_v42 = vadd.f32 %v16759_v50, %v4527_v49  ;;  %v8520_v1 = vadd.f32 %v13930_v57, %v8048_v41  ;;  %8103 = vrot.lane.b32.xlu1 %v14712_v9, %s10557_s6  ;;  %7462 = vmatprep.mubr.f32.mxu0 %v16647_v5  ;;  %v16761_v11 = vld [vmem:[#allocation90_spill] sm:$0xff]  ;;  %v16762_v29 = vld [vmem:[#allocation92_spill] sm:$0xff] }
 0x64f   : > { %v5836_v35 = vadd.f32 %v16760_v21, %v4529_v34  ;;  %v4532_v12 = vpop.f32.mrb[228].mxu1  ;;  %v1329_v34 = vld [vmem:[%s10873_s17 + $0x2508] sm:$0xff] }
 0x650   : > { %v14731_v30 = vadd.f32 %v7140_v10, %v5834_v42  ;;  %v8700_v38 = vadd.f32 %v8520_v1, %v14529_v53  ;;  %v4533_v39 = vadd.f32 %v4532_v12, %v16761_v11  ;;  %v7146_v57 = vpop.f32.mrb[228].mxu0  ;;  %v4534_v49 = vpop.f32.mrb[229].mxu1  ;;  %4849 = vmatmul.mubr.f32.gmra.mrb[228].mxu1 %v1322_v0  ;;  %v16763_v53 = vld [vmem:[#allocation91_spill] sm:$0xff] }
 0x651   : > { %v7148_v59 = vpop.f32.mrb[229].mxu0  ;;  %9224 = vmatmul.mubr.msk.f32.gmra.mrb[114].mxu0 %vm1856_vm0, %v1326_v36  ;;  %v8050_v41 = vpop.permute.xlu0 %8049  ;;  %v4535_v50 = vadd.f32 %v4534_v49, %v16762_v29  ;;  %4854 = vmatprep.mubr.f32.mxu1 %v1330_v58  ;;  %v14738_v21 = vadd.f32 %v7142_v19, %v5836_v35  ;;  %v1333_v0 = vld [vmem:[%s10873_s17 + $0x2528] sm:$0xff]  ;;  %v16764_v36 = vld [vmem:[#allocation93_spill] sm:$0xff]  ;;  %v16766_v29 = vld [vmem:[#allocation96_spill] sm:$0xff] }
 0x652   : > { %8881 = vst.msk [vmem:[%s13640_s11 + $0x218] sm:$0xff] %vm8813_vm1, %v8700_v38  ;;  %v5840_v10 = vadd.f32 %v16763_v53, %v4533_v39  ;;  %v8521_v42 = vadd.f32 %v13945_v43, %v8050_v41  ;;  %8105 = vrot.lane.b32.xlu0 %v14731_v30, %s10557_s6  ;;  %7468 = vmatprep.mubr.f32.mxu0 %v16647_v5  ;;  %v1337_v1 = vld [vmem:[%s10873_s17 + $0x2548] sm:$0xff]  ;;  %v16765_v38 = vld [vmem:[#allocation94_spill] sm:$0xff] }
 0x653   : > { %v5842_v58 = vadd.f32 %v16764_v36, %v4535_v50  ;;  %v4538_v12 = vpop.f32.mrb[230].mxu1  ;;  %v1336_v50 = vld [vmem:[%s10873_s17 + $0x2540] sm:$0xff] }
 0x654   : > { %v14750_v19 = vadd.f32 %v7146_v57, %v5840_v10  ;;  %v8701_v35 = vadd.f32 %v8521_v42, %v14548_v45  ;;  %v4539_v11 = vadd.f32 %v4538_v12, %v16765_v38  ;;  %v7152_v43 = vpop.f32.mrb[230].mxu0  ;;  %v4540_v39 = vpop.f32.mrb[231].mxu1  ;;  %4855 = vmatmul.mubr.f32.gmra.mrb[230].mxu1 %v1329_v34  ;;  %v16767_v45 = vld [vmem:[#allocation95_spill] sm:$0xff]  ;;  %v1340_v34 = vld [vmem:[%s10873_s17 + $0x2560] sm:$0xff] }
 0x655   : > { %v7154_v49 = vpop.f32.mrb[231].mxu0  ;;  %9225 = vmatmul.mubr.msk.f32.gmra.mrb[116].mxu0 %vm1856_vm0, %v1333_v0  ;;  %v8052_v41 = vpop.permute.xlu1 %8051  ;;  %v4541_v53 = vadd.f32 %v4540_v39, %v16766_v29  ;;  %4860 = vmatprep.mubr.f32.mxu1 %v1337_v1  ;;  %v14757_v36 = vadd.f32 %v7148_v59, %v5842_v58  ;;  %v1344_v42 = vld [vmem:[%s10873_s17 + $0x2580] sm:$0xff]  ;;  %v16768_v0 = vld [vmem:[#allocation97_spill] sm:$0xff]  ;;  %v16770_v29 = vld [vmem:[#allocation100_spill] sm:$0xff] }
 0x656   : > { %8882 = vst.msk [vmem:[%s13640_s11 + $0x220] sm:$0xff] %vm8813_vm1, %v8701_v35  ;;  %v5846_v57 = vadd.f32 %v16767_v45, %v4539_v11  ;;  %v8522_v10 = vadd.f32 %v13960_v7, %v8052_v41  ;;  %8107 = vrot.lane.b32.xlu1 %v14750_v19, %s10557_s6  ;;  %7474 = vmatprep.mubr.f32.mxu0 %v16647_v5  ;;  %v16769_v35 = vld [vmem:[#allocation98_spill] sm:$0xff] }
 0x657   : > { %v5848_v1 = vadd.f32 %v16768_v0, %v4541_v53  ;;  %v4544_v12 = vpop.f32.mrb[232].mxu1  ;;  %v1343_v53 = vld [vmem:[%s10873_s17 + $0x2578] sm:$0xff] }
 0x658   : > { %v14769_v59 = vadd.f32 %v7152_v43, %v5846_v57  ;;  %v8702_v58 = vadd.f32 %v8522_v10, %v14567_v47  ;;  %v4545_v38 = vadd.f32 %v4544_v12, %v16769_v35  ;;  %v7158_v7 = vpop.f32.mrb[232].mxu0  ;;  %v4546_v11 = vpop.f32.mrb[233].mxu1  ;;  %4861 = vmatmul.mubr.f32.gmra.mrb[232].mxu1 %v1336_v50  ;;  %v16771_v47 = vld [vmem:[#allocation99_spill] sm:$0xff]  ;;  %v1347_v50 = vld [vmem:[%s10873_s17 + $0x2598] sm:$0xff] }
 0x659   : > { %v7160_v39 = vpop.f32.mrb[233].mxu0  ;;  %9226 = vmatmul.mubr.msk.f32.gmra.mrb[118].mxu0 %vm1856_vm0, %v1340_v34  ;;  %v8054_v41 = vpop.permute.xlu0 %8053  ;;  %v4547_v45 = vadd.f32 %v4546_v11, %v16770_v29  ;;  %4866 = vmatprep.mubr.f32.mxu1 %v1344_v42  ;;  %v14776_v0 = vadd.f32 %v7154_v49, %v5848_v1  ;;  %v1351_v10 = vld [vmem:[%s10873_s17 + $0x25b8] sm:$0xff]  ;;  %v16774_v29 = vld [vmem:[#allocation104_spill] sm:$0xff] }
 0x65a   : > { %8883 = vst.msk [vmem:[%s13640_s11 + $0x228] sm:$0xff] %vm8813_vm1, %v8702_v58  ;;  %v5852_v43 = vadd.f32 %v16771_v47, %v4545_v38  ;;  %v8523_v57 = vadd.f32 %v13975_v51, %v8054_v41  ;;  %8109 = vrot.lane.b32.xlu0 %v14769_v59, %s10557_s6  ;;  %7480 = vmatprep.mubr.f32.mxu0 %v16647_v5  ;;  %v16772_v34 = vld [vmem:[#allocation101_spill] sm:$0xff]  ;;  %v16773_v58 = vld [vmem:[#allocation102_spill] sm:$0xff] }
 0x65b   : > { %v5854_v42 = vadd.f32 %v16772_v34, %v4547_v45  ;;  %v4550_v12 = vpop.f32.mrb[234].mxu1  ;;  %v1350_v45 = vld [vmem:[%s10873_s17 + $0x25b0] sm:$0xff] }
 0x65c   : > { %v14788_v49 = vadd.f32 %v7158_v7, %v5852_v43  ;;  %v8703_v1 = vadd.f32 %v8523_v57, %v14586_v54  ;;  %v4551_v35 = vadd.f32 %v4550_v12, %v16773_v58  ;;  %v7164_v51 = vpop.f32.mrb[234].mxu0  ;;  %v4552_v38 = vpop.f32.mrb[235].mxu1  ;;  %4867 = vmatmul.mubr.f32.gmra.mrb[234].mxu1 %v1343_v53  ;;  %v16775_v54 = vld [vmem:[#allocation103_spill] sm:$0xff]  ;;  %v1354_v53 = vld [vmem:[%s10873_s17 + $0x25d0] sm:$0xff] }
 0x65d   : > { %v7166_v11 = vpop.f32.mrb[235].mxu0  ;;  %9227 = vmatmul.mubr.msk.f32.gmra.mrb[120].mxu0 %vm1856_vm0, %v1347_v50  ;;  %v8056_v41 = vpop.permute.xlu1 %8055  ;;  %v4553_v47 = vadd.f32 %v4552_v38, %v16774_v29  ;;  %4872 = vmatprep.mubr.f32.mxu1 %v1351_v10  ;;  %v14795_v34 = vadd.f32 %v7160_v39, %v5854_v42  ;;  %v1358_v57 = vld [vmem:[%s10873_s17 + $0x25f0] sm:$0xff]  ;;  %v16776_v50 = vld [vmem:[#allocation105_spill] sm:$0xff] }
 0x65e   : > { %8884 = vst.msk [vmem:[%s13640_s11 + $0x230] sm:$0xff] %vm8813_vm1, %v8703_v1  ;;  %v5858_v7 = vadd.f32 %v16775_v54, %v4551_v35  ;;  %v8524_v43 = vadd.f32 %v13990_v16, %v8056_v41  ;;  %8111 = vrot.lane.b32.xlu1 %v14788_v49, %s10557_s6  ;;  %7486 = vmatprep.mubr.f32.mxu0 %v16647_v5  ;;  %v16777_v1 = vld [vmem:[#allocation106_spill] sm:$0xff]  ;;  %v16778_v29 = vld [vmem:[#allocation108_spill] sm:$0xff] }
 0x65f   : > { %v5860_v10 = vadd.f32 %v16776_v50, %v4553_v47  ;;  %v4556_v12 = vpop.f32.mrb[236].mxu1  ;;  %v1357_v47 = vld [vmem:[%s10873_s17 + $0x25e8] sm:$0xff] }
 0x660   : > { %v14807_v39 = vadd.f32 %v7164_v51, %v5858_v7  ;;  %v8704_v42 = vadd.f32 %v8524_v43, %v14605_v44  ;;  %v4557_v58 = vadd.f32 %v4556_v12, %v16777_v1  ;;  %v7170_v16 = vpop.f32.mrb[236].mxu0  ;;  %v4558_v35 = vpop.f32.mrb[237].mxu1  ;;  %4873 = vmatmul.mubr.f32.gmra.mrb[236].mxu1 %v1350_v45  ;;  %v16779_v44 = vld [vmem:[#allocation107_spill] sm:$0xff] }
 0x661   : > { %v7172_v38 = vpop.f32.mrb[237].mxu0  ;;  %9228 = vmatmul.mubr.msk.f32.gmra.mrb[122].mxu0 %vm1856_vm0, %v1354_v53  ;;  %v8058_v41 = vpop.permute.xlu0 %8057  ;;  %v4559_v54 = vadd.f32 %v4558_v35, %v16778_v29  ;;  %4878 = vmatprep.mubr.f32.mxu1 %v1358_v57  ;;  %v14814_v50 = vadd.f32 %v7166_v11, %v5860_v10  ;;  %v1361_v45 = vld [vmem:[%s10873_s17 + $0x2608] sm:$0xff]  ;;  %v16780_v53 = vld [vmem:[#allocation109_spill] sm:$0xff]  ;;  %v16782_v29 = vld [vmem:[#allocation112_spill] sm:$0xff] }
 0x662   : > { %8885 = vst.msk [vmem:[%s13640_s11 + $0x238] sm:$0xff] %vm8813_vm1, %v8704_v42  ;;  %v5864_v51 = vadd.f32 %v16779_v44, %v4557_v58  ;;  %v8525_v7 = vadd.f32 %v14005_v63, %v8058_v41  ;;  %8113 = vrot.lane.b32.xlu0 %v14807_v39, %s10557_s6  ;;  %7492 = vmatprep.mubr.f32.mxu0 %v16647_v5  ;;  %v1365_v43 = vld [vmem:[%s10873_s17 + $0x2628] sm:$0xff]  ;;  %v16781_v42 = vld [vmem:[#allocation110_spill] sm:$0xff] }
 0x663   : > { %v5866_v57 = vadd.f32 %v16780_v53, %v4559_v54  ;;  %v4562_v12 = vpop.f32.mrb[238].mxu1  ;;  %v1364_v54 = vld [vmem:[%s10873_s17 + $0x2620] sm:$0xff] }
 0x664   : > { %v14826_v11 = vadd.f32 %v7170_v16, %v5864_v51  ;;  %v8705_v10 = vadd.f32 %v8525_v7, %v14624_v31  ;;  %v4563_v1 = vadd.f32 %v4562_v12, %v16781_v42  ;;  %v7176_v63 = vpop.f32.mrb[238].mxu0  ;;  %v4564_v58 = vpop.f32.mrb[239].mxu1  ;;  %4879 = vmatmul.mubr.f32.gmra.mrb[238].mxu1 %v1357_v47  ;;  %v16783_v31 = vld [vmem:[#allocation111_spill] sm:$0xff]  ;;  %v1368_v47 = vld [vmem:[%s10873_s17 + $0x2640] sm:$0xff] }
 0x665   : > { %v7178_v35 = vpop.f32.mrb[239].mxu0  ;;  %9229 = vmatmul.mubr.msk.f32.gmra.mrb[124].mxu0 %vm1856_vm0, %v1361_v45  ;;  %v8060_v41 = vpop.permute.xlu1 %8059  ;;  %v4565_v44 = vadd.f32 %v4564_v58, %v16782_v29  ;;  %4884 = vmatprep.mubr.f32.mxu1 %v1365_v43  ;;  %v14833_v53 = vadd.f32 %v7172_v38, %v5866_v57  ;;  %v1372_v7 = vld [vmem:[%s10873_s17 + $0x2660] sm:$0xff]  ;;  %v16784_v45 = vld [vmem:[#allocation113_spill] sm:$0xff]  ;;  %v16786_v29 = vld [vmem:[#allocation116_spill] sm:$0xff] }
 0x666   : > { %8886 = vst.msk [vmem:[%s13640_s11 + $0x240] sm:$0xff] %vm8813_vm1, %v8705_v10  ;;  %v5870_v16 = vadd.f32 %v16783_v31, %v4563_v1  ;;  %v8526_v51 = vadd.f32 %v14020_v15, %v8060_v41  ;;  %8115 = vrot.lane.b32.xlu1 %v14826_v11, %s10557_s6  ;;  %7498 = vmatprep.mubr.f32.mxu0 %v16647_v5  ;;  %v16785_v10 = vld [vmem:[#allocation114_spill] sm:$0xff] }
 0x667   : > { %v5872_v43 = vadd.f32 %v16784_v45, %v4565_v44  ;;  %v4568_v12 = vpop.f32.mrb[240].mxu1  ;;  %v1371_v44 = vld [vmem:[%s10873_s17 + $0x2658] sm:$0xff] }
 0x668   : > { %v14845_v38 = vadd.f32 %v7176_v63, %v5870_v16  ;;  %v8706_v57 = vadd.f32 %v8526_v51, %v14643_v56  ;;  %v4569_v42 = vadd.f32 %v4568_v12, %v16785_v10  ;;  %v7182_v15 = vpop.f32.mrb[240].mxu0  ;;  %v4570_v1 = vpop.f32.mrb[241].mxu1  ;;  %4885 = vmatmul.mubr.f32.gmra.mrb[240].mxu1 %v1364_v54  ;;  %v16787_v56 = vld [vmem:[#allocation115_spill] sm:$0xff]  ;;  %v1375_v54 = vld [vmem:[%s10873_s17 + $0x2678] sm:$0xff] }
 0x669   : > { %v7184_v58 = vpop.f32.mrb[241].mxu0  ;;  %9230 = vmatmul.mubr.msk.f32.gmra.mrb[126].mxu0 %vm1856_vm0, %v1368_v47  ;;  %v8062_v41 = vpop.permute.xlu0 %8061  ;;  %v4571_v31 = vadd.f32 %v4570_v1, %v16786_v29  ;;  %4890 = vmatprep.mubr.f32.mxu1 %v1372_v7  ;;  %v14852_v45 = vadd.f32 %v7178_v35, %v5872_v43  ;;  %v1379_v51 = vld [vmem:[%s10873_s17 + $0x2698] sm:$0xff]  ;;  %v16791_v1 = vld [vmem:[#allocation120_spill] sm:$0xff] }
 0x66a   : > { %8887 = vst.msk [vmem:[%s13640_s11 + $0x248] sm:$0xff] %vm8813_vm1, %v8706_v57  ;;  %v5876_v63 = vadd.f32 %v16787_v56, %v4569_v42  ;;  %v8527_v16 = vadd.f32 %v14035_v13, %v8062_v41  ;;  %8117 = vrot.lane.b32.xlu0 %v14845_v38, %s10557_s6  ;;  %7504 = vmatprep.mubr.f32.mxu0 %v16647_v5  ;;  %v16788_v47 = vld [vmem:[#allocation117_spill] sm:$0xff]  ;;  %v16790_v57 = vld [vmem:[#allocation118_spill] sm:$0xff]  ;;  %v1378_v56 = vld [vmem:[%s10873_s17 + $0x2690] sm:$0xff] }
 0x66b   : > { %v5878_v7 = vadd.f32 %v16788_v47, %v4571_v31  ;;  %v4574_v12 = vpop.f32.mrb[242].mxu1 }
 0x66c   : > { %v14864_v35 = vadd.f32 %v7182_v15, %v5876_v63  ;;  %v8707_v43 = vadd.f32 %v8527_v16, %v14662_v48  ;;  %v4575_v13 = vadd.f32 %v4574_v12, %v16790_v57  ;;  %v7188_v10 = vpop.f32.mrb[242].mxu0  ;;  %v4576_v42 = vpop.f32.mrb[243].mxu1  ;;  %4891 = vmatmul.mubr.f32.gmra.mrb[242].mxu1 %v1371_v44  ;;  %v16792_v15 = vld [vmem:[#allocation119_spill] sm:$0xff]  ;;  %v1382_v48 = vld [vmem:[%s10873_s17 + $0x26b0] sm:$0xff]  ;;  %v16793_v16 = vld [vmem:[#allocation121_spill] sm:$0xff] }
 0x66d   : > { %v4577_v41 = vadd.f32 %v4576_v42, %v16791_v1  ;;  %v7190_v29 = vpop.f32.mrb[243].mxu0  ;;  %9231 = vmatmul.mubr.msk.f32.gmra.mrb[128].mxu0 %vm1856_vm0, %v1375_v54  ;;  %4896 = vmatprep.mubr.f32.mxu1 %v1379_v51  ;;  %v14871_v31 = vadd.f32 %v7184_v58, %v5878_v7  ;;  %v1386_v44 = vld [vmem:[%s10873_s17 + $0x26d0] sm:$0xff]  ;;  %v16795_v51 = vld [vmem:[#allocation122_spill] sm:$0xff] }
 0x66e   : > { %16789 = vst [vmem:[#allocation2_spill] sm:$0xff] %v14864_v35  ;;  %8888 = vst.msk [vmem:[%s13640_s11 + $0x250] sm:$0xff] %vm8813_vm1, %v8707_v43  ;;  %v5882_v63 = vadd.f32 %v16792_v15, %v4575_v13  ;;  %8119 = vrot.lane.b32.xlu1 %v14864_v35, %s10557_s6  ;;  %7510 = vmatprep.mubr.f32.mxu0 %v16647_v5  ;;  %v16796_v13 = vld [vmem:[#allocation124_spill] sm:$0xff] }
 0x66f   : > { %v5884_v47 = vadd.f32 %v16793_v16, %v4577_v41  ;;  %v4580_v12 = vpop.f32.mrb[244].mxu1  ;;  %v1385_v41 = vld [vmem:[%s10873_s17 + $0x26c8] sm:$0xff] }
 0x670   : > { %v14882_v54 = vadd.f32 %v7188_v10, %v5882_v63  ;;  %v4581_v58 = vadd.f32 %v4580_v12, %v16795_v51  ;;  %v7194_v7 = vpop.f32.mrb[244].mxu0  ;;  %v4582_v43 = vpop.f32.mrb[245].mxu1  ;;  %4897 = vmatmul.mubr.f32.gmra.mrb[244].mxu1 %v1378_v56  ;;  %v16797_v16 = vld [vmem:[#allocation123_spill] sm:$0xff] }
 0x671   : > { %v14885_v57 = vadd.f32 %v7190_v29, %v5884_v47  ;;  %v4583_v42 = vadd.f32 %v4582_v43, %v16796_v13  ;;  %v7196_v1 = vpop.f32.mrb[245].mxu0  ;;  %9232 = vmatmul.mubr.msk.f32.gmra.mrb[130].mxu0 %vm1856_vm0, %v1382_v48  ;;  %v8064_v15 = vpop.permute.xlu1 %8063  ;;  %4902 = vmatprep.mubr.f32.mxu1 %v1386_v44  ;;  %v1389_v56 = vld [vmem:[%s10873_s17 + $0x26e8] sm:$0xff]  ;;  %v16798_v47 = vld [vmem:[#allocation125_spill] sm:$0xff]  ;;  %v16799_v43 = vld [vmem:[#allocation126_spill] sm:$0xff] }
 0x672   : > { %16794 = vst [vmem:[#allocation4_spill] sm:$0xff] %v14882_v54  ;;  %v5888_v10 = vadd.f32 %v16797_v16, %v4581_v58  ;;  %v8528_v63 = vadd.f32 %v14050_v37, %v8064_v15  ;;  %8121 = vrot.lane.b32.xlu0 %v14882_v54, %s10557_s6  ;;  %7516 = vmatprep.mubr.f32.mxu0 %v16647_v5  ;;  %v1393_v29 = vld [vmem:[%s10873_s17 + $0x2708] sm:$0xff]  ;;  %v16800_v16 = vld [vmem:[#allocation128_spill] sm:$0xff] }
 0x673   : > { %v5890_v12 = vadd.f32 %v16798_v47, %v4583_v42  ;;  %v4586_v51 = vpop.f32.mrb[246].mxu1  ;;  %v16802_v47 = vld [vmem:[#allocation129_spill] sm:$0xff] }
 0x674   : > { %v14898_v48 = vadd.f32 %v7194_v7, %v5888_v10  ;;  %v8708_v44 = vadd.f32 %v8528_v63, %v14681_v52  ;;  %v4587_v58 = vadd.f32 %v4586_v51, %v16799_v43  ;;  %v7200_v37 = vpop.f32.mrb[246].mxu0  ;;  %v4588_v13 = vpop.f32.mrb[247].mxu1  ;;  %4903 = vmatmul.mubr.f32.gmra.mrb[246].mxu1 %v1385_v41  ;;  %v1392_v7 = vld [vmem:[%s10873_s17 + $0x2700] sm:$0xff]  ;;  %v16801_v52 = vld [vmem:[#allocation127_spill] sm:$0xff] }
 0x675   : > { %v14902_v15 = vadd.f32 %v7196_v1, %v5890_v12  ;;  %v4589_v54 = vadd.f32 %v4588_v13, %v16800_v16  ;;  %v7202_v35 = vpop.f32.mrb[247].mxu0  ;;  %9233 = vmatmul.mubr.msk.f32.gmra.mrb[132].mxu0 %vm1856_vm0, %v1389_v56  ;;  %v8066_v42 = vpop.permute.xlu0 %8065  ;;  %4908 = vmatprep.mubr.f32.mxu1 %v1393_v29  ;;  %v1396_v1 = vld [vmem:[%s10873_s17 + $0x2720] sm:$0xff]  ;;  %v16804_v16 = vld [vmem:[#allocation132_spill] sm:$0xff] }
 0x676   : > { %8889 = vst.msk [vmem:[%s13640_s11 + $0x258] sm:$0xff] %vm8813_vm1, %v8708_v44  ;;  %v5894_v10 = vadd.f32 %v16801_v52, %v4587_v58  ;;  %v8529_v63 = vadd.f32 %v14065_v33, %v8066_v42  ;;  %8123 = vrot.lane.b32.xlu1 %v14898_v48, %s10557_s6  ;;  %7522 = vmatprep.mubr.f32.mxu0 %v16647_v5  ;;  %v1400_v41 = vld [vmem:[%s10873_s17 + $0x2740] sm:$0xff] }
 0x677   : > { %v5896_v56 = vadd.f32 %v16802_v47, %v4589_v54  ;;  %v4592_v12 = vpop.f32.mrb[248].mxu1  ;;  %v16803_v44 = vld [vmem:[#allocation130_spill] sm:$0xff]  ;;  %v16806_v47 = vld [vmem:[#allocation133_spill] sm:$0xff] }
 0x678   : > { %v14917_v29 = vadd.f32 %v7200_v37, %v5894_v10  ;;  %v8709_v51 = vadd.f32 %v8529_v63, %v14700_v20  ;;  %v4593_v43 = vadd.f32 %v4592_v12, %v16803_v44  ;;  %v7206_v33 = vpop.f32.mrb[248].mxu0  ;;  %v4594_v58 = vpop.f32.mrb[249].mxu1  ;;  %4909 = vmatmul.mubr.f32.gmra.mrb[248].mxu1 %v1392_v7  ;;  %v1399_v37 = vld [vmem:[%s10873_s17 + $0x2738] sm:$0xff]  ;;  %v16805_v20 = vld [vmem:[#allocation131_spill] sm:$0xff] }
 0x679   : > { %v14921_v13 = vadd.f32 %v7202_v35, %v5896_v56  ;;  %v4595_v42 = vadd.f32 %v4594_v58, %v16804_v16  ;;  %v7208_v52 = vpop.f32.mrb[249].mxu0  ;;  %9234 = vmatmul.mubr.msk.f32.gmra.mrb[134].mxu0 %vm1856_vm0, %v1396_v1  ;;  %v8068_v54 = vpop.permute.xlu1 %8067  ;;  %4914 = vmatprep.mubr.f32.mxu1 %v1400_v41  ;;  %v1403_v35 = vld [vmem:[%s10873_s17 + $0x2758] sm:$0xff]  ;;  %v16808_v16 = vld [vmem:[#allocation136_spill] sm:$0xff] }
 0x67a   : > { %8890 = vst.msk [vmem:[%s13640_s11 + $0x260] sm:$0xff] %vm8813_vm1, %v8709_v51  ;;  %v5900_v10 = vadd.f32 %v16805_v20, %v4593_v43  ;;  %v8530_v63 = vadd.f32 %v14080_v26, %v8068_v54  ;;  %8125 = vrot.lane.b32.xlu0 %v14917_v29, %s10557_s6  ;;  %7528 = vmatprep.mubr.f32.mxu0 %v16647_v5  ;;  %v1407_v7 = vld [vmem:[%s10873_s17 + $0x2778] sm:$0xff]  ;;  %v16807_v51 = vld [vmem:[#allocation134_spill] sm:$0xff] }
 0x67b   : > { %v5902_v1 = vadd.f32 %v16806_v47, %v4595_v42  ;;  %v4598_v56 = vpop.f32.mrb[250].mxu1  ;;  %v16810_v47 = vld [vmem:[#allocation137_spill] sm:$0xff] }
 0x67c   : > { %v14936_v41 = vadd.f32 %v7206_v33, %v5900_v10  ;;  %v8710_v12 = vadd.f32 %v8530_v63, %v14719_v40  ;;  %v4599_v44 = vadd.f32 %v4598_v56, %v16807_v51  ;;  %v7212_v26 = vpop.f32.mrb[250].mxu0  ;;  %v4600_v43 = vpop.f32.mrb[251].mxu1  ;;  %4915 = vmatmul.mubr.f32.gmra.mrb[250].mxu1 %v1399_v37  ;;  %v1406_v33 = vld [vmem:[%s10873_s17 + $0x2770] sm:$0xff]  ;;  %v16809_v40 = vld [vmem:[#allocation135_spill] sm:$0xff] }
 0x67d   : > { %v14940_v58 = vadd.f32 %v7208_v52, %v5902_v1  ;;  %v4601_v54 = vadd.f32 %v4600_v43, %v16808_v16  ;;  %v7214_v20 = vpop.f32.mrb[251].mxu0  ;;  %9235 = vmatmul.mubr.msk.f32.gmra.mrb[136].mxu0 %vm1856_vm0, %v1403_v35  ;;  %v8070_v42 = vpop.permute.xlu0 %8069  ;;  %4920 = vmatprep.mubr.f32.mxu1 %v1407_v7  ;;  %v1410_v52 = vld [vmem:[%s10873_s17 + $0x2790] sm:$0xff] }
 0x67e   : > { %8891 = vst.msk [vmem:[%s13640_s11 + $0x268] sm:$0xff] %vm8813_vm1, %v8710_v12  ;;  %v5906_v10 = vadd.f32 %v16809_v40, %v4599_v44  ;;  %v8531_v63 = vadd.f32 %v14095_v27, %v8070_v42  ;;  %8127 = vrot.lane.b32.xlu1 %v14936_v41, %s10557_s6  ;;  %7534 = vmatprep.mubr.f32.mxu0 %v16647_v5  ;;  %v1414_v37 = vld [vmem:[%s10873_s17 + $0x27b0] sm:$0xff]  ;;  %v16812_v12 = vld [vmem:[#allocation138_spill] sm:$0xff] }
 0x67f   : > { %v5908_v35 = vadd.f32 %v16810_v47, %v4601_v54  ;;  %v4604_v1 = vpop.f32.mrb[252].mxu1  ;;  %v16813_v16 = vld [vmem:[#allocation140_spill] sm:$0xff] }
 0x680   : > { %v14955_v7 = vadd.f32 %v7212_v26, %v5906_v10  ;;  %v8711_v56 = vadd.f32 %v8531_v63, %v14738_v21  ;;  %v4605_v51 = vadd.f32 %v4604_v1, %v16812_v12  ;;  %v7218_v27 = vpop.f32.mrb[252].mxu0  ;;  %v4606_v44 = vpop.f32.mrb[253].mxu1  ;;  %4921 = vmatmul.mubr.f32.gmra.mrb[252].mxu1 %v1406_v33  ;;  %v1413_v26 = vld [vmem:[%s10873_s17 + $0x27a8] sm:$0xff]  ;;  %v16815_v63 = vld [vmem:[#allocation400_spill] sm:$0xff]  ;;  %v16818_v12 = vld [vmem:[#allocation142_spill] sm:$0xff] }
 0x681   : > { %v14959_v43 = vadd.f32 %v7214_v20, %v5908_v35  ;;  %v4607_v42 = vadd.f32 %v4606_v44, %v16813_v16  ;;  %v7220_v40 = vpop.f32.mrb[253].mxu0  ;;  %9236 = vmatmul.mubr.msk.f32.gmra.mrb[138].mxu0 %vm1856_vm0, %v1410_v52  ;;  %v8072_v54 = vpop.permute.xlu1 %8071  ;;  %4926 = vmatprep.mubr.f32.mxu1 %v1414_v37  ;;  %v16814_v21 = vld [vmem:[#allocation139_spill] sm:$0xff]  ;;  %v16816_v35 = vld [vmem:[#allocation141_spill] sm:$0xff] }
 0x682   : > { %16811 = vst [vmem:[#allocation3_spill] sm:$0xff] %v14955_v7  ;;  %8892 = vst.msk [vmem:[%s13640_s11 + $0x270] sm:$0xff] %vm8813_vm1, %v8711_v56  ;;  %v5912_v10 = vadd.f32 %v16814_v21, %v4605_v51  ;;  %v8532_v47 = vadd.f32 %v16815_v63, %v8072_v54  ;;  %8129 = vrot.lane.b32.xlu0 %v14955_v7, %s10557_s6  ;;  %7540 = vmatprep.mubr.f32.mxu0 %v16647_v5  ;;  %v1417_v20 = vld [vmem:[%s10873_s17 + $0x27c8] sm:$0xff]  ;;  %v16819_v21 = vld [vmem:[#allocation144_spill] sm:$0xff] }
 0x683   : > { %v1421_v33 = vld [vmem:[%s10873_s17 + $0x27e8] sm:$0xff]  ;;  %v5914_v52 = vadd.f32 %v16816_v35, %v4607_v42  ;;  %v4610_v1 = vpop.f32.mrb[254].mxu1 }
 0x684   : > { %v14974_v37 = vadd.f32 %v7218_v27, %v5912_v10  ;;  %v8712_v56 = vadd.f32 %v8532_v47, %v14757_v36  ;;  %v4611_v51 = vadd.f32 %v4610_v1, %v16818_v12  ;;  %v7224_v44 = vpop.f32.mrb[254].mxu0  ;;  %v4612_v16 = vpop.f32.mrb[255].mxu1  ;;  %4927 = vmatmul.mubr.f32.gmra.mrb[0].mxu1 %v1413_v26  ;;  %v1420_v27 = vld [vmem:[%s10873_s17 + $0x27e0] sm:$0xff]  ;;  %v16820_v36 = vld [vmem:[#allocation143_spill] sm:$0xff]  ;;  %v16821_v47 = vld [vmem:[#allocation401_spill] sm:$0xff] }
 0x685   : > { %v14978_v54 = vadd.f32 %v7220_v40, %v5914_v52  ;;  %v4613_v63 = vadd.f32 %v4612_v16, %v16819_v21  ;;  %v7226_v7 = vpop.f32.mrb[255].mxu0  ;;  %9237 = vmatmul.mubr.msk.f32.gmra.mrb[0].mxu0 %vm1856_vm0, %v1417_v20  ;;  %v8074_v42 = vpop.permute.xlu0 %8073  ;;  %4932 = vmatprep.mubr.f32.mxu1 %v1421_v33  ;;  %v1424_v40 = vld [vmem:[%s10873_s17 + $0x2800] sm:$0xff]  ;;  %v16822_v52 = vld [vmem:[#allocation145_spill] sm:$0xff] }
 0x686   : > { %16817 = vst [vmem:[#allocation398_spill] sm:$0xff] %v14974_v37  ;;  %8893 = vst.msk [vmem:[%s13640_s11 + $0x278] sm:$0xff] %vm8813_vm1, %v8712_v56  ;;  %v5918_v10 = vadd.f32 %v16820_v36, %v4611_v51  ;;  %v8533_v35 = vadd.f32 %v16821_v47, %v8074_v42  ;;  %8131 = vrot.lane.b32.xlu1 %v14974_v37, %s10557_s6  ;;  %7546 = vmatprep.mubr.f32.mxu0 %v16647_v5  ;;  %v1428_v26 = vld [vmem:[%s10873_s17 + $0x2820] sm:$0xff]  ;;  %v16825_v36 = vld [vmem:[#allocation148_spill] sm:$0xff] }
 0x687   : > { %v5920_v20 = vadd.f32 %v16822_v52, %v4613_v63  ;;  %v4616_v1 = vpop.f32.mrb[152].mxu1  ;;  %v16824_v12 = vld [vmem:[#allocation146_spill] sm:$0xff] }
 0x688   : > { %v14993_v33 = vadd.f32 %v7224_v44, %v5918_v10  ;;  %v8713_v56 = vadd.f32 %v8533_v35, %v14776_v0  ;;  %v4617_v51 = vadd.f32 %v4616_v1, %v16824_v12  ;;  %v7230_v16 = vpop.f32.mrb[36].mxu0  ;;  %v4618_v21 = vpop.f32.mrb[153].mxu1  ;;  %4933 = vmatmul.mubr.f32.gmra.mrb[2].mxu1 %v1420_v27  ;;  %v1427_v44 = vld [vmem:[%s10873_s17 + $0x2818] sm:$0xff]  ;;  %v16826_v0 = vld [vmem:[#allocation147_spill] sm:$0xff]  ;;  %v16827_v35 = vld [vmem:[#allocation402_spill] sm:$0xff] }
 0x689   : > { %v14997_v42 = vadd.f32 %v7226_v7, %v5920_v20  ;;  %v4619_v47 = vadd.f32 %v4618_v21, %v16825_v36  ;;  %v7232_v37 = vpop.f32.mrb[37].mxu0  ;;  %9238 = vmatmul.mubr.msk.f32.gmra.mrb[2].mxu0 %vm1856_vm0, %v1424_v40  ;;  %v8076_v63 = vpop.permute.xlu1 %8075  ;;  %4938 = vmatprep.mubr.f32.mxu1 %v1428_v26  ;;  %v1431_v7 = vld [vmem:[%s10873_s17 + $0x2838] sm:$0xff]  ;;  %v16830_v12 = vld [vmem:[#allocation150_spill] sm:$0xff] }
 0x68a   : > { %16823 = vst [vmem:[#allocation5_spill] sm:$0xff] %v14993_v33  ;;  %8894 = vst.msk [vmem:[%s13640_s11 + $0x280] sm:$0xff] %vm8813_vm1, %v8713_v56  ;;  %v5924_v10 = vadd.f32 %v16826_v0, %v4617_v51  ;;  %v8534_v52 = vadd.f32 %v16827_v35, %v8076_v63  ;;  %8133 = vrot.lane.b32.xlu0 %v14993_v33, %s10557_s6  ;;  %7552 = vmatprep.mubr.f32.mxu0 %v16647_v5  ;;  %v1435_v27 = vld [vmem:[%s10873_s17 + $0x2858] sm:$0xff]  ;;  %v16831_v0 = vld [vmem:[#allocation152_spill] sm:$0xff] }
 0x68b   : > { %v16828_v20 = vld [vmem:[#allocation149_spill] sm:$0xff]  ;;  %v4622_v1 = vpop.f32.mrb[154].mxu1 }
 0x68c   : > { %v5926_v40 = vadd.f32 %v16828_v20, %v4619_v47  ;;  %v15012_v26 = vadd.f32 %v7230_v16, %v5924_v10  ;;  %v8714_v56 = vadd.f32 %v8534_v52, %v14795_v34  ;;  %v4623_v51 = vadd.f32 %v4622_v1, %v16830_v12  ;;  %v7236_v21 = vpop.f32.mrb[38].mxu0  ;;  %v4624_v36 = vpop.f32.mrb[155].mxu1  ;;  %4939 = vmatmul.mubr.f32.gmra.mrb[4].mxu1 %v1427_v44  ;;  %v1434_v16 = vld [vmem:[%s10873_s17 + $0x2850] sm:$0xff]  ;;  %v16832_v34 = vld [vmem:[#allocation151_spill] sm:$0xff]  ;;  %v16836_v12 = vld [vmem:[#allocation154_spill] sm:$0xff] }
 0x68d   : > { %v4625_v35 = vadd.f32 %v4624_v36, %v16831_v0  ;;  %v7238_v33 = vpop.f32.mrb[39].mxu0  ;;  %9239 = vmatmul.mubr.msk.f32.gmra.mrb[4].mxu0 %vm1856_vm0, %v1431_v7  ;;  %v8078_v47 = vpop.permute.xlu0 %8077  ;;  %4944 = vmatprep.mubr.f32.mxu1 %v1435_v27  ;;  %v16833_v52 = vld [vmem:[#allocation403_spill] sm:$0xff]  ;;  %v1442_v44 = vld [vmem:[%s10873_s17 + $0x2890] sm:$0xff] }
 0x68e   : > { %16829 = vst [vmem:[#allocation6_spill] sm:$0xff] %v15012_v26  ;;  %v15016_v63 = vadd.f32 %v7232_v37, %v5926_v40  ;;  %8895 = vst.msk [vmem:[%s13640_s11 + $0x288] sm:$0xff] %vm8813_vm1, %v8714_v56  ;;  %v5930_v10 = vadd.f32 %v16832_v34, %v4623_v51  ;;  %v8535_v20 = vadd.f32 %v16833_v52, %v8078_v47  ;;  %8135 = vrot.lane.b32.xlu1 %v15012_v26, %s10557_s6  ;;  %v1438_v37 = vld [vmem:[%s10873_s17 + $0x2870] sm:$0xff]  ;;  %v16834_v40 = vld [vmem:[#allocation153_spill] sm:$0xff] }
 0x68f   : > { %7558 = vmatprep.mubr.f32.mxu0 %v16647_v5  ;;  %v5932_v7 = vadd.f32 %v16834_v40, %v4625_v35  ;;  %v4628_v1 = vpop.f32.mrb[156].mxu1  ;;  %v16837_v34 = vld [vmem:[#allocation156_spill] sm:$0xff] }
 0x690   : > { %v15031_v27 = vadd.f32 %v7236_v21, %v5930_v10  ;;  %v8715_v56 = vadd.f32 %v8535_v20, %v14814_v50  ;;  %v4629_v51 = vadd.f32 %v4628_v1, %v16836_v12  ;;  %v7242_v36 = vpop.f32.mrb[40].mxu0  ;;  %v4630_v0 = vpop.f32.mrb[157].mxu1  ;;  %4945 = vmatmul.mubr.f32.gmra.mrb[6].mxu1 %v1434_v16  ;;  %v1441_v21 = vld [vmem:[%s10873_s17 + $0x2888] sm:$0xff]  ;;  %v16839_v20 = vld [vmem:[#allocation404_spill] sm:$0xff]  ;;  %v16842_v12 = vld [vmem:[#allocation158_spill] sm:$0xff] }
 0x691   : > { %v15035_v47 = vadd.f32 %v7238_v33, %v5932_v7  ;;  %v4631_v52 = vadd.f32 %v4630_v0, %v16837_v34  ;;  %v7244_v26 = vpop.f32.mrb[41].mxu0  ;;  %9240 = vmatmul.mubr.msk.f32.gmra.mrb[6].mxu0 %vm1856_vm0, %v1438_v37  ;;  %v8080_v35 = vpop.permute.xlu1 %8079  ;;  %4950 = vmatprep.mubr.f32.mxu1 %v1442_v44  ;;  %v16838_v50 = vld [vmem:[#allocation155_spill] sm:$0xff]  ;;  %v16840_v7 = vld [vmem:[#allocation157_spill] sm:$0xff] }
 0x692   : > { %16835 = vst [vmem:[#allocation8_spill] sm:$0xff] %v15031_v27  ;;  %8896 = vst.msk [vmem:[%s13640_s11 + $0x290] sm:$0xff] %vm8813_vm1, %v8715_v56  ;;  %v5936_v10 = vadd.f32 %v16838_v50, %v4629_v51  ;;  %v8536_v40 = vadd.f32 %v16839_v20, %v8080_v35  ;;  %8137 = vrot.lane.b32.xlu0 %v15031_v27, %s10557_s6  ;;  %7564 = vmatprep.mubr.f32.mxu0 %v16647_v5  ;;  %v1445_v33 = vld [vmem:[%s10873_s17 + $0x28a8] sm:$0xff]  ;;  %v16843_v50 = vld [vmem:[#allocation160_spill] sm:$0xff] }
 0x693   : > { %v1449_v16 = vld [vmem:[%s10873_s17 + $0x28c8] sm:$0xff]  ;;  %v5938_v37 = vadd.f32 %v16840_v7, %v4631_v52  ;;  %v4634_v1 = vpop.f32.mrb[158].mxu1 }
 0x694   : > { %v15050_v44 = vadd.f32 %v7242_v36, %v5936_v10  ;;  %v8716_v56 = vadd.f32 %v8536_v40, %v14833_v53  ;;  %v4635_v51 = vadd.f32 %v4634_v1, %v16842_v12  ;;  %v7248_v0 = vpop.f32.mrb[42].mxu0  ;;  %v4636_v34 = vpop.f32.mrb[159].mxu1  ;;  %4951 = vmatmul.mubr.f32.gmra.mrb[8].mxu1 %v1441_v21  ;;  %v1448_v36 = vld [vmem:[%s10873_s17 + $0x28c0] sm:$0xff]  ;;  %v16844_v53 = vld [vmem:[#allocation159_spill] sm:$0xff]  ;;  %v16845_v40 = vld [vmem:[#allocation405_spill] sm:$0xff] }
 0x695   : > { %v15054_v35 = vadd.f32 %v7244_v26, %v5938_v37  ;;  %v4637_v20 = vadd.f32 %v4636_v34, %v16843_v50  ;;  %v7250_v27 = vpop.f32.mrb[43].mxu0  ;;  %9241 = vmatmul.mubr.msk.f32.gmra.mrb[8].mxu0 %vm1856_vm0, %v1445_v33  ;;  %v8082_v52 = vpop.permute.xlu0 %8081  ;;  %4956 = vmatprep.mubr.f32.mxu1 %v1449_v16  ;;  %v1452_v26 = vld [vmem:[%s10873_s17 + $0x28e0] sm:$0xff]  ;;  %v16846_v37 = vld [vmem:[#allocation161_spill] sm:$0xff] }
 0x696   : > { %16841 = vst [vmem:[#allocation7_spill] sm:$0xff] %v15050_v44  ;;  %8897 = vst.msk [vmem:[%s13640_s11 + $0x298] sm:$0xff] %vm8813_vm1, %v8716_v56  ;;  %v5942_v10 = vadd.f32 %v16844_v53, %v4635_v51  ;;  %v8537_v7 = vadd.f32 %v16845_v40, %v8082_v52  ;;  %8139 = vrot.lane.b32.xlu1 %v15050_v44, %s10557_s6  ;;  %7570 = vmatprep.mubr.f32.mxu0 %v16647_v5  ;;  %v1456_v21 = vld [vmem:[%s10873_s17 + $0x2900] sm:$0xff]  ;;  %v16849_v53 = vld [vmem:[#allocation164_spill] sm:$0xff] }
 0x697   : > { %v5944_v33 = vadd.f32 %v16846_v37, %v4637_v20  ;;  %v4640_v1 = vpop.f32.mrb[160].mxu1  ;;  %v16848_v12 = vld [vmem:[#allocation162_spill] sm:$0xff] }
 0x698   : > { %v15069_v16 = vadd.f32 %v7248_v0, %v5942_v10  ;;  %v8717_v56 = vadd.f32 %v8537_v7, %v14852_v45  ;;  %v4641_v51 = vadd.f32 %v4640_v1, %v16848_v12  ;;  %v7254_v34 = vpop.f32.mrb[44].mxu0  ;;  %v4642_v50 = vpop.f32.mrb[161].mxu1  ;;  %4957 = vmatmul.mubr.f32.gmra.mrb[10].mxu1 %v1448_v36  ;;  %v1455_v0 = vld [vmem:[%s10873_s17 + $0x28f8] sm:$0xff]  ;;  %v16850_v45 = vld [vmem:[#allocation163_spill] sm:$0xff]  ;;  %v16851_v7 = vld [vmem:[#allocation406_spill] sm:$0xff] }
 0x699   : > { %v15073_v52 = vadd.f32 %v7250_v27, %v5944_v33  ;;  %v4643_v40 = vadd.f32 %v4642_v50, %v16849_v53  ;;  %v7256_v44 = vpop.f32.mrb[45].mxu0  ;;  %9242 = vmatmul.mubr.msk.f32.gmra.mrb[10].mxu0 %vm1856_vm0, %v1452_v26  ;;  %v8084_v20 = vpop.permute.xlu1 %8083  ;;  %4962 = vmatprep.mubr.f32.mxu1 %v1456_v21  ;;  %v1459_v27 = vld [vmem:[%s10873_s17 + $0x2918] sm:$0xff]  ;;  %v16854_v12 = vld [vmem:[#allocation166_spill] sm:$0xff] }
 0x69a   : > { %16847 = vst [vmem:[#allocation399_spill] sm:$0xff] %v15069_v16  ;;  %8898 = vst.msk [vmem:[%s13640_s11 + $0x2a0] sm:$0xff] %vm8813_vm1, %v8717_v56  ;;  %v5948_v10 = vadd.f32 %v16850_v45, %v4641_v51  ;;  %v8538_v37 = vadd.f32 %v16851_v7, %v8084_v20  ;;  %8141 = vrot.lane.b32.xlu0 %v15069_v16, %s10557_s6  ;;  %7576 = vmatprep.mubr.f32.mxu0 %v16647_v5  ;;  %v1463_v36 = vld [vmem:[%s10873_s17 + $0x2938] sm:$0xff]  ;;  %v16855_v45 = vld [vmem:[#allocation168_spill] sm:$0xff] }
 0x69b   : > { %v16852_v33 = vld [vmem:[#allocation165_spill] sm:$0xff]  ;;  %v4646_v1 = vpop.f32.mrb[162].mxu1 }
 0x69c   : > { %v5950_v26 = vadd.f32 %v16852_v33, %v4643_v40  ;;  %v15088_v21 = vadd.f32 %v7254_v34, %v5948_v10  ;;  %v8718_v56 = vadd.f32 %v8538_v37, %v14871_v31  ;;  %v4647_v51 = vadd.f32 %v4646_v1, %v16854_v12  ;;  %v7260_v50 = vpop.f32.mrb[46].mxu0  ;;  %v4648_v53 = vpop.f32.mrb[163].mxu1  ;;  %4963 = vmatmul.mubr.f32.gmra.mrb[12].mxu1 %v1455_v0  ;;  %v1462_v34 = vld [vmem:[%s10873_s17 + $0x2930] sm:$0xff]  ;;  %v16856_v31 = vld [vmem:[#allocation167_spill] sm:$0xff]  ;;  %v16857_v37 = vld [vmem:[#allocation390_spill] sm:$0xff] }
 0x69d   : > { %v4649_v7 = vadd.f32 %v4648_v53, %v16855_v45  ;;  %v7262_v16 = vpop.f32.mrb[47].mxu0  ;;  %9243 = vmatmul.mubr.msk.f32.gmra.mrb[12].mxu0 %vm1856_vm0, %v1459_v27  ;;  %v8086_v40 = vpop.permute.xlu0 %8085  ;;  %4968 = vmatprep.mubr.f32.mxu1 %v1463_v36  ;;  %v1470_v0 = vld [vmem:[%s10873_s17 + $0x2970] sm:$0xff]  ;;  %v16860_v12 = vld [vmem:[#allocation170_spill] sm:$0xff] }
 0x69e   : > { %16853 = vst [vmem:[#allocation9_spill] sm:$0xff] %v15088_v21  ;;  %v15092_v20 = vadd.f32 %v7256_v44, %v5950_v26  ;;  %8899 = vst.msk [vmem:[%s13640_s11 + $0x2a8] sm:$0xff] %vm8813_vm1, %v8718_v56  ;;  %v5954_v10 = vadd.f32 %v16856_v31, %v4647_v51  ;;  %v8539_v33 = vadd.f32 %v16857_v37, %v8086_v40  ;;  %8143 = vrot.lane.b32.xlu1 %v15088_v21, %s10557_s6  ;;  %v1466_v44 = vld [vmem:[%s10873_s17 + $0x2950] sm:$0xff]  ;;  %v16858_v26 = vld [vmem:[#allocation169_spill] sm:$0xff] }
 0x69f   : > { %7582 = vmatprep.mubr.f32.mxu0 %v16647_v5  ;;  %v5956_v27 = vadd.f32 %v16858_v26, %v4649_v7  ;;  %v4652_v1 = vpop.f32.mrb[164].mxu1  ;;  %v16861_v31 = vld [vmem:[#allocation172_spill] sm:$0xff] }
 0x6a0   : > { %v15107_v36 = vadd.f32 %v7260_v50, %v5954_v10  ;;  %v8719_v56 = vadd.f32 %v8539_v33, %v14885_v57  ;;  %v4653_v51 = vadd.f32 %v4652_v1, %v16860_v12  ;;  %v7266_v53 = vpop.f32.mrb[48].mxu0  ;;  %v4654_v45 = vpop.f32.mrb[165].mxu1  ;;  %4969 = vmatmul.mubr.f32.gmra.mrb[14].mxu1 %v1462_v34  ;;  %v1469_v50 = vld [vmem:[%s10873_s17 + $0x2968] sm:$0xff]  ;;  %v16866_v12 = vld [vmem:[#allocation174_spill] sm:$0xff] }
 0x6a1   : > { %v15111_v40 = vadd.f32 %v7262_v16, %v5956_v27  ;;  %v4655_v37 = vadd.f32 %v4654_v45, %v16861_v31  ;;  %v7268_v21 = vpop.f32.mrb[49].mxu0  ;;  %9244 = vmatmul.mubr.msk.f32.gmra.mrb[14].mxu0 %vm1856_vm0, %v1466_v44  ;;  %v8088_v7 = vpop.permute.xlu1 %8087  ;;  %4974 = vmatprep.mubr.f32.mxu1 %v1470_v0  ;;  %v16862_v57 = vld [vmem:[#allocation171_spill] sm:$0xff]  ;;  %v16864_v27 = vld [vmem:[#allocation173_spill] sm:$0xff] }
 0x6a2   : > { %16859 = vst [vmem:[#allocation10_spill] sm:$0xff] %v15107_v36  ;;  %8900 = vst.msk [vmem:[%s13640_s11 + $0x2b0] sm:$0xff] %vm8813_vm1, %v8719_v56  ;;  %v5960_v10 = vadd.f32 %v16862_v57, %v4653_v51  ;;  %v16863_v33 = vld [vmem:[#allocation391_spill] sm:$0xff]  ;;  %8145 = vrot.lane.b32.xlu0 %v15107_v36, %s10557_s6  ;;  %7588 = vmatprep.mubr.f32.mxu0 %v16647_v5  ;;  %v16867_v57 = vld [vmem:[#allocation176_spill] sm:$0xff] }
 0x6a3   : > { %v8540_v26 = vadd.f32 %v16863_v33, %v8088_v7  ;;  %v1473_v16 = vld [vmem:[%s10873_s17 + $0x2988] sm:$0xff]  ;;  %v5962_v44 = vadd.f32 %v16864_v27, %v4655_v37  ;;  %v4658_v1 = vpop.f32.mrb[166].mxu1 }
 0x6a4   : > { %v1477_v34 = vld [vmem:[%s10873_s17 + $0x29a8] sm:$0xff]  ;;  %v15126_v0 = vadd.f32 %v7266_v53, %v5960_v10  ;;  %v4659_v51 = vadd.f32 %v4658_v1, %v16866_v12  ;;  %v7272_v45 = vpop.f32.mrb[50].mxu0  ;;  %v4660_v31 = vpop.f32.mrb[167].mxu1  ;;  %4975 = vmatmul.mubr.f32.gmra.mrb[16].mxu1 %v1469_v50  ;;  %v1476_v53 = vld [vmem:[%s10873_s17 + $0x29a0] sm:$0xff] }
 0x6a5   : > { %v8720_v56 = vadd.f32 %v8540_v26, %v14902_v15  ;;  %v15130_v7 = vadd.f32 %v7268_v21, %v5962_v44  ;;  %v4661_v33 = vadd.f32 %v4660_v31, %v16867_v57  ;;  %v7274_v36 = vpop.f32.mrb[51].mxu0  ;;  %9245 = vmatmul.mubr.msk.f32.gmra.mrb[16].mxu0 %vm1856_vm0, %v1473_v16  ;;  %v8090_v37 = vpop.permute.xlu0 %8089  ;;  %4980 = vmatprep.mubr.f32.mxu1 %v1477_v34  ;;  %v16868_v15 = vld [vmem:[#allocation175_spill] sm:$0xff]  ;;  %v16869_v26 = vld [vmem:[#allocation392_spill] sm:$0xff]  ;;  %v1480_v21 = vld [vmem:[%s10873_s17 + $0x29c0] sm:$0xff] }
 0x6a6   : > { %16865 = vst [vmem:[#allocation12_spill] sm:$0xff] %v15126_v0  ;;  %v5966_v10 = vadd.f32 %v16868_v15, %v4659_v51  ;;  %v8541_v27 = vadd.f32 %v16869_v26, %v8090_v37  ;;  %8147 = vrot.lane.b32.xlu1 %v15126_v0, %s10557_s6  ;;  %7594 = vmatprep.mubr.f32.mxu0 %v16647_v5  ;;  %v1484_v50 = vld [vmem:[%s10873_s17 + $0x29e0] sm:$0xff]  ;;  %v16870_v44 = vld [vmem:[#allocation177_spill] sm:$0xff]  ;;  %v16873_v15 = vld [vmem:[#allocation180_spill] sm:$0xff] }
 0x6a7   : > { %8901 = vst.msk [vmem:[%s13640_s11 + $0x2b8] sm:$0xff] %vm8813_vm1, %v8720_v56  ;;  %v5968_v16 = vadd.f32 %v16870_v44, %v4661_v33  ;;  %v4664_v1 = vpop.f32.mrb[168].mxu1  ;;  %v16872_v12 = vld [vmem:[#allocation178_spill] sm:$0xff] }
 0x6a8   : > { %v15145_v34 = vadd.f32 %v7272_v45, %v5966_v10  ;;  %v8721_v56 = vadd.f32 %v8541_v27, %v14921_v13  ;;  %v4665_v51 = vadd.f32 %v4664_v1, %v16872_v12  ;;  %v7278_v31 = vpop.f32.mrb[52].mxu0  ;;  %v4666_v57 = vpop.f32.mrb[169].mxu1  ;;  %4981 = vmatmul.mubr.f32.gmra.mrb[18].mxu1 %v1476_v53  ;;  %v1483_v45 = vld [vmem:[%s10873_s17 + $0x29d8] sm:$0xff]  ;;  %v16874_v13 = vld [vmem:[#allocation179_spill] sm:$0xff]  ;;  %v16878_v12 = vld [vmem:[#allocation182_spill] sm:$0xff] }
 0x6a9   : > { %v15149_v37 = vadd.f32 %v7274_v36, %v5968_v16  ;;  %v4667_v26 = vadd.f32 %v4666_v57, %v16873_v15  ;;  %v7280_v0 = vpop.f32.mrb[53].mxu0  ;;  %9246 = vmatmul.mubr.msk.f32.gmra.mrb[18].mxu0 %vm1856_vm0, %v1480_v21  ;;  %v8092_v33 = vpop.permute.xlu1 %8091  ;;  %4986 = vmatprep.mubr.f32.mxu1 %v1484_v50  ;;  %v16875_v27 = vld [vmem:[#allocation393_spill] sm:$0xff] }
 0x6aa   : > { %16871 = vst [vmem:[#allocation11_spill] sm:$0xff] %v15145_v34  ;;  %8902 = vst.msk [vmem:[%s13640_s11 + $0x2c0] sm:$0xff] %vm8813_vm1, %v8721_v56  ;;  %v5972_v10 = vadd.f32 %v16874_v13, %v4665_v51  ;;  %v8542_v44 = vadd.f32 %v16875_v27, %v8092_v33  ;;  %8149 = vrot.lane.b32.xlu0 %v15145_v34, %s10557_s6  ;;  %7600 = vmatprep.mubr.f32.mxu0 %v16647_v5  ;;  %v1487_v36 = vld [vmem:[%s10873_s17 + $0x29f8] sm:$0xff]  ;;  %v16879_v13 = vld [vmem:[#allocation184_spill] sm:$0xff] }
 0x6ab   : > { %v1491_v53 = vld [vmem:[%s10873_s17 + $0x2a18] sm:$0xff]  ;;  %v4670_v1 = vpop.f32.mrb[170].mxu1 }
 0x6ac   : > { %v16876_v16 = vld [vmem:[#allocation181_spill] sm:$0xff]  ;;  %v15164_v50 = vadd.f32 %v7278_v31, %v5972_v10  ;;  %v8722_v56 = vadd.f32 %v8542_v44, %v14940_v58  ;;  %v4671_v51 = vadd.f32 %v4670_v1, %v16878_v12  ;;  %v7284_v57 = vpop.f32.mrb[54].mxu0  ;;  %v4672_v15 = vpop.f32.mrb[171].mxu1  ;;  %4987 = vmatmul.mubr.f32.gmra.mrb[20].mxu1 %v1483_v45  ;;  %v1490_v31 = vld [vmem:[%s10873_s17 + $0x2a10] sm:$0xff]  ;;  %v16880_v58 = vld [vmem:[#allocation183_spill] sm:$0xff] }
 0x6ad   : > { %v5974_v21 = vadd.f32 %v16876_v16, %v4667_v26  ;;  %v4673_v27 = vadd.f32 %v4672_v15, %v16879_v13  ;;  %v7286_v34 = vpop.f32.mrb[55].mxu0  ;;  %9247 = vmatmul.mubr.msk.f32.gmra.mrb[20].mxu0 %vm1856_vm0, %v1487_v36  ;;  %v8094_v26 = vpop.permute.xlu0 %8093  ;;  %4992 = vmatprep.mubr.f32.mxu1 %v1491_v53  ;;  %v16881_v44 = vld [vmem:[#allocation394_spill] sm:$0xff]  ;;  %v1498_v45 = vld [vmem:[%s10873_s17 + $0x2a50] sm:$0xff] }
 0x6ae   : > { %16877 = vst [vmem:[#allocation13_spill] sm:$0xff] %v15164_v50  ;;  %8903 = vst.msk [vmem:[%s13640_s11 + $0x2c8] sm:$0xff] %vm8813_vm1, %v8722_v56  ;;  %v5978_v10 = vadd.f32 %v16880_v58, %v4671_v51  ;;  %v8543_v16 = vadd.f32 %v16881_v44, %v8094_v26  ;;  %8151 = vrot.lane.b32.xlu1 %v15164_v50, %s10557_s6  ;;  %7606 = vmatprep.mubr.f32.mxu0 %v16647_v5  ;;  %v16884_v12 = vld [vmem:[#allocation186_spill] sm:$0xff]  ;;  %v16885_v58 = vld [vmem:[#allocation188_spill] sm:$0xff] }
 0x6af   : > { %v15168_v33 = vadd.f32 %v7280_v0, %v5974_v21  ;;  %v1494_v0 = vld [vmem:[%s10873_s17 + $0x2a30] sm:$0xff]  ;;  %v16882_v21 = vld [vmem:[#allocation185_spill] sm:$0xff]  ;;  %v4676_v1 = vpop.f32.mrb[172].mxu1 }
 0x6b0   : > { %v5980_v36 = vadd.f32 %v16882_v21, %v4673_v27  ;;  %v15183_v53 = vadd.f32 %v7284_v57, %v5978_v10  ;;  %v8723_v56 = vadd.f32 %v8543_v16, %v14959_v43  ;;  %v4677_v51 = vadd.f32 %v4676_v1, %v16884_v12  ;;  %v7290_v15 = vpop.f32.mrb[56].mxu0  ;;  %v4678_v13 = vpop.f32.mrb[173].mxu1  ;;  %4993 = vmatmul.mubr.f32.gmra.mrb[22].mxu1 %v1490_v31  ;;  %v1497_v57 = vld [vmem:[%s10873_s17 + $0x2a48] sm:$0xff]  ;;  %v16890_v12 = vld [vmem:[#allocation190_spill] sm:$0xff] }
 0x6b1   : > { %v4679_v44 = vadd.f32 %v4678_v13, %v16885_v58  ;;  %v7292_v50 = vpop.f32.mrb[57].mxu0  ;;  %9248 = vmatmul.mubr.msk.f32.gmra.mrb[22].mxu0 %vm1856_vm0, %v1494_v0  ;;  %v8096_v27 = vpop.permute.xlu1 %8095  ;;  %4998 = vmatprep.mubr.f32.mxu1 %v1498_v45  ;;  %v16886_v43 = vld [vmem:[#allocation187_spill] sm:$0xff] }
 0x6b2   : > { %16883 = vst [vmem:[#allocation14_spill] sm:$0xff] %v15183_v53  ;;  %v15187_v26 = vadd.f32 %v7286_v34, %v5980_v36  ;;  %8904 = vst.msk [vmem:[%s13640_s11 + $0x2d0] sm:$0xff] %vm8813_vm1, %v8723_v56  ;;  %v5984_v10 = vadd.f32 %v16886_v43, %v4677_v51  ;;  %v16887_v16 = vld [vmem:[#allocation395_spill] sm:$0xff]  ;;  %8153 = vrot.lane.b32.xlu0 %v15183_v53, %s10557_s6  ;;  %7612 = vmatprep.mubr.f32.mxu0 %v16647_v5  ;;  %v16888_v36 = vld [vmem:[#allocation189_spill] sm:$0xff] }
 0x6b3   : > { %v8544_v21 = vadd.f32 %v16887_v16, %v8096_v27  ;;  %v1501_v34 = vld [vmem:[%s10873_s17 + $0x2a68] sm:$0xff]  ;;  %v5986_v0 = vadd.f32 %v16888_v36, %v4679_v44  ;;  %v4682_v1 = vpop.f32.mrb[174].mxu1  ;;  %v16891_v43 = vld [vmem:[#allocation192_spill] sm:$0xff] }
 0x6b4   : > { %v1505_v31 = vld [vmem:[%s10873_s17 + $0x2a88] sm:$0xff]  ;;  %v15202_v45 = vadd.f32 %v7290_v15, %v5984_v10  ;;  %v4683_v51 = vadd.f32 %v4682_v1, %v16890_v12  ;;  %v7296_v13 = vpop.f32.mrb[58].mxu0  ;;  %v4684_v58 = vpop.f32.mrb[175].mxu1  ;;  %4999 = vmatmul.mubr.f32.gmra.mrb[24].mxu1 %v1497_v57  ;;  %v1504_v15 = vld [vmem:[%s10873_s17 + $0x2a80] sm:$0xff] }
 0x6b5   : > { %v8724_v56 = vadd.f32 %v8544_v21, %v14978_v54  ;;  %v15206_v27 = vadd.f32 %v7292_v50, %v5986_v0  ;;  %v4685_v16 = vadd.f32 %v4684_v58, %v16891_v43  ;;  %v7298_v53 = vpop.f32.mrb[59].mxu0  ;;  %9249 = vmatmul.mubr.msk.f32.gmra.mrb[24].mxu0 %vm1856_vm0, %v1501_v34  ;;  %v8098_v44 = vpop.permute.xlu0 %8097  ;;  %5004 = vmatprep.mubr.f32.mxu1 %v1505_v31  ;;  %v16892_v54 = vld [vmem:[#allocation191_spill] sm:$0xff]  ;;  %v16893_v21 = vld [vmem:[#allocation396_spill] sm:$0xff]  ;;  %v1508_v50 = vld [vmem:[%s10873_s17 + $0x2aa0] sm:$0xff] }
 0x6b6   : > { %16889 = vst [vmem:[#allocation16_spill] sm:$0xff] %v15202_v45  ;;  %v5990_v10 = vadd.f32 %v16892_v54, %v4683_v51  ;;  %v8545_v36 = vadd.f32 %v16893_v21, %v8098_v44  ;;  %8155 = vrot.lane.b32.xlu1 %v15202_v45, %s10557_s6  ;;  %7618 = vmatprep.mubr.f32.mxu0 %v16647_v5  ;;  %v1512_v57 = vld [vmem:[%s10873_s17 + $0x2ac0] sm:$0xff]  ;;  %v16894_v0 = vld [vmem:[#allocation193_spill] sm:$0xff]  ;;  %v16897_v54 = vld [vmem:[#allocation196_spill] sm:$0xff] }
 0x6b7   : > { %8905 = vst.msk [vmem:[%s13640_s11 + $0x2d8] sm:$0xff] %vm8813_vm1, %v8724_v56  ;;  %v5992_v34 = vadd.f32 %v16894_v0, %v4685_v16  ;;  %v4688_v1 = vpop.f32.mrb[176].mxu1  ;;  %v16896_v12 = vld [vmem:[#allocation194_spill] sm:$0xff] }
 0x6b8   : > { %v15221_v31 = vadd.f32 %v7296_v13, %v5990_v10  ;;  %v8725_v56 = vadd.f32 %v8545_v36, %v14997_v42  ;;  %v4689_v51 = vadd.f32 %v4688_v1, %v16896_v12  ;;  %v7302_v58 = vpop.f32.mrb[60].mxu0  ;;  %v4690_v43 = vpop.f32.mrb[177].mxu1  ;;  %5005 = vmatmul.mubr.f32.gmra.mrb[26].mxu1 %v1504_v15  ;;  %v1511_v13 = vld [vmem:[%s10873_s17 + $0x2ab8] sm:$0xff]  ;;  %v16898_v42 = vld [vmem:[#allocation195_spill] sm:$0xff]  ;;  %v16901_v12 = vld [vmem:[#allocation198_spill] sm:$0xff] }
 0x6b9   : > { %v15225_v44 = vadd.f32 %v7298_v53, %v5992_v34  ;;  %v4691_v21 = vadd.f32 %v4690_v43, %v16897_v54  ;;  %v7304_v45 = vpop.f32.mrb[61].mxu0  ;;  %9250 = vmatmul.mubr.msk.f32.gmra.mrb[26].mxu0 %vm1856_vm0, %v1508_v50  ;;  %v8100_v16 = vpop.permute.xlu1 %8099  ;;  %5010 = vmatprep.mubr.f32.mxu1 %v1512_v57  ;;  %v16899_v36 = vld [vmem:[#allocation397_spill] sm:$0xff] }
 0x6ba   : > { %16895 = vst [vmem:[#allocation15_spill] sm:$0xff] %v15221_v31  ;;  %8906 = vst.msk [vmem:[%s13640_s11 + $0x2e0] sm:$0xff] %vm8813_vm1, %v8725_v56  ;;  %v5996_v10 = vadd.f32 %v16898_v42, %v4689_v51  ;;  %v8546_v0 = vadd.f32 %v8100_v16, %v16899_v36  ;;  %8157 = vrot.lane.b32.xlu0 %v15221_v31, %s10557_s6  ;;  %7624 = vmatprep.mubr.f32.mxu0 %v16647_v5  ;;  %v1515_v53 = vld [vmem:[%s10873_s17 + $0x2ad8] sm:$0xff]  ;;  %v16902_v42 = vld [vmem:[#allocation200_spill] sm:$0xff] }
 0x6bb   : > { %v1519_v15 = vld [vmem:[%s10873_s17 + $0x2af8] sm:$0xff]  ;;  %v4694_v1 = vpop.f32.mrb[178].mxu1 }
 0x6bc   : > { %v16900_v34 = vld [vmem:[#allocation197_spill] sm:$0xff]  ;;  %v15240_v57 = vadd.f32 %v7302_v58, %v5996_v10  ;;  %v8726_v56 = vadd.f32 %v8546_v0, %v15016_v63  ;;  %v4695_v51 = vadd.f32 %v4694_v1, %v16901_v12  ;;  %v7308_v43 = vpop.f32.mrb[62].mxu0  ;;  %v4696_v54 = vpop.f32.mrb[179].mxu1  ;;  %5011 = vmatmul.mubr.f32.gmra.mrb[28].mxu1 %v1511_v13  ;;  %v1518_v58 = vld [vmem:[%s10873_s17 + $0x2af0] sm:$0xff]  ;;  %v16903_v63 = vld [vmem:[#allocation199_spill] sm:$0xff] }
 0x6bd   : > { %v5998_v50 = vadd.f32 %v16900_v34, %v4691_v21  ;;  %v4697_v36 = vadd.f32 %v4696_v54, %v16902_v42  ;;  %v7310_v31 = vpop.f32.mrb[63].mxu0  ;;  %9251 = vmatmul.mubr.msk.f32.gmra.mrb[28].mxu0 %vm1856_vm0, %v1515_v53  ;;  %v8102_v21 = vpop.permute.xlu0 %8101  ;;  %5016 = vmatprep.mubr.f32.mxu1 %v1519_v15  ;;  %v1526_v13 = vld [vmem:[%s10873_s17 + $0x2b30] sm:$0xff]  ;;  %v16904_v34 = vld [vmem:[#allocation201_spill] sm:$0xff] }
 0x6be   : > { %8907 = vst.msk [vmem:[%s13640_s11 + $0x2e8] sm:$0xff] %vm8813_vm1, %v8726_v56  ;;  %v6002_v10 = vadd.f32 %v16903_v63, %v4695_v51  ;;  %v8547_v0 = vadd.f32 %v8102_v21, %v14351_v2  ;;  %8159 = vrot.lane.b32.xlu1 %v15240_v57, %s10557_s6  ;;  %7630 = vmatprep.mubr.f32.mxu0 %v16647_v5  ;;  %v16905_v56 = vld [vmem:[#allocation202_spill] sm:$0xff]  ;;  %v16906_v42 = vld [vmem:[#allocation204_spill] sm:$0xff] }
 0x6bf   : > { %v15244_v16 = vadd.f32 %v7304_v45, %v5998_v50  ;;  %v1522_v45 = vld [vmem:[%s10873_s17 + $0x2b10] sm:$0xff]  ;;  %v6004_v53 = vadd.f32 %v16904_v34, %v4697_v36  ;;  %v4700_v50 = vpop.f32.mrb[180].mxu1  ;;  %v16908_v34 = vld [vmem:[#allocation205_spill] sm:$0xff] }
 0x6c0   : > { %v15259_v15 = vadd.f32 %v7308_v43, %v6002_v10  ;;  %v8727_v1 = vadd.f32 %v8547_v0, %v15035_v47  ;;  %v4701_v12 = vadd.f32 %v4700_v50, %v16905_v56  ;;  %v7314_v2 = vpop.f32.mrb[64].mxu0  ;;  %v4702_v51 = vpop.f32.mrb[181].mxu1  ;;  %5017 = vmatmul.mubr.f32.gmra.mrb[30].mxu1 %v1518_v58  ;;  %v1525_v43 = vld [vmem:[%s10873_s17 + $0x2b28] sm:$0xff] }
 0x6c1   : > { %v15263_v54 = vadd.f32 %v7310_v31, %v6004_v53  ;;  %v4703_v21 = vadd.f32 %v4702_v51, %v16906_v42  ;;  %v7316_v63 = vpop.f32.mrb[65].mxu0  ;;  %9252 = vmatmul.mubr.msk.f32.gmra.mrb[30].mxu0 %vm1856_vm0, %v1522_v45  ;;  %v8104_v36 = vpop.permute.xlu1 %8103  ;;  %5022 = vmatprep.mubr.f32.mxu1 %v1526_v13  ;;  %v16907_v47 = vld [vmem:[#allocation203_spill] sm:$0xff]  ;;  %v16911_v42 = vld [vmem:[#allocation208_spill] sm:$0xff] }
 0x6c2   : > { %8908 = vst.msk [vmem:[%s13640_s11 + $0x2f0] sm:$0xff] %vm8813_vm1, %v8727_v1  ;;  %v6008_v10 = vadd.f32 %v16907_v47, %v4701_v12  ;;  %v8548_v0 = vadd.f32 %v8104_v36, %v14370_v3  ;;  %8161 = vrot.lane.b32.xlu0 %v15259_v15, %s10557_s6  ;;  %7636 = vmatprep.mubr.f32.mxu0 %v16647_v5  ;;  %v1529_v31 = vld [vmem:[%s10873_s17 + $0x2b48] sm:$0xff]  ;;  %v16910_v1 = vld [vmem:[#allocation206_spill] sm:$0xff] }
 0x6c3   : > { %v1533_v58 = vld [vmem:[%s10873_s17 + $0x2b68] sm:$0xff]  ;;  %v6010_v45 = vadd.f32 %v16908_v34, %v4703_v21  ;;  %v4706_v53 = vpop.f32.mrb[182].mxu1  ;;  %v16913_v34 = vld [vmem:[#allocation209_spill] sm:$0xff] }
 0x6c4   : > { %v15278_v13 = vadd.f32 %v7314_v2, %v6008_v10  ;;  %v8728_v50 = vadd.f32 %v8548_v0, %v15054_v35  ;;  %v4707_v56 = vadd.f32 %v4706_v53, %v16910_v1  ;;  %v7320_v3 = vpop.f32.mrb[66].mxu0  ;;  %v4708_v12 = vpop.f32.mrb[183].mxu1  ;;  %5023 = vmatmul.mubr.f32.gmra.mrb[32].mxu1 %v1525_v43  ;;  %v1532_v2 = vld [vmem:[%s10873_s17 + $0x2b60] sm:$0xff]  ;;  %v16912_v35 = vld [vmem:[#allocation207_spill] sm:$0xff] }
 0x6c5   : > { %v15282_v51 = vadd.f32 %v7316_v63, %v6010_v45  ;;  %v4709_v36 = vadd.f32 %v4708_v12, %v16911_v42  ;;  %v7322_v47 = vpop.f32.mrb[67].mxu0  ;;  %9253 = vmatmul.mubr.msk.f32.gmra.mrb[32].mxu0 %vm1856_vm0, %v1529_v31  ;;  %v8106_v21 = vpop.permute.xlu0 %8105  ;;  %5028 = vmatprep.mubr.f32.mxu1 %v1533_v58  ;;  %v1540_v43 = vld [vmem:[%s10873_s17 + $0x2ba0] sm:$0xff]  ;;  %v16915_v42 = vld [vmem:[#allocation212_spill] sm:$0xff] }
 0x6c6   : > { %16909 = vst [vmem:[#allocation17_spill] sm:$0xff] %v15278_v13  ;;  %8909 = vst.msk [vmem:[%s13640_s11 + $0x2f8] sm:$0xff] %vm8813_vm1, %v8728_v50  ;;  %v6014_v10 = vadd.f32 %v16912_v35, %v4707_v56  ;;  %v8549_v0 = vadd.f32 %v8106_v21, %v14389_v62  ;;  %8163 = vrot.lane.b32.xlu1 %v15278_v13, %s10557_s6  ;;  %7642 = vmatprep.mubr.f32.mxu0 %v16647_v5  ;;  %v1536_v63 = vld [vmem:[%s10873_s17 + $0x2b80] sm:$0xff] }
 0x6c7   : > { %v6016_v31 = vadd.f32 %v16913_v34, %v4709_v36  ;;  %v4712_v45 = vpop.f32.mrb[184].mxu1  ;;  %v16914_v50 = vld [vmem:[#allocation210_spill] sm:$0xff]  ;;  %v1539_v36 = vld [vmem:[%s10873_s17 + $0x2b98] sm:$0xff] }
 0x6c8   : > { %v15297_v58 = vadd.f32 %v7320_v3, %v6014_v10  ;;  %v8729_v53 = vadd.f32 %v8549_v0, %v15073_v52  ;;  %v4713_v1 = vadd.f32 %v4712_v45, %v16914_v50  ;;  %v7326_v62 = vpop.f32.mrb[68].mxu0  ;;  %v4714_v56 = vpop.f32.mrb[185].mxu1  ;;  %5029 = vmatmul.mubr.f32.gmra.mrb[184].mxu1 %v1532_v2  ;;  %v16916_v52 = vld [vmem:[#allocation211_spill] sm:$0xff]  ;;  %v1547_v2 = vld [vmem:[%s10873_s17 + $0x2bd8] sm:$0xff]  ;;  %v16918_v45 = vld [vmem:[#allocation214_spill] sm:$0xff] }
 0x6c9   : > { %v15301_v12 = vadd.f32 %v7322_v47, %v6016_v31  ;;  %v4715_v21 = vadd.f32 %v4714_v56, %v16915_v42  ;;  %v7328_v35 = vpop.f32.mrb[69].mxu0  ;;  %v8108_v13 = vpop.permute.xlu1 %8107  ;;  %5033 = vmatprep.mubr.f32.mxu1 %v1540_v43  ;;  %9254 = vmatmul.mubr.msk.f32.gmra.mrb[140].mxu0 %vm1856_vm0, %v1536_v63  ;;  %v1543_v47 = vld [vmem:[%s10873_s17 + $0x2bb8] sm:$0xff] }
 0x6ca   : > { %8910 = vst.msk [vmem:[%s13640_s11 + $0x300] sm:$0xff] %vm8813_vm1, %v8729_v53  ;;  %v6020_v3 = vadd.f32 %v16916_v52, %v4713_v1  ;;  %v8550_v10 = vadd.f32 %v8108_v13, %v14408_v60  ;;  %8165 = vrot.lane.b32.xlu0 %v15297_v58, %s10557_s6  ;;  %7647 = vmatprep.mubr.f32.mxu0 %v16647_v5  ;;  %v16917_v0 = vld [vmem:[#allocation213_spill] sm:$0xff]  ;;  %v16919_v1 = vld [vmem:[#allocation216_spill] sm:$0xff] }
 0x6cb   : > { %v6022_v43 = vadd.f32 %v16917_v0, %v4715_v21  ;;  %v4718_v34 = vpop.f32.mrb[34].mxu1  ;;  %v1546_v21 = vld [vmem:[%s10873_s17 + $0x2bd0] sm:$0xff] }
 0x6cc   : > { %v15316_v31 = vadd.f32 %v7326_v62, %v6020_v3  ;;  %v8730_v63 = vadd.f32 %v8550_v10, %v15092_v20  ;;  %v4719_v53 = vadd.f32 %v4718_v34, %v16918_v45  ;;  %v7332_v60 = vpop.f32.mrb[70].mxu0  ;;  %v4720_v13 = vpop.f32.mrb[35].mxu1  ;;  %5034 = vmatmul.mubr.f32.gmra.mrb[34].mxu1 %v1539_v36  ;;  %v16920_v20 = vld [vmem:[#allocation215_spill] sm:$0xff]  ;;  %v1554_v36 = vld [vmem:[%s10873_s17 + $0x2c10] sm:$0xff]  ;;  %v16921_v10 = vld [vmem:[#allocation217_spill] sm:$0xff] }
 0x6cd   : > { %v15320_v50 = vadd.f32 %v7328_v35, %v6022_v43  ;;  %v4721_v56 = vadd.f32 %v4720_v13, %v16919_v1  ;;  %v7334_v42 = vpop.f32.mrb[71].mxu0  ;;  %v8110_v52 = vpop.permute.xlu0 %8109  ;;  %5038 = vmatprep.mubr.f32.mxu1 %v1547_v2  ;;  %9255 = vmatmul.mubr.msk.f32.gmra.mrb[142].mxu0 %vm1856_vm0, %v1543_v47  ;;  %v1550_v35 = vld [vmem:[%s10873_s17 + $0x2bf0] sm:$0xff]  ;;  %v16922_v34 = vld [vmem:[#allocation218_spill] sm:$0xff] }
 0x6ce   : > { %8911 = vst.msk [vmem:[%s13640_s11 + $0x308] sm:$0xff] %vm8813_vm1, %v8730_v63  ;;  %v6026_v62 = vadd.f32 %v16920_v20, %v4719_v53  ;;  %v8551_v3 = vadd.f32 %v8110_v52, %v14427_v46  ;;  %8167 = vrot.lane.b32.xlu1 %v15316_v31, %s10557_s6  ;;  %7652 = vmatprep.mubr.f32.mxu0 %v16647_v5  ;;  %v16923_v13 = vld [vmem:[#allocation220_spill] sm:$0xff] }
 0x6cf   : > { %v6028_v2 = vadd.f32 %v16921_v10, %v4721_v56  ;;  %v4724_v0 = vpop.f32.mrb[186].mxu1  ;;  %v1553_v56 = vld [vmem:[%s10873_s17 + $0x2c08] sm:$0xff] }
 0x6d0   : > { %v15335_v43 = vadd.f32 %v7332_v60, %v6026_v62  ;;  %v8731_v47 = vadd.f32 %v8551_v3, %v15111_v40  ;;  %v4725_v63 = vadd.f32 %v4724_v0, %v16922_v34  ;;  %v7338_v46 = vpop.f32.mrb[72].mxu0  ;;  %v4726_v45 = vpop.f32.mrb[187].mxu1  ;;  %5039 = vmatmul.mubr.f32.gmra.mrb[186].mxu1 %v1546_v21  ;;  %v16924_v40 = vld [vmem:[#allocation219_spill] sm:$0xff]  ;;  %v16925_v3 = vld [vmem:[#allocation221_spill] sm:$0xff]  ;;  %v16926_v0 = vld [vmem:[#allocation222_spill] sm:$0xff] }
 0x6d1   : > { %v15339_v53 = vadd.f32 %v7334_v42, %v6028_v2  ;;  %v4727_v1 = vadd.f32 %v4726_v45, %v16923_v13  ;;  %v7340_v52 = vpop.f32.mrb[73].mxu0  ;;  %v8112_v20 = vpop.permute.xlu1 %8111  ;;  %5043 = vmatprep.mubr.f32.mxu1 %v1554_v36  ;;  %9256 = vmatmul.mubr.msk.f32.gmra.mrb[144].mxu0 %vm1856_vm0, %v1550_v35  ;;  %v1561_v21 = vld [vmem:[%s10873_s17 + $0x2c48] sm:$0xff]  ;;  %v16927_v45 = vld [vmem:[#allocation224_spill] sm:$0xff] }
 0x6d2   : > { %8912 = vst.msk [vmem:[%s13640_s11 + $0x310] sm:$0xff] %vm8813_vm1, %v8731_v47  ;;  %v6032_v60 = vadd.f32 %v16924_v40, %v4725_v63  ;;  %v8552_v62 = vadd.f32 %v8112_v20, %v14446_v8  ;;  %8169 = vrot.lane.b32.xlu0 %v15335_v43, %s10557_s6  ;;  %7657 = vmatprep.mubr.f32.mxu0 %v16647_v5  ;;  %v1557_v42 = vld [vmem:[%s10873_s17 + $0x2c28] sm:$0xff] }
 0x6d3   : > { %v6034_v36 = vadd.f32 %v16925_v3, %v4727_v1  ;;  %v4730_v10 = vpop.f32.mrb[188].mxu1  ;;  %v1560_v1 = vld [vmem:[%s10873_s17 + $0x2c40] sm:$0xff] }
 0x6d4   : > { %v15354_v2 = vadd.f32 %v7338_v46, %v6032_v60  ;;  %v8732_v35 = vadd.f32 %v8552_v62, %v15130_v7  ;;  %v4731_v47 = vadd.f32 %v4730_v10, %v16926_v0  ;;  %v7344_v8 = vpop.f32.mrb[74].mxu0  ;;  %v4732_v34 = vpop.f32.mrb[189].mxu1  ;;  %5044 = vmatmul.mubr.f32.gmra.mrb[188].mxu1 %v1553_v56  ;;  %v16928_v7 = vld [vmem:[#allocation223_spill] sm:$0xff]  ;;  %v1568_v56 = vld [vmem:[%s10873_s17 + $0x2c80] sm:$0xff]  ;;  %v16929_v62 = vld [vmem:[#allocation225_spill] sm:$0xff] }
 0x6d5   : > { %v15358_v63 = vadd.f32 %v7340_v52, %v6034_v36  ;;  %v4733_v13 = vadd.f32 %v4732_v34, %v16927_v45  ;;  %v7346_v20 = vpop.f32.mrb[75].mxu0  ;;  %v8114_v40 = vpop.permute.xlu0 %8113  ;;  %5048 = vmatprep.mubr.f32.mxu1 %v1561_v21  ;;  %9257 = vmatmul.mubr.msk.f32.gmra.mrb[146].mxu0 %vm1856_vm0, %v1557_v42  ;;  %v1564_v52 = vld [vmem:[%s10873_s17 + $0x2c60] sm:$0xff]  ;;  %v16931_v34 = vld [vmem:[#allocation228_spill] sm:$0xff] }
 0x6d6   : > { %8913 = vst.msk [vmem:[%s13640_s11 + $0x318] sm:$0xff] %vm8813_vm1, %v8732_v35  ;;  %v6038_v46 = vadd.f32 %v16928_v7, %v4731_v47  ;;  %v8553_v60 = vadd.f32 %v8114_v40, %v14465_v14  ;;  %8171 = vrot.lane.b32.xlu1 %v15354_v2, %s10557_s6  ;;  %7662 = vmatprep.mubr.f32.mxu0 %v16647_v5  ;;  %v16930_v10 = vld [vmem:[#allocation226_spill] sm:$0xff] }
 0x6d7   : > { %v6040_v21 = vadd.f32 %v16929_v62, %v4733_v13  ;;  %v4736_v3 = vpop.f32.mrb[190].mxu1  ;;  %v1567_v13 = vld [vmem:[%s10873_s17 + $0x2c78] sm:$0xff] }
 0x6d8   : > { %v15373_v36 = vadd.f32 %v7344_v8, %v6038_v46  ;;  %v8733_v42 = vadd.f32 %v8553_v60, %v15149_v37  ;;  %v4737_v35 = vadd.f32 %v4736_v3, %v16930_v10  ;;  %v7350_v14 = vpop.f32.mrb[76].mxu0  ;;  %v4738_v0 = vpop.f32.mrb[191].mxu1  ;;  %5049 = vmatmul.mubr.f32.gmra.mrb[190].mxu1 %v1560_v1  ;;  %v16932_v37 = vld [vmem:[#allocation227_spill] sm:$0xff]  ;;  %v1575_v1 = vld [vmem:[%s10873_s17 + $0x2cb8] sm:$0xff]  ;;  %v16934_v3 = vld [vmem:[#allocation230_spill] sm:$0xff] }
 0x6d9   : > { %v15377_v47 = vadd.f32 %v7346_v20, %v6040_v21  ;;  %v4739_v45 = vadd.f32 %v4738_v0, %v16931_v34  ;;  %v7352_v40 = vpop.f32.mrb[77].mxu0  ;;  %v8116_v7 = vpop.permute.xlu1 %8115  ;;  %5053 = vmatprep.mubr.f32.mxu1 %v1568_v56  ;;  %9258 = vmatmul.mubr.msk.f32.gmra.mrb[148].mxu0 %vm1856_vm0, %v1564_v52  ;;  %v1571_v20 = vld [vmem:[%s10873_s17 + $0x2c98] sm:$0xff]  ;;  %v16935_v0 = vld [vmem:[#allocation232_spill] sm:$0xff] }
 0x6da   : > { %8914 = vst.msk [vmem:[%s13640_s11 + $0x320] sm:$0xff] %vm8813_vm1, %v8733_v42  ;;  %v6044_v8 = vadd.f32 %v16932_v37, %v4737_v35  ;;  %v8554_v46 = vadd.f32 %v8116_v7, %v14484_v18  ;;  %8173 = vrot.lane.b32.xlu0 %v15373_v36, %s10557_s6  ;;  %7667 = vmatprep.mubr.f32.mxu0 %v16647_v5  ;;  %v16933_v60 = vld [vmem:[#allocation229_spill] sm:$0xff] }
 0x6db   : > { %v6046_v56 = vadd.f32 %v16933_v60, %v4739_v45  ;;  %v4742_v62 = vpop.f32.mrb[192].mxu1  ;;  %v1574_v45 = vld [vmem:[%s10873_s17 + $0x2cb0] sm:$0xff] }
 0x6dc   : > { %v15392_v21 = vadd.f32 %v7350_v14, %v6044_v8  ;;  %v8734_v52 = vadd.f32 %v8554_v46, %v15168_v33  ;;  %v4743_v42 = vadd.f32 %v4742_v62, %v16934_v3  ;;  %v7356_v18 = vpop.f32.mrb[78].mxu0  ;;  %v4744_v10 = vpop.f32.mrb[193].mxu1  ;;  %5054 = vmatmul.mubr.f32.gmra.mrb[192].mxu1 %v1567_v13  ;;  %v16936_v33 = vld [vmem:[#allocation231_spill] sm:$0xff]  ;;  %v1582_v13 = vld [vmem:[%s10873_s17 + $0x2cf0] sm:$0xff]  ;;  %v16937_v46 = vld [vmem:[#allocation233_spill] sm:$0xff] }
 0x6dd   : > { %v15396_v35 = vadd.f32 %v7352_v40, %v6046_v56  ;;  %v4745_v34 = vadd.f32 %v4744_v10, %v16935_v0  ;;  %v7358_v7 = vpop.f32.mrb[79].mxu0  ;;  %v8118_v37 = vpop.permute.xlu0 %8117  ;;  %5058 = vmatprep.mubr.f32.mxu1 %v1575_v1  ;;  %9259 = vmatmul.mubr.msk.f32.gmra.mrb[150].mxu0 %vm1856_vm0, %v1571_v20  ;;  %v1578_v40 = vld [vmem:[%s10873_s17 + $0x2cd0] sm:$0xff]  ;;  %v16938_v62 = vld [vmem:[#allocation234_spill] sm:$0xff] }
 0x6de   : > { %8915 = vst.msk [vmem:[%s13640_s11 + $0x328] sm:$0xff] %vm8813_vm1, %v8734_v52  ;;  %v6050_v14 = vadd.f32 %v16936_v33, %v4743_v42  ;;  %v8555_v8 = vadd.f32 %v8118_v37, %v14503_v61  ;;  %8175 = vrot.lane.b32.xlu1 %v15392_v21, %s10557_s6  ;;  %7672 = vmatprep.mubr.f32.mxu0 %v16647_v5  ;;  %v16939_v10 = vld [vmem:[#allocation236_spill] sm:$0xff] }
 0x6df   : > { %v6052_v1 = vadd.f32 %v16937_v46, %v4745_v34  ;;  %v4748_v60 = vpop.f32.mrb[194].mxu1  ;;  %v1581_v34 = vld [vmem:[%s10873_s17 + $0x2ce8] sm:$0xff] }
 0x6e0   : > { %v15411_v56 = vadd.f32 %v7356_v18, %v6050_v14  ;;  %v8735_v20 = vadd.f32 %v8555_v8, %v15187_v26  ;;  %v4749_v52 = vadd.f32 %v4748_v60, %v16938_v62  ;;  %v7362_v61 = vpop.f32.mrb[80].mxu0  ;;  %v4750_v3 = vpop.f32.mrb[195].mxu1  ;;  %5059 = vmatmul.mubr.f32.gmra.mrb[194].mxu1 %v1574_v45  ;;  %v16940_v26 = vld [vmem:[#allocation235_spill] sm:$0xff]  ;;  %v16941_v8 = vld [vmem:[#allocation237_spill] sm:$0xff]  ;;  %v16942_v60 = vld [vmem:[#allocation238_spill] sm:$0xff] }
 0x6e1   : > { %v15415_v42 = vadd.f32 %v7358_v7, %v6052_v1  ;;  %v4751_v0 = vadd.f32 %v4750_v3, %v16939_v10  ;;  %v7364_v37 = vpop.f32.mrb[81].mxu0  ;;  %v8120_v33 = vpop.permute.xlu1 %8119  ;;  %5063 = vmatprep.mubr.f32.mxu1 %v1582_v13  ;;  %9260 = vmatmul.mubr.msk.f32.gmra.mrb[152].mxu0 %vm1856_vm0, %v1578_v40  ;;  %v1589_v45 = vld [vmem:[%s10873_s17 + $0x2d28] sm:$0xff]  ;;  %v16943_v3 = vld [vmem:[#allocation240_spill] sm:$0xff] }
 0x6e2   : > { %8916 = vst.msk [vmem:[%s13640_s11 + $0x330] sm:$0xff] %vm8813_vm1, %v8735_v20  ;;  %v6056_v18 = vadd.f32 %v16940_v26, %v4749_v52  ;;  %v8556_v14 = vadd.f32 %v8120_v33, %v14522_v22  ;;  %8177 = vrot.lane.b32.xlu0 %v15411_v56, %s10557_s6  ;;  %7677 = vmatprep.mubr.f32.mxu0 %v16647_v5  ;;  %v1585_v7 = vld [vmem:[%s10873_s17 + $0x2d08] sm:$0xff] }
 0x6e3   : > { %v6058_v13 = vadd.f32 %v16941_v8, %v4751_v0  ;;  %v4754_v46 = vpop.f32.mrb[196].mxu1  ;;  %v1588_v0 = vld [vmem:[%s10873_s17 + $0x2d20] sm:$0xff] }
 0x6e4   : > { %v15430_v1 = vadd.f32 %v7362_v61, %v6056_v18  ;;  %v8736_v40 = vadd.f32 %v8556_v14, %v15206_v27  ;;  %v4755_v20 = vadd.f32 %v4754_v46, %v16942_v60  ;;  %v7368_v22 = vpop.f32.mrb[82].mxu0  ;;  %v4756_v62 = vpop.f32.mrb[197].mxu1  ;;  %5064 = vmatmul.mubr.f32.gmra.mrb[196].mxu1 %v1581_v34  ;;  %v16944_v27 = vld [vmem:[#allocation239_spill] sm:$0xff]  ;;  %v1596_v34 = vld [vmem:[%s10873_s17 + $0x2d60] sm:$0xff]  ;;  %v16945_v14 = vld [vmem:[#allocation241_spill] sm:$0xff] }
 0x6e5   : > { %v15434_v52 = vadd.f32 %v7364_v37, %v6058_v13  ;;  %v4757_v10 = vadd.f32 %v4756_v62, %v16943_v3  ;;  %v7370_v33 = vpop.f32.mrb[83].mxu0  ;;  %v8122_v26 = vpop.permute.xlu0 %8121  ;;  %5068 = vmatprep.mubr.f32.mxu1 %v1589_v45  ;;  %9261 = vmatmul.mubr.msk.f32.gmra.mrb[154].mxu0 %vm1856_vm0, %v1585_v7  ;;  %v1592_v37 = vld [vmem:[%s10873_s17 + $0x2d40] sm:$0xff]  ;;  %v16947_v62 = vld [vmem:[#allocation244_spill] sm:$0xff] }
 0x6e6   : > { %8917 = vst.msk [vmem:[%s13640_s11 + $0x338] sm:$0xff] %vm8813_vm1, %v8736_v40  ;;  %v6062_v61 = vadd.f32 %v16944_v27, %v4755_v20  ;;  %v8557_v18 = vadd.f32 %v8122_v26, %v14541_v55  ;;  %8179 = vrot.lane.b32.xlu1 %v15430_v1, %s10557_s6  ;;  %7682 = vmatprep.mubr.f32.mxu0 %v16647_v5  ;;  %v16946_v46 = vld [vmem:[#allocation242_spill] sm:$0xff] }
 0x6e7   : > { %v6064_v45 = vadd.f32 %v16945_v14, %v4757_v10  ;;  %v4760_v8 = vpop.f32.mrb[198].mxu1  ;;  %v1595_v10 = vld [vmem:[%s10873_s17 + $0x2d58] sm:$0xff] }
 0x6e8   : > { %v15449_v13 = vadd.f32 %v7368_v22, %v6062_v61  ;;  %v8737_v7 = vadd.f32 %v8557_v18, %v15225_v44  ;;  %v4761_v40 = vadd.f32 %v4760_v8, %v16946_v46  ;;  %v7374_v55 = vpop.f32.mrb[84].mxu0  ;;  %v4762_v60 = vpop.f32.mrb[199].mxu1  ;;  %5069 = vmatmul.mubr.f32.gmra.mrb[198].mxu1 %v1588_v0  ;;  %v16948_v44 = vld [vmem:[#allocation243_spill] sm:$0xff]  ;;  %v1603_v0 = vld [vmem:[%s10873_s17 + $0x2d98] sm:$0xff]  ;;  %v16950_v8 = vld [vmem:[#allocation246_spill] sm:$0xff] }
 0x6e9   : > { %v15453_v20 = vadd.f32 %v7370_v33, %v6064_v45  ;;  %v4763_v3 = vadd.f32 %v4762_v60, %v16947_v62  ;;  %v7376_v26 = vpop.f32.mrb[85].mxu0  ;;  %v8124_v27 = vpop.permute.xlu1 %8123  ;;  %5073 = vmatprep.mubr.f32.mxu1 %v1596_v34  ;;  %9262 = vmatmul.mubr.msk.f32.gmra.mrb[156].mxu0 %vm1856_vm0, %v1592_v37  ;;  %v1599_v33 = vld [vmem:[%s10873_s17 + $0x2d78] sm:$0xff]  ;;  %v16951_v60 = vld [vmem:[#allocation248_spill] sm:$0xff] }
 0x6ea   : > { %8918 = vst.msk [vmem:[%s13640_s11 + $0x340] sm:$0xff] %vm8813_vm1, %v8737_v7  ;;  %v6068_v22 = vadd.f32 %v16948_v44, %v4761_v40  ;;  %v8558_v61 = vadd.f32 %v8124_v27, %v14560_v6  ;;  %8181 = vrot.lane.b32.xlu0 %v15449_v13, %s10557_s6  ;;  %7687 = vmatprep.mubr.f32.mxu0 %v16647_v5  ;;  %v16949_v18 = vld [vmem:[#allocation245_spill] sm:$0xff] }
 0x6eb   : > { %v6070_v34 = vadd.f32 %v16949_v18, %v4763_v3  ;;  %v4766_v14 = vpop.f32.mrb[200].mxu1  ;;  %v1602_v3 = vld [vmem:[%s10873_s17 + $0x2d90] sm:$0xff] }
 0x6ec   : > { %v15468_v45 = vadd.f32 %v7374_v55, %v6068_v22  ;;  %v8738_v37 = vadd.f32 %v8558_v61, %v15244_v16  ;;  %v4767_v7 = vadd.f32 %v4766_v14, %v16950_v8  ;;  %v7380_v6 = vpop.f32.mrb[86].mxu0  ;;  %v4768_v46 = vpop.f32.mrb[201].mxu1  ;;  %5074 = vmatmul.mubr.f32.gmra.mrb[200].mxu1 %v1595_v10  ;;  %v16952_v16 = vld [vmem:[#allocation247_spill] sm:$0xff]  ;;  %v1610_v10 = vld [vmem:[%s10873_s17 + $0x2dd0] sm:$0xff]  ;;  %v16953_v61 = vld [vmem:[#allocation249_spill] sm:$0xff] }
 0x6ed   : > { %v15472_v40 = vadd.f32 %v7376_v26, %v6070_v34  ;;  %v4769_v62 = vadd.f32 %v4768_v46, %v16951_v60  ;;  %v7382_v27 = vpop.f32.mrb[87].mxu0  ;;  %v8126_v44 = vpop.permute.xlu0 %8125  ;;  %5078 = vmatprep.mubr.f32.mxu1 %v1603_v0  ;;  %9263 = vmatmul.mubr.msk.f32.gmra.mrb[158].mxu0 %vm1856_vm0, %v1599_v33  ;;  %v1606_v26 = vld [vmem:[%s10873_s17 + $0x2db0] sm:$0xff]  ;;  %v16954_v14 = vld [vmem:[#allocation250_spill] sm:$0xff] }
 0x6ee   : > { %8919 = vst.msk [vmem:[%s13640_s11 + $0x348] sm:$0xff] %vm8813_vm1, %v8738_v37  ;;  %v6074_v55 = vadd.f32 %v16952_v16, %v4767_v7  ;;  %v8559_v22 = vadd.f32 %v8126_v44, %v14579_v23  ;;  %8183 = vrot.lane.b32.xlu1 %v15468_v45, %s10557_s6  ;;  %7692 = vmatprep.mubr.f32.mxu0 %v16647_v5  ;;  %v16955_v46 = vld [vmem:[#allocation252_spill] sm:$0xff] }
 0x6ef   : > { %v6076_v0 = vadd.f32 %v16953_v61, %v4769_v62  ;;  %v4772_v18 = vpop.f32.mrb[202].mxu1  ;;  %v1609_v62 = vld [vmem:[%s10873_s17 + $0x2dc8] sm:$0xff] }
 0x6f0   : > { %v15487_v34 = vadd.f32 %v7380_v6, %v6074_v55  ;;  %v8739_v33 = vadd.f32 %v8559_v22, %v15263_v54  ;;  %v4773_v37 = vadd.f32 %v4772_v18, %v16954_v14  ;;  %v7386_v23 = vpop.f32.mrb[88].mxu0  ;;  %v4774_v8 = vpop.f32.mrb[203].mxu1  ;;  %5079 = vmatmul.mubr.f32.gmra.mrb[202].mxu1 %v1602_v3  ;;  %v16956_v54 = vld [vmem:[#allocation251_spill] sm:$0xff]  ;;  %v16957_v22 = vld [vmem:[#allocation253_spill] sm:$0xff]  ;;  %v16958_v18 = vld [vmem:[#allocation254_spill] sm:$0xff] }
 0x6f1   : > { %v15491_v7 = vadd.f32 %v7382_v27, %v6076_v0  ;;  %v4775_v60 = vadd.f32 %v4774_v8, %v16955_v46  ;;  %v7388_v44 = vpop.f32.mrb[89].mxu0  ;;  %v8128_v16 = vpop.permute.xlu1 %8127  ;;  %5083 = vmatprep.mubr.f32.mxu1 %v1610_v10  ;;  %9264 = vmatmul.mubr.msk.f32.gmra.mrb[160].mxu0 %vm1856_vm0, %v1606_v26  ;;  %v1617_v3 = vld [vmem:[%s10873_s17 + $0x2e08] sm:$0xff]  ;;  %v16959_v8 = vld [vmem:[#allocation256_spill] sm:$0xff] }
 0x6f2   : > { %8920 = vst.msk [vmem:[%s13640_s11 + $0x350] sm:$0xff] %vm8813_vm1, %v8739_v33  ;;  %v6080_v6 = vadd.f32 %v16956_v54, %v4773_v37  ;;  %v8560_v55 = vadd.f32 %v8128_v16, %v14598_v32  ;;  %8185 = vrot.lane.b32.xlu0 %v15487_v34, %s10557_s6  ;;  %7697 = vmatprep.mubr.f32.mxu0 %v16647_v5  ;;  %v1613_v27 = vld [vmem:[%s10873_s17 + $0x2de8] sm:$0xff] }
 0x6f3   : > { %v6082_v10 = vadd.f32 %v16957_v22, %v4775_v60  ;;  %v4778_v61 = vpop.f32.mrb[204].mxu1  ;;  %v1616_v60 = vld [vmem:[%s10873_s17 + $0x2e00] sm:$0xff] }
 0x6f4   : > { %v15506_v0 = vadd.f32 %v7386_v23, %v6080_v6  ;;  %v8740_v26 = vadd.f32 %v8560_v55, %v15282_v51  ;;  %v4779_v33 = vadd.f32 %v4778_v61, %v16958_v18  ;;  %v7392_v32 = vpop.f32.mrb[90].mxu0  ;;  %v4780_v14 = vpop.f32.mrb[205].mxu1  ;;  %5084 = vmatmul.mubr.f32.gmra.mrb[204].mxu1 %v1609_v62  ;;  %v16960_v51 = vld [vmem:[#allocation255_spill] sm:$0xff]  ;;  %v1624_v62 = vld [vmem:[%s10873_s17 + $0x2e40] sm:$0xff]  ;;  %v16961_v55 = vld [vmem:[#allocation257_spill] sm:$0xff] }
 0x6f5   : > { %v15510_v37 = vadd.f32 %v7388_v44, %v6082_v10  ;;  %v4781_v46 = vadd.f32 %v4780_v14, %v16959_v8  ;;  %v7394_v16 = vpop.f32.mrb[91].mxu0  ;;  %v8130_v54 = vpop.permute.xlu0 %8129  ;;  %5088 = vmatprep.mubr.f32.mxu1 %v1617_v3  ;;  %9265 = vmatmul.mubr.msk.f32.gmra.mrb[162].mxu0 %vm1856_vm0, %v1613_v27  ;;  %v1620_v44 = vld [vmem:[%s10873_s17 + $0x2e20] sm:$0xff]  ;;  %v16963_v14 = vld [vmem:[#allocation260_spill] sm:$0xff] }
 0x6f6   : > { %8921 = vst.msk [vmem:[%s13640_s11 + $0x358] sm:$0xff] %vm8813_vm1, %v8740_v26  ;;  %v6086_v23 = vadd.f32 %v16960_v51, %v4779_v33  ;;  %v8561_v6 = vadd.f32 %v8130_v54, %v14617_v24  ;;  %8187 = vrot.lane.b32.xlu1 %v15506_v0, %s10557_s6  ;;  %7702 = vmatprep.mubr.f32.mxu0 %v16647_v5  ;;  %v16962_v61 = vld [vmem:[#allocation258_spill] sm:$0xff] }
 0x6f7   : > { %v6088_v3 = vadd.f32 %v16961_v55, %v4781_v46  ;;  %v4784_v22 = vpop.f32.mrb[206].mxu1  ;;  %v1623_v46 = vld [vmem:[%s10873_s17 + $0x2e38] sm:$0xff] }
 0x6f8   : > { %v15525_v10 = vadd.f32 %v7392_v32, %v6086_v23  ;;  %v8741_v27 = vadd.f32 %v8561_v6, %v15301_v12  ;;  %v4785_v26 = vadd.f32 %v4784_v22, %v16962_v61  ;;  %v7398_v24 = vpop.f32.mrb[92].mxu0  ;;  %v4786_v18 = vpop.f32.mrb[207].mxu1  ;;  %5089 = vmatmul.mubr.f32.gmra.mrb[206].mxu1 %v1616_v60  ;;  %v16964_v12 = vld [vmem:[#allocation259_spill] sm:$0xff]  ;;  %v1631_v60 = vld [vmem:[%s10873_s17 + $0x2e78] sm:$0xff]  ;;  %v16966_v22 = vld [vmem:[#allocation262_spill] sm:$0xff] }
 0x6f9   : > { %v15529_v33 = vadd.f32 %v7394_v16, %v6088_v3  ;;  %v4787_v8 = vadd.f32 %v4786_v18, %v16963_v14  ;;  %v7400_v54 = vpop.f32.mrb[93].mxu0  ;;  %v8132_v51 = vpop.permute.xlu1 %8131  ;;  %5093 = vmatprep.mubr.f32.mxu1 %v1624_v62  ;;  %9266 = vmatmul.mubr.msk.f32.gmra.mrb[164].mxu0 %vm1856_vm0, %v1620_v44  ;;  %v1627_v16 = vld [vmem:[%s10873_s17 + $0x2e58] sm:$0xff]  ;;  %v16967_v18 = vld [vmem:[#allocation264_spill] sm:$0xff] }
 0x6fa   : > { %8922 = vst.msk [vmem:[%s13640_s11 + $0x360] sm:$0xff] %vm8813_vm1, %v8741_v27  ;;  %v6092_v32 = vadd.f32 %v16964_v12, %v4785_v26  ;;  %v8562_v23 = vadd.f32 %v8132_v51, %v14636_v4  ;;  %8189 = vrot.lane.b32.xlu0 %v15525_v10, %s10557_s6  ;;  %7707 = vmatprep.mubr.f32.mxu0 %v16647_v5  ;;  %v16965_v6 = vld [vmem:[#allocation261_spill] sm:$0xff] }
 0x6fb   : > { %v6094_v62 = vadd.f32 %v16965_v6, %v4787_v8  ;;  %v4790_v55 = vpop.f32.mrb[208].mxu1  ;;  %v1630_v8 = vld [vmem:[%s10873_s17 + $0x2e70] sm:$0xff] }
 0x6fc   : > { %v15544_v3 = vadd.f32 %v7398_v24, %v6092_v32  ;;  %v8742_v44 = vadd.f32 %v8562_v23, %v15320_v50  ;;  %v4791_v27 = vadd.f32 %v4790_v55, %v16966_v22  ;;  %v7404_v4 = vpop.f32.mrb[94].mxu0  ;;  %v4792_v61 = vpop.f32.mrb[209].mxu1  ;;  %5094 = vmatmul.mubr.f32.gmra.mrb[208].mxu1 %v1623_v46  ;;  %v16968_v50 = vld [vmem:[#allocation263_spill] sm:$0xff]  ;;  %v1638_v46 = vld [vmem:[%s10873_s17 + $0x2eb0] sm:$0xff]  ;;  %v16969_v23 = vld [vmem:[#allocation265_spill] sm:$0xff] }
 0x6fd   : > { %v15548_v26 = vadd.f32 %v7400_v54, %v6094_v62  ;;  %v4793_v14 = vadd.f32 %v4792_v61, %v16967_v18  ;;  %v7406_v51 = vpop.f32.mrb[95].mxu0  ;;  %v8134_v12 = vpop.permute.xlu0 %8133  ;;  %5098 = vmatprep.mubr.f32.mxu1 %v1631_v60  ;;  %9267 = vmatmul.mubr.msk.f32.gmra.mrb[166].mxu0 %vm1856_vm0, %v1627_v16  ;;  %v1634_v54 = vld [vmem:[%s10873_s17 + $0x2e90] sm:$0xff]  ;;  %v16970_v55 = vld [vmem:[#allocation266_spill] sm:$0xff] }
 0x6fe   : > { %8923 = vst.msk [vmem:[%s13640_s11 + $0x368] sm:$0xff] %vm8813_vm1, %v8742_v44  ;;  %v6098_v24 = vadd.f32 %v16968_v50, %v4791_v27  ;;  %v8563_v32 = vadd.f32 %v8134_v12, %v14655_v28  ;;  %8191 = vrot.lane.b32.xlu1 %v15544_v3, %s10557_s6  ;;  %7712 = vmatprep.mubr.f32.mxu0 %v16647_v5  ;;  %v16971_v61 = vld [vmem:[#allocation268_spill] sm:$0xff] }
 0x6ff   : > { %v6100_v60 = vadd.f32 %v16969_v23, %v4793_v14  ;;  %v4796_v6 = vpop.f32.mrb[210].mxu1  ;;  %v1637_v14 = vld [vmem:[%s10873_s17 + $0x2ea8] sm:$0xff] }
 0x700   : > { %v15563_v62 = vadd.f32 %v7404_v4, %v6098_v24  ;;  %v8743_v16 = vadd.f32 %v8563_v32, %v15339_v53  ;;  %v4797_v44 = vadd.f32 %v4796_v6, %v16970_v55  ;;  %v7410_v28 = vpop.f32.mrb[96].mxu0  ;;  %v4798_v22 = vpop.f32.mrb[211].mxu1  ;;  %5099 = vmatmul.mubr.f32.gmra.mrb[210].mxu1 %v1630_v8  ;;  %v16972_v53 = vld [vmem:[#allocation267_spill] sm:$0xff]  ;;  %v16973_v32 = vld [vmem:[#allocation269_spill] sm:$0xff]  ;;  %v16975_v6 = vld [vmem:[#allocation270_spill] sm:$0xff] }
 0x701   : > { %v15567_v27 = vadd.f32 %v7406_v51, %v6100_v60  ;;  %v4799_v18 = vadd.f32 %v4798_v22, %v16971_v61  ;;  %v7412_v12 = vpop.f32.mrb[97].mxu0  ;;  %v8136_v50 = vpop.permute.xlu1 %8135  ;;  %5103 = vmatprep.mubr.f32.mxu1 %v1638_v46  ;;  %9268 = vmatmul.mubr.msk.f32.gmra.mrb[168].mxu0 %vm1856_vm0, %v1634_v54  ;;  %v1645_v8 = vld [vmem:[%s10873_s17 + $0x2ee8] sm:$0xff]  ;;  %v16976_v22 = vld [vmem:[#allocation272_spill] sm:$0xff] }
 0x702   : > { %8924 = vst.msk [vmem:[%s13640_s11 + $0x370] sm:$0xff] %vm8813_vm1, %v8743_v16  ;;  %v6104_v4 = vadd.f32 %v16972_v53, %v4797_v44  ;;  %v8564_v24 = vadd.f32 %v8136_v50, %v14674_v25  ;;  %8193 = vrot.lane.b32.xlu0 %v15563_v62, %s10557_s6  ;;  %7717 = vmatprep.mubr.f32.mxu0 %v16647_v5  ;;  %v1641_v51 = vld [vmem:[%s10873_s17 + $0x2ec8] sm:$0xff] }
 0x703   : > { %v6106_v46 = vadd.f32 %v16973_v32, %v4799_v18  ;;  %v4802_v23 = vpop.f32.mrb[212].mxu1  ;;  %v1644_v18 = vld [vmem:[%s10873_s17 + $0x2ee0] sm:$0xff] }
 0x704   : > { %v15582_v60 = vadd.f32 %v7410_v28, %v6104_v4  ;;  %v8744_v54 = vadd.f32 %v8564_v24, %v15358_v63  ;;  %v4803_v16 = vadd.f32 %v4802_v23, %v16975_v6  ;;  %v7416_v25 = vpop.f32.mrb[98].mxu0  ;;  %v4804_v55 = vpop.f32.mrb[213].mxu1  ;;  %5104 = vmatmul.mubr.f32.gmra.mrb[212].mxu1 %v1637_v14  ;;  %v16977_v63 = vld [vmem:[#allocation271_spill] sm:$0xff]  ;;  %v1652_v14 = vld [vmem:[%s10873_s17 + $0x2f20] sm:$0xff]  ;;  %v16978_v24 = vld [vmem:[#allocation273_spill] sm:$0xff] }
 0x705   : > { %v15586_v44 = vadd.f32 %v7412_v12, %v6106_v46  ;;  %v4805_v61 = vadd.f32 %v4804_v55, %v16976_v22  ;;  %v7418_v50 = vpop.f32.mrb[99].mxu0  ;;  %v8138_v53 = vpop.permute.xlu0 %8137  ;;  %5108 = vmatprep.mubr.f32.mxu1 %v1645_v8  ;;  %9269 = vmatmul.mubr.msk.f32.gmra.mrb[170].mxu0 %vm1856_vm0, %v1641_v51  ;;  %v1648_v12 = vld [vmem:[%s10873_s17 + $0x2f00] sm:$0xff]  ;;  %v16980_v55 = vld [vmem:[#allocation276_spill] sm:$0xff] }
 0x706   : > { %16974 = vst [vmem:[#allocation18_spill] sm:$0xff] %v15582_v60  ;;  %8925 = vst.msk [vmem:[%s13640_s11 + $0x378] sm:$0xff] %vm8813_vm1, %v8744_v54  ;;  %v6110_v28 = vadd.f32 %v16977_v63, %v4803_v16  ;;  %v8565_v4 = vadd.f32 %v8138_v53, %v14693_v17  ;;  %8195 = vrot.lane.b32.xlu1 %v15582_v60, %s10557_s6  ;;  %7722 = vmatprep.mubr.f32.mxu0 %v16647_v5  ;;  %v16979_v23 = vld [vmem:[#allocation274_spill] sm:$0xff]  ;;  %v1651_v60 = vld [vmem:[%s10873_s17 + $0x2f18] sm:$0xff] }
 0x707   : > { %v6112_v8 = vadd.f32 %v16978_v24, %v4805_v61  ;;  %v4808_v32 = vpop.f32.mrb[214].mxu1  ;;  %v16983_v24 = vld [vmem:[#allocation278_spill] sm:$0xff] }
 0x708   : > { %v15601_v46 = vadd.f32 %v7416_v25, %v6110_v28  ;;  %v8745_v51 = vadd.f32 %v8565_v4, %v15377_v47  ;;  %v4809_v54 = vadd.f32 %v4808_v32, %v16979_v23  ;;  %v7422_v17 = vpop.f32.mrb[100].mxu0  ;;  %v4810_v6 = vpop.f32.mrb[215].mxu1  ;;  %5109 = vmatmul.mubr.f32.gmra.mrb[214].mxu1 %v1644_v18  ;;  %v16981_v25 = vld [vmem:[#allocation275_spill] sm:$0xff]  ;;  %v16982_v18 = vld [vmem:[#allocation277_spill] sm:$0xff]  ;;  %v16984_v23 = vld [vmem:[#allocation280_spill] sm:$0xff] }
 0x709   : > { %v15605_v16 = vadd.f32 %v7418_v50, %v6112_v8  ;;  %v4811_v22 = vadd.f32 %v4810_v6, %v16980_v55  ;;  %v7424_v53 = vpop.f32.mrb[101].mxu0  ;;  %v8140_v63 = vpop.permute.xlu1 %8139  ;;  %5113 = vmatprep.mubr.f32.mxu1 %v1652_v14  ;;  %9270 = vmatmul.mubr.msk.f32.gmra.mrb[172].mxu0 %vm1856_vm0, %v1648_v12  ;;  %v1655_v50 = vld [vmem:[%s10873_s17 + $0x2f38] sm:$0xff] }
 0x70a   : > { %8926 = vst.msk [vmem:[%s13640_s11 + $0x380] sm:$0xff] %vm8813_vm1, %v8745_v51  ;;  %v6116_v47 = vadd.f32 %v16981_v25, %v4809_v54  ;;  %v8566_v61 = vadd.f32 %v8140_v63, %v14712_v9  ;;  %8197 = vrot.lane.b32.xlu0 %v15601_v46, %s10557_s6  ;;  %7727 = vmatprep.mubr.f32.mxu0 %v16647_v5  ;;  %v16985_v5 = vld [vmem:[#allocation279_spill] sm:$0xff] }
 0x70b   : > { %v6118_v28 = vadd.f32 %v16982_v18, %v4811_v22  ;;  %v4814_v4 = vpop.f32.mrb[216].mxu1  ;;  %v16986_v22 = vld [vmem:[#allocation281_spill] sm:$0xff] }
 0x70c   : > { %v15619_v14 = vadd.f32 %v7422_v17, %v6116_v47  ;;  %v8746_v12 = vadd.f32 %v8566_v61, %v15396_v35  ;;  %v4815_v8 = vadd.f32 %v4814_v4, %v16983_v24  ;;  %v7428_v32 = vpop.f32.mrb[102].mxu0  ;;  %v4816_v51 = vpop.f32.mrb[217].mxu1  ;;  %5114 = vmatmul.mubr.f32.gmra.mrb[216].mxu1 %v1651_v60  ;;  %v16987_v47 = vld [vmem:[#allocation282_spill] sm:$0xff]  ;;  %v16988_v4 = vld [vmem:[#allocation284_spill] sm:$0xff] }
 0x70d   : > { %v15623_v9 = vadd.f32 %v7424_v53, %v6118_v28  ;;  %v4817_v54 = vadd.f32 %v4816_v51, %v16984_v23  ;;  %v7430_v6 = vpop.f32.mrb[103].mxu0  ;;  %v8142_v55 = vpop.permute.xlu0 %8141  ;;  %9271 = vmatmul.mubr.msk.f32.gmra.mrb[174].mxu0 %vm1856_vm0, %v1655_v50 }
 0x70e   : > { %8927 = vst.msk [vmem:[%s13640_s11 + $0x388] sm:$0xff] %vm8813_vm1, %v8746_v12  ;;  %v6122_v17 = vadd.f32 %v16985_v5, %v4815_v8  ;;  %v8567_v35 = vadd.f32 %v8142_v55, %v14731_v30  ;;  %8199 = vrot.lane.b32.xlu1 %v15619_v14, %s10557_s6  ;;  %v16989_v8 = vld [vmem:[#allocation283_spill] sm:$0xff]  ;;  %v16991_v5 = vld [vmem:[#allocation286_spill] sm:$0xff] }
 0x70f   : > { %v6124_v60 = vadd.f32 %v16986_v22, %v4817_v54  ;;  %v4820_v53 = vpop.f32.mrb[218].mxu1 }
 0x710   : > { %v15634_v63 = vadd.f32 %v7428_v32, %v6122_v17  ;;  %v8747_v25 = vadd.f32 %v8567_v35, %v15415_v42  ;;  %v4821_v61 = vadd.f32 %v4820_v53, %v16987_v47  ;;  %v7434_v50 = vpop.f32.mrb[104].mxu0  ;;  %v4822_v18 = vpop.f32.mrb[219].mxu1  ;;  %v16990_v42 = vld [vmem:[#allocation285_spill] sm:$0xff]  ;;  %v16992_v53 = vld [vmem:[#allocation288_spill] sm:$0xff] }
 0x711   : > { %v15638_v28 = vadd.f32 %v7430_v6, %v6124_v60  ;;  %v4823_v12 = vadd.f32 %v4822_v18, %v16988_v4  ;;  %v7436_v24 = vpop.f32.mrb[105].mxu0  ;;  %v8144_v30 = vpop.permute.xlu1 %8143 }
 0x712   : > { %8928 = vst.msk [vmem:[%s13640_s11 + $0x390] sm:$0xff] %vm8813_vm1, %v8747_v25  ;;  %v6128_v51 = vadd.f32 %v16989_v8, %v4821_v61  ;;  %v8568_v32 = vadd.f32 %v8144_v30, %v14750_v19  ;;  %8201 = vrot.lane.b32.xlu0 %v15634_v63, %s10557_s6  ;;  %v16993_v61 = vld [vmem:[#allocation287_spill] sm:$0xff]  ;;  %v16995_v8 = vld [vmem:[#allocation290_spill] sm:$0xff] }
 0x713   : > { %v6130_v23 = vadd.f32 %v16990_v42, %v4823_v12  ;;  %v4826_v54 = vpop.f32.mrb[220].mxu1 }
 0x714   : > { %v15648_v55 = vadd.f32 %v7434_v50, %v6128_v51  ;;  %v8748_v6 = vadd.f32 %v8568_v32, %v15434_v52  ;;  %v4827_v17 = vadd.f32 %v4826_v54, %v16991_v5  ;;  %v7440_v35 = vpop.f32.mrb[106].mxu0  ;;  %v4828_v22 = vpop.f32.mrb[221].mxu1  ;;  %v16994_v52 = vld [vmem:[#allocation289_spill] sm:$0xff]  ;;  %v16996_v54 = vld [vmem:[#allocation292_spill] sm:$0xff] }
 0x715   : > { %v15652_v60 = vadd.f32 %v7436_v24, %v6130_v23  ;;  %v4829_v25 = vadd.f32 %v4828_v22, %v16992_v53  ;;  %v7442_v47 = vpop.f32.mrb[107].mxu0  ;;  %v8146_v19 = vpop.permute.xlu0 %8145 }
 0x716   : > { %8929 = vst.msk [vmem:[%s13640_s11 + $0x398] sm:$0xff] %vm8813_vm1, %v8748_v6  ;;  %v6134_v18 = vadd.f32 %v16993_v61, %v4827_v17  ;;  %v8569_v50 = vadd.f32 %v8146_v19, %v14769_v59  ;;  %8203 = vrot.lane.b32.xlu1 %v15648_v55, %s10557_s6  ;;  %v16997_v17 = vld [vmem:[#allocation291_spill] sm:$0xff]  ;;  %v16999_v61 = vld [vmem:[#allocation294_spill] sm:$0xff] }
 0x717   : > { %v6136_v4 = vadd.f32 %v16994_v52, %v4829_v25  ;;  %v4832_v12 = vpop.f32.mrb[222].mxu1 }
 0x718   : > { %v15662_v30 = vadd.f32 %v7440_v35, %v6134_v18  ;;  %v8749_v24 = vadd.f32 %v8569_v50, %v15453_v20  ;;  %v4833_v51 = vadd.f32 %v4832_v12, %v16995_v8  ;;  %v7446_v32 = vpop.f32.mrb[108].mxu0  ;;  %v4834_v42 = vpop.f32.mrb[223].mxu1  ;;  %v16998_v20 = vld [vmem:[#allocation293_spill] sm:$0xff]  ;;  %v17000_v12 = vld [vmem:[#allocation296_spill] sm:$0xff] }
 0x719   : > { %v15666_v23 = vadd.f32 %v7442_v47, %v6136_v4  ;;  %v4835_v6 = vadd.f32 %v4834_v42, %v16996_v54  ;;  %v7448_v5 = vpop.f32.mrb[109].mxu0  ;;  %v8148_v59 = vpop.permute.xlu1 %8147 }
 0x71a   : > { %8930 = vst.msk [vmem:[%s13640_s11 + $0x3a0] sm:$0xff] %vm8813_vm1, %v8749_v24  ;;  %v6140_v22 = vadd.f32 %v16997_v17, %v4833_v51  ;;  %v8570_v35 = vadd.f32 %v8148_v59, %v14788_v49  ;;  %8205 = vrot.lane.b32.xlu0 %v15662_v30, %s10557_s6  ;;  %v17001_v51 = vld [vmem:[#allocation295_spill] sm:$0xff]  ;;  %v17003_v17 = vld [vmem:[#allocation298_spill] sm:$0xff] }
 0x71b   : > { %v6142_v53 = vadd.f32 %v16998_v20, %v4835_v6  ;;  %v4838_v25 = vpop.f32.mrb[224].mxu1 }
 0x71c   : > { %v15676_v19 = vadd.f32 %v7446_v32, %v6140_v22  ;;  %v8750_v47 = vadd.f32 %v8570_v35, %v15472_v40  ;;  %v4839_v18 = vadd.f32 %v4838_v25, %v16999_v61  ;;  %v7452_v50 = vpop.f32.mrb[110].mxu0  ;;  %v4840_v52 = vpop.f32.mrb[225].mxu1  ;;  %v17002_v40 = vld [vmem:[#allocation297_spill] sm:$0xff]  ;;  %v17004_v25 = vld [vmem:[#allocation300_spill] sm:$0xff] }
 0x71d   : > { %v15680_v4 = vadd.f32 %v7448_v5, %v6142_v53  ;;  %v4841_v24 = vadd.f32 %v4840_v52, %v17000_v12  ;;  %v7454_v8 = vpop.f32.mrb[111].mxu0  ;;  %v8150_v49 = vpop.permute.xlu0 %8149 }
 0x71e   : > { %8931 = vst.msk [vmem:[%s13640_s11 + $0x3a8] sm:$0xff] %vm8813_vm1, %v8750_v47  ;;  %v6146_v42 = vadd.f32 %v17001_v51, %v4839_v18  ;;  %v8571_v32 = vadd.f32 %v8150_v49, %v14807_v39  ;;  %8207 = vrot.lane.b32.xlu1 %v15676_v19, %s10557_s6  ;;  %v17005_v18 = vld [vmem:[#allocation299_spill] sm:$0xff]  ;;  %v17007_v51 = vld [vmem:[#allocation302_spill] sm:$0xff] }
 0x71f   : > { %v6148_v54 = vadd.f32 %v17002_v40, %v4841_v24  ;;  %v4844_v6 = vpop.f32.mrb[226].mxu1 }
 0x720   : > { %v15690_v59 = vadd.f32 %v7452_v50, %v6146_v42  ;;  %v8751_v5 = vadd.f32 %v8571_v32, %v15491_v7  ;;  %v4845_v22 = vadd.f32 %v4844_v6, %v17003_v17  ;;  %v7458_v35 = vpop.f32.mrb[112].mxu0  ;;  %v4846_v20 = vpop.f32.mrb[227].mxu1  ;;  %v17006_v7 = vld [vmem:[#allocation301_spill] sm:$0xff]  ;;  %v17008_v6 = vld [vmem:[#allocation304_spill] sm:$0xff] }
 0x721   : > { %v15694_v53 = vadd.f32 %v7454_v8, %v6148_v54  ;;  %v4847_v47 = vadd.f32 %v4846_v20, %v17004_v25  ;;  %v7460_v61 = vpop.f32.mrb[113].mxu0  ;;  %v8152_v39 = vpop.permute.xlu1 %8151 }
 0x722   : > { %8932 = vst.msk [vmem:[%s13640_s11 + $0x3b0] sm:$0xff] %vm8813_vm1, %v8751_v5  ;;  %v6152_v52 = vadd.f32 %v17005_v18, %v4845_v22  ;;  %v8572_v50 = vadd.f32 %v8152_v39, %v14826_v11  ;;  %8209 = vrot.lane.b32.xlu0 %v15690_v59, %s10557_s6  ;;  %v17009_v22 = vld [vmem:[#allocation303_spill] sm:$0xff]  ;;  %v17011_v18 = vld [vmem:[#allocation306_spill] sm:$0xff] }
 0x723   : > { %v6154_v12 = vadd.f32 %v17006_v7, %v4847_v47  ;;  %v4850_v24 = vpop.f32.mrb[228].mxu1 }
 0x724   : > { %v15704_v49 = vadd.f32 %v7458_v35, %v6152_v52  ;;  %v8752_v8 = vadd.f32 %v8572_v50, %v15510_v37  ;;  %v4851_v42 = vadd.f32 %v4850_v24, %v17007_v51  ;;  %v7464_v32 = vpop.f32.mrb[114].mxu0  ;;  %v4852_v40 = vpop.f32.mrb[229].mxu1  ;;  %v17010_v37 = vld [vmem:[#allocation305_spill] sm:$0xff]  ;;  %v17012_v24 = vld [vmem:[#allocation308_spill] sm:$0xff] }
 0x725   : > { %v15708_v54 = vadd.f32 %v7460_v61, %v6154_v12  ;;  %v4853_v5 = vadd.f32 %v4852_v40, %v17008_v6  ;;  %v7466_v17 = vpop.f32.mrb[115].mxu0  ;;  %v8154_v11 = vpop.permute.xlu0 %8153  ;;  %v17014_v6 = vld [vmem:[#allocation2_spill] sm:$0xff] }
 0x726   : > { %8933 = vst.msk [vmem:[%s13640_s11 + $0x3b8] sm:$0xff] %vm8813_vm1, %v8752_v8  ;;  %v6158_v20 = vadd.f32 %v17009_v22, %v4851_v42  ;;  %v8573_v35 = vadd.f32 %v8154_v11, %v14845_v38  ;;  %8211 = vrot.lane.b32.xlu1 %v15704_v49, %s10557_s6  ;;  %v17013_v42 = vld [vmem:[#allocation307_spill] sm:$0xff] }
 0x727   : > { %v6160_v25 = vadd.f32 %v17010_v37, %v4853_v5  ;;  %v4856_v47 = vpop.f32.mrb[230].mxu1 }
 0x728   : > { %v15718_v39 = vadd.f32 %v7464_v32, %v6158_v20  ;;  %v8753_v61 = vadd.f32 %v8573_v35, %v15529_v33  ;;  %v4857_v52 = vadd.f32 %v4856_v47, %v17011_v18  ;;  %v7470_v50 = vpop.f32.mrb[116].mxu0  ;;  %v4858_v7 = vpop.f32.mrb[231].mxu1  ;;  %v17015_v33 = vld [vmem:[#allocation309_spill] sm:$0xff]  ;;  %v17016_v20 = vld [vmem:[#allocation310_spill] sm:$0xff] }
 0x729   : > { %v15722_v12 = vadd.f32 %v7466_v17, %v6160_v25  ;;  %v4859_v8 = vadd.f32 %v4858_v7, %v17012_v24  ;;  %v7472_v51 = vpop.f32.mrb[117].mxu0  ;;  %v8156_v38 = vpop.permute.xlu1 %8155  ;;  %v17018_v24 = vld [vmem:[#allocation311_spill] sm:$0xff] }
 0x72a   : > { %8934 = vst.msk [vmem:[%s13640_s11 + $0x3c0] sm:$0xff] %vm8813_vm1, %v8753_v61  ;;  %v6164_v40 = vadd.f32 %v17013_v42, %v4857_v52  ;;  %v8574_v32 = vadd.f32 %v8156_v38, %v17014_v6  ;;  %8213 = vrot.lane.b32.xlu0 %v15718_v39, %s10557_s6  ;;  %v17017_v61 = vld [vmem:[#allocation312_spill] sm:$0xff] }
 0x72b   : > { %v6166_v5 = vadd.f32 %v17015_v33, %v4859_v8  ;;  %v4862_v11 = vpop.f32.mrb[232].mxu1  ;;  %v17019_v38 = vld [vmem:[#allocation4_spill] sm:$0xff] }
 0x72c   : > { %v15732_v22 = vadd.f32 %v7470_v50, %v6164_v40  ;;  %v8754_v17 = vadd.f32 %v8574_v32, %v15548_v26  ;;  %v4863_v35 = vadd.f32 %v4862_v11, %v17016_v20  ;;  %v7476_v37 = vpop.f32.mrb[118].mxu0  ;;  %v4864_v25 = vpop.f32.mrb[233].mxu1  ;;  %v17020_v26 = vld [vmem:[#allocation313_spill] sm:$0xff]  ;;  %v17021_v32 = vld [vmem:[#allocation314_spill] sm:$0xff] }
 0x72d   : > { %v15736_v47 = vadd.f32 %v7472_v51, %v6166_v5  ;;  %v4865_v18 = vadd.f32 %v4864_v25, %v17017_v61  ;;  %v7478_v52 = vpop.f32.mrb[119].mxu0  ;;  %v8158_v7 = vpop.permute.xlu0 %8157 }
 0x72e   : > { %8935 = vst.msk [vmem:[%s13640_s11 + $0x3c8] sm:$0xff] %vm8813_vm1, %v8754_v17  ;;  %v6170_v8 = vadd.f32 %v17018_v24, %v4863_v35  ;;  %v8575_v50 = vadd.f32 %v8158_v7, %v17019_v38  ;;  %8215 = vrot.lane.b32.xlu1 %v15732_v22, %s10557_s6  ;;  %v17022_v17 = vld [vmem:[#allocation316_spill] sm:$0xff]  ;;  %v17023_v7 = vld [vmem:[#allocation315_spill] sm:$0xff] }
 0x72f   : > { %v6172_v42 = vadd.f32 %v17020_v26, %v4865_v18  ;;  %v4868_v40 = vpop.f32.mrb[234].mxu1 }
 0x730   : > { %v15746_v6 = vadd.f32 %v7476_v37, %v6170_v8  ;;  %v8755_v51 = vadd.f32 %v8575_v50, %v15567_v27  ;;  %v4869_v33 = vadd.f32 %v4868_v40, %v17021_v32  ;;  %v7482_v5 = vpop.f32.mrb[120].mxu0  ;;  %v4870_v11 = vpop.f32.mrb[235].mxu1  ;;  %v17024_v27 = vld [vmem:[#allocation317_spill] sm:$0xff]  ;;  %v17025_v50 = vld [vmem:[#allocation318_spill] sm:$0xff] }
 0x731   : > { %v15750_v20 = vadd.f32 %v7478_v52, %v6172_v42  ;;  %v4871_v35 = vadd.f32 %v4870_v11, %v17022_v17  ;;  %v7484_v25 = vpop.f32.mrb[121].mxu0  ;;  %v8160_v61 = vpop.permute.xlu1 %8159  ;;  %v17027_v17 = vld [vmem:[#allocation319_spill] sm:$0xff] }
 0x732   : > { %8936 = vst.msk [vmem:[%s13640_s11 + $0x3d0] sm:$0xff] %vm8813_vm1, %v8755_v51  ;;  %v6176_v18 = vadd.f32 %v17023_v7, %v4869_v33  ;;  %v8576_v37 = vadd.f32 %v8160_v61, %v14898_v48  ;;  %8217 = vrot.lane.b32.xlu0 %v15746_v6, %s10557_s6  ;;  %v17026_v51 = vld [vmem:[#allocation320_spill] sm:$0xff] }
 0x733   : > { %v6178_v24 = vadd.f32 %v17024_v27, %v4871_v35  ;;  %v4874_v8 = vpop.f32.mrb[236].mxu1 }
 0x734   : > { %v15760_v38 = vadd.f32 %v7482_v5, %v6176_v18  ;;  %v8756_v52 = vadd.f32 %v8576_v37, %v15586_v44  ;;  %v4875_v26 = vadd.f32 %v4874_v8, %v17025_v50  ;;  %v7488_v42 = vpop.f32.mrb[122].mxu0  ;;  %v4876_v40 = vpop.f32.mrb[237].mxu1  ;;  %v17028_v44 = vld [vmem:[#allocation321_spill] sm:$0xff]  ;;  %v17029_v37 = vld [vmem:[#allocation322_spill] sm:$0xff] }
 0x735   : > { %v15764_v32 = vadd.f32 %v7484_v25, %v6178_v24  ;;  %v4877_v33 = vadd.f32 %v4876_v40, %v17026_v51  ;;  %v7490_v11 = vpop.f32.mrb[123].mxu0  ;;  %v8162_v48 = vpop.permute.xlu0 %8161  ;;  %v17031_v51 = vld [vmem:[#allocation323_spill] sm:$0xff] }
 0x736   : > { %8937 = vst.msk [vmem:[%s13640_s11 + $0x3d8] sm:$0xff] %vm8813_vm1, %v8756_v52  ;;  %v6182_v35 = vadd.f32 %v17027_v17, %v4875_v26  ;;  %v8577_v5 = vadd.f32 %v8162_v48, %v14917_v29  ;;  %8219 = vrot.lane.b32.xlu1 %v15760_v38, %s10557_s6  ;;  %v17030_v52 = vld [vmem:[#allocation324_spill] sm:$0xff] }
 0x737   : > { %v6184_v61 = vadd.f32 %v17028_v44, %v4877_v33  ;;  %v4880_v7 = vpop.f32.mrb[238].mxu1 }
 0x738   : > { %v15774_v18 = vadd.f32 %v7488_v42, %v6182_v35  ;;  %v8757_v25 = vadd.f32 %v8577_v5, %v15605_v16  ;;  %v4881_v27 = vadd.f32 %v4880_v7, %v17029_v37  ;;  %v7494_v24 = vpop.f32.mrb[124].mxu0  ;;  %v4882_v8 = vpop.f32.mrb[239].mxu1  ;;  %v17032_v16 = vld [vmem:[#allocation325_spill] sm:$0xff]  ;;  %v17033_v5 = vld [vmem:[#allocation326_spill] sm:$0xff] }
 0x739   : > { %v15778_v50 = vadd.f32 %v7490_v11, %v6184_v61  ;;  %v4883_v26 = vadd.f32 %v4882_v8, %v17030_v52  ;;  %v7496_v40 = vpop.f32.mrb[125].mxu0  ;;  %v8164_v29 = vpop.permute.xlu1 %8163  ;;  %v17035_v52 = vld [vmem:[#allocation327_spill] sm:$0xff] }
 0x73a   : > { %8938 = vst.msk [vmem:[%s13640_s11 + $0x3e0] sm:$0xff] %vm8813_vm1, %v8757_v25  ;;  %v6188_v33 = vadd.f32 %v17031_v51, %v4881_v27  ;;  %v8578_v42 = vadd.f32 %v8164_v29, %v14936_v41  ;;  %8221 = vrot.lane.b32.xlu0 %v15774_v18, %s10557_s6  ;;  %v17034_v25 = vld [vmem:[#allocation328_spill] sm:$0xff]  ;;  %v17036_v29 = vld [vmem:[#allocation3_spill] sm:$0xff] }
 0x73b   : > { %v6190_v48 = vadd.f32 %v17032_v16, %v4883_v26  ;;  %v4886_v17 = vpop.f32.mrb[240].mxu1  ;;  %v17039_v16 = vld [vmem:[#allocation330_spill] sm:$0xff] }
 0x73c   : > { %v15788_v35 = vadd.f32 %v7494_v24, %v6188_v33  ;;  %v8758_v11 = vadd.f32 %v8578_v42, %v15623_v9  ;;  %v4887_v44 = vadd.f32 %v4886_v17, %v17033_v5  ;;  %v7500_v61 = vpop.f32.mrb[126].mxu0  ;;  %v4888_v7 = vpop.f32.mrb[241].mxu1  ;;  %v17037_v9 = vld [vmem:[#allocation329_spill] sm:$0xff] }
 0x73d   : > { %v15792_v37 = vadd.f32 %v7496_v40, %v6190_v48  ;;  %v4889_v27 = vadd.f32 %v4888_v7, %v17034_v25  ;;  %v7502_v8 = vpop.f32.mrb[127].mxu0  ;;  %v8166_v41 = vpop.permute.xlu0 %8165 }
 0x73e   : > { %8939 = vst.msk [vmem:[%s13640_s11 + $0x3e8] sm:$0xff] %vm8813_vm1, %v8758_v11  ;;  %v6194_v26 = vadd.f32 %v17035_v52, %v4887_v44  ;;  %v8579_v24 = vadd.f32 %v8166_v41, %v17036_v29  ;;  %8223 = vrot.lane.b32.xlu1 %v15788_v35, %s10557_s6  ;;  %v17040_v11 = vld [vmem:[#allocation332_spill] sm:$0xff]  ;;  %v17041_v52 = vld [vmem:[#allocation331_spill] sm:$0xff]  ;;  %v17042_v29 = vld [vmem:[#allocation398_spill] sm:$0xff] }
 0x73f   : > { %v6196_v51 = vadd.f32 %v17037_v9, %v4889_v27  ;;  %v4892_v33 = vpop.f32.mrb[242].mxu1 }
 0x740   : > { %v15802_v42 = vadd.f32 %v7500_v61, %v6194_v26  ;;  %v8759_v40 = vadd.f32 %v8579_v24, %v15638_v28  ;;  %v4893_v48 = vadd.f32 %v4892_v33, %v17039_v16  ;;  %v7506_v17 = vpop.f32.mrb[128].mxu0  ;;  %v4894_v5 = vpop.f32.mrb[243].mxu1  ;;  %v17043_v28 = vld [vmem:[#allocation333_spill] sm:$0xff] }
 0x741   : > { %v15806_v7 = vadd.f32 %v7502_v8, %v6196_v51  ;;  %v4895_v44 = vadd.f32 %v4894_v5, %v17040_v11  ;;  %v7508_v25 = vpop.f32.mrb[129].mxu0  ;;  %v8168_v41 = vpop.permute.xlu1 %8167  ;;  %v17045_v51 = vld [vmem:[#allocation334_spill] sm:$0xff] }
 0x742   : > { %17038 = vst [vmem:[#allocation20_spill] sm:$0xff] %v15802_v42  ;;  %8940 = vst.msk [vmem:[%s13640_s11 + $0x3f0] sm:$0xff] %vm8813_vm1, %v8759_v40  ;;  %v6200_v27 = vadd.f32 %v17041_v52, %v4893_v48  ;;  %v8580_v61 = vadd.f32 %v8168_v41, %v17042_v29  ;;  %8225 = vrot.lane.b32.xlu0 %v15802_v42, %s10557_s6  ;;  %v17046_v40 = vld [vmem:[#allocation336_spill] sm:$0xff]  ;;  %v17047_v29 = vld [vmem:[#allocation335_spill] sm:$0xff] }
 0x743   : > { %v6202_v26 = vadd.f32 %v17043_v28, %v4895_v44  ;;  %v4898_v24 = vpop.f32.mrb[244].mxu1  ;;  %v17048_v28 = vld [vmem:[#allocation5_spill] sm:$0xff] }
 0x744   : > { %v15816_v9 = vadd.f32 %v7506_v17, %v6200_v27  ;;  %v8760_v8 = vadd.f32 %v8580_v61, %v15652_v60  ;;  %v4899_v33 = vadd.f32 %v4898_v24, %v17045_v51  ;;  %v7512_v16 = vpop.f32.mrb[130].mxu0  ;;  %v4900_v5 = vpop.f32.mrb[245].mxu1  ;;  %v17049_v60 = vld [vmem:[#allocation337_spill] sm:$0xff] }
 0x745   : > { %v15820_v11 = vadd.f32 %v7508_v25, %v6202_v26  ;;  %v4901_v48 = vadd.f32 %v4900_v5, %v17046_v40  ;;  %v7514_v52 = vpop.f32.mrb[131].mxu0  ;;  %v8170_v41 = vpop.permute.xlu0 %8169  ;;  %v17051_v26 = vld [vmem:[#allocation338_spill] sm:$0xff] }
 0x746   : > { %17044 = vst [vmem:[#allocation19_spill] sm:$0xff] %v15816_v9  ;;  %8941 = vst.msk [vmem:[%s13640_s11 + $0x3f8] sm:$0xff] %vm8813_vm1, %v8760_v8  ;;  %v6206_v44 = vadd.f32 %v17047_v29, %v4899_v33  ;;  %v8581_v17 = vadd.f32 %v8170_v41, %v17048_v28  ;;  %8227 = vrot.lane.b32.xlu1 %v15816_v9, %s10557_s6  ;;  %v17052_v8 = vld [vmem:[#allocation340_spill] sm:$0xff]  ;;  %v17053_v28 = vld [vmem:[#allocation339_spill] sm:$0xff] }
 0x747   : > { %v6208_v27 = vadd.f32 %v17049_v60, %v4901_v48  ;;  %v4904_v61 = vpop.f32.mrb[246].mxu1  ;;  %v17054_v60 = vld [vmem:[#allocation6_spill] sm:$0xff] }
 0x748   : > { %v15830_v24 = vadd.f32 %v7512_v16, %v6206_v44  ;;  %v8761_v25 = vadd.f32 %v8581_v17, %v15666_v23  ;;  %v4905_v51 = vadd.f32 %v4904_v61, %v17051_v26  ;;  %v7518_v5 = vpop.f32.mrb[132].mxu0  ;;  %v4906_v40 = vpop.f32.mrb[247].mxu1  ;;  %v17055_v23 = vld [vmem:[#allocation341_spill] sm:$0xff] }
 0x749   : > { %v15834_v42 = vadd.f32 %v7514_v52, %v6208_v27  ;;  %v4907_v33 = vadd.f32 %v4906_v40, %v17052_v8  ;;  %v7520_v29 = vpop.f32.mrb[133].mxu0  ;;  %v8172_v41 = vpop.permute.xlu1 %8171  ;;  %v17057_v27 = vld [vmem:[#allocation342_spill] sm:$0xff] }
 0x74a   : > { %17050 = vst [vmem:[#allocation21_spill] sm:$0xff] %v15830_v24  ;;  %8942 = vst.msk [vmem:[%s13640_s11 + $0x400] sm:$0xff] %vm8813_vm1, %v8761_v25  ;;  %v6212_v48 = vadd.f32 %v17053_v28, %v4905_v51  ;;  %v8582_v16 = vadd.f32 %v8172_v41, %v17054_v60  ;;  %8229 = vrot.lane.b32.xlu0 %v15830_v24, %s10557_s6  ;;  %v17058_v25 = vld [vmem:[#allocation344_spill] sm:$0xff]  ;;  %v17059_v60 = vld [vmem:[#allocation343_spill] sm:$0xff] }
 0x74b   : > { %v6214_v44 = vadd.f32 %v17055_v23, %v4907_v33  ;;  %v4910_v17 = vpop.f32.mrb[248].mxu1  ;;  %v17060_v23 = vld [vmem:[#allocation8_spill] sm:$0xff] }
 0x74c   : > { %v15844_v61 = vadd.f32 %v7518_v5, %v6212_v48  ;;  %v8762_v52 = vadd.f32 %v8582_v16, %v15680_v4  ;;  %v4911_v26 = vadd.f32 %v4910_v17, %v17057_v27  ;;  %v7524_v40 = vpop.f32.mrb[134].mxu0  ;;  %v4912_v8 = vpop.f32.mrb[249].mxu1  ;;  %v17061_v4 = vld [vmem:[#allocation345_spill] sm:$0xff] }
 0x74d   : > { %v15848_v9 = vadd.f32 %v7520_v29, %v6214_v44  ;;  %v4913_v51 = vadd.f32 %v4912_v8, %v17058_v25  ;;  %v7526_v28 = vpop.f32.mrb[135].mxu0  ;;  %v8174_v41 = vpop.permute.xlu0 %8173  ;;  %v17063_v44 = vld [vmem:[#allocation346_spill] sm:$0xff] }
 0x74e   : > { %17056 = vst [vmem:[#allocation22_spill] sm:$0xff] %v15844_v61  ;;  %8943 = vst.msk [vmem:[%s13640_s11 + $0x408] sm:$0xff] %vm8813_vm1, %v8762_v52  ;;  %v6218_v33 = vadd.f32 %v17059_v60, %v4911_v26  ;;  %v8583_v5 = vadd.f32 %v8174_v41, %v17060_v23  ;;  %8231 = vrot.lane.b32.xlu1 %v15844_v61, %s10557_s6  ;;  %v17064_v52 = vld [vmem:[#allocation348_spill] sm:$0xff]  ;;  %v17065_v23 = vld [vmem:[#allocation347_spill] sm:$0xff] }
 0x74f   : > { %v6220_v48 = vadd.f32 %v17061_v4, %v4913_v51  ;;  %v4916_v16 = vpop.f32.mrb[250].mxu1  ;;  %v17066_v4 = vld [vmem:[#allocation7_spill] sm:$0xff] }
 0x750   : > { %v15858_v17 = vadd.f32 %v7524_v40, %v6218_v33  ;;  %v8763_v29 = vadd.f32 %v8583_v5, %v15694_v53  ;;  %v4917_v27 = vadd.f32 %v4916_v16, %v17063_v44  ;;  %v7530_v8 = vpop.f32.mrb[136].mxu0  ;;  %v4918_v25 = vpop.f32.mrb[251].mxu1  ;;  %v17067_v53 = vld [vmem:[#allocation349_spill] sm:$0xff] }
 0x751   : > { %v15862_v24 = vadd.f32 %v7526_v28, %v6220_v48  ;;  %v4919_v26 = vadd.f32 %v4918_v25, %v17064_v52  ;;  %v7532_v60 = vpop.f32.mrb[137].mxu0  ;;  %v8176_v41 = vpop.permute.xlu1 %8175  ;;  %v17068_v48 = vld [vmem:[#allocation350_spill] sm:$0xff] }
 0x752   : > { %17062 = vst [vmem:[#allocation24_spill] sm:$0xff] %v15858_v17  ;;  %8944 = vst.msk [vmem:[%s13640_s11 + $0x410] sm:$0xff] %vm8813_vm1, %v8763_v29  ;;  %v6224_v51 = vadd.f32 %v17065_v23, %v4917_v27  ;;  %v8584_v40 = vadd.f32 %v8176_v41, %v17066_v4  ;;  %8233 = vrot.lane.b32.xlu0 %v15858_v17, %s10557_s6  ;;  %v17069_v29 = vld [vmem:[#allocation352_spill] sm:$0xff]  ;;  %v17070_v4 = vld [vmem:[#allocation351_spill] sm:$0xff] }
 0x753   : > { %v6226_v33 = vadd.f32 %v17067_v53, %v4919_v26  ;;  %v4922_v5 = vpop.f32.mrb[252].mxu1  ;;  %v17071_v53 = vld [vmem:[#allocation399_spill] sm:$0xff] }
 0x754   : > { %v15872_v16 = vadd.f32 %v7530_v8, %v6224_v51  ;;  %v8764_v28 = vadd.f32 %v8584_v40, %v15708_v54  ;;  %v4923_v44 = vadd.f32 %v4922_v5, %v17068_v48  ;;  %v7536_v25 = vpop.f32.mrb[138].mxu0  ;;  %v4924_v52 = vpop.f32.mrb[253].mxu1  ;;  %v17072_v54 = vld [vmem:[#allocation353_spill] sm:$0xff] }
 0x755   : > { %v15876_v61 = vadd.f32 %v7532_v60, %v6226_v33  ;;  %v4925_v27 = vadd.f32 %v4924_v52, %v17069_v29  ;;  %v7538_v23 = vpop.f32.mrb[139].mxu0  ;;  %v8178_v41 = vpop.permute.xlu0 %8177 }
 0x756   : > { %8945 = vst.msk [vmem:[%s13640_s11 + $0x418] sm:$0xff] %vm8813_vm1, %v8764_v28  ;;  %v6230_v26 = vadd.f32 %v17070_v4, %v4923_v44  ;;  %v8585_v8 = vadd.f32 %v8178_v41, %v17071_v53  ;;  %8235 = vrot.lane.b32.xlu1 %v15872_v16, %s10557_s6  ;;  %v17073_v41 = vld [vmem:[#allocation9_spill] sm:$0xff] }
 0x757   : > { %v6232_v51 = vadd.f32 %v17072_v54, %v4925_v27  ;;  %v4928_v40 = vpop.f32.mrb[0].mxu1 }
 0x758   : > { %v7537_v5 = vadd.f32 %v7536_v25, %v6230_v26  ;;  %v8765_v60 = vadd.f32 %v8585_v8, %v15722_v12  ;;  %v7542_v33 = vpop.f32.mrb[0].mxu0  ;;  %v4930_v48 = vpop.f32.mrb[1].mxu1 }
 0x759   : > { %v15887_v52 = vadd.f32 %v7538_v23, %v6232_v51  ;;  %v10134_v29 = vadd.f32 %v7542_v33, %v4928_v40  ;;  %v7544_v28 = vpop.f32.mrb[1].mxu0  ;;  %v8180_v17 = vpop.permute.xlu1 %8179  ;;  %v17074_v51 = vld [vmem:[#allocation10_spill] sm:$0xff] }
 0x75a   : > { %8946 = vst.msk [vmem:[%s13640_s11 + $0x420] sm:$0xff] %vm8813_vm1, %v8765_v60  ;;  %v15891_v44 = vadd.f32 %v7544_v28, %v4930_v48  ;;  %v8586_v4 = vadd.f32 %v8180_v17, %v17073_v41  ;;  %8237 = vrot.lane.b32.xlu0 %v7537_v5, %s10557_s6  ;;  %v17075_v41 = vld [vmem:[#allocation12_spill] sm:$0xff] }
 0x75b   : > { %8239 = vrot.lane.b32.xlu1 %v10134_v29, %s10557_s6  ;;  %v4934_v25 = vpop.f32.mrb[2].mxu1 }
 0x75c   : > { %v8766_v12 = vadd.f32 %v8586_v4, %v15736_v47  ;;  %v7548_v27 = vpop.f32.mrb[2].mxu0  ;;  %v4936_v23 = vpop.f32.mrb[3].mxu1 }
 0x75d   : > { %v10136_v26 = vadd.f32 %v7548_v27, %v4934_v25  ;;  %v7550_v53 = vpop.f32.mrb[3].mxu0  ;;  %v8182_v8 = vpop.permute.xlu0 %8181 }
 0x75e   : > { %8947 = vst.msk [vmem:[%s13640_s11 + $0x428] sm:$0xff] %vm8813_vm1, %v8766_v12  ;;  %v15899_v54 = vadd.f32 %v7550_v53, %v4936_v23  ;;  %v8587_v40 = vadd.f32 %v8182_v8, %v17074_v51  ;;  %v17076_v51 = vld [vmem:[#allocation11_spill] sm:$0xff] }
 0x75f   : > { %8241 = vrot.lane.b32.xlu0 %v10136_v26, %s10557_s6  ;;  %v4940_v17 = vpop.f32.mrb[4].mxu1 }
 0x760   : > { %v8767_v5 = vadd.f32 %v8587_v40, %v15750_v20  ;;  %v7554_v60 = vpop.f32.mrb[4].mxu0  ;;  %v4942_v47 = vpop.f32.mrb[5].mxu1 }
 0x761   : > { %v10138_v33 = vadd.f32 %v7554_v60, %v4940_v17  ;;  %v7556_v48 = vpop.f32.mrb[5].mxu0  ;;  %v8184_v29 = vpop.permute.xlu1 %8183 }
 0x762   : > { %8948 = vst.msk [vmem:[%s13640_s11 + $0x430] sm:$0xff] %vm8813_vm1, %v8767_v5  ;;  %v15906_v28 = vadd.f32 %v7556_v48, %v4942_v47  ;;  %v8588_v4 = vadd.f32 %v8184_v29, %v17075_v41  ;;  %v17077_v41 = vld [vmem:[#allocation13_spill] sm:$0xff] }
 0x763   : > { %8243 = vrot.lane.b32.xlu1 %v10138_v33, %s10557_s6  ;;  %v4946_v25 = vpop.f32.mrb[6].mxu1 }
 0x764   : > { %v8768_v12 = vadd.f32 %v8588_v4, %v15764_v32  ;;  %v7560_v27 = vpop.f32.mrb[6].mxu0  ;;  %v4948_v20 = vpop.f32.mrb[7].mxu1 }
 0x765   : > { %v10140_v23 = vadd.f32 %v7560_v27, %v4946_v25  ;;  %v7562_v26 = vpop.f32.mrb[7].mxu0  ;;  %v8186_v53 = vpop.permute.xlu0 %8185 }
 0x766   : > { %8949 = vst.msk [vmem:[%s13640_s11 + $0x438] sm:$0xff] %vm8813_vm1, %v8768_v12  ;;  %v15913_v8 = vadd.f32 %v7562_v26, %v4948_v20  ;;  %v8589_v40 = vadd.f32 %v8186_v53, %v17076_v51  ;;  %v17078_v51 = vld [vmem:[#allocation14_spill] sm:$0xff] }
 0x767   : > { %8245 = vrot.lane.b32.xlu0 %v10140_v23, %s10557_s6  ;;  %v4952_v17 = vpop.f32.mrb[8].mxu1 }
 0x768   : > { %v8769_v5 = vadd.f32 %v8589_v40, %v15778_v50  ;;  %v7566_v60 = vpop.f32.mrb[8].mxu0  ;;  %v4954_v32 = vpop.f32.mrb[9].mxu1 }
 0x769   : > { %v10142_v47 = vadd.f32 %v7566_v60, %v4952_v17  ;;  %v7568_v33 = vpop.f32.mrb[9].mxu0  ;;  %v8188_v48 = vpop.permute.xlu1 %8187 }
 0x76a   : > { %8950 = vst.msk [vmem:[%s13640_s11 + $0x440] sm:$0xff] %vm8813_vm1, %v8769_v5  ;;  %v15920_v29 = vadd.f32 %v7568_v33, %v4954_v32  ;;  %v8590_v4 = vadd.f32 %v8188_v48, %v17077_v41  ;;  %v17079_v41 = vld [vmem:[#allocation16_spill] sm:$0xff] }
 0x76b   : > { %8247 = vrot.lane.b32.xlu1 %v10142_v47, %s10557_s6  ;;  %v4958_v25 = vpop.f32.mrb[10].mxu1 }
 0x76c   : > { %v8770_v12 = vadd.f32 %v8590_v4, %v15792_v37  ;;  %v7572_v27 = vpop.f32.mrb[10].mxu0  ;;  %v4960_v50 = vpop.f32.mrb[11].mxu1 }
 0x76d   : > { %v10144_v20 = vadd.f32 %v7572_v27, %v4958_v25  ;;  %v7574_v23 = vpop.f32.mrb[11].mxu0  ;;  %v8190_v26 = vpop.permute.xlu0 %8189 }
 0x76e   : > { %8951 = vst.msk [vmem:[%s13640_s11 + $0x448] sm:$0xff] %vm8813_vm1, %v8770_v12  ;;  %v15927_v53 = vadd.f32 %v7574_v23, %v4960_v50  ;;  %v8591_v40 = vadd.f32 %v8190_v26, %v17078_v51  ;;  %v17080_v51 = vld [vmem:[#allocation15_spill] sm:$0xff] }
 0x76f   : > { %8249 = vrot.lane.b32.xlu0 %v10144_v20, %s10557_s6  ;;  %v4964_v17 = vpop.f32.mrb[12].mxu1 }
 0x770   : > { %v8771_v5 = vadd.f32 %v8591_v40, %v15806_v7  ;;  %v7578_v60 = vpop.f32.mrb[12].mxu0  ;;  %v4966_v37 = vpop.f32.mrb[13].mxu1 }
 0x771   : > { %v10146_v32 = vadd.f32 %v7578_v60, %v4964_v17  ;;  %v7580_v47 = vpop.f32.mrb[13].mxu0  ;;  %v8192_v33 = vpop.permute.xlu1 %8191 }
 0x772   : > { %8952 = vst.msk [vmem:[%s13640_s11 + $0x450] sm:$0xff] %vm8813_vm1, %v8771_v5  ;;  %v15934_v48 = vadd.f32 %v7580_v47, %v4966_v37  ;;  %v8592_v4 = vadd.f32 %v8192_v33, %v17079_v41 }
 0x773   : > { %8251 = vrot.lane.b32.xlu1 %v10146_v32, %s10557_s6  ;;  %v4970_v25 = vpop.f32.mrb[14].mxu1 }
 0x774   : > { %v8772_v12 = vadd.f32 %v8592_v4, %v15820_v11  ;;  %v7584_v27 = vpop.f32.mrb[14].mxu0  ;;  %v4972_v7 = vpop.f32.mrb[15].mxu1 }
 0x775   : > { %v10148_v50 = vadd.f32 %v7584_v27, %v4970_v25  ;;  %v7586_v20 = vpop.f32.mrb[15].mxu0  ;;  %v8194_v23 = vpop.permute.xlu0 %8193 }
 0x776   : > { %8953 = vst.msk [vmem:[%s13640_s11 + $0x458] sm:$0xff] %vm8813_vm1, %v8772_v12  ;;  %v15941_v26 = vadd.f32 %v7586_v20, %v4972_v7  ;;  %v8593_v40 = vadd.f32 %v8194_v23, %v17080_v51 }
 0x777   : > { %8253 = vrot.lane.b32.xlu0 %v10148_v50, %s10557_s6  ;;  %v4976_v17 = vpop.f32.mrb[16].mxu1 }
 0x778   : > { %v8773_v5 = vadd.f32 %v8593_v40, %v15834_v42  ;;  %v7590_v60 = vpop.f32.mrb[16].mxu0  ;;  %v4978_v11 = vpop.f32.mrb[17].mxu1 }
 0x779   : > { %v10150_v37 = vadd.f32 %v7590_v60, %v4976_v17  ;;  %v7592_v32 = vpop.f32.mrb[17].mxu0  ;;  %v8196_v47 = vpop.permute.xlu1 %8195 }
 0x77a   : > { %8954 = vst.msk [vmem:[%s13640_s11 + $0x460] sm:$0xff] %vm8813_vm1, %v8773_v5  ;;  %v15948_v33 = vadd.f32 %v7592_v32, %v4978_v11  ;;  %v8594_v41 = vadd.f32 %v8196_v47, %v15240_v57 }
 0x77b   : > { %8255 = vrot.lane.b32.xlu1 %v10150_v37, %s10557_s6  ;;  %v4982_v4 = vpop.f32.mrb[18].mxu1  ;;  %v17081_v37 = vld [vmem:[#allocation17_spill] sm:$0xff] }
 0x77c   : > { %v8774_v25 = vadd.f32 %v8594_v41, %v15848_v9  ;;  %v7596_v12 = vpop.f32.mrb[18].mxu0  ;;  %v4984_v42 = vpop.f32.mrb[19].mxu1 }
 0x77d   : > { %v10152_v27 = vadd.f32 %v7596_v12, %v4982_v4  ;;  %v7598_v7 = vpop.f32.mrb[19].mxu0  ;;  %v8198_v50 = vpop.permute.xlu0 %8197 }
 0x77e   : > { %8955 = vst.msk [vmem:[%s13640_s11 + $0x468] sm:$0xff] %vm8813_vm1, %v8774_v25  ;;  %v15955_v20 = vadd.f32 %v7598_v7, %v4984_v42  ;;  %v8595_v23 = vadd.f32 %v8198_v50, %v15259_v15 }
 0x77f   : > { %8257 = vrot.lane.b32.xlu0 %v10152_v27, %s10557_s6  ;;  %v4988_v57 = vpop.f32.mrb[20].mxu1 }
 0x780   : > { %v8775_v51 = vadd.f32 %v8595_v23, %v15862_v24  ;;  %v7602_v40 = vpop.f32.mrb[20].mxu0  ;;  %v4990_v9 = vpop.f32.mrb[21].mxu1 }
 0x781   : > { %v10154_v17 = vadd.f32 %v7602_v40, %v4988_v57  ;;  %v7604_v5 = vpop.f32.mrb[21].mxu0  ;;  %v8200_v60 = vpop.permute.xlu1 %8199 }
 0x782   : > { %8956 = vst.msk [vmem:[%s13640_s11 + $0x470] sm:$0xff] %vm8813_vm1, %v8775_v51  ;;  %v15962_v11 = vadd.f32 %v7604_v5, %v4990_v9  ;;  %v8596_v32 = vadd.f32 %v8200_v60, %v17081_v37 }
 0x783   : > { %8259 = vrot.lane.b32.xlu1 %v10154_v17, %s10557_s6  ;;  %v4994_v15 = vpop.f32.mrb[22].mxu1 }
 0x784   : > { %v8776_v47 = vadd.f32 %v8596_v32, %v15876_v61  ;;  %v7608_v41 = vpop.f32.mrb[22].mxu0  ;;  %v4996_v24 = vpop.f32.mrb[23].mxu1 }
 0x785   : > { %v10156_v4 = vadd.f32 %v7608_v41, %v4994_v15  ;;  %v7610_v25 = vpop.f32.mrb[23].mxu0  ;;  %v8202_v12 = vpop.permute.xlu0 %8201 }
 0x786   : > { %8957 = vst.msk [vmem:[%s13640_s11 + $0x478] sm:$0xff] %vm8813_vm1, %v8776_v47  ;;  %v15969_v42 = vadd.f32 %v7610_v25, %v4996_v24  ;;  %v8597_v27 = vadd.f32 %v8202_v12, %v15297_v58 }
 0x787   : > { %8261 = vrot.lane.b32.xlu0 %v10156_v4, %s10557_s6  ;;  %v5000_v7 = vpop.f32.mrb[24].mxu1 }
 0x788   : > { %v8777_v50 = vadd.f32 %v8597_v27, %v15887_v52  ;;  %v7614_v23 = vpop.f32.mrb[24].mxu0  ;;  %v5002_v61 = vpop.f32.mrb[25].mxu1 }
 0x789   : > { %v10158_v57 = vadd.f32 %v7614_v23, %v5000_v7  ;;  %v7616_v51 = vpop.f32.mrb[25].mxu0  ;;  %v8204_v40 = vpop.permute.xlu1 %8203 }
 0x78a   : > { %8958 = vst.msk [vmem:[%s13640_s11 + $0x480] sm:$0xff] %vm8813_vm1, %v8777_v50  ;;  %v15976_v9 = vadd.f32 %v7616_v51, %v5002_v61  ;;  %v8598_v17 = vadd.f32 %v8204_v40, %v15316_v31 }
 0x78b   : > { %8263 = vrot.lane.b32.xlu1 %v10158_v57, %s10557_s6  ;;  %v5006_v58 = vpop.f32.mrb[26].mxu1 }
 0x78c   : > { %v8778_v5 = vadd.f32 %v15891_v44, %v8598_v17  ;;  %v7620_v60 = vpop.f32.mrb[26].mxu0  ;;  %v5008_v52 = vpop.f32.mrb[27].mxu1 }
 0x78d   : > { %v10160_v37 = vadd.f32 %v7620_v60, %v5006_v58  ;;  %v7622_v32 = vpop.f32.mrb[27].mxu0  ;;  %v8206_v15 = vpop.permute.xlu0 %8205 }
 0x78e   : > { %8959 = vst.msk [vmem:[%s13640_s11 + $0x488] sm:$0xff] %vm8813_vm1, %v8778_v5  ;;  %v15983_v47 = vadd.f32 %v7622_v32, %v5008_v52  ;;  %v8599_v41 = vadd.f32 %v8206_v15, %v15335_v43 }
 0x78f   : > { %8265 = vrot.lane.b32.xlu0 %v10160_v37, %s10557_s6  ;;  %v5012_v31 = vpop.f32.mrb[28].mxu1 }
 0x790   : > { %v8779_v24 = vadd.f32 %v15899_v54, %v8599_v41  ;;  %v7626_v4 = vpop.f32.mrb[28].mxu0  ;;  %v5014_v44 = vpop.f32.mrb[29].mxu1 }
 0x791   : > { %v10162_v25 = vadd.f32 %v7626_v4, %v5012_v31  ;;  %v7628_v12 = vpop.f32.mrb[29].mxu0  ;;  %v8208_v27 = vpop.permute.xlu1 %8207  ;;  %v17082_v4 = vld [vmem:[#allocation354_spill] sm:$0xff] }
 0x792   : > { %8960 = vst.msk [vmem:[%s13640_s11 + $0x490] sm:$0xff] %vm8813_vm1, %v8779_v24  ;;  %v15990_v7 = vadd.f32 %v7628_v12, %v5014_v44  ;;  %v8600_v50 = vadd.f32 %v8208_v27, %v15354_v2 }
 0x793   : > { %8267 = vrot.lane.b32.xlu1 %v10162_v25, %s10557_s6  ;;  %v5018_v43 = vpop.f32.mrb[30].mxu1 }
 0x794   : > { %v8780_v23 = vadd.f32 %v15906_v28, %v8600_v50  ;;  %v7632_v61 = vpop.f32.mrb[30].mxu0  ;;  %v5020_v54 = vpop.f32.mrb[31].mxu1 }
 0x795   : > { %v10164_v57 = vadd.f32 %v7632_v61, %v5018_v43  ;;  %v7634_v51 = vpop.f32.mrb[31].mxu0  ;;  %v8210_v40 = vpop.permute.xlu0 %8209  ;;  %v17083_v43 = vld [vmem:[#allocation355_spill] sm:$0xff] }
 0x796   : > { %8961 = vst.msk [vmem:[%s13640_s11 + $0x498] sm:$0xff] %vm8813_vm1, %v8780_v23  ;;  %v15997_v17 = vadd.f32 %v7634_v51, %v5020_v54  ;;  %v8601_v58 = vadd.f32 %v8210_v40, %v15373_v36 }
 0x797   : > { %8269 = vrot.lane.b32.xlu0 %v10164_v57, %s10557_s6  ;;  %v5024_v2 = vpop.f32.mrb[32].mxu1 }
 0x798   : > { %v8781_v5 = vadd.f32 %v15913_v8, %v8601_v58  ;;  %v7638_v60 = vpop.f32.mrb[32].mxu0  ;;  %v5026_v28 = vpop.f32.mrb[33].mxu1 }
 0x799   : > { %v10166_v52 = vadd.f32 %v7638_v60, %v5024_v2  ;;  %v7640_v37 = vpop.f32.mrb[33].mxu0  ;;  %v8212_v32 = vpop.permute.xlu1 %8211 }
 0x79a   : > { %8962 = vst.msk [vmem:[%s13640_s11 + $0x4a0] sm:$0xff] %vm8813_vm1, %v8781_v5  ;;  %v16004_v15 = vadd.f32 %v7640_v37, %v5026_v28  ;;  %v8602_v41 = vadd.f32 %v8212_v32, %v15392_v21  ;;  %v17085_v5 = vld [vmem:[#allocation357_spill] sm:$0xff]  ;;  %v17086_v37 = vld [vmem:[#allocation358_spill] sm:$0xff] }
 0x79b   : > { %8271 = vrot.lane.b32.xlu1 %v10166_v52, %s10557_s6  ;;  %v5030_v36 = vpop.f32.mrb[184].mxu1 }
 0x79c   : > { %v8782_v31 = vadd.f32 %v15920_v29, %v8602_v41  ;;  %v5031_v24 = vpop.f32.mrb[185].mxu1  ;;  %v8214_v8 = vpop.permute.xlu0 %8213  ;;  %v17084_v29 = vld [vmem:[#allocation356_spill] sm:$0xff] }
 0x79d   : > { %v5032_v44 = vadd.f32 %v5031_v24, %v17082_v4  ;;  %v8603_v25 = vadd.f32 %v8214_v8, %v15411_v56  ;;  %v7644_v12 = vpop.f32.mrb[140].mxu0  ;;  %v17087_v8 = vld [vmem:[#allocation359_spill] sm:$0xff] }
 0x79e   : > { %8963 = vst.msk [vmem:[%s13640_s11 + $0x4a8] sm:$0xff] %vm8813_vm1, %v8782_v31  ;;  %v7645_v27 = vpop.f32.mrb[141].mxu0  ;;  %v17088_v12 = vld [vmem:[#allocation360_spill] sm:$0xff] }
 0x79f   : > { %v8783_v50 = vadd.f32 %v15927_v53, %v8603_v25  ;;  %v5035_v21 = vpop.f32.mrb[34].mxu1  ;;  %v6339_v23 = vadd.f32 %v17083_v43, %v5032_v44 }
 0x7a0   : > { %v5036_v61 = vpop.f32.mrb[35].mxu1  ;;  %v8216_v54 = vpop.permute.xlu1 %8215 }
 0x7a1   : > { %8964 = vst.msk [vmem:[%s13640_s11 + $0x4b0] sm:$0xff] %vm8813_vm1, %v8783_v50  ;;  %v5037_v57 = vadd.f32 %v5036_v61, %v17084_v29  ;;  %v16018_v51 = vadd.f32 %v7645_v27, %v6339_v23  ;;  %v8604_v56 = vadd.f32 %v8216_v54, %v15430_v1  ;;  %v7649_v40 = vpop.f32.mrb[142].mxu0  ;;  %v17089_v61 = vld [vmem:[#allocation361_spill] sm:$0xff] }
 0x7a2   : > { %v7650_v58 = vpop.f32.mrb[143].mxu0 }
 0x7a3   : > { %v8784_v2 = vadd.f32 %v15934_v48, %v8604_v56  ;;  %v5040_v53 = vpop.f32.mrb[186].mxu1  ;;  %v6344_v60 = vadd.f32 %v17085_v5, %v5037_v57  ;;  %v17090_v56 = vld [vmem:[#allocation362_spill] sm:$0xff] }
 0x7a4   : > { %v5041_v28 = vpop.f32.mrb[187].mxu1  ;;  %v8218_v52 = vpop.permute.xlu0 %8217 }
 0x7a5   : > { %8965 = vst.msk [vmem:[%s13640_s11 + $0x4b8] sm:$0xff] %vm8813_vm1, %v8784_v2  ;;  %v5042_v32 = vadd.f32 %v5041_v28, %v17086_v37  ;;  %v16026_v41 = vadd.f32 %v7650_v58, %v6344_v60  ;;  %v8605_v36 = vadd.f32 %v8218_v52, %v15449_v13  ;;  %v7654_v31 = vpop.f32.mrb[144].mxu0  ;;  %v17091_v60 = vld [vmem:[#allocation363_spill] sm:$0xff] }
 0x7a6   : > { %v7655_v1 = vpop.f32.mrb[145].mxu0 }
 0x7a7   : > { %v8785_v24 = vadd.f32 %v15941_v26, %v8605_v36  ;;  %v5045_v48 = vpop.f32.mrb[188].mxu1  ;;  %v6349_v4 = vadd.f32 %v17087_v8, %v5042_v32  ;;  %v17092_v32 = vld [vmem:[#allocation364_spill] sm:$0xff]  ;;  %v17093_v8 = vld [vmem:[#allocation365_spill] sm:$0xff] }
 0x7a8   : > { %v5046_v44 = vpop.f32.mrb[189].mxu1  ;;  %v8220_v25 = vpop.permute.xlu1 %8219 }
 0x7a9   : > { %8966 = vst.msk [vmem:[%s13640_s11 + $0x4c0] sm:$0xff] %vm8813_vm1, %v8785_v24  ;;  %v5047_v27 = vadd.f32 %v5046_v44, %v17088_v12  ;;  %v16034_v50 = vadd.f32 %v7655_v1, %v6349_v4  ;;  %v8606_v21 = vadd.f32 %v8220_v25, %v15468_v45  ;;  %v7659_v43 = vpop.f32.mrb[146].mxu0  ;;  %v17094_v12 = vld [vmem:[#allocation366_spill] sm:$0xff] }
 0x7aa   : > { %v7660_v13 = vpop.f32.mrb[147].mxu0 }
 0x7ab   : > { %v8786_v23 = vadd.f32 %v15948_v33, %v8606_v21  ;;  %v5050_v26 = vpop.f32.mrb[190].mxu1  ;;  %v6354_v54 = vadd.f32 %v17089_v61, %v5047_v27 }
 0x7ac   : > { %v5051_v29 = vpop.f32.mrb[191].mxu1  ;;  %v8222_v57 = vpop.permute.xlu0 %8221  ;;  %v17095_v26 = vld [vmem:[#allocation367_spill] sm:$0xff] }
 0x7ad   : > { %8967 = vst.msk [vmem:[%s13640_s11 + $0x4c8] sm:$0xff] %vm8813_vm1, %v8786_v23  ;;  %v5052_v40 = vadd.f32 %v5051_v29, %v17090_v56  ;;  %v16042_v58 = vadd.f32 %v7660_v13, %v6354_v54  ;;  %v8607_v2 = vadd.f32 %v8222_v57, %v15487_v34  ;;  %v7664_v53 = vpop.f32.mrb[148].mxu0  ;;  %v17096_v57 = vld [vmem:[#allocation368_spill] sm:$0xff] }
 0x7ae   : > { %v7665_v45 = vpop.f32.mrb[149].mxu0 }
 0x7af   : > { %v8787_v5 = vadd.f32 %v15955_v20, %v8607_v2  ;;  %v5055_v33 = vpop.f32.mrb[192].mxu1  ;;  %v6359_v28 = vadd.f32 %v17091_v60, %v5052_v40 }
 0x7b0   : > { %v5056_v52 = vpop.f32.mrb[193].mxu1  ;;  %v8224_v37 = vpop.permute.xlu1 %8223 }
 0x7b1   : > { %8968 = vst.msk [vmem:[%s13640_s11 + $0x4d0] sm:$0xff] %vm8813_vm1, %v8787_v5  ;;  %v5057_v36 = vadd.f32 %v5056_v52, %v17092_v32  ;;  %v16050_v31 = vadd.f32 %v7665_v45, %v6359_v28  ;;  %v8608_v1 = vadd.f32 %v8224_v37, %v15506_v0  ;;  %v7669_v24 = vpop.f32.mrb[150].mxu0  ;;  %v17097_v5 = vld [vmem:[#allocation369_spill] sm:$0xff]  ;;  %v17098_v52 = vld [vmem:[#allocation370_spill] sm:$0xff] }
 0x7b2   : > { %v7670_v34 = vpop.f32.mrb[151].mxu0 }
 0x7b3   : > { %v8788_v48 = vadd.f32 %v15962_v11, %v8608_v1  ;;  %v5060_v20 = vpop.f32.mrb[194].mxu1  ;;  %v6364_v4 = vadd.f32 %v17093_v8, %v5057_v36 }
 0x7b4   : > { %v5061_v44 = vpop.f32.mrb[195].mxu1  ;;  %v8226_v25 = vpop.permute.xlu0 %8225 }
 0x7b5   : > { %8969 = vst.msk [vmem:[%s13640_s11 + $0x4d8] sm:$0xff] %vm8813_vm1, %v8788_v48  ;;  %v5062_v27 = vadd.f32 %v5061_v44, %v17094_v12  ;;  %v16058_v21 = vadd.f32 %v7670_v34, %v6364_v4  ;;  %v8609_v43 = vadd.f32 %v8226_v25, %v15525_v10  ;;  %v7674_v13 = vpop.f32.mrb[152].mxu0  ;;  %v17099_v34 = vld [vmem:[#allocation371_spill] sm:$0xff]  ;;  %v17100_v4 = vld [vmem:[#allocation372_spill] sm:$0xff]  ;;  %v17101_v12 = vld [vmem:[#allocation18_spill] sm:$0xff] }
 0x7b6   : > { %v7675_v0 = vpop.f32.mrb[153].mxu0 }
 0x7b7   : > { %v8789_v23 = vadd.f32 %v15969_v42, %v8609_v43  ;;  %v5065_v11 = vpop.f32.mrb[196].mxu1  ;;  %v6369_v61 = vadd.f32 %v17095_v26, %v5062_v27 }
 0x7b8   : > { %v5066_v54 = vpop.f32.mrb[197].mxu1  ;;  %v8228_v29 = vpop.permute.xlu1 %8227 }
 0x7b9   : > { %8970 = vst.msk [vmem:[%s13640_s11 + $0x4e0] sm:$0xff] %vm8813_vm1, %v8789_v23  ;;  %v5067_v56 = vadd.f32 %v5066_v54, %v17096_v57  ;;  %v16066_v40 = vadd.f32 %v7675_v0, %v6369_v61  ;;  %v8610_v2 = vadd.f32 %v8228_v29, %v15544_v3  ;;  %v7679_v53 = vpop.f32.mrb[154].mxu0  ;;  %v17102_v0 = vld [vmem:[#allocation373_spill] sm:$0xff]  ;;  %v17103_v61 = vld [vmem:[#allocation374_spill] sm:$0xff] }
 0x7ba   : > { %v7680_v10 = vpop.f32.mrb[155].mxu0 }
 0x7bb   : > { %v8790_v45 = vadd.f32 %v15976_v9, %v8610_v2  ;;  %v5070_v42 = vpop.f32.mrb[198].mxu1  ;;  %v6374_v33 = vadd.f32 %v17097_v5, %v5067_v56 }
 0x7bc   : > { %v5071_v60 = vpop.f32.mrb[199].mxu1  ;;  %v8230_v28 = vpop.permute.xlu0 %8229 }
 0x7bd   : > { %8971 = vst.msk [vmem:[%s13640_s11 + $0x4e8] sm:$0xff] %vm8813_vm1, %v8790_v45  ;;  %v5072_v37 = vadd.f32 %v5071_v60, %v17098_v52  ;;  %v16074_v32 = vadd.f32 %v7680_v10, %v6374_v33  ;;  %v8611_v36 = vadd.f32 %v8230_v28, %v15563_v62  ;;  %v7684_v1 = vpop.f32.mrb[156].mxu0  ;;  %v17104_v10 = vld [vmem:[#allocation375_spill] sm:$0xff]  ;;  %v17105_v33 = vld [vmem:[#allocation376_spill] sm:$0xff] }
 0x7be   : > { %v7685_v3 = vpop.f32.mrb[157].mxu0 }
 0x7bf   : > { %v8791_v24 = vadd.f32 %v15983_v47, %v8611_v36  ;;  %v5075_v9 = vpop.f32.mrb[200].mxu1  ;;  %v6379_v48 = vadd.f32 %v17099_v34, %v5072_v37  ;;  %v17107_v34 = vld [vmem:[#allocation378_spill] sm:$0xff] }
 0x7c0   : > { %v5076_v20 = vpop.f32.mrb[201].mxu1  ;;  %v8232_v8 = vpop.permute.xlu1 %8231 }
 0x7c1   : > { %8972 = vst.msk [vmem:[%s13640_s11 + $0x4f0] sm:$0xff] %vm8813_vm1, %v8791_v24  ;;  %v5077_v44 = vadd.f32 %v5076_v20, %v17100_v4  ;;  %v16082_v25 = vadd.f32 %v7685_v3, %v6379_v48  ;;  %v8612_v27 = vadd.f32 %v8232_v8, %v17101_v12  ;;  %v7689_v43 = vpop.f32.mrb[158].mxu0 }
 0x7c2   : > { %v7690_v62 = vpop.f32.mrb[159].mxu0  ;;  %v17108_v43 = vld [vmem:[#allocation379_spill] sm:$0xff] }
 0x7c3   : > { %v8792_v13 = vadd.f32 %v15990_v7, %v8612_v27  ;;  %v5080_v47 = vpop.f32.mrb[202].mxu1  ;;  %v6384_v23 = vadd.f32 %v17102_v0, %v5077_v44 }
 0x7c4   : > { %v5081_v11 = vpop.f32.mrb[203].mxu1  ;;  %v8234_v26 = vpop.permute.xlu0 %8233 }
 0x7c5   : > { %8973 = vst.msk [vmem:[%s13640_s11 + $0x4f8] sm:$0xff] %vm8813_vm1, %v8792_v13  ;;  %v5082_v54 = vadd.f32 %v5081_v11, %v17103_v61  ;;  %v16090_v29 = vadd.f32 %v7690_v62, %v6384_v23  ;;  %v8613_v57 = vadd.f32 %v8234_v26, %v15601_v46  ;;  %v7694_v56 = vpop.f32.mrb[160].mxu0  ;;  %v17109_v23 = vld [vmem:[#allocation380_spill] sm:$0xff] }
 0x7c6   : > { %v7695_v2 = vpop.f32.mrb[161].mxu0 }
 0x7c7   : > { %v8793_v53 = vadd.f32 %v15997_v17, %v8613_v57  ;;  %v5085_v7 = vpop.f32.mrb[204].mxu1  ;;  %v6389_v45 = vadd.f32 %v17104_v10, %v5082_v54  ;;  %v17106_v17 = vld [vmem:[#allocation377_spill] sm:$0xff] }
 0x7c8   : > { %v5086_v42 = vpop.f32.mrb[205].mxu1  ;;  %v8236_v5 = vpop.permute.xlu1 %8235  ;;  %v17110_v54 = vld [vmem:[#allocation381_spill] sm:$0xff] }
 0x7c9   : > { %8974 = vst.msk [vmem:[%s13640_s11 + $0x500] sm:$0xff] %vm8813_vm1, %v8793_v53  ;;  %v5087_v60 = vadd.f32 %v5086_v42, %v17105_v33  ;;  %v16098_v28 = vadd.f32 %v7695_v2, %v6389_v45  ;;  %v8614_v52 = vadd.f32 %v8236_v5, %v15619_v14  ;;  %v7699_v37 = vpop.f32.mrb[162].mxu0  ;;  %v17111_v53 = vld [vmem:[#allocation382_spill] sm:$0xff] }
 0x7ca   : > { %v7700_v46 = vpop.f32.mrb[163].mxu0 }
 0x7cb   : > { %v8794_v36 = vadd.f32 %v16004_v15, %v8614_v52  ;;  %v5090_v1 = vpop.f32.mrb[206].mxu1  ;;  %v6394_v3 = vadd.f32 %v17106_v17, %v5087_v60 }
 0x7cc   : > { %v5091_v24 = vpop.f32.mrb[207].mxu1  ;;  %v8238_v9 = vpop.permute.xlu0 %8237 }
 0x7cd   : > { %8975 = vst.msk [vmem:[%s13640_s11 + $0x508] sm:$0xff] %vm8813_vm1, %v8794_v36  ;;  %v5092_v48 = vadd.f32 %v5091_v24, %v17107_v34  ;;  %v16106_v20 = vadd.f32 %v7700_v46, %v6394_v3  ;;  %v8615_v8 = vadd.f32 %v8238_v9, %v15634_v63  ;;  %v8240_v14 = vpop.permute.xlu1 %8239  ;;  %v7704_v4 = vpop.f32.mrb[164].mxu0  ;;  %v17113_v46 = vld [vmem:[#allocation384_spill] sm:$0xff]  ;;  %v17114_v34 = vld [vmem:[#allocation385_spill] sm:$0xff] }
 0x7ce   : > { %v8616_v44 = vadd.f32 %v8240_v14, %v15648_v55  ;;  %v7705_v15 = vpop.f32.mrb[165].mxu0 }
 0x7cf   : > { %v8795_v12 = vadd.f32 %v8615_v8, %v16018_v51  ;;  %v5095_v27 = vpop.f32.mrb[208].mxu1  ;;  %v6399_v62 = vadd.f32 %v17108_v43, %v5092_v48 }
 0x7d0   : > { %v8796_v13 = vadd.f32 %v8616_v44, %v16026_v41  ;;  %v5096_v47 = vpop.f32.mrb[209].mxu1  ;;  %v7709_v0 = vpop.f32.mrb[166].mxu0 }
 0x7d1   : > { %8976 = vst.msk [vmem:[%s13640_s11 + $0x510] sm:$0xff] %vm8813_vm1, %v8795_v12  ;;  %v5097_v63 = vadd.f32 %v5096_v47, %v17109_v23  ;;  %v16116_v11 = vadd.f32 %v7705_v15, %v6399_v62  ;;  %v8242_v26 = vpop.permute.xlu0 %8241  ;;  %v7710_v61 = vpop.f32.mrb[167].mxu0  ;;  %v17117_v0 = vld [vmem:[#allocation388_spill] sm:$0xff] }
 0x7d2   : > { %8977 = vst.msk [vmem:[%s13640_s11 + $0x518] sm:$0xff] %vm8813_vm1, %v8796_v13  ;;  %v8617_v55 = vadd.f32 %v8242_v26, %v15662_v30  ;;  %v17112_v30 = vld [vmem:[#allocation383_spill] sm:$0xff] }
 0x7d3   : > { %v5100_v51 = vpop.f32.mrb[210].mxu1  ;;  %v6404_v57 = vadd.f32 %v17110_v54, %v5097_v63 }
 0x7d4   : > { %v8797_v41 = vadd.f32 %v8617_v55, %v16034_v50  ;;  %v5101_v56 = vpop.f32.mrb[211].mxu1  ;;  %v7714_v2 = vpop.f32.mrb[168].mxu0 }
 0x7d5   : > { %v5102_v7 = vadd.f32 %v5101_v56, %v17111_v53  ;;  %v16124_v10 = vadd.f32 %v7710_v61, %v6404_v57  ;;  %v8244_v45 = vpop.permute.xlu1 %8243  ;;  %v7715_v42 = vpop.f32.mrb[169].mxu0 }
 0x7d6   : > { %8978 = vst.msk [vmem:[%s13640_s11 + $0x520] sm:$0xff] %vm8813_vm1, %v8797_v41  ;;  %v8618_v5 = vadd.f32 %v8244_v45, %v15676_v19 }
 0x7d7   : > { %v5105_v33 = vpop.f32.mrb[212].mxu1  ;;  %v6409_v60 = vadd.f32 %v17112_v30, %v5102_v7 }
 0x7d8   : > { %v8798_v52 = vadd.f32 %v8618_v5, %v16042_v58  ;;  %v5106_v37 = vpop.f32.mrb[213].mxu1  ;;  %v7719_v50 = vpop.f32.mrb[170].mxu0  ;;  %v17115_v58 = vld [vmem:[#allocation386_spill] sm:$0xff] }
 0x7d9   : > { %v5107_v36 = vadd.f32 %v5106_v37, %v17113_v46  ;;  %v7716_v1 = vadd.f32 %v7715_v42, %v6409_v60  ;;  %v8246_v17 = vpop.permute.xlu0 %8245  ;;  %v7720_v3 = vpop.f32.mrb[171].mxu0 }
 0x7da   : > { %8979 = vst.msk [vmem:[%s13640_s11 + $0x528] sm:$0xff] %vm8813_vm1, %v8798_v52  ;;  %v8619_v24 = vadd.f32 %v8246_v17, %v15690_v59  ;;  %v17116_v59 = vld [vmem:[#allocation387_spill] sm:$0xff] }
 0x7db   : > { %v5110_v9 = vpop.f32.mrb[214].mxu1  ;;  %v6414_v19 = vadd.f32 %v17114_v34, %v5107_v36  ;;  %v17122_v36 = vld [vmem:[#allocation22_spill] sm:$0xff] }
 0x7dc   : > { %v8799_v48 = vadd.f32 %v8619_v24, %v16050_v31  ;;  %v5111_v8 = vpop.f32.mrb[215].mxu1  ;;  %v7724_v14 = vpop.f32.mrb[172].mxu0  ;;  %v17123_v24 = vld [vmem:[#allocation24_spill] sm:$0xff] }
 0x7dd   : > { %v5112_v4 = vadd.f32 %v5111_v8, %v17115_v58  ;;  %v7721_v44 = vadd.f32 %v7720_v3, %v6414_v19  ;;  %v8248_v15 = vpop.permute.xlu1 %8247  ;;  %v7725_v12 = vpop.f32.mrb[173].mxu0 }
 0x7de   : > { %8980 = vst.msk [vmem:[%s13640_s11 + $0x530] sm:$0xff] %vm8813_vm1, %v8799_v48  ;;  %v8620_v27 = vadd.f32 %v8248_v15, %v15704_v49  ;;  %v17118_v49 = vld [vmem:[#allocation389_spill] sm:$0xff] }
 0x7df   : > { %v5115_v43 = vpop.f32.mrb[216].mxu1  ;;  %v6419_v62 = vadd.f32 %v17116_v59, %v5112_v4 }
 0x7e0   : > { %v8800_v13 = vadd.f32 %v8620_v27, %v16058_v21  ;;  %v5116_v47 = vpop.f32.mrb[217].mxu1  ;;  %v7729_v31 = vpop.f32.mrb[174].mxu0 }
 0x7e1   : > { %v5117_v23 = vadd.f32 %v5116_v47, %v17117_v0  ;;  %v7726_v63 = vadd.f32 %v7725_v12, %v6419_v62  ;;  %v8250_v26 = vpop.permute.xlu0 %8249  ;;  %v7730_v61 = vpop.f32.mrb[175].mxu0 }
 0x7e2   : > { %8981 = vst.msk [vmem:[%s13640_s11 + $0x538] sm:$0xff] %vm8813_vm1, %v8800_v13  ;;  %v8621_v55 = vadd.f32 %v8250_v26, %v15718_v39 }
 0x7e3   : > { %v6424_v51 = vadd.f32 %v17118_v49, %v5117_v23 }
 0x7e4   : > { %v8801_v54 = vadd.f32 %v8621_v55, %v16066_v40 }
 0x7e5   : > { %v7731_v57 = vadd.f32 %v7730_v61, %v6424_v51  ;;  %v8252_v21 = vpop.permute.xlu1 %8251 }
 0x7e6   : > { %8982 = vst.msk [vmem:[%s13640_s11 + $0x540] sm:$0xff] %vm8813_vm1, %v8801_v54  ;;  %v8622_v41 = vadd.f32 %v8252_v21, %v15732_v22 }
 0x7e8   : > { %v8802_v56 = vadd.f32 %v8622_v41, %v16074_v32 }
 0x7e9   : > { %v8254_v2 = vpop.permute.xlu0 %8253 }
 0x7ea   : > { %8983 = vst.msk [vmem:[%s13640_s11 + $0x548] sm:$0xff] %vm8813_vm1, %v8802_v56  ;;  %v8623_v39 = vadd.f32 %v8254_v2, %v15746_v6 }
 0x7ec   : > { %v8803_v53 = vadd.f32 %v8623_v39, %v16082_v25 }
 0x7ed   : > { %v8256_v7 = vpop.permute.xlu1 %8255 }
 0x7ee   : > { %8984 = vst.msk [vmem:[%s13640_s11 + $0x550] sm:$0xff] %vm8813_vm1, %v8803_v53  ;;  %v8624_v40 = vadd.f32 %v8256_v7, %v15760_v38  ;;  %v17119_v38 = vld [vmem:[#allocation20_spill] sm:$0xff] }
 0x7f0   : > { %v8804_v45 = vadd.f32 %v8624_v40, %v16090_v29 }
 0x7f1   : > { %v8258_v42 = vpop.permute.xlu0 %8257 }
 0x7f2   : > { %8985 = vst.msk [vmem:[%s13640_s11 + $0x558] sm:$0xff] %vm8813_vm1, %v8804_v45  ;;  %v8625_v22 = vadd.f32 %v8258_v42, %v15774_v18  ;;  %v17120_v18 = vld [vmem:[#allocation19_spill] sm:$0xff] }
 0x7f4   : > { %v8805_v32 = vadd.f32 %v8625_v22, %v16098_v28 }
 0x7f5   : > { %v8260_v5 = vpop.permute.xlu1 %8259 }
 0x7f6   : > { %8986 = vst.msk [vmem:[%s13640_s11 + $0x560] sm:$0xff] %vm8813_vm1, %v8805_v32  ;;  %v8626_v6 = vadd.f32 %v8260_v5, %v15788_v35  ;;  %v17121_v35 = vld [vmem:[#allocation21_spill] sm:$0xff] }
 0x7f8   : > { %v8806_v25 = vadd.f32 %v8626_v6, %v16106_v20 }
 0x7f9   : > { %v8262_v33 = vpop.permute.xlu0 %8261 }
 0x7fa   : > { %8987 = vst.msk [vmem:[%s13640_s11 + $0x568] sm:$0xff] %vm8813_vm1, %v8806_v25  ;;  %v8627_v29 = vadd.f32 %v8262_v33, %v17119_v38 }
 0x7fc   : > { %v8807_v30 = vadd.f32 %v8627_v29, %v16116_v11 }
 0x7fd   : > { %v8264_v60 = vpop.permute.xlu1 %8263 }
 0x7fe   : > { %8988 = vst.msk [vmem:[%s13640_s11 + $0x570] sm:$0xff] %vm8813_vm1, %v8807_v30  ;;  %v8628_v28 = vadd.f32 %v8264_v60, %v17120_v18 }
 0x800   : > { %v8808_v52 = vadd.f32 %v8628_v28, %v16124_v10 }
 0x801   : > { %v8266_v37 = vpop.permute.xlu0 %8265 }
 0x802   : > { %8989 = vst.msk [vmem:[%s13640_s11 + $0x578] sm:$0xff] %vm8813_vm1, %v8808_v52  ;;  %v8629_v20 = vadd.f32 %v8266_v37, %v17121_v35 }
 0x804   : > { %v8809_v50 = vadd.f32 %v8629_v20, %v7716_v1 }
 0x805   : > { %v8268_v46 = vpop.permute.xlu1 %8267 }
 0x806   : > { %8990 = vst.msk [vmem:[%s13640_s11 + $0x580] sm:$0xff] %vm8813_vm1, %v8809_v50  ;;  %v8630_v11 = vadd.f32 %v8268_v46, %v17122_v36 }
 0x808   : > { %v8810_v17 = vadd.f32 %v8630_v11, %v7721_v44 }
 0x809   : > { %v8270_v3 = vpop.permute.xlu0 %8269 }
 0x80a   : > { %8991 = vst.msk [vmem:[%s13640_s11 + $0x588] sm:$0xff] %vm8813_vm1, %v8810_v17  ;;  %v8631_v9 = vadd.f32 %v8270_v3, %v17123_v24 }
 0x80c   : > { %v8811_v34 = vadd.f32 %v8631_v9, %v7726_v63 }
 0x80d   : > { %v8272_v10 = vpop.permute.xlu1 %8271 }
 0x80e   : > { %8992 = vst.msk [vmem:[%s13640_s11 + $0x590] sm:$0xff] %vm8813_vm1, %v8811_v34  ;;  %v8632_v19 = vadd.f32 %v8272_v10, %v15872_v16 }
 0x810   : > { %v8812_v48 = vadd.f32 %v8632_v19, %v7731_v57 }
 0x812   : > { %8993 = vst.msk [vmem:[%s13640_s11 + $0x598] sm:$0xff] %vm8813_vm1, %v8812_v48 }
 0x813 PF: > { %s12_s9 = sadd.s32 1, %s10554_s9  }
 0x814   : > { %p9_p4 = scmp.ge.s32.totalorder %s12_s9, 4  }
 0x816   :  { %11 = sbr.rel (!%p9_p4) target bundleno = 1 (0x1), region = 58 }

</bundles_post_ra>
